<compile_context>
chip_gen: v6e
topology: v6e:2x2x1
jax: 0.10.0
libtpu: 0.0.40
codegen_flags: <defaults>
</compile_context>

<pallas_src>
import numpy as np

import jax
import jax.numpy as jnp
from jax import lax
from jax.experimental import pallas as pl
from jax.experimental.pallas import tpu as pltpu


# ----------------------------------------------------------------------------
# Model geometry
# ----------------------------------------------------------------------------
def _stage_dims(im_size, hidden_dim, kernel_size):
    """Per-stage bookkeeping for the four conv(+pad=1) -> maxpool(3,1) stages."""
    C, H, W = im_size
    chans = [C, hidden_dim * 3, hidden_dim * 2, hidden_dim, hidden_dim]
    ksizes = [kernel_size, kernel_size + 2, kernel_size, kernel_size + 2]
    stages = []
    h, w = H, W
    for i in range(4):
        K, cin, cout = ksizes[i], chans[i], chans[i + 1]
        ch, cw = h + 3 - K, w + 3 - K        # conv output (padding=1, stride=1)
        ph, pw = ch - 2, cw - 2              # 3x3 / stride-1 max pool output
        stages.append(dict(K=K, Cin=cin, Cout=cout, Hin=h, Win=w,
                           CH=ch, CW=cw, PH=ph, PW=pw))
        h, w = ph, pw
    return stages


# ----------------------------------------------------------------------------
# Parameters (torch-layout) and one-time host-side packing for the kernel
# ----------------------------------------------------------------------------
def init_params(key, im_size, hidden_dim, kernel_size, n_classes):
    """PyTorch-style params: conv weights HWIO, linear weights (in, out)."""
    stages = _stage_dims(im_size, hidden_dim, kernel_size)
    params = {}
    keys = jax.random.split(key, 12)
    ki = 0
    for i, st in enumerate(stages):
        K, cin, cout = st["K"], st["Cin"], st["Cout"]
        bound = 1.0 / np.sqrt(cin * K * K)
        params[f"conv{i+1}_w"] = jax.random.uniform(
            keys[ki], (K, K, cin, cout), jnp.float32, -bound, bound); ki += 1
        params[f"conv{i+1}_b"] = jax.random.uniform(
            keys[ki], (cout,), jnp.float32, -bound, bound); ki += 1
    last = stages[-1]
    fc1_in = last["Cout"] * last["PH"] * last["PW"]
    assert fc1_in == hidden_dim * 20 * 20, "module implies a 20x20 final map"
    b1 = 1.0 / np.sqrt(fc1_in)
    # fc1_w rows are in torch NCHW-flatten order: row = c*PH*PW + h*PW + w.
    params["fc1_w"] = jax.random.uniform(
        keys[ki], (fc1_in, hidden_dim), jnp.float32, -b1, b1); ki += 1
    params["fc1_b"] = jax.random.uniform(
        keys[ki], (hidden_dim,), jnp.float32, -b1, b1); ki += 1
    b2 = 1.0 / np.sqrt(hidden_dim)
    params["fc2_w"] = jax.random.uniform(
        keys[ki], (hidden_dim, n_classes), jnp.float32, -b2, b2); ki += 1
    params["fc2_b"] = jax.random.uniform(
        keys[ki], (n_classes,), jnp.float32, -b2, b2); ki += 1
    return params


def _expand_conv_weight(w_hwio, w_in, channel_major_rows):
    """Expand an HWIO conv weight into K block-Toeplitz matrices R[kh] so that
        conv(x)[oh, ow*Cout+co] = sum_kh (x_rows[oh+kh, :] @ R[kh])[ow*Cout+co]
    where x_rows lanes are `w*Cin+ci` (channel-minor) or `ci*Win+w`
    (channel-major; used for the NCHW network input).  Horizontal zero padding
    (padding=1) is folded in by clipping the band at the image edges."""
    w = np.asarray(w_hwio, np.float32)
    K, _, cin, cout = w.shape
    cw = w_in + 3 - K
    R = np.zeros((K, w_in * cin, cw * cout), np.float32)
    for kh in range(K):
        for kw in range(K):
            blk = w[kh, kw]                                  # (Cin, Cout)
            for ow in range(cw):
                col_w = ow + kw - 1                          # unpadded column
                if col_w < 0 or col_w >= w_in:
                    continue                                 # zero-pad column
                col = ow * cout
                if channel_major_rows:
                    for ci in range(cin):
                        R[kh, ci * w_in + col_w, col:col + cout] = blk[ci]
                else:
                    R[kh, col_w * cin:(col_w + 1) * cin, col:col + cout] = blk
    return R


def pack_params(params, im_size, hidden_dim, kernel_size):
    """One-time host-side repacking into the forms the fused kernel consumes.
    Conv Toeplitz blocks and the fc1 weight are stored bf16 (halves the
    grid-invariant weight DMA); biases and the tiny fc2 stay f32."""
    stages = _stage_dims(im_size, hidden_dim, kernel_size)
    packed = []
    for i, st in enumerate(stages):
        R = _expand_conv_weight(params[f"conv{i+1}_w"], st["Win"],
                                channel_major_rows=(i == 0))
        for kh in range(st["K"]):
            packed.append(jnp.asarray(R[kh], dtype=jnp.bfloat16))
        b = np.asarray(params[f"conv{i+1}_b"], np.float32)
        packed.append(jnp.asarray(np.tile(b, st["CW"])[None, :]))
    last = stages[-1]
    ph, pw, cc = last["PH"], last["PW"], last["Cout"]
    # Permute fc1 rows from torch NCHW-flatten order (c*PH*PW + h*PW + w) to the
    # kernel's lane-dense (H, W*C) flatten order (h*PW*C + w*C + c).
    r = np.arange(ph * pw * cc)
    h_idx = r // (pw * cc)
    w_idx = (r % (pw * cc)) // cc
    c_idx = r % cc
    torch_rows = c_idx * (ph * pw) + h_idx * pw + w_idx
    w1 = np.asarray(params["fc1_w"], np.float32)[torch_rows, :]
    packed.append(jnp.asarray(w1.reshape(ph, pw * cc, hidden_dim),
                              dtype=jnp.bfloat16))
    packed.append(jnp.asarray(np.asarray(params["fc1_b"], np.float32)[None, :]))
    packed.append(jnp.asarray(np.asarray(params["fc2_w"], np.float32)))
    packed.append(jnp.asarray(np.asarray(params["fc2_b"], np.float32)[None, :]))
    return tuple(packed)


# ----------------------------------------------------------------------------
# The fused kernel
# ----------------------------------------------------------------------------
def _make_fused_kernel(stages, im_size, hidden_dim, n_classes):
    C_img, H, W = im_size
    n_stages = len(stages)
    last = stages[-1]

    def kernel(*refs):
        # ----- unpack refs: inputs, output, scratch ------------------------
        x_ref = refs[0]
        idx = 1
        conv_refs = []                 # per stage: ([R_kh refs], bias-tile ref)
        for st in stages:
            conv_refs.append((refs[idx:idx + st["K"]], refs[idx + st["K"]]))
            idx += st["K"] + 1
        w1_ref, b1_ref, w2_ref, b2_ref = refs[idx:idx + 4]
        idx += 4
        o_ref = refs[idx]
        pads = refs[idx + 1:idx + 1 + n_stages]

        # ----- stage-1 padded input: wrapper delivers (H, C*W), lanes c*W+w -
        pad0 = pads[0]
        zrow0 = jnp.zeros((1, C_img * W), jnp.float32)
        pad0[0:1, :] = zrow0                         # top zero-pad row
        pad0[H + 1:H + 2, :] = zrow0                 # bottom zero-pad row
        pad0[1:1 + H, :] = x_ref[0]                  # single interior-row store

        # ----- conv -> maxpool(3,1) -> relu stages ---------------------------
        act = None
        for s, st in enumerate(stages):
            K, CH, Cout = st["K"], st["CH"], st["Cout"]
            PH, PW = st["PH"], st["PW"]
            r_refs, bt_ref = conv_refs[s]
            pad = pads[s]

            # conv (stride=1, padding=1) as K block-Toeplitz MXU matmuls.
            # Operands are bf16 (full-rate MXU, half the weight DMA), the
            # accumulation stays f32.
            acc = None
            for kh in range(K):
                lhs = pad[kh:kh + CH, :].astype(jnp.bfloat16)
                part = jnp.dot(lhs, r_refs[kh][...],
                               preferred_element_type=jnp.float32)
                acc = part if acc is None else acc + part
            conv = acc + bt_ref[...]                          # (CH, CW*Cout) f32

            # separable 3x3 / stride-1 max pool, then ReLU (all f32 elementwise)
            rmax = jnp.maximum(jnp.maximum(conv[0:PH, :], conv[1:PH + 1, :]),
                               conv[2:PH + 2, :])             # (PH, CW*Cout)
            width = PW * Cout
            pooled = jnp.maximum(
                jnp.maximum(rmax[:, 0:width], rmax[:, Cout:Cout + width]),
                rmax[:, 2 * Cout:2 * Cout + width])           # (PH, PW*Cout)
            act = jnp.maximum(pooled, 0.0)

            # dropout (stages 2 and 4) = identity in eval mode -- see TODO.

            # feed the next stage: interior rows of its padded input scratch
            if s + 1 < n_stages:
                nxt = pads[s + 1]
                zrow = jnp.zeros((1, width), jnp.float32)
                nxt[0:1, :] = zrow
                nxt[PH + 1:PH + 2, :] = zrow
                nxt[1:1 + PH, :] = act

        # ----- classifier head: fc1 -> relu -> fc2 -> softmax(dim=1) --------
        # fc1 = sum over the PH rows of independent (1, PW*C) @ (PW*C, hidden)
        # dots; the dots share no data dependence (unlike the old serial chain
        # through `h`) and the partials are combined with a pairwise tree sum.
        act16 = act.astype(jnp.bfloat16)
        parts = [jnp.dot(act16[row:row + 1, :], w1_ref[row],
                         preferred_element_type=jnp.float32)
                 for row in range(last["PH"])]
        while len(parts) > 1:
            nxt_parts = [parts[i] + parts[i + 1]
                         for i in range(0, len(parts) - 1, 2)]
            if len(parts) % 2:
                nxt_parts.append(parts[-1])
            parts = nxt_parts
        h = jnp.maximum(parts[0] + b1_ref[...], 0.0)          # (1, hidden) f32
        logits = jnp.dot(h, w2_ref[...],
                         preferred_element_type=jnp.float32) + b2_ref[...]
        m = jnp.max(logits, axis=-1, keepdims=True)
        e = jnp.exp(logits - m)
        # Exact divide (single (1, n_classes) vector): keeps each softmax row
        # summing to 1 to float precision; an approx EUP reciprocal buys nothing.
        probs = e / jnp.sum(e, axis=-1, keepdims=True)
        o_ref[...] = probs.reshape(1, 1, n_classes)

    return kernel


def build_forward(im_size, hidden_dim, kernel_size, n_classes):
    """Returns a jitted forward(packed_params, images_nchw) -> (N, n_classes)."""
    stages = _stage_dims(im_size, hidden_dim, kernel_size)
    C_img, H, W = im_size
    last = stages[-1]
    kernel = _make_fused_kernel(stages, im_size, hidden_dim, n_classes)

    cmap2 = lambda i: (0, 0)
    cmap3 = lambda i: (0, 0, 0)
    weight_specs = []
    for st in stages:
        r_shape = (st["Win"] * st["Cin"], st["CW"] * st["Cout"])
        weight_specs += [pl.BlockSpec(r_shape, cmap2) for _ in range(st["K"])]
        weight_specs.append(pl.BlockSpec((1, st["CW"] * st["Cout"]), cmap2))
    weight_specs += [
        pl.BlockSpec((last["PH"], last["PW"] * last["Cout"], hidden_dim), cmap3),
        pl.BlockSpec((1, hidden_dim), cmap2),
        pl.BlockSpec((hidden_dim, n_classes), cmap2),
        pl.BlockSpec((1, n_classes), cmap2),
    ]
    scratch_shapes = [
        pltpu.VMEM((st["Hin"] + 2, st["Win"] * st["Cin"]), jnp.float32)
        for st in stages
    ]

    @jax.jit
    def forward(packed, images_nchw):
        n = images_nchw.shape[0]
        # One cheap XLA relayout off the hot path: NCHW -> (N, H, C*W) with
        # lanes ordered c*W+w (the stage-1 Toeplitz row order).
        x_rows = jnp.transpose(images_nchw.astype(jnp.float32),
                               (0, 2, 1, 3)).reshape(n, H, C_img * W)
        out = pl.pallas_call(
            kernel,
            out_shape=jax.ShapeDtypeStruct((n, 1, n_classes), jnp.float32),
            grid=(n,),
            in_specs=([pl.BlockSpec((1, H, C_img * W), lambda i: (i, 0, 0))]
                      + weight_specs),
            out_specs=pl.BlockSpec((1, 1, n_classes), lambda i: (i, 0, 0)),
            scratch_shapes=scratch_shapes,
            compiler_params=pltpu.CompilerParams(
                dimension_semantics=("parallel",),   # v7x: 2 TCs split the batch
                vmem_limit_bytes=32 * 1024 * 1024),
        )(x_rows, *packed)
        return out.reshape(n, n_classes)

    return forward


# ----------------------------------------------------------------------------
# Pure-JAX reference (same eval-mode semantics as MyModel.forward)
# ----------------------------------------------------------------------------
@jax.jit
def reference_forward(params, images_nchw):
    prec = lax.Precision.HIGHEST

    def conv(x, w, b):
        y = lax.conv_general_dilated(
            x, w, window_strides=(1, 1), padding=((1, 1), (1, 1)),
            dimension_numbers=("NCHW", "HWIO", "NCHW"), precision=prec)
        return y + b[None, :, None, None]

    def pool(x):
        return lax.reduce_window(x, -jnp.inf, lax.max,
                                 (1, 1, 3, 3), (1, 1, 1, 1), "VALID")

    x = images_nchw.astype(jnp.float32)
    x = jnp.maximum(pool(conv(x, params["conv1_w"], params["conv1_b"])), 0.0)
    x = jnp.maximum(pool(conv(x, params["conv2_w"], params["conv2_b"])), 0.0)
    x = jnp.maximum(pool(conv(x, params["conv3_w"], params["conv3_b"])), 0.0)
    x = jnp.maximum(pool(conv(x, params["conv4_w"], params["conv4_b"])), 0.0)
    xf = x.reshape(x.shape[0], -1)                       # torch NCHW flatten
    h = jnp.maximum(jnp.dot(xf, params["fc1_w"], precision=prec)
                    + params["fc1_b"], 0.0)
    logits = jnp.dot(h, params["fc2_w"], precision=prec) + params["fc2_b"]
    return jax.nn.softmax(logits, axis=1)


# ----------------------------------------------------------------------------
if __name__ == "__main__":
    # fc1 expects hidden_dim*20*20 features, which with kernel_size=3 implies
    # a 32x32 spatial input.
    im_size = (3, 32, 32)
    hidden_dim = 8
    kernel_size = 3
    n_classes = 10
    batch = 2

    root = jax.random.PRNGKey(0)
    k_in, k_par = jax.random.split(root)
    images = jax.random.normal(k_in, (batch,) + im_size, dtype=jnp.float32)
    params = init_params(k_par, im_size, hidden_dim, kernel_size, n_classes)
    packed = pack_params(params, im_size, hidden_dim, kernel_size)

    forward = build_forward(im_size, hidden_dim, kernel_size, n_classes)
    scores = jax.block_until_ready(forward(packed, images))

    assert scores.shape == (batch, n_classes), scores.shape
    row_sums = jnp.sum(scores, axis=1)
    assert bool(jnp.all(jnp.abs(row_sums - 1.0) < 1e-4)), row_sums

    ref = jax.block_until_ready(reference_forward(params, images))
    err = float(jnp.max(jnp.abs(scores - ref)))
    assert err < 3e-2, f"kernel vs reference mismatch: max abs err = {err}"

    print("KERNEL_OK")
</pallas_src>

<mosaic_0001>
module attributes {stable_mosaic.version = 11 : i64} {
  func.func @kernel(%arg0: i32, %arg1: memref<1x32x96xf32, #tpu.memory_space<vmem>>, %arg2: memref<96x768xbf16, #tpu.memory_space<vmem>>, %arg3: memref<96x768xbf16, #tpu.memory_space<vmem>>, %arg4: memref<96x768xbf16, #tpu.memory_space<vmem>>, %arg5: memref<1x768xf32, #tpu.memory_space<vmem>>, %arg6: memref<720x448xbf16, #tpu.memory_space<vmem>>, %arg7: memref<720x448xbf16, #tpu.memory_space<vmem>>, %arg8: memref<720x448xbf16, #tpu.memory_space<vmem>>, %arg9: memref<720x448xbf16, #tpu.memory_space<vmem>>, %arg10: memref<720x448xbf16, #tpu.memory_space<vmem>>, %arg11: memref<1x448xf32, #tpu.memory_space<vmem>>, %arg12: memref<416x208xbf16, #tpu.memory_space<vmem>>, %arg13: memref<416x208xbf16, #tpu.memory_space<vmem>>, %arg14: memref<416x208xbf16, #tpu.memory_space<vmem>>, %arg15: memref<1x208xf32, #tpu.memory_space<vmem>>, %arg16: memref<192x176xbf16, #tpu.memory_space<vmem>>, %arg17: memref<192x176xbf16, #tpu.memory_space<vmem>>, %arg18: memref<192x176xbf16, #tpu.memory_space<vmem>>, %arg19: memref<192x176xbf16, #tpu.memory_space<vmem>>, %arg20: memref<192x176xbf16, #tpu.memory_space<vmem>>, %arg21: memref<1x176xf32, #tpu.memory_space<vmem>>, %arg22: memref<20x160x8xbf16, #tpu.memory_space<vmem>>, %arg23: memref<1x8xf32, #tpu.memory_space<vmem>>, %arg24: memref<8x10xf32, #tpu.memory_space<vmem>>, %arg25: memref<1x10xf32, #tpu.memory_space<vmem>>, %arg26: memref<1x1x10xf32, #tpu.memory_space<vmem>>, %arg27: memref<34x96xf32, #tpu.memory_space<vmem>>, %arg28: memref<32x720xf32, #tpu.memory_space<vmem>>, %arg29: memref<28x416xf32, #tpu.memory_space<vmem>>, %arg30: memref<26x192xf32, #tpu.memory_space<vmem>>) attributes {dimension_semantics = [#tpu.dimension_semantics<parallel>], iteration_bounds = array<i64: 2>, scalar_prefetch = 0 : i64, scratch_operands = 4 : i64, tpu.core_type = #tpu.core_type<tc>, window_params = [{transform_indices = @transform_0, window_bounds = array<i64: 1, 32, 96>}, {pipeline_mode = #tpu.pipeline_mode<synchronous>, transform_indices = @transform_1, window_bounds = array<i64: 96, 768>}, {pipeline_mode = #tpu.pipeline_mode<synchronous>, transform_indices = @transform_2, window_bounds = array<i64: 96, 768>}, {pipeline_mode = #tpu.pipeline_mode<synchronous>, transform_indices = @transform_3, window_bounds = array<i64: 96, 768>}, {pipeline_mode = #tpu.pipeline_mode<synchronous>, transform_indices = @transform_4, window_bounds = array<i64: 1, 768>}, {pipeline_mode = #tpu.pipeline_mode<synchronous>, transform_indices = @transform_5, window_bounds = array<i64: 720, 448>}, {pipeline_mode = #tpu.pipeline_mode<synchronous>, transform_indices = @transform_6, window_bounds = array<i64: 720, 448>}, {pipeline_mode = #tpu.pipeline_mode<synchronous>, transform_indices = @transform_7, window_bounds = array<i64: 720, 448>}, {pipeline_mode = #tpu.pipeline_mode<synchronous>, transform_indices = @transform_8, window_bounds = array<i64: 720, 448>}, {pipeline_mode = #tpu.pipeline_mode<synchronous>, transform_indices = @transform_9, window_bounds = array<i64: 720, 448>}, {pipeline_mode = #tpu.pipeline_mode<synchronous>, transform_indices = @transform_10, window_bounds = array<i64: 1, 448>}, {pipeline_mode = #tpu.pipeline_mode<synchronous>, transform_indices = @transform_11, window_bounds = array<i64: 416, 208>}, {pipeline_mode = #tpu.pipeline_mode<synchronous>, transform_indices = @transform_12, window_bounds = array<i64: 416, 208>}, {pipeline_mode = #tpu.pipeline_mode<synchronous>, transform_indices = @transform_13, window_bounds = array<i64: 416, 208>}, {pipeline_mode = #tpu.pipeline_mode<synchronous>, transform_indices = @transform_14, window_bounds = array<i64: 1, 208>}, {pipeline_mode = #tpu.pipeline_mode<synchronous>, transform_indices = @transform_15, window_bounds = array<i64: 192, 176>}, {pipeline_mode = #tpu.pipeline_mode<synchronous>, transform_indices = @transform_16, window_bounds = array<i64: 192, 176>}, {pipeline_mode = #tpu.pipeline_mode<synchronous>, transform_indices = @transform_17, window_bounds = array<i64: 192, 176>}, {pipeline_mode = #tpu.pipeline_mode<synchronous>, transform_indices = @transform_18, window_bounds = array<i64: 192, 176>}, {pipeline_mode = #tpu.pipeline_mode<synchronous>, transform_indices = @transform_19, window_bounds = array<i64: 192, 176>}, {pipeline_mode = #tpu.pipeline_mode<synchronous>, transform_indices = @transform_20, window_bounds = array<i64: 1, 176>}, {pipeline_mode = #tpu.pipeline_mode<synchronous>, transform_indices = @transform_21, window_bounds = array<i64: 20, 160, 8>}, {pipeline_mode = #tpu.pipeline_mode<synchronous>, transform_indices = @transform_22, window_bounds = array<i64: 1, 8>}, {pipeline_mode = #tpu.pipeline_mode<synchronous>, transform_indices = @transform_23, window_bounds = array<i64: 8, 10>}, {pipeline_mode = #tpu.pipeline_mode<synchronous>, transform_indices = @transform_24, window_bounds = array<i64: 1, 10>}, {transform_indices = @transform_25, window_bounds = array<i64: 1, 1, 10>}]} {
    %cst = arith.constant 0.000000e+00 : f32
    %0 = vector.broadcast %cst : f32 to vector<1x96xf32>
    %c0 = arith.constant 0 : index
    %c0_0 = arith.constant 0 : index
    %1 = vector.load %arg27[%c0, %c0_0] : memref<34x96xf32, #tpu.memory_space<vmem>>, vector<1x96xf32>
    tpu.vector_store %arg27[%c0, %c0_0], %0 {strides = array<i32>} : memref<34x96xf32, #tpu.memory_space<vmem>>, vector<1x96xf32>,
    %c33 = arith.constant 33 : index
    %c0_1 = arith.constant 0 : index
    %2 = vector.load %arg27[%c33, %c0_1] : memref<34x96xf32, #tpu.memory_space<vmem>>, vector<1x96xf32>
    tpu.vector_store %arg27[%c33, %c0_1], %0 {strides = array<i32>} : memref<34x96xf32, #tpu.memory_space<vmem>>, vector<1x96xf32>,
    %c0_2 = arith.constant 0 : index
    %c0_3 = arith.constant 0 : index
    %c0_4 = arith.constant 0 : index
    %3 = vector.load %arg1[%c0_2, %c0_3, %c0_4] : memref<1x32x96xf32, #tpu.memory_space<vmem>>, vector<1x32x96xf32>
    %4 = vector.shape_cast %3 : vector<1x32x96xf32> to vector<32x96xf32>
    %c1 = arith.constant 1 : index
    %c0_5 = arith.constant 0 : index
    %5 = vector.load %arg27[%c1, %c0_5] : memref<34x96xf32, #tpu.memory_space<vmem>>, vector<32x96xf32>
    tpu.vector_store %arg27[%c1, %c0_5], %4 {strides = array<i32>} : memref<34x96xf32, #tpu.memory_space<vmem>>, vector<32x96xf32>,
    %c0_6 = arith.constant 0 : index
    %c0_7 = arith.constant 0 : index
    %6 = vector.load %arg27[%c0_6, %c0_7] : memref<34x96xf32, #tpu.memory_space<vmem>>, vector<32x96xf32>
    %7 = arith.truncf %6 : vector<32x96xf32> to vector<32x96xbf16>
    %c0_8 = arith.constant 0 : index
    %c0_9 = arith.constant 0 : index
    %8 = vector.load %arg2[%c0_8, %c0_9] : memref<96x768xbf16, #tpu.memory_space<vmem>>, vector<96x768xbf16>
    %cst_10 = arith.constant dense<0.000000e+00> : vector<32x768xf32>
    %9 = tpu.matmul %7, %8, %cst_10 {dimension_numbers = #tpu.dot_dimension_numbers<[1], [0], [0], [1], [0, 0, 1, 1], [], []>} : vector<32x96xbf16>, vector<96x768xbf16>, vector<32x768xf32> -> vector<32x768xf32>
    %c1_11 = arith.constant 1 : index
    %c0_12 = arith.constant 0 : index
    %10 = vector.load %arg27[%c1_11, %c0_12] : memref<34x96xf32, #tpu.memory_space<vmem>>, vector<32x96xf32>
    %11 = arith.truncf %10 : vector<32x96xf32> to vector<32x96xbf16>
    %c0_13 = arith.constant 0 : index
    %c0_14 = arith.constant 0 : index
    %12 = vector.load %arg3[%c0_13, %c0_14] : memref<96x768xbf16, #tpu.memory_space<vmem>>, vector<96x768xbf16>
    %cst_15 = arith.constant dense<0.000000e+00> : vector<32x768xf32>
    %13 = tpu.matmul %11, %12, %cst_15 {dimension_numbers = #tpu.dot_dimension_numbers<[1], [0], [0], [1], [0, 0, 1, 1], [], []>} : vector<32x96xbf16>, vector<96x768xbf16>, vector<32x768xf32> -> vector<32x768xf32>
    %14 = arith.addf %9, %13 : vector<32x768xf32>
    %c2 = arith.constant 2 : index
    %c0_16 = arith.constant 0 : index
    %15 = vector.load %arg27[%c2, %c0_16] : memref<34x96xf32, #tpu.memory_space<vmem>>, vector<32x96xf32>
    %16 = arith.truncf %15 : vector<32x96xf32> to vector<32x96xbf16>
    %c0_17 = arith.constant 0 : index
    %c0_18 = arith.constant 0 : index
    %17 = vector.load %arg4[%c0_17, %c0_18] : memref<96x768xbf16, #tpu.memory_space<vmem>>, vector<96x768xbf16>
    %cst_19 = arith.constant dense<0.000000e+00> : vector<32x768xf32>
    %18 = tpu.matmul %16, %17, %cst_19 {dimension_numbers = #tpu.dot_dimension_numbers<[1], [0], [0], [1], [0, 0, 1, 1], [], []>} : vector<32x96xbf16>, vector<96x768xbf16>, vector<32x768xf32> -> vector<32x768xf32>
    %19 = arith.addf %14, %18 : vector<32x768xf32>
    %c0_20 = arith.constant 0 : index
    %c0_21 = arith.constant 0 : index
    %20 = vector.load %arg5[%c0_20, %c0_21] : memref<1x768xf32, #tpu.memory_space<vmem>>, vector<1x768xf32>
    %21 = vector.broadcast %20 : vector<1x768xf32> to vector<32x768xf32>
    %22 = arith.addf %19, %21 : vector<32x768xf32>
    %23 = vector.extract_strided_slice %22 {offsets = [0, 0], sizes = [30, 768], strides = [1, 1]} : vector<32x768xf32> to vector<30x768xf32>
    %24 = vector.extract_strided_slice %22 {offsets = [1, 0], sizes = [30, 768], strides = [1, 1]} : vector<32x768xf32> to vector<30x768xf32>
    %25 = arith.maximumf %23, %24 : vector<30x768xf32>
    %26 = vector.extract_strided_slice %22 {offsets = [2, 0], sizes = [30, 768], strides = [1, 1]} : vector<32x768xf32> to vector<30x768xf32>
    %27 = arith.maximumf %25, %26 : vector<30x768xf32>
    %28 = vector.extract_strided_slice %27 {offsets = [0, 0], sizes = [30, 720], strides = [1, 1]} : vector<30x768xf32> to vector<30x720xf32>
    %29 = vector.extract_strided_slice %27 {offsets = [0, 24], sizes = [30, 720], strides = [1, 1]} : vector<30x768xf32> to vector<30x720xf32>
    %30 = arith.maximumf %28, %29 : vector<30x720xf32>
    %31 = vector.extract_strided_slice %27 {offsets = [0, 48], sizes = [30, 720], strides = [1, 1]} : vector<30x768xf32> to vector<30x720xf32>
    %32 = arith.maximumf %30, %31 : vector<30x720xf32>
    %cst_22 = arith.constant 0.000000e+00 : f32
    %33 = vector.broadcast %cst_22 : f32 to vector<30x720xf32>
    %34 = arith.maximumf %32, %33 : vector<30x720xf32>
    %cst_23 = arith.constant 0.000000e+00 : f32
    %35 = vector.broadcast %cst_23 : f32 to vector<1x720xf32>
    %c0_24 = arith.constant 0 : index
    %c0_25 = arith.constant 0 : index
    %36 = vector.load %arg28[%c0_24, %c0_25] : memref<32x720xf32, #tpu.memory_space<vmem>>, vector<1x720xf32>
    tpu.vector_store %arg28[%c0_24, %c0_25], %35 {strides = array<i32>} : memref<32x720xf32, #tpu.memory_space<vmem>>, vector<1x720xf32>,
    %c31 = arith.constant 31 : index
    %c0_26 = arith.constant 0 : index
    %37 = vector.load %arg28[%c31, %c0_26] : memref<32x720xf32, #tpu.memory_space<vmem>>, vector<1x720xf32>
    tpu.vector_store %arg28[%c31, %c0_26], %35 {strides = array<i32>} : memref<32x720xf32, #tpu.memory_space<vmem>>, vector<1x720xf32>,
    %c1_27 = arith.constant 1 : index
    %c0_28 = arith.constant 0 : index
    %38 = vector.load %arg28[%c1_27, %c0_28] : memref<32x720xf32, #tpu.memory_space<vmem>>, vector<30x720xf32>
    tpu.vector_store %arg28[%c1_27, %c0_28], %34 {strides = array<i32>} : memref<32x720xf32, #tpu.memory_space<vmem>>, vector<30x720xf32>,
    %c0_29 = arith.constant 0 : index
    %c0_30 = arith.constant 0 : index
    %39 = vector.load %arg28[%c0_29, %c0_30] : memref<32x720xf32, #tpu.memory_space<vmem>>, vector<28x720xf32>
    %40 = arith.truncf %39 : vector<28x720xf32> to vector<28x720xbf16>
    %c0_31 = arith.constant 0 : index
    %c0_32 = arith.constant 0 : index
    %41 = vector.load %arg6[%c0_31, %c0_32] : memref<720x448xbf16, #tpu.memory_space<vmem>>, vector<720x448xbf16>
    %cst_33 = arith.constant dense<0.000000e+00> : vector<28x448xf32>
    %42 = tpu.matmul %40, %41, %cst_33 {dimension_numbers = #tpu.dot_dimension_numbers<[1], [0], [0], [1], [0, 0, 1, 1], [], []>} : vector<28x720xbf16>, vector<720x448xbf16>, vector<28x448xf32> -> vector<28x448xf32>
    %c1_34 = arith.constant 1 : index
    %c0_35 = arith.constant 0 : index
    %43 = vector.load %arg28[%c1_34, %c0_35] : memref<32x720xf32, #tpu.memory_space<vmem>>, vector<28x720xf32>
    %44 = arith.truncf %43 : vector<28x720xf32> to vector<28x720xbf16>
    %c0_36 = arith.constant 0 : index
    %c0_37 = arith.constant 0 : index
    %45 = vector.load %arg7[%c0_36, %c0_37] : memref<720x448xbf16, #tpu.memory_space<vmem>>, vector<720x448xbf16>
    %cst_38 = arith.constant dense<0.000000e+00> : vector<28x448xf32>
    %46 = tpu.matmul %44, %45, %cst_38 {dimension_numbers = #tpu.dot_dimension_numbers<[1], [0], [0], [1], [0, 0, 1, 1], [], []>} : vector<28x720xbf16>, vector<720x448xbf16>, vector<28x448xf32> -> vector<28x448xf32>
    %47 = arith.addf %42, %46 : vector<28x448xf32>
    %c2_39 = arith.constant 2 : index
    %c0_40 = arith.constant 0 : index
    %48 = vector.load %arg28[%c2_39, %c0_40] : memref<32x720xf32, #tpu.memory_space<vmem>>, vector<28x720xf32>
    %49 = arith.truncf %48 : vector<28x720xf32> to vector<28x720xbf16>
    %c0_41 = arith.constant 0 : index
    %c0_42 = arith.constant 0 : index
    %50 = vector.load %arg8[%c0_41, %c0_42] : memref<720x448xbf16, #tpu.memory_space<vmem>>, vector<720x448xbf16>
    %cst_43 = arith.constant dense<0.000000e+00> : vector<28x448xf32>
    %51 = tpu.matmul %49, %50, %cst_43 {dimension_numbers = #tpu.dot_dimension_numbers<[1], [0], [0], [1], [0, 0, 1, 1], [], []>} : vector<28x720xbf16>, vector<720x448xbf16>, vector<28x448xf32> -> vector<28x448xf32>
    %52 = arith.addf %47, %51 : vector<28x448xf32>
    %c3 = arith.constant 3 : index
    %c0_44 = arith.constant 0 : index
    %53 = vector.load %arg28[%c3, %c0_44] : memref<32x720xf32, #tpu.memory_space<vmem>>, vector<28x720xf32>
    %54 = arith.truncf %53 : vector<28x720xf32> to vector<28x720xbf16>
    %c0_45 = arith.constant 0 : index
    %c0_46 = arith.constant 0 : index
    %55 = vector.load %arg9[%c0_45, %c0_46] : memref<720x448xbf16, #tpu.memory_space<vmem>>, vector<720x448xbf16>
    %cst_47 = arith.constant dense<0.000000e+00> : vector<28x448xf32>
    %56 = tpu.matmul %54, %55, %cst_47 {dimension_numbers = #tpu.dot_dimension_numbers<[1], [0], [0], [1], [0, 0, 1, 1], [], []>} : vector<28x720xbf16>, vector<720x448xbf16>, vector<28x448xf32> -> vector<28x448xf32>
    %57 = arith.addf %52, %56 : vector<28x448xf32>
    %c4 = arith.constant 4 : index
    %c0_48 = arith.constant 0 : index
    %58 = vector.load %arg28[%c4, %c0_48] : memref<32x720xf32, #tpu.memory_space<vmem>>, vector<28x720xf32>
    %59 = arith.truncf %58 : vector<28x720xf32> to vector<28x720xbf16>
    %c0_49 = arith.constant 0 : index
    %c0_50 = arith.constant 0 : index
    %60 = vector.load %arg10[%c0_49, %c0_50] : memref<720x448xbf16, #tpu.memory_space<vmem>>, vector<720x448xbf16>
    %cst_51 = arith.constant dense<0.000000e+00> : vector<28x448xf32>
    %61 = tpu.matmul %59, %60, %cst_51 {dimension_numbers = #tpu.dot_dimension_numbers<[1], [0], [0], [1], [0, 0, 1, 1], [], []>} : vector<28x720xbf16>, vector<720x448xbf16>, vector<28x448xf32> -> vector<28x448xf32>
    %62 = arith.addf %57, %61 : vector<28x448xf32>
    %c0_52 = arith.constant 0 : index
    %c0_53 = arith.constant 0 : index
    %63 = vector.load %arg11[%c0_52, %c0_53] : memref<1x448xf32, #tpu.memory_space<vmem>>, vector<1x448xf32>
    %64 = vector.broadcast %63 : vector<1x448xf32> to vector<28x448xf32>
    %65 = arith.addf %62, %64 : vector<28x448xf32>
    %66 = vector.extract_strided_slice %65 {offsets = [0, 0], sizes = [26, 448], strides = [1, 1]} : vector<28x448xf32> to vector<26x448xf32>
    %67 = vector.extract_strided_slice %65 {offsets = [1, 0], sizes = [26, 448], strides = [1, 1]} : vector<28x448xf32> to vector<26x448xf32>
    %68 = arith.maximumf %66, %67 : vector<26x448xf32>
    %69 = vector.extract_strided_slice %65 {offsets = [2, 0], sizes = [26, 448], strides = [1, 1]} : vector<28x448xf32> to vector<26x448xf32>
    %70 = arith.maximumf %68, %69 : vector<26x448xf32>
    %71 = vector.extract_strided_slice %70 {offsets = [0, 0], sizes = [26, 416], strides = [1, 1]} : vector<26x448xf32> to vector<26x416xf32>
    %72 = vector.extract_strided_slice %70 {offsets = [0, 16], sizes = [26, 416], strides = [1, 1]} : vector<26x448xf32> to vector<26x416xf32>
    %73 = arith.maximumf %71, %72 : vector<26x416xf32>
    %74 = vector.extract_strided_slice %70 {offsets = [0, 32], sizes = [26, 416], strides = [1, 1]} : vector<26x448xf32> to vector<26x416xf32>
    %75 = arith.maximumf %73, %74 : vector<26x416xf32>
    %cst_54 = arith.constant 0.000000e+00 : f32
    %76 = vector.broadcast %cst_54 : f32 to vector<26x416xf32>
    %77 = arith.maximumf %75, %76 : vector<26x416xf32>
    %cst_55 = arith.constant 0.000000e+00 : f32
    %78 = vector.broadcast %cst_55 : f32 to vector<1x416xf32>
    %c0_56 = arith.constant 0 : index
    %c0_57 = arith.constant 0 : index
    %79 = vector.load %arg29[%c0_56, %c0_57] : memref<28x416xf32, #tpu.memory_space<vmem>>, vector<1x416xf32>
    tpu.vector_store %arg29[%c0_56, %c0_57], %78 {strides = array<i32>} : memref<28x416xf32, #tpu.memory_space<vmem>>, vector<1x416xf32>,
    %c27 = arith.constant 27 : index
    %c0_58 = arith.constant 0 : index
    %80 = vector.load %arg29[%c27, %c0_58] : memref<28x416xf32, #tpu.memory_space<vmem>>, vector<1x416xf32>
    tpu.vector_store %arg29[%c27, %c0_58], %78 {strides = array<i32>} : memref<28x416xf32, #tpu.memory_space<vmem>>, vector<1x416xf32>,
    %c1_59 = arith.constant 1 : index
    %c0_60 = arith.constant 0 : index
    %81 = vector.load %arg29[%c1_59, %c0_60] : memref<28x416xf32, #tpu.memory_space<vmem>>, vector<26x416xf32>
    tpu.vector_store %arg29[%c1_59, %c0_60], %77 {strides = array<i32>} : memref<28x416xf32, #tpu.memory_space<vmem>>, vector<26x416xf32>,
    %c0_61 = arith.constant 0 : index
    %c0_62 = arith.constant 0 : index
    %82 = vector.load %arg29[%c0_61, %c0_62] : memref<28x416xf32, #tpu.memory_space<vmem>>, vector<26x416xf32>
    %83 = arith.truncf %82 : vector<26x416xf32> to vector<26x416xbf16>
    %c0_63 = arith.constant 0 : index
    %c0_64 = arith.constant 0 : index
    %84 = vector.load %arg12[%c0_63, %c0_64] : memref<416x208xbf16, #tpu.memory_space<vmem>>, vector<416x208xbf16>
    %cst_65 = arith.constant dense<0.000000e+00> : vector<26x208xf32>
    %85 = tpu.matmul %83, %84, %cst_65 {dimension_numbers = #tpu.dot_dimension_numbers<[1], [0], [0], [1], [0, 0, 1, 1], [], []>} : vector<26x416xbf16>, vector<416x208xbf16>, vector<26x208xf32> -> vector<26x208xf32>
    %c1_66 = arith.constant 1 : index
    %c0_67 = arith.constant 0 : index
    %86 = vector.load %arg29[%c1_66, %c0_67] : memref<28x416xf32, #tpu.memory_space<vmem>>, vector<26x416xf32>
    %87 = arith.truncf %86 : vector<26x416xf32> to vector<26x416xbf16>
    %c0_68 = arith.constant 0 : index
    %c0_69 = arith.constant 0 : index
    %88 = vector.load %arg13[%c0_68, %c0_69] : memref<416x208xbf16, #tpu.memory_space<vmem>>, vector<416x208xbf16>
    %cst_70 = arith.constant dense<0.000000e+00> : vector<26x208xf32>
    %89 = tpu.matmul %87, %88, %cst_70 {dimension_numbers = #tpu.dot_dimension_numbers<[1], [0], [0], [1], [0, 0, 1, 1], [], []>} : vector<26x416xbf16>, vector<416x208xbf16>, vector<26x208xf32> -> vector<26x208xf32>
    %90 = arith.addf %85, %89 : vector<26x208xf32>
    %c2_71 = arith.constant 2 : index
    %c0_72 = arith.constant 0 : index
    %91 = vector.load %arg29[%c2_71, %c0_72] : memref<28x416xf32, #tpu.memory_space<vmem>>, vector<26x416xf32>
    %92 = arith.truncf %91 : vector<26x416xf32> to vector<26x416xbf16>
    %c0_73 = arith.constant 0 : index
    %c0_74 = arith.constant 0 : index
    %93 = vector.load %arg14[%c0_73, %c0_74] : memref<416x208xbf16, #tpu.memory_space<vmem>>, vector<416x208xbf16>
    %cst_75 = arith.constant dense<0.000000e+00> : vector<26x208xf32>
    %94 = tpu.matmul %92, %93, %cst_75 {dimension_numbers = #tpu.dot_dimension_numbers<[1], [0], [0], [1], [0, 0, 1, 1], [], []>} : vector<26x416xbf16>, vector<416x208xbf16>, vector<26x208xf32> -> vector<26x208xf32>
    %95 = arith.addf %90, %94 : vector<26x208xf32>
    %c0_76 = arith.constant 0 : index
    %c0_77 = arith.constant 0 : index
    %96 = vector.load %arg15[%c0_76, %c0_77] : memref<1x208xf32, #tpu.memory_space<vmem>>, vector<1x208xf32>
    %97 = vector.broadcast %96 : vector<1x208xf32> to vector<26x208xf32>
    %98 = arith.addf %95, %97 : vector<26x208xf32>
    %99 = vector.extract_strided_slice %98 {offsets = [0, 0], sizes = [24, 208], strides = [1, 1]} : vector<26x208xf32> to vector<24x208xf32>
    %100 = vector.extract_strided_slice %98 {offsets = [1, 0], sizes = [24, 208], strides = [1, 1]} : vector<26x208xf32> to vector<24x208xf32>
    %101 = arith.maximumf %99, %100 : vector<24x208xf32>
    %102 = vector.extract_strided_slice %98 {offsets = [2, 0], sizes = [24, 208], strides = [1, 1]} : vector<26x208xf32> to vector<24x208xf32>
    %103 = arith.maximumf %101, %102 : vector<24x208xf32>
    %104 = vector.extract_strided_slice %103 {offsets = [0, 0], sizes = [24, 192], strides = [1, 1]} : vector<24x208xf32> to vector<24x192xf32>
    %105 = vector.extract_strided_slice %103 {offsets = [0, 8], sizes = [24, 192], strides = [1, 1]} : vector<24x208xf32> to vector<24x192xf32>
    %106 = arith.maximumf %104, %105 : vector<24x192xf32>
    %107 = vector.extract_strided_slice %103 {offsets = [0, 16], sizes = [24, 192], strides = [1, 1]} : vector<24x208xf32> to vector<24x192xf32>
    %108 = arith.maximumf %106, %107 : vector<24x192xf32>
    %cst_78 = arith.constant 0.000000e+00 : f32
    %109 = vector.broadcast %cst_78 : f32 to vector<24x192xf32>
    %110 = arith.maximumf %108, %109 : vector<24x192xf32>
    %cst_79 = arith.constant 0.000000e+00 : f32
    %111 = vector.broadcast %cst_79 : f32 to vector<1x192xf32>
    %c0_80 = arith.constant 0 : index
    %c0_81 = arith.constant 0 : index
    %112 = vector.load %arg30[%c0_80, %c0_81] : memref<26x192xf32, #tpu.memory_space<vmem>>, vector<1x192xf32>
    tpu.vector_store %arg30[%c0_80, %c0_81], %111 {strides = array<i32>} : memref<26x192xf32, #tpu.memory_space<vmem>>, vector<1x192xf32>,
    %c25 = arith.constant 25 : index
    %c0_82 = arith.constant 0 : index
    %113 = vector.load %arg30[%c25, %c0_82] : memref<26x192xf32, #tpu.memory_space<vmem>>, vector<1x192xf32>
    tpu.vector_store %arg30[%c25, %c0_82], %111 {strides = array<i32>} : memref<26x192xf32, #tpu.memory_space<vmem>>, vector<1x192xf32>,
    %c1_83 = arith.constant 1 : index
    %c0_84 = arith.constant 0 : index
    %114 = vector.load %arg30[%c1_83, %c0_84] : memref<26x192xf32, #tpu.memory_space<vmem>>, vector<24x192xf32>
    tpu.vector_store %arg30[%c1_83, %c0_84], %110 {strides = array<i32>} : memref<26x192xf32, #tpu.memory_space<vmem>>, vector<24x192xf32>,
    %c0_85 = arith.constant 0 : index
    %c0_86 = arith.constant 0 : index
    %115 = vector.load %arg30[%c0_85, %c0_86] : memref<26x192xf32, #tpu.memory_space<vmem>>, vector<22x192xf32>
    %116 = arith.truncf %115 : vector<22x192xf32> to vector<22x192xbf16>
    %c0_87 = arith.constant 0 : index
    %c0_88 = arith.constant 0 : index
    %117 = vector.load %arg16[%c0_87, %c0_88] : memref<192x176xbf16, #tpu.memory_space<vmem>>, vector<192x176xbf16>
    %cst_89 = arith.constant dense<0.000000e+00> : vector<22x176xf32>
    %118 = tpu.matmul %116, %117, %cst_89 {dimension_numbers = #tpu.dot_dimension_numbers<[1], [0], [0], [1], [0, 0, 1, 1], [], []>} : vector<22x192xbf16>, vector<192x176xbf16>, vector<22x176xf32> -> vector<22x176xf32>
    %c1_90 = arith.constant 1 : index
    %c0_91 = arith.constant 0 : index
    %119 = vector.load %arg30[%c1_90, %c0_91] : memref<26x192xf32, #tpu.memory_space<vmem>>, vector<22x192xf32>
    %120 = arith.truncf %119 : vector<22x192xf32> to vector<22x192xbf16>
    %c0_92 = arith.constant 0 : index
    %c0_93 = arith.constant 0 : index
    %121 = vector.load %arg17[%c0_92, %c0_93] : memref<192x176xbf16, #tpu.memory_space<vmem>>, vector<192x176xbf16>
    %cst_94 = arith.constant dense<0.000000e+00> : vector<22x176xf32>
    %122 = tpu.matmul %120, %121, %cst_94 {dimension_numbers = #tpu.dot_dimension_numbers<[1], [0], [0], [1], [0, 0, 1, 1], [], []>} : vector<22x192xbf16>, vector<192x176xbf16>, vector<22x176xf32> -> vector<22x176xf32>
    %123 = arith.addf %118, %122 : vector<22x176xf32>
    %c2_95 = arith.constant 2 : index
    %c0_96 = arith.constant 0 : index
    %124 = vector.load %arg30[%c2_95, %c0_96] : memref<26x192xf32, #tpu.memory_space<vmem>>, vector<22x192xf32>
    %125 = arith.truncf %124 : vector<22x192xf32> to vector<22x192xbf16>
    %c0_97 = arith.constant 0 : index
    %c0_98 = arith.constant 0 : index
    %126 = vector.load %arg18[%c0_97, %c0_98] : memref<192x176xbf16, #tpu.memory_space<vmem>>, vector<192x176xbf16>
    %cst_99 = arith.constant dense<0.000000e+00> : vector<22x176xf32>
    %127 = tpu.matmul %125, %126, %cst_99 {dimension_numbers = #tpu.dot_dimension_numbers<[1], [0], [0], [1], [0, 0, 1, 1], [], []>} : vector<22x192xbf16>, vector<192x176xbf16>, vector<22x176xf32> -> vector<22x176xf32>
    %128 = arith.addf %123, %127 : vector<22x176xf32>
    %c3_100 = arith.constant 3 : index
    %c0_101 = arith.constant 0 : index
    %129 = vector.load %arg30[%c3_100, %c0_101] : memref<26x192xf32, #tpu.memory_space<vmem>>, vector<22x192xf32>
    %130 = arith.truncf %129 : vector<22x192xf32> to vector<22x192xbf16>
    %c0_102 = arith.constant 0 : index
    %c0_103 = arith.constant 0 : index
    %131 = vector.load %arg19[%c0_102, %c0_103] : memref<192x176xbf16, #tpu.memory_space<vmem>>, vector<192x176xbf16>
    %cst_104 = arith.constant dense<0.000000e+00> : vector<22x176xf32>
    %132 = tpu.matmul %130, %131, %cst_104 {dimension_numbers = #tpu.dot_dimension_numbers<[1], [0], [0], [1], [0, 0, 1, 1], [], []>} : vector<22x192xbf16>, vector<192x176xbf16>, vector<22x176xf32> -> vector<22x176xf32>
    %133 = arith.addf %128, %132 : vector<22x176xf32>
    %c4_105 = arith.constant 4 : index
    %c0_106 = arith.constant 0 : index
    %134 = vector.load %arg30[%c4_105, %c0_106] : memref<26x192xf32, #tpu.memory_space<vmem>>, vector<22x192xf32>
    %135 = arith.truncf %134 : vector<22x192xf32> to vector<22x192xbf16>
    %c0_107 = arith.constant 0 : index
    %c0_108 = arith.constant 0 : index
    %136 = vector.load %arg20[%c0_107, %c0_108] : memref<192x176xbf16, #tpu.memory_space<vmem>>, vector<192x176xbf16>
    %cst_109 = arith.constant dense<0.000000e+00> : vector<22x176xf32>
    %137 = tpu.matmul %135, %136, %cst_109 {dimension_numbers = #tpu.dot_dimension_numbers<[1], [0], [0], [1], [0, 0, 1, 1], [], []>} : vector<22x192xbf16>, vector<192x176xbf16>, vector<22x176xf32> -> vector<22x176xf32>
    %138 = arith.addf %133, %137 : vector<22x176xf32>
    %c0_110 = arith.constant 0 : index
    %c0_111 = arith.constant 0 : index
    %139 = vector.load %arg21[%c0_110, %c0_111] : memref<1x176xf32, #tpu.memory_space<vmem>>, vector<1x176xf32>
    %140 = vector.broadcast %139 : vector<1x176xf32> to vector<22x176xf32>
    %141 = arith.addf %138, %140 : vector<22x176xf32>
    %142 = vector.extract_strided_slice %141 {offsets = [0, 0], sizes = [20, 176], strides = [1, 1]} : vector<22x176xf32> to vector<20x176xf32>
    %143 = vector.extract_strided_slice %141 {offsets = [1, 0], sizes = [20, 176], strides = [1, 1]} : vector<22x176xf32> to vector<20x176xf32>
    %144 = arith.maximumf %142, %143 : vector<20x176xf32>
    %145 = vector.extract_strided_slice %141 {offsets = [2, 0], sizes = [20, 176], strides = [1, 1]} : vector<22x176xf32> to vector<20x176xf32>
    %146 = arith.maximumf %144, %145 : vector<20x176xf32>
    %147 = vector.extract_strided_slice %146 {offsets = [0, 0], sizes = [20, 160], strides = [1, 1]} : vector<20x176xf32> to vector<20x160xf32>
    %148 = vector.extract_strided_slice %146 {offsets = [0, 8], sizes = [20, 160], strides = [1, 1]} : vector<20x176xf32> to vector<20x160xf32>
    %149 = arith.maximumf %147, %148 : vector<20x160xf32>
    %150 = vector.extract_strided_slice %146 {offsets = [0, 16], sizes = [20, 160], strides = [1, 1]} : vector<20x176xf32> to vector<20x160xf32>
    %151 = arith.maximumf %149, %150 : vector<20x160xf32>
    %cst_112 = arith.constant 0.000000e+00 : f32
    %152 = vector.broadcast %cst_112 : f32 to vector<20x160xf32>
    %153 = arith.maximumf %151, %152 : vector<20x160xf32>
    %154 = arith.truncf %153 : vector<20x160xf32> to vector<20x160xbf16>
    %155 = vector.extract_strided_slice %154 {offsets = [0, 0], sizes = [1, 160], strides = [1, 1]} : vector<20x160xbf16> to vector<1x160xbf16>
    %c0_113 = arith.constant 0 : index
    %c0_114 = arith.constant 0 : index
    %c0_115 = arith.constant 0 : index
    %156 = vector.load %arg22[%c0_113, %c0_114, %c0_115] : memref<20x160x8xbf16, #tpu.memory_space<vmem>>, vector<1x160x8xbf16>
    %157 = vector.shape_cast %156 : vector<1x160x8xbf16> to vector<160x8xbf16>
    %cst_116 = arith.constant dense<0.000000e+00> : vector<1x8xf32>
    %158 = tpu.matmul %155, %157, %cst_116 {dimension_numbers = #tpu.dot_dimension_numbers<[1], [0], [0], [1], [0, 0, 1, 1], [], []>} : vector<1x160xbf16>, vector<160x8xbf16>, vector<1x8xf32> -> vector<1x8xf32>
    %159 = vector.extract_strided_slice %154 {offsets = [1, 0], sizes = [1, 160], strides = [1, 1]} : vector<20x160xbf16> to vector<1x160xbf16>
    %c1_117 = arith.constant 1 : index
    %c0_118 = arith.constant 0 : index
    %c0_119 = arith.constant 0 : index
    %160 = vector.load %arg22[%c1_117, %c0_118, %c0_119] : memref<20x160x8xbf16, #tpu.memory_space<vmem>>, vector<1x160x8xbf16>
    %161 = vector.shape_cast %160 : vector<1x160x8xbf16> to vector<160x8xbf16>
    %cst_120 = arith.constant dense<0.000000e+00> : vector<1x8xf32>
    %162 = tpu.matmul %159, %161, %cst_120 {dimension_numbers = #tpu.dot_dimension_numbers<[1], [0], [0], [1], [0, 0, 1, 1], [], []>} : vector<1x160xbf16>, vector<160x8xbf16>, vector<1x8xf32> -> vector<1x8xf32>
    %163 = vector.extract_strided_slice %154 {offsets = [2, 0], sizes = [1, 160], strides = [1, 1]} : vector<20x160xbf16> to vector<1x160xbf16>
    %c2_121 = arith.constant 2 : index
    %c0_122 = arith.constant 0 : index
    %c0_123 = arith.constant 0 : index
    %164 = vector.load %arg22[%c2_121, %c0_122, %c0_123] : memref<20x160x8xbf16, #tpu.memory_space<vmem>>, vector<1x160x8xbf16>
    %165 = vector.shape_cast %164 : vector<1x160x8xbf16> to vector<160x8xbf16>
    %cst_124 = arith.constant dense<0.000000e+00> : vector<1x8xf32>
    %166 = tpu.matmul %163, %165, %cst_124 {dimension_numbers = #tpu.dot_dimension_numbers<[1], [0], [0], [1], [0, 0, 1, 1], [], []>} : vector<1x160xbf16>, vector<160x8xbf16>, vector<1x8xf32> -> vector<1x8xf32>
    %167 = vector.extract_strided_slice %154 {offsets = [3, 0], sizes = [1, 160], strides = [1, 1]} : vector<20x160xbf16> to vector<1x160xbf16>
    %c3_125 = arith.constant 3 : index
    %c0_126 = arith.constant 0 : index
    %c0_127 = arith.constant 0 : index
    %168 = vector.load %arg22[%c3_125, %c0_126, %c0_127] : memref<20x160x8xbf16, #tpu.memory_space<vmem>>, vector<1x160x8xbf16>
    %169 = vector.shape_cast %168 : vector<1x160x8xbf16> to vector<160x8xbf16>
    %cst_128 = arith.constant dense<0.000000e+00> : vector<1x8xf32>
    %170 = tpu.matmul %167, %169, %cst_128 {dimension_numbers = #tpu.dot_dimension_numbers<[1], [0], [0], [1], [0, 0, 1, 1], [], []>} : vector<1x160xbf16>, vector<160x8xbf16>, vector<1x8xf32> -> vector<1x8xf32>
    %171 = vector.extract_strided_slice %154 {offsets = [4, 0], sizes = [1, 160], strides = [1, 1]} : vector<20x160xbf16> to vector<1x160xbf16>
    %c4_129 = arith.constant 4 : index
    %c0_130 = arith.constant 0 : index
    %c0_131 = arith.constant 0 : index
    %172 = vector.load %arg22[%c4_129, %c0_130, %c0_131] : memref<20x160x8xbf16, #tpu.memory_space<vmem>>, vector<1x160x8xbf16>
    %173 = vector.shape_cast %172 : vector<1x160x8xbf16> to vector<160x8xbf16>
    %cst_132 = arith.constant dense<0.000000e+00> : vector<1x8xf32>
    %174 = tpu.matmul %171, %173, %cst_132 {dimension_numbers = #tpu.dot_dimension_numbers<[1], [0], [0], [1], [0, 0, 1, 1], [], []>} : vector<1x160xbf16>, vector<160x8xbf16>, vector<1x8xf32> -> vector<1x8xf32>
    %175 = vector.extract_strided_slice %154 {offsets = [5, 0], sizes = [1, 160], strides = [1, 1]} : vector<20x160xbf16> to vector<1x160xbf16>
    %c5 = arith.constant 5 : index
    %c0_133 = arith.constant 0 : index
    %c0_134 = arith.constant 0 : index
    %176 = vector.load %arg22[%c5, %c0_133, %c0_134] : memref<20x160x8xbf16, #tpu.memory_space<vmem>>, vector<1x160x8xbf16>
    %177 = vector.shape_cast %176 : vector<1x160x8xbf16> to vector<160x8xbf16>
    %cst_135 = arith.constant dense<0.000000e+00> : vector<1x8xf32>
    %178 = tpu.matmul %175, %177, %cst_135 {dimension_numbers = #tpu.dot_dimension_numbers<[1], [0], [0], [1], [0, 0, 1, 1], [], []>} : vector<1x160xbf16>, vector<160x8xbf16>, vector<1x8xf32> -> vector<1x8xf32>
    %179 = vector.extract_strided_slice %154 {offsets = [6, 0], sizes = [1, 160], strides = [1, 1]} : vector<20x160xbf16> to vector<1x160xbf16>
    %c6 = arith.constant 6 : index
    %c0_136 = arith.constant 0 : index
    %c0_137 = arith.constant 0 : index
    %180 = vector.load %arg22[%c6, %c0_136, %c0_137] : memref<20x160x8xbf16, #tpu.memory_space<vmem>>, vector<1x160x8xbf16>
    %181 = vector.shape_cast %180 : vector<1x160x8xbf16> to vector<160x8xbf16>
    %cst_138 = arith.constant dense<0.000000e+00> : vector<1x8xf32>
    %182 = tpu.matmul %179, %181, %cst_138 {dimension_numbers = #tpu.dot_dimension_numbers<[1], [0], [0], [1], [0, 0, 1, 1], [], []>} : vector<1x160xbf16>, vector<160x8xbf16>, vector<1x8xf32> -> vector<1x8xf32>
    %183 = vector.extract_strided_slice %154 {offsets = [7, 0], sizes = [1, 160], strides = [1, 1]} : vector<20x160xbf16> to vector<1x160xbf16>
    %c7 = arith.constant 7 : index
    %c0_139 = arith.constant 0 : index
    %c0_140 = arith.constant 0 : index
    %184 = vector.load %arg22[%c7, %c0_139, %c0_140] : memref<20x160x8xbf16, #tpu.memory_space<vmem>>, vector<1x160x8xbf16>
    %185 = vector.shape_cast %184 : vector<1x160x8xbf16> to vector<160x8xbf16>
    %cst_141 = arith.constant dense<0.000000e+00> : vector<1x8xf32>
    %186 = tpu.matmul %183, %185, %cst_141 {dimension_numbers = #tpu.dot_dimension_numbers<[1], [0], [0], [1], [0, 0, 1, 1], [], []>} : vector<1x160xbf16>, vector<160x8xbf16>, vector<1x8xf32> -> vector<1x8xf32>
    %187 = vector.extract_strided_slice %154 {offsets = [8, 0], sizes = [1, 160], strides = [1, 1]} : vector<20x160xbf16> to vector<1x160xbf16>
    %c8 = arith.constant 8 : index
    %c0_142 = arith.constant 0 : index
    %c0_143 = arith.constant 0 : index
    %188 = vector.load %arg22[%c8, %c0_142, %c0_143] : memref<20x160x8xbf16, #tpu.memory_space<vmem>>, vector<1x160x8xbf16>
    %189 = vector.shape_cast %188 : vector<1x160x8xbf16> to vector<160x8xbf16>
    %cst_144 = arith.constant dense<0.000000e+00> : vector<1x8xf32>
    %190 = tpu.matmul %187, %189, %cst_144 {dimension_numbers = #tpu.dot_dimension_numbers<[1], [0], [0], [1], [0, 0, 1, 1], [], []>} : vector<1x160xbf16>, vector<160x8xbf16>, vector<1x8xf32> -> vector<1x8xf32>
    %191 = vector.extract_strided_slice %154 {offsets = [9, 0], sizes = [1, 160], strides = [1, 1]} : vector<20x160xbf16> to vector<1x160xbf16>
    %c9 = arith.constant 9 : index
    %c0_145 = arith.constant 0 : index
    %c0_146 = arith.constant 0 : index
    %192 = vector.load %arg22[%c9, %c0_145, %c0_146] : memref<20x160x8xbf16, #tpu.memory_space<vmem>>, vector<1x160x8xbf16>
    %193 = vector.shape_cast %192 : vector<1x160x8xbf16> to vector<160x8xbf16>
    %cst_147 = arith.constant dense<0.000000e+00> : vector<1x8xf32>
    %194 = tpu.matmul %191, %193, %cst_147 {dimension_numbers = #tpu.dot_dimension_numbers<[1], [0], [0], [1], [0, 0, 1, 1], [], []>} : vector<1x160xbf16>, vector<160x8xbf16>, vector<1x8xf32> -> vector<1x8xf32>
    %195 = vector.extract_strided_slice %154 {offsets = [10, 0], sizes = [1, 160], strides = [1, 1]} : vector<20x160xbf16> to vector<1x160xbf16>
    %c10 = arith.constant 10 : index
    %c0_148 = arith.constant 0 : index
    %c0_149 = arith.constant 0 : index
    %196 = vector.load %arg22[%c10, %c0_148, %c0_149] : memref<20x160x8xbf16, #tpu.memory_space<vmem>>, vector<1x160x8xbf16>
    %197 = vector.shape_cast %196 : vector<1x160x8xbf16> to vector<160x8xbf16>
    %cst_150 = arith.constant dense<0.000000e+00> : vector<1x8xf32>
    %198 = tpu.matmul %195, %197, %cst_150 {dimension_numbers = #tpu.dot_dimension_numbers<[1], [0], [0], [1], [0, 0, 1, 1], [], []>} : vector<1x160xbf16>, vector<160x8xbf16>, vector<1x8xf32> -> vector<1x8xf32>
    %199 = vector.extract_strided_slice %154 {offsets = [11, 0], sizes = [1, 160], strides = [1, 1]} : vector<20x160xbf16> to vector<1x160xbf16>
    %c11 = arith.constant 11 : index
    %c0_151 = arith.constant 0 : index
    %c0_152 = arith.constant 0 : index
    %200 = vector.load %arg22[%c11, %c0_151, %c0_152] : memref<20x160x8xbf16, #tpu.memory_space<vmem>>, vector<1x160x8xbf16>
    %201 = vector.shape_cast %200 : vector<1x160x8xbf16> to vector<160x8xbf16>
    %cst_153 = arith.constant dense<0.000000e+00> : vector<1x8xf32>
    %202 = tpu.matmul %199, %201, %cst_153 {dimension_numbers = #tpu.dot_dimension_numbers<[1], [0], [0], [1], [0, 0, 1, 1], [], []>} : vector<1x160xbf16>, vector<160x8xbf16>, vector<1x8xf32> -> vector<1x8xf32>
    %203 = vector.extract_strided_slice %154 {offsets = [12, 0], sizes = [1, 160], strides = [1, 1]} : vector<20x160xbf16> to vector<1x160xbf16>
    %c12 = arith.constant 12 : index
    %c0_154 = arith.constant 0 : index
    %c0_155 = arith.constant 0 : index
    %204 = vector.load %arg22[%c12, %c0_154, %c0_155] : memref<20x160x8xbf16, #tpu.memory_space<vmem>>, vector<1x160x8xbf16>
    %205 = vector.shape_cast %204 : vector<1x160x8xbf16> to vector<160x8xbf16>
    %cst_156 = arith.constant dense<0.000000e+00> : vector<1x8xf32>
    %206 = tpu.matmul %203, %205, %cst_156 {dimension_numbers = #tpu.dot_dimension_numbers<[1], [0], [0], [1], [0, 0, 1, 1], [], []>} : vector<1x160xbf16>, vector<160x8xbf16>, vector<1x8xf32> -> vector<1x8xf32>
    %207 = vector.extract_strided_slice %154 {offsets = [13, 0], sizes = [1, 160], strides = [1, 1]} : vector<20x160xbf16> to vector<1x160xbf16>
    %c13 = arith.constant 13 : index
    %c0_157 = arith.constant 0 : index
    %c0_158 = arith.constant 0 : index
    %208 = vector.load %arg22[%c13, %c0_157, %c0_158] : memref<20x160x8xbf16, #tpu.memory_space<vmem>>, vector<1x160x8xbf16>
    %209 = vector.shape_cast %208 : vector<1x160x8xbf16> to vector<160x8xbf16>
    %cst_159 = arith.constant dense<0.000000e+00> : vector<1x8xf32>
    %210 = tpu.matmul %207, %209, %cst_159 {dimension_numbers = #tpu.dot_dimension_numbers<[1], [0], [0], [1], [0, 0, 1, 1], [], []>} : vector<1x160xbf16>, vector<160x8xbf16>, vector<1x8xf32> -> vector<1x8xf32>
    %211 = vector.extract_strided_slice %154 {offsets = [14, 0], sizes = [1, 160], strides = [1, 1]} : vector<20x160xbf16> to vector<1x160xbf16>
    %c14 = arith.constant 14 : index
    %c0_160 = arith.constant 0 : index
    %c0_161 = arith.constant 0 : index
    %212 = vector.load %arg22[%c14, %c0_160, %c0_161] : memref<20x160x8xbf16, #tpu.memory_space<vmem>>, vector<1x160x8xbf16>
    %213 = vector.shape_cast %212 : vector<1x160x8xbf16> to vector<160x8xbf16>
    %cst_162 = arith.constant dense<0.000000e+00> : vector<1x8xf32>
    %214 = tpu.matmul %211, %213, %cst_162 {dimension_numbers = #tpu.dot_dimension_numbers<[1], [0], [0], [1], [0, 0, 1, 1], [], []>} : vector<1x160xbf16>, vector<160x8xbf16>, vector<1x8xf32> -> vector<1x8xf32>
    %215 = vector.extract_strided_slice %154 {offsets = [15, 0], sizes = [1, 160], strides = [1, 1]} : vector<20x160xbf16> to vector<1x160xbf16>
    %c15 = arith.constant 15 : index
    %c0_163 = arith.constant 0 : index
    %c0_164 = arith.constant 0 : index
    %216 = vector.load %arg22[%c15, %c0_163, %c0_164] : memref<20x160x8xbf16, #tpu.memory_space<vmem>>, vector<1x160x8xbf16>
    %217 = vector.shape_cast %216 : vector<1x160x8xbf16> to vector<160x8xbf16>
    %cst_165 = arith.constant dense<0.000000e+00> : vector<1x8xf32>
    %218 = tpu.matmul %215, %217, %cst_165 {dimension_numbers = #tpu.dot_dimension_numbers<[1], [0], [0], [1], [0, 0, 1, 1], [], []>} : vector<1x160xbf16>, vector<160x8xbf16>, vector<1x8xf32> -> vector<1x8xf32>
    %219 = vector.extract_strided_slice %154 {offsets = [16, 0], sizes = [1, 160], strides = [1, 1]} : vector<20x160xbf16> to vector<1x160xbf16>
    %c16 = arith.constant 16 : index
    %c0_166 = arith.constant 0 : index
    %c0_167 = arith.constant 0 : index
    %220 = vector.load %arg22[%c16, %c0_166, %c0_167] : memref<20x160x8xbf16, #tpu.memory_space<vmem>>, vector<1x160x8xbf16>
    %221 = vector.shape_cast %220 : vector<1x160x8xbf16> to vector<160x8xbf16>
    %cst_168 = arith.constant dense<0.000000e+00> : vector<1x8xf32>
    %222 = tpu.matmul %219, %221, %cst_168 {dimension_numbers = #tpu.dot_dimension_numbers<[1], [0], [0], [1], [0, 0, 1, 1], [], []>} : vector<1x160xbf16>, vector<160x8xbf16>, vector<1x8xf32> -> vector<1x8xf32>
    %223 = vector.extract_strided_slice %154 {offsets = [17, 0], sizes = [1, 160], strides = [1, 1]} : vector<20x160xbf16> to vector<1x160xbf16>
    %c17 = arith.constant 17 : index
    %c0_169 = arith.constant 0 : index
    %c0_170 = arith.constant 0 : index
    %224 = vector.load %arg22[%c17, %c0_169, %c0_170] : memref<20x160x8xbf16, #tpu.memory_space<vmem>>, vector<1x160x8xbf16>
    %225 = vector.shape_cast %224 : vector<1x160x8xbf16> to vector<160x8xbf16>
    %cst_171 = arith.constant dense<0.000000e+00> : vector<1x8xf32>
    %226 = tpu.matmul %223, %225, %cst_171 {dimension_numbers = #tpu.dot_dimension_numbers<[1], [0], [0], [1], [0, 0, 1, 1], [], []>} : vector<1x160xbf16>, vector<160x8xbf16>, vector<1x8xf32> -> vector<1x8xf32>
    %227 = vector.extract_strided_slice %154 {offsets = [18, 0], sizes = [1, 160], strides = [1, 1]} : vector<20x160xbf16> to vector<1x160xbf16>
    %c18 = arith.constant 18 : index
    %c0_172 = arith.constant 0 : index
    %c0_173 = arith.constant 0 : index
    %228 = vector.load %arg22[%c18, %c0_172, %c0_173] : memref<20x160x8xbf16, #tpu.memory_space<vmem>>, vector<1x160x8xbf16>
    %229 = vector.shape_cast %228 : vector<1x160x8xbf16> to vector<160x8xbf16>
    %cst_174 = arith.constant dense<0.000000e+00> : vector<1x8xf32>
    %230 = tpu.matmul %227, %229, %cst_174 {dimension_numbers = #tpu.dot_dimension_numbers<[1], [0], [0], [1], [0, 0, 1, 1], [], []>} : vector<1x160xbf16>, vector<160x8xbf16>, vector<1x8xf32> -> vector<1x8xf32>
    %231 = vector.extract_strided_slice %154 {offsets = [19, 0], sizes = [1, 160], strides = [1, 1]} : vector<20x160xbf16> to vector<1x160xbf16>
    %c19 = arith.constant 19 : index
    %c0_175 = arith.constant 0 : index
    %c0_176 = arith.constant 0 : index
    %232 = vector.load %arg22[%c19, %c0_175, %c0_176] : memref<20x160x8xbf16, #tpu.memory_space<vmem>>, vector<1x160x8xbf16>
    %233 = vector.shape_cast %232 : vector<1x160x8xbf16> to vector<160x8xbf16>
    %cst_177 = arith.constant dense<0.000000e+00> : vector<1x8xf32>
    %234 = tpu.matmul %231, %233, %cst_177 {dimension_numbers = #tpu.dot_dimension_numbers<[1], [0], [0], [1], [0, 0, 1, 1], [], []>} : vector<1x160xbf16>, vector<160x8xbf16>, vector<1x8xf32> -> vector<1x8xf32>
    %235 = arith.addf %158, %162 : vector<1x8xf32>
    %236 = arith.addf %166, %170 : vector<1x8xf32>
    %237 = arith.addf %174, %178 : vector<1x8xf32>
    %238 = arith.addf %182, %186 : vector<1x8xf32>
    %239 = arith.addf %190, %194 : vector<1x8xf32>
    %240 = arith.addf %198, %202 : vector<1x8xf32>
    %241 = arith.addf %206, %210 : vector<1x8xf32>
    %242 = arith.addf %214, %218 : vector<1x8xf32>
    %243 = arith.addf %222, %226 : vector<1x8xf32>
    %244 = arith.addf %230, %234 : vector<1x8xf32>
    %245 = arith.addf %235, %236 : vector<1x8xf32>
    %246 = arith.addf %237, %238 : vector<1x8xf32>
    %247 = arith.addf %239, %240 : vector<1x8xf32>
    %248 = arith.addf %241, %242 : vector<1x8xf32>
    %249 = arith.addf %243, %244 : vector<1x8xf32>
    %250 = arith.addf %245, %246 : vector<1x8xf32>
    %251 = arith.addf %247, %248 : vector<1x8xf32>
    %252 = arith.addf %250, %251 : vector<1x8xf32>
    %253 = arith.addf %252, %249 : vector<1x8xf32>
    %c0_178 = arith.constant 0 : index
    %c0_179 = arith.constant 0 : index
    %254 = vector.load %arg23[%c0_178, %c0_179] : memref<1x8xf32, #tpu.memory_space<vmem>>, vector<1x8xf32>
    %255 = arith.addf %253, %254 : vector<1x8xf32>
    %cst_180 = arith.constant 0.000000e+00 : f32
    %256 = vector.broadcast %cst_180 : f32 to vector<1x8xf32>
    %257 = arith.maximumf %255, %256 : vector<1x8xf32>
    %c0_181 = arith.constant 0 : index
    %c0_182 = arith.constant 0 : index
    %258 = vector.load %arg24[%c0_181, %c0_182] : memref<8x10xf32, #tpu.memory_space<vmem>>, vector<8x10xf32>
    %cst_183 = arith.constant dense<0.000000e+00> : vector<1x10xf32>
    %259 = tpu.matmul %257, %258, %cst_183 {dimension_numbers = #tpu.dot_dimension_numbers<[1], [0], [0], [1], [0, 0, 1, 1], [], []>} : vector<1x8xf32>, vector<8x10xf32>, vector<1x10xf32> -> vector<1x10xf32>
    %c0_184 = arith.constant 0 : index
    %c0_185 = arith.constant 0 : index
    %260 = vector.load %arg25[%c0_184, %c0_185] : memref<1x10xf32, #tpu.memory_space<vmem>>, vector<1x10xf32>
    %261 = arith.addf %259, %260 : vector<1x10xf32>
    %cst_186 = arith.constant dense<0xFF800000> : vector<1xf32>
    %262 = vector.multi_reduction <maximumf>, %261, %cst_186 [1] : vector<1x10xf32> to vector<1xf32>
    %263 = vector.shape_cast %262 : vector<1xf32> to vector<1x1xf32>
    %264 = vector.broadcast %263 : vector<1x1xf32> to vector<1x10xf32>
    %265 = arith.subf %261, %264 : vector<1x10xf32>
    %266 = math.exp %265 : vector<1x10xf32>
    %cst_187 = arith.constant dense<0.000000e+00> : vector<1xf32>
    %267 = vector.multi_reduction <add>, %266, %cst_187 [1] : vector<1x10xf32> to vector<1xf32>
    %268 = vector.shape_cast %267 : vector<1xf32> to vector<1x1xf32>
    %269 = vector.broadcast %268 : vector<1x1xf32> to vector<1x10xf32>
    %270 = arith.divf %266, %269 : vector<1x10xf32>
    %271 = vector.shape_cast %270 : vector<1x10xf32> to vector<1x1x10xf32>
    %c0_188 = arith.constant 0 : index
    %c0_189 = arith.constant 0 : index
    %c0_190 = arith.constant 0 : index
    %272 = vector.load %arg26[%c0_188, %c0_189, %c0_190] : memref<1x1x10xf32, #tpu.memory_space<vmem>>, vector<1x1x10xf32>
    tpu.vector_store %arg26[%c0_188, %c0_189, %c0_190], %271 {strides = array<i32>} : memref<1x1x10xf32, #tpu.memory_space<vmem>>, vector<1x1x10xf32>,
    return
  }
  func.func @transform_0(%arg0: i32) -> (i32, i32, i32) {
    %c0_i32 = arith.constant 0 : i32
    %c0_i32_0 = arith.constant 0 : i32
    %c0_i32_1 = arith.constant 0 : i32
    return %arg0, %c0_i32, %c0_i32_0 : i32, i32, i32
  }
  func.func @transform_1(%arg0: i32) -> (i32, i32) {
    %c0_i32 = arith.constant 0 : i32
    %c0_i32_0 = arith.constant 0 : i32
    %c0_i32_1 = arith.constant 0 : i32
    return %c0_i32, %c0_i32_0 : i32, i32
  }
  func.func @transform_2(%arg0: i32) -> (i32, i32) {
    %c0_i32 = arith.constant 0 : i32
    %c0_i32_0 = arith.constant 0 : i32
    %c0_i32_1 = arith.constant 0 : i32
    return %c0_i32, %c0_i32_0 : i32, i32
  }
  func.func @transform_3(%arg0: i32) -> (i32, i32) {
    %c0_i32 = arith.constant 0 : i32
    %c0_i32_0 = arith.constant 0 : i32
    %c0_i32_1 = arith.constant 0 : i32
    return %c0_i32, %c0_i32_0 : i32, i32
  }
  func.func @transform_4(%arg0: i32) -> (i32, i32) {
    %c0_i32 = arith.constant 0 : i32
    %c0_i32_0 = arith.constant 0 : i32
    %c0_i32_1 = arith.constant 0 : i32
    return %c0_i32, %c0_i32_0 : i32, i32
  }
  func.func @transform_5(%arg0: i32) -> (i32, i32) {
    %c0_i32 = arith.constant 0 : i32
    %c0_i32_0 = arith.constant 0 : i32
    %c0_i32_1 = arith.constant 0 : i32
    return %c0_i32, %c0_i32_0 : i32, i32
  }
  func.func @transform_6(%arg0: i32) -> (i32, i32) {
    %c0_i32 = arith.constant 0 : i32
    %c0_i32_0 = arith.constant 0 : i32
    %c0_i32_1 = arith.constant 0 : i32
    return %c0_i32, %c0_i32_0 : i32, i32
  }
  func.func @transform_7(%arg0: i32) -> (i32, i32) {
    %c0_i32 = arith.constant 0 : i32
    %c0_i32_0 = arith.constant 0 : i32
    %c0_i32_1 = arith.constant 0 : i32
    return %c0_i32, %c0_i32_0 : i32, i32
  }
  func.func @transform_8(%arg0: i32) -> (i32, i32) {
    %c0_i32 = arith.constant 0 : i32
    %c0_i32_0 = arith.constant 0 : i32
    %c0_i32_1 = arith.constant 0 : i32
    return %c0_i32, %c0_i32_0 : i32, i32
  }
  func.func @transform_9(%arg0: i32) -> (i32, i32) {
    %c0_i32 = arith.constant 0 : i32
    %c0_i32_0 = arith.constant 0 : i32
    %c0_i32_1 = arith.constant 0 : i32
    return %c0_i32, %c0_i32_0 : i32, i32
  }
  func.func @transform_10(%arg0: i32) -> (i32, i32) {
    %c0_i32 = arith.constant 0 : i32
    %c0_i32_0 = arith.constant 0 : i32
    %c0_i32_1 = arith.constant 0 : i32
    return %c0_i32, %c0_i32_0 : i32, i32
  }
  func.func @transform_11(%arg0: i32) -> (i32, i32) {
    %c0_i32 = arith.constant 0 : i32
    %c0_i32_0 = arith.constant 0 : i32
    %c0_i32_1 = arith.constant 0 : i32
    return %c0_i32, %c0_i32_0 : i32, i32
  }
  func.func @transform_12(%arg0: i32) -> (i32, i32) {
    %c0_i32 = arith.constant 0 : i32
    %c0_i32_0 = arith.constant 0 : i32
    %c0_i32_1 = arith.constant 0 : i32
    return %c0_i32, %c0_i32_0 : i32, i32
  }
  func.func @transform_13(%arg0: i32) -> (i32, i32) {
    %c0_i32 = arith.constant 0 : i32
    %c0_i32_0 = arith.constant 0 : i32
    %c0_i32_1 = arith.constant 0 : i32
    return %c0_i32, %c0_i32_0 : i32, i32
  }
  func.func @transform_14(%arg0: i32) -> (i32, i32) {
    %c0_i32 = arith.constant 0 : i32
    %c0_i32_0 = arith.constant 0 : i32
    %c0_i32_1 = arith.constant 0 : i32
    return %c0_i32, %c0_i32_0 : i32, i32
  }
  func.func @transform_15(%arg0: i32) -> (i32, i32) {
    %c0_i32 = arith.constant 0 : i32
    %c0_i32_0 = arith.constant 0 : i32
    %c0_i32_1 = arith.constant 0 : i32
    return %c0_i32, %c0_i32_0 : i32, i32
  }
  func.func @transform_16(%arg0: i32) -> (i32, i32) {
    %c0_i32 = arith.constant 0 : i32
    %c0_i32_0 = arith.constant 0 : i32
    %c0_i32_1 = arith.constant 0 : i32
    return %c0_i32, %c0_i32_0 : i32, i32
  }
  func.func @transform_17(%arg0: i32) -> (i32, i32) {
    %c0_i32 = arith.constant 0 : i32
    %c0_i32_0 = arith.constant 0 : i32
    %c0_i32_1 = arith.constant 0 : i32
    return %c0_i32, %c0_i32_0 : i32, i32
  }
  func.func @transform_18(%arg0: i32) -> (i32, i32) {
    %c0_i32 = arith.constant 0 : i32
    %c0_i32_0 = arith.constant 0 : i32
    %c0_i32_1 = arith.constant 0 : i32
    return %c0_i32, %c0_i32_0 : i32, i32
  }
  func.func @transform_19(%arg0: i32) -> (i32, i32) {
    %c0_i32 = arith.constant 0 : i32
    %c0_i32_0 = arith.constant 0 : i32
    %c0_i32_1 = arith.constant 0 : i32
    return %c0_i32, %c0_i32_0 : i32, i32
  }
  func.func @transform_20(%arg0: i32) -> (i32, i32) {
    %c0_i32 = arith.constant 0 : i32
    %c0_i32_0 = arith.constant 0 : i32
    %c0_i32_1 = arith.constant 0 : i32
    return %c0_i32, %c0_i32_0 : i32, i32
  }
  func.func @transform_21(%arg0: i32) -> (i32, i32, i32) {
    %c0_i32 = arith.constant 0 : i32
    %c0_i32_0 = arith.constant 0 : i32
    %c0_i32_1 = arith.constant 0 : i32
    %c0_i32_2 = arith.constant 0 : i32
    return %c0_i32, %c0_i32_0, %c0_i32_1 : i32, i32, i32
  }
  func.func @transform_22(%arg0: i32) -> (i32, i32) {
    %c0_i32 = arith.constant 0 : i32
    %c0_i32_0 = arith.constant 0 : i32
    %c0_i32_1 = arith.constant 0 : i32
    return %c0_i32, %c0_i32_0 : i32, i32
  }
  func.func @transform_23(%arg0: i32) -> (i32, i32) {
    %c0_i32 = arith.constant 0 : i32
    %c0_i32_0 = arith.constant 0 : i32
    %c0_i32_1 = arith.constant 0 : i32
    return %c0_i32, %c0_i32_0 : i32, i32
  }
  func.func @transform_24(%arg0: i32) -> (i32, i32) {
    %c0_i32 = arith.constant 0 : i32
    %c0_i32_0 = arith.constant 0 : i32
    %c0_i32_1 = arith.constant 0 : i32
    return %c0_i32, %c0_i32_0 : i32, i32
  }
  func.func @transform_25(%arg0: i32) -> (i32, i32, i32) {
    %c0_i32 = arith.constant 0 : i32
    %c0_i32_0 = arith.constant 0 : i32
    %c0_i32_1 = arith.constant 0 : i32
    return %arg0, %c0_i32, %c0_i32_0 : i32, i32, i32
  }
}

</mosaic_0001>

<bundles_post_ra>
// kernel: forward.1
= control target key start
LH: loop header
LB: loop body
LE: loop exit
PB: predicated region body
PF: predicated region fallthrough
CT: control target
= control target key end

     0   :  { %s27553_s0 = inlined_call_operand.vmem [shape: f32[2,32,96], index: 0, kind: input, shape index: {}]   ;;  %s27554_s1 = inlined_call_operand.vmem [shape: bf16[96,768], index: 1, kind: input, shape index: {}]   ;;  %s27555_s2 = inlined_call_operand.vmem [shape: bf16[96,768], index: 2, kind: input, shape index: {}]   ;;  %s27556_s3 = inlined_call_operand.vmem [shape: bf16[96,768], index: 3, kind: input, shape index: {}]   ;;  %s27557_s4 = inlined_call_operand.vmem [shape: f32[1,768], index: 4, kind: input, shape index: {}]   ;;  %s27558_s5 = inlined_call_operand.vmem [shape: bf16[720,448], index: 5, kind: input, shape index: {}]   ;;  %s27559_s6 = inlined_call_operand.vmem [shape: bf16[720,448], index: 6, kind: input, shape index: {}]   ;;  %s27560_s7 = inlined_call_operand.vmem [shape: bf16[720,448], index: 7, kind: input, shape index: {}]   ;;  %s27561_s8 = inlined_call_operand.vmem [shape: bf16[720,448], index: 8, kind: input, shape index: {}]   ;;  %s27562_s9 = inlined_call_operand.vmem [shape: bf16[720,448], index: 9, kind: input, shape index: {}]   ;;  %s27563_s10 = inlined_call_operand.vmem [shape: f32[1,448], index: 10, kind: input, shape index: {}]   ;;  %s27564_s11 = inlined_call_operand.vmem [shape: bf16[416,208], index: 11, kind: input, shape index: {}]   ;;  %s27565_s12 = inlined_call_operand.vmem [shape: bf16[416,208], index: 12, kind: input, shape index: {}]   ;;  %s27566_s13 = inlined_call_operand.vmem [shape: bf16[416,208], index: 13, kind: input, shape index: {}]   ;;  %s27567_s14 = inlined_call_operand.vmem [shape: f32[1,208], index: 14, kind: input, shape index: {}]   ;;  %s27568_s15 = inlined_call_operand.vmem [shape: bf16[192,176], index: 15, kind: input, shape index: {}]   ;;  %s27569_s16 = inlined_call_operand.vmem [shape: bf16[192,176], index: 16, kind: input, shape index: {}]   ;;  %s27570_s17 = inlined_call_operand.vmem [shape: bf16[192,176], index: 17, kind: input, shape index: {}]   ;;  %s27571_s18 = inlined_call_operand.vmem [shape: bf16[192,176], index: 18, kind: input, shape index: {}]   ;;  %s27572_s19 = inlined_call_operand.vmem [shape: bf16[192,176], index: 19, kind: input, shape index: {}]   ;;  %s27573_s20 = inlined_call_operand.vmem [shape: f32[1,176], index: 20, kind: input, shape index: {}]   ;;  %s27574_s21 = inlined_call_operand.vmem [shape: bf16[20,160,8], index: 21, kind: input, shape index: {}]   ;;  %s27575_s22 = inlined_call_operand.vmem [shape: f32[1,8], index: 22, kind: input, shape index: {}]   ;;  %s27576_s23 = inlined_call_operand.vmem [shape: f32[8,10], index: 23, kind: input, shape index: {}]   ;;  %s27577_s24 = inlined_call_operand.vmem [shape: f32[1,10], index: 24, kind: input, shape index: {}]   ;;  %s27578_s25 = inlined_call_operand.hbm [shape: f32[2,1,10], index: 25, kind: output, shape index: {}]  }
   0x1   :  { %27618 = sst [smem:[#allocation38_spill]] %s27553_s0 }
   0x2   :  { %27619 = sst [smem:[#allocation39_spill]] %s27554_s1 }
   0x3   :  { %27620 = sst [smem:[#allocation40_spill]] %s27555_s2 }
   0x4   :  { %27621 = sst [smem:[#allocation41_spill]] %s27556_s3 }
   0x5   :  { %27622 = sst [smem:[#allocation42_spill]] %s27557_s4 }
   0x6   :  { %27623 = sst [smem:[#allocation43_spill]] %s27558_s5 }
   0x7   :  { %27624 = sst [smem:[#allocation44_spill]] %s27559_s6 }
   0x8   :  { %27625 = sst [smem:[#allocation45_spill]] %s27560_s7 }
   0x9   :  { %27626 = sst [smem:[#allocation46_spill]] %s27561_s8 }
   0xa   :  { %27627 = sst [smem:[#allocation47_spill]] %s27562_s9 }
   0xb   :  { %27628 = sst [smem:[#allocation48_spill]] %s27563_s10 }
   0xc   :  { %27629 = sst [smem:[#allocation49_spill]] %s27564_s11 }
   0xd   :  { %27630 = sst [smem:[#allocation50_spill]] %s27565_s12 }
   0xe   :  { %27631 = sst [smem:[#allocation51_spill]] %s27578_s25 }
   0xf   :  { %30 = vsyncpa [#allocation7], 0 }
  0x10   :  { %32 = vsyncpa [#allocation7 + $0x1], 0  ;;  %s20605_s29 = smov 0   ;;  %s20607_s2 = smov 0  }
  0x11   :  { %s20609_s6 = smov 0   ;;  %s20611_s30 = smov 0  }
  0x12 LB: > { %27632 = sst [smem:[#allocation9_spill]] %s20452_s29  ;;  %s20626_s7 = sadd.s32 4294967295, %s20464_s30   ;;  %s20464_s30 = sphi %s20611_s30, %s27713_s30   ;;  %s20460_s6 = sphi %s20609_s6, %s27715_s6   ;;  %s20456_s2 = sphi %s20607_s2, %s27717_s2   ;;  %s20452_s29 = sphi %s20605_s29, %s27716_s29  }
  0x13   : > { %27633 = sst [smem:[#allocation10_spill]] %s20460_s6  ;;  %s16199_s3 = sadd.s32 4294967294, %s20464_s30  }
  0x14   : > { %27634 = sst [smem:[#allocation11_spill]] %s20464_s30  ;;  %s20630_s26 = sadd.s32 1, %s20464_s30  }
  0x15   : > { %27635 = sst [smem:[#allocation12_spill]] %s20626_s7  ;;  %s575_s1 = sadd.s32 1, %s20460_s6 }
  0x16   : > { %27636 = sst [smem:[#allocation13_spill]] %s20630_s26  ;;  %s572_s8 = ssub.s32 %s20464_s30, %s20630_s26 }
  0x17   : > { %p585_p0 = scmp.ne.s32.totalorder %s20460_s6, %s20456_s2  ;;  %p573_p1 = scmp.eq.s32.totalorder %s572_s8, 0 }
  0x18   : > { %p586_p2 = scmp.eq.s32.totalorder %s20626_s7, 1  ;;  %p591_p3 = scmp.ne.s32.totalorder %s20456_s2, %s20452_s29 }
  0x19   : > { %p592_p4 = scmp.eq.s32.totalorder %s16199_s3, 1  ;;  %p16202_p7 = scmp.ge.s32.totalorder %s20464_s30, 1 }
  0x1a   : > { %s20641_s27 = scalar_select %p573_p1, %s20460_s6, %s575_s1  }
  0x1b   : > { %p20643_p5 = por %p586_p2, %p585_p0  ;;  %p20647_p6 = por %p592_p4, %p591_p3 }
  0x1c   : > { %27637 = sst [smem:[#allocation14_spill]] %s20641_s27  ;;  %p690_p8 = scmp.lt.s32.totalorder %s20464_s30, 3 }
  0x1d   : > { %s27638_s4 = scalar_select %p20643_p5, 1, 0 }
  0x1e   : > { %s27640_s28 = scalar_select %p20647_p6, 1, 0 }
  0x1f   : > { %27639 = sst [smem:[#allocation15_spill]] %s27638_s4  ;;  %p691_p9 = pnand %p16202_p7, %p690_p8 }
  0x20   : > { %27641 = sst [smem:[#allocation16_spill]] %s27640_s28 }
  0x21   : > { %694 = sbr.rel (%p691_p9) target bundleno = 3856 (0xf10), region = 120 }
  0x26   : > { %s27642_s0 = sld [smem:[#allocation40_spill]]  ;;  %v27601_v2 = vmov 0   ;;  %vm763_vm0 = vcmask 778240   ;;  %p757_p10 = scmp.lt.s32.totalorder %s20626_s7, 1  ;;  %v27603_v8 = vmov 0.0   ;;  %vm770_vm1 = vcmask 785408  }
  0x27   : > { %s27643_s8 = sld [smem:[#allocation39_spill]]  ;;  %1077 = vmatprep.mubr.bf16.mxu0 %v27601_v2  ;;  %1422 = vmatprep.mubr.bf16.mxu1 %v27601_v2  ;;  %764 = vst.msk [vmem:[#allocation2] sm:$0x1] %vm763_vm0, %v27603_v8  ;;  %765 = vst.msk [vmem:[#allocation2 + $0x21] sm:$0x1] %vm763_vm0, %v27603_v8  ;;  %vm2040_vm2 = vcmask 1046528  }
  0x28   : > { %s758_s3 = scalar_select %p757_p10, %s20626_s7, 1  ;;  %vm2131_vm3 = vcmask 1045504   ;;  %vm2294_vm5 = vcmask 850944   ;;  %vm2411_vm6 = vcmask 654336   ;;  %vm2537_vm7 = vcmask 1040384  }
  0x29   : > { %s27644_s6 = sld [smem:[#allocation38_spill]]  ;;  %s20469_s5 = smov 104   ;;  %vm2609_vm8 = vcmask 654337   ;;  %vm3050_vm9 = vsmask.f32 7424  ;;  %vm2628_vm10 = vcmask 653312  }
  0x2a   : > { %s18147_s1 = sshll.u32 %s758_s3, 5  ;;  %s27645_s27 = sld [smem:[#allocation41_spill]]  ;;  %vm7288_vm11 = vsmask.f32 6400  ;;  %vm10348_vm13 = vcmask 916480   ;;  %vm10555_vm14 = vcmask 261121  }
  0x2b   : > { %s27647_s9 = sld [smem:[#allocation42_spill]]  ;;  %s27598_s3 = smov 80   ;;  %vm10560_vm15 = vcmask 261120   ;;  %vm10569_vm0 = vcmask 256000  }
  0x2c   : > { %v18232_v0 = vld [vmem:[%s27642_s0 + $0xf4] ss:$24 sps:$4 sm:$0xff]   ;;  %v18236_v3 = vld [vmem:[%s27642_s0 + $0xf0] ss:$24 sps:$4 sm:$0xff]   ;;  %v18238_v5 = vld [vmem:[%s27642_s0 + $0xc4] ss:$24 sps:$4 sm:$0xff]  }
  0x2d   : > { %v18234_v1 = vld [vmem:[%s27643_s8 + $0xf4] ss:$24 sps:$4 sm:$0xff]   ;;  %1049 = vmatprep.subr.bf16.mxu0 %v18232_v0  ;;  %v18237_v4 = vld [vmem:[%s27643_s8 + $0xf0] ss:$24 sps:$4 sm:$0xff]   ;;  %v18240_v6 = vld [vmem:[%s27643_s8 + $0xc4] ss:$24 sps:$4 sm:$0xff]  }
  0x2e   : > { %1394 = vmatprep.subr.bf16.mxu1 %v18234_v1  ;;  %1050 = vmatpush1.bf16.msra.mxu0 %v18236_v3  ;;  %v18242_v7 = vld [vmem:[%s27642_s0 + $0xc0] ss:$24 sps:$4 sm:$0xff]   ;;  %v18244_v10 = vld [vmem:[%s27642_s0 + $0x94] ss:$24 sps:$4 sm:$0xff]   ;;  %v18248_v12 = vld [vmem:[%s27642_s0 + $0x90] ss:$24 sps:$4 sm:$0xff]  }
  0x2f   : > { %1395 = vmatpush1.bf16.msra.mxu1 %v18237_v4  ;;  %1051 = vmatprep.subr.bf16.mxu0 %v18238_v5  ;;  %v18243_v9 = vld [vmem:[%s27643_s8 + $0xc0] ss:$24 sps:$4 sm:$0xff]   ;;  %v18246_v11 = vld [vmem:[%s27643_s8 + $0x94] ss:$24 sps:$4 sm:$0xff]   ;;  %v18249_v13 = vld [vmem:[%s27643_s8 + $0x90] ss:$24 sps:$4 sm:$0xff]   ;;  %s761_s29 = scalar_lea.vmem %s27644_s6, %s18147_s1 }
  0x30   : > { %1396 = vmatprep.subr.bf16.mxu1 %v18240_v6  ;;  %v18250_v14 = vld [vmem:[%s27642_s0 + $0x64] ss:$24 sps:$4 sm:$0xff]   ;;  %v18254_v16 = vld [vmem:[%s27642_s0 + $0x60] ss:$24 sps:$4 sm:$0xff]   ;;  %v18256_v18 = vld [vmem:[%s27642_s0 + $0x34] ss:$24 sps:$4 sm:$0xff]  }
  0x31   : > { %v18252_v15 = vld [vmem:[%s27643_s8 + $0x64] ss:$24 sps:$4 sm:$0xff]   ;;  %v18255_v17 = vld [vmem:[%s27643_s8 + $0x60] ss:$24 sps:$4 sm:$0xff]   ;;  %v18258_v19 = vld [vmem:[%s27643_s8 + $0x34] ss:$24 sps:$4 sm:$0xff]  }
  0x32   : > { %1052 = vmatpush1.bf16.msra.mxu0 %v18242_v7  ;;  %v18260_v20 = vld [vmem:[%s27642_s0 + $0x30] ss:$24 sps:$4 sm:$0xff]   ;;  %v766_v22 = vld [vmem:[%s761_s29] sm:$0xff]  ;;  %v18270_v28 = vld [vmem:[%s27642_s0 + $0xfc] ss:$24 sps:$4 sm:$0xff]   ;;  %s27648_s30 = sld [smem:[#allocation44_spill]] }
  0x33   : > { %1397 = vmatpush1.bf16.msra.mxu1 %v18243_v9  ;;  %1053 = vmatprep.subr.bf16.mxu0 %v18244_v10  ;;  %v18261_v21 = vld [vmem:[%s27643_s8 + $0x30] ss:$24 sps:$4 sm:$0xff]   ;;  %v18262_v24 = vld [vmem:[%s27642_s0 + $0x4] ss:$24 sps:$4 sm:$0xff]   ;;  %771 = vst.msk [vmem:[#allocation2 + $0x1] sm:$0xff] %vm770_vm1, %v766_v22  ;;  %s27651_s25 = sld [smem:[#allocation43_spill]] }
  0x34   : > { %1398 = vmatprep.subr.bf16.mxu1 %v18246_v11  ;;  %v767_v23 = vld [vmem:[%s761_s29 + $0x8] sm:$0xff]  ;;  %v18264_v25 = vld [vmem:[%s27643_s8 + $0x4] ss:$24 sps:$4 sm:$0xff]   ;;  %v18266_v26 = vld [vmem:[%s27642_s0] ss:$24 sps:$4 sm:$0xff]   ;;  %s27677_s10 = sld [smem:[#allocation48_spill]] }
  0x35   : > { %772 = vst.msk [vmem:[#allocation2 + $0x9] sm:$0xff] %vm770_vm1, %v767_v23  ;;  %v18267_v27 = vld [vmem:[%s27643_s8] ss:$24 sps:$4 sm:$0xff]   ;;  %v768_v29 = vld [vmem:[%s761_s29 + $0x10] sm:$0xff]  ;;  %v18273_v32 = vld [vmem:[%s27642_s0 + $0xcc] ss:$24 sps:$4 sm:$0xff]  }
  0x36   : > { %1054 = vmatpush1.bf16.msra.mxu0 %v18248_v12  ;;  %v769_v30 = vld [vmem:[%s761_s29 + $0x18] sm:$0xff]  ;;  %773 = vst.msk [vmem:[#allocation2 + $0x11] sm:$0xff] %vm770_vm1, %v768_v29  ;;  %v18271_v39 = vld [vmem:[%s27642_s0 + $0xc8] ss:$24 sps:$4 sm:$0xff]   ;;  %v18294_v49 = vld [vmem:[%s27643_s8 + $0xd4] ss:$24 sps:$4 sm:$0xff]  }
  0x37   : > { %1399 = vmatpush1.bf16.msra.mxu1 %v18249_v13  ;;  %1055 = vmatprep.subr.bf16.mxu0 %v18250_v14  ;;  %774 = vst.msk [vmem:[#allocation2 + $0x19] sm:$0xff] %vm770_vm1, %v769_v30  ;;  %v18268_v31 = vld [vmem:[%s27642_s0 + $0xf8] ss:$24 sps:$4 sm:$0xff]   ;;  %v18276_v40 = vld [vmem:[%s27642_s0 + $0x9c] ss:$24 sps:$4 sm:$0xff]   ;;  %s27661_s29 = sld [smem:[#allocation46_spill]] }
  0x38   : > { %1400 = vmatprep.subr.bf16.mxu1 %v18252_v15  ;;  %v18286_v41 = vld [vmem:[%s27643_s8 + $0x100] ss:$24 sps:$4 sm:$0xff]   ;;  %v18288_v42 = vld [vmem:[%s27643_s8 + $0x104] ss:$24 sps:$4 sm:$0xff]   ;;  %v18292_v48 = vld [vmem:[%s27643_s8 + $0xd0] ss:$24 sps:$4 sm:$0xff]   ;;  %s27649_s26 = smov %s27648_s30 }
  0x39   : > { %v18274_v50 = vld [vmem:[%s27642_s0 + $0x98] ss:$24 sps:$4 sm:$0xff]   ;;  %v18279_v52 = vld [vmem:[%s27642_s0 + $0x6c] ss:$24 sps:$4 sm:$0xff]   ;;  %v18277_v54 = vld [vmem:[%s27642_s0 + $0x68] ss:$24 sps:$4 sm:$0xff]  }
  0x3a   : > { %1056 = vmatpush1.bf16.msra.mxu0 %v18254_v16  ;;  %v817_v33 = vld [vmem:[#allocation2 + $0x1] sm:$0xff]  ;;  %v18282_v56 = vld [vmem:[%s27642_s0 + $0x3c] ss:$24 sps:$4 sm:$0xff]   ;;  %v18280_v58 = vld [vmem:[%s27642_s0 + $0x38] ss:$24 sps:$4 sm:$0xff]   ;;  %s27698_s12 = sld [smem:[#allocation50_spill]] }
  0x3b   : > { %1401 = vmatpush1.bf16.msra.mxu1 %v18255_v17  ;;  %1057 = vmatprep.subr.bf16.mxu0 %v18256_v18  ;;  %v775_v35 = vld [vmem:[#allocation2] sm:$0xff]  ;;  %v18306_v57 = vld [vmem:[%s27643_s8 + $0x74] ss:$24 sps:$4 sm:$0xff]   ;;  %v18304_v59 = vld [vmem:[%s27643_s8 + $0x70] ss:$24 sps:$4 sm:$0xff]   ;;  %s27704_s7 = smov 96  }
  0x3c   : > { %1402 = vmatprep.subr.bf16.mxu1 %v18258_v19  ;;  %v818_v34 = vld [vmem:[#allocation2 + $0x9] sm:$0xff]  ;;  %v18300_v53 = vld [vmem:[%s27643_s8 + $0xa4] ss:$24 sps:$4 sm:$0xff]   ;;  %v18298_v55 = vld [vmem:[%s27643_s8 + $0xa0] ss:$24 sps:$4 sm:$0xff]   ;;  %s27705_s11 = sld [smem:[#allocation49_spill]] }
  0x3d   : > { %v20749_v36 = vpack.c.bf16 %v818_v34, %v817_v33  ;;  %v776_v37 = vld [vmem:[#allocation2 + $0x8] sm:$0xff]  ;;  %v819_v43 = vld [vmem:[#allocation2 + $0x11] sm:$0xff]  ;;  %v18312_v60 = vld [vmem:[%s27643_s8 + $0x44] ss:$24 sps:$4 sm:$0xff]   ;;  %s27662_s1 = smov %s27661_s29  ;;  %s27707_s4 = sld [smem:[#allocation12_spill]] }
  0x3e   : > { %1058 = vmatpush1.bf16.msra.mxu0 %v18260_v20  ;;  %v20751_v38 = vpack.c.bf16 %v776_v37, %v775_v35  ;;  %v777_v44 = vld [vmem:[#allocation2 + $0x10] sm:$0xff]  ;;  %v820_v45 = vld [vmem:[#allocation2 + $0x19] sm:$0xff]  ;;  %v18285_v61 = vld [vmem:[%s27642_s0 + $0xc] ss:$24 sps:$4 sm:$0xff]  }
  0x3f   : > { %1403 = vmatpush1.bf16.msra.mxu1 %v18261_v21  ;;  %1059 = vmatprep.subr.bf16.mxu0 %v18262_v24  ;;  %v778_v46 = vld [vmem:[#allocation2 + $0x18] sm:$0xff]  ;;  %v20771_v47 = vpack.c.bf16 %v820_v45, %v819_v43  ;;  %v18283_v62 = vld [vmem:[%s27642_s0 + $0x8] ss:$24 sps:$4 sm:$0xff]   ;;  %v18318_v0 = vld [vmem:[%s27643_s8 + $0x14] ss:$24 sps:$4 sm:$0xff]  }
  0x40   : > { %1404 = vmatprep.subr.bf16.mxu1 %v18264_v25  ;;  %v20782_v51 = vpack.c.bf16 %v778_v46, %v777_v44  ;;  %v18310_v63 = vld [vmem:[%s27643_s8 + $0x40] ss:$24 sps:$4 sm:$0xff]   ;;  %v18291_v1 = vld [vmem:[%s27642_s0 + $0x104] ss:$24 sps:$4 sm:$0xff]   ;;  %v18316_v4 = vld [vmem:[%s27643_s8 + $0x10] ss:$24 sps:$4 sm:$0xff]  }
  0x41   : > { %v18289_v3 = vld [vmem:[%s27642_s0 + $0x100] ss:$24 sps:$4 sm:$0xff]   ;;  %v18297_v5 = vld [vmem:[%s27642_s0 + $0xd4] ss:$24 sps:$4 sm:$0xff]   ;;  %v18295_v7 = vld [vmem:[%s27642_s0 + $0xd0] ss:$24 sps:$4 sm:$0xff]  }
  0x42   : > { %1060 = vmatpush1.bf16.msra.mxu0 %v18266_v26  ;;  %v18324_v6 = vld [vmem:[%s27645_s27 + $0xfc] ss:$24 sps:$4 sm:$0xff]   ;;  %v18322_v9 = vld [vmem:[%s27645_s27 + $0xf8] ss:$24 sps:$4 sm:$0xff]   ;;  %v18330_v10 = vld [vmem:[%s27645_s27 + $0xcc] ss:$24 sps:$4 sm:$0xff]  }
  0x43   : > { %1405 = vmatpush1.bf16.msra.mxu1 %v18267_v27  ;;  %1102 = vmatprep.subr.bf16.mxu0 %v18270_v28  ;;  %v18303_v11 = vld [vmem:[%s27642_s0 + $0xa4] ss:$24 sps:$4 sm:$0xff]   ;;  %v18301_v12 = vld [vmem:[%s27642_s0 + $0xa0] ss:$24 sps:$4 sm:$0xff]   ;;  %v18309_v14 = vld [vmem:[%s27642_s0 + $0x74] ss:$24 sps:$4 sm:$0xff]  }
  0x44   : > { %1500 = vmatprep.subr.bf16.mxu1 %v18288_v42  ;;  %v18328_v13 = vld [vmem:[%s27645_s27 + $0xc8] ss:$24 sps:$4 sm:$0xff]   ;;  %v18336_v15 = vld [vmem:[%s27645_s27 + $0x9c] ss:$24 sps:$4 sm:$0xff]   ;;  %v18334_v16 = vld [vmem:[%s27645_s27 + $0x98] ss:$24 sps:$4 sm:$0xff]  }
  0x45   : > { %16241 = vmatmul.mubr.msk.bf16.vlgmr.msra.gmra.mxu0 %vm770_vm1, %v20749_v36  ;;  %v18307_v17 = vld [vmem:[%s27642_s0 + $0x70] ss:$24 sps:$4 sm:$0xff]   ;;  %v18342_v18 = vld [vmem:[%s27645_s27 + $0x6c] ss:$24 sps:$4 sm:$0xff]   ;;  %v18313_v20 = vld [vmem:[%s27642_s0 + $0x40] ss:$24 sps:$4 sm:$0xff]  }
  0x46   : > { %16283 = vmatmul.mubr.msk.bf16.vlgmr.msra.gmra.mxu1 %vm770_vm1, %v20751_v38  ;;  %1103 = vmatpush1.bf16.msra.mxu0 %v18268_v31  ;;  %v18315_v19 = vld [vmem:[%s27642_s0 + $0x44] ss:$24 sps:$4 sm:$0xff]   ;;  %v18340_v21 = vld [vmem:[%s27645_s27 + $0x68] ss:$24 sps:$4 sm:$0xff]   ;;  %v18321_v23 = vld [vmem:[%s27642_s0 + $0x14] ss:$24 sps:$4 sm:$0xff]  }
  0x47   : > { %1104 = vmatprep.subr.bf16.mxu0 %v18273_v32  ;;  %1087 = vmatprep.mubr.bf16.mxu0 %v27601_v2  ;;  %v18348_v22 = vld [vmem:[%s27645_s27 + $0x3c] ss:$24 sps:$4 sm:$0xff]   ;;  %v18319_v24 = vld [vmem:[%s27642_s0 + $0x10] ss:$24 sps:$4 sm:$0xff]   ;;  %v18354_v26 = vld [vmem:[%s27645_s27 + $0xc] ss:$24 sps:$4 sm:$0xff]  }
  0x48   : > { %1432 = vmatprep.mubr.bf16.mxu1 %v27601_v2  ;;  %1501 = vmatpush1.bf16.msra.mxu1 %v18286_v41  ;;  %v18346_v25 = vld [vmem:[%s27645_s27 + $0x38] ss:$24 sps:$4 sm:$0xff]   ;;  %v18327_v27 = vld [vmem:[%s27643_s8 + $0xfc] ss:$24 sps:$4 sm:$0xff]   ;;  %v18352_v28 = vld [vmem:[%s27645_s27 + $0x8] ss:$24 sps:$4 sm:$0xff]  }
  0x49   : > { %1502 = vmatprep.subr.bf16.mxu1 %v18294_v49  ;;  %v1549_v29 = vld [vmem:[#allocation2 + $0x2] sm:$0xff]  ;;  %v1550_v30 = vld [vmem:[#allocation2 + $0xa] sm:$0xff]  ;;  %v18339_v35 = vld [vmem:[%s27643_s8 + $0x9c] ss:$24 sps:$4 sm:$0xff]   ;;  %s27650_s0 = smov 80  }
  0x4a   : > { %1105 = vmatpush1.bf16.msra.mxu0 %v18271_v39  ;;  %v18325_v31 = vld [vmem:[%s27643_s8 + $0xf8] ss:$24 sps:$4 sm:$0xff]   ;;  %v18333_v32 = vld [vmem:[%s27643_s8 + $0xcc] ss:$24 sps:$4 sm:$0xff]   ;;  %v20925_v33 = vpack.c.bf16 %v1550_v30, %v1549_v29  ;;  %v18331_v34 = vld [vmem:[%s27643_s8 + $0xc8] ss:$24 sps:$4 sm:$0xff]  }
  0x4b   : > { %1106 = vmatprep.subr.bf16.mxu0 %v18276_v40  ;;  %v1551_v37 = vld [vmem:[#allocation2 + $0x12] sm:$0xff]  ;;  %v1552_v39 = vld [vmem:[#allocation2 + $0x1a] sm:$0xff]  ;;  %v18357_v45 = vld [vmem:[%s27643_s8 + $0xc] ss:$24 sps:$4 sm:$0xff]  }
  0x4c   : > { %1503 = vmatpush1.bf16.msra.mxu1 %v18292_v48  ;;  %v18337_v40 = vld [vmem:[%s27643_s8 + $0x98] ss:$24 sps:$4 sm:$0xff]   ;;  %v18343_v41 = vld [vmem:[%s27643_s8 + $0x68] ss:$24 sps:$4 sm:$0xff]   ;;  %v20948_v42 = vpack.c.bf16 %v1552_v39, %v1551_v37  ;;  %v18351_v43 = vld [vmem:[%s27643_s8 + $0x3c] ss:$24 sps:$4 sm:$0xff]  }
  0x4d   : > { %16242 = vmatmul.mubr.msk.bf16.gmra.mxu0 %vm770_vm1, %v20771_v47  ;;  %1504 = vmatprep.subr.bf16.mxu1 %v18300_v53  ;;  %v18349_v44 = vld [vmem:[%s27643_s8 + $0x38] ss:$24 sps:$4 sm:$0xff]   ;;  %v18355_v46 = vld [vmem:[%s27643_s8 + $0x8] ss:$24 sps:$4 sm:$0xff]   ;;  %v18363_v49 = vld [vmem:[%s27645_s27 + $0xc4] ss:$24 sps:$4 sm:$0xff]  }
  0x4e   : > { %1107 = vmatpush1.bf16.msra.mxu0 %v18274_v50  ;;  %16284 = vmatmul.mubr.msk.bf16.gmra.mxu1 %vm770_vm1, %v20782_v51  ;;  %v18358_v48 = vld [vmem:[%s27645_s27 + $0xf0] ss:$24 sps:$4 sm:$0xff]   ;;  %v18361_v50 = vld [vmem:[%s27645_s27 + $0xc0] ss:$24 sps:$4 sm:$0xff]  }
  0x4f   : > { %1108 = vmatprep.subr.bf16.mxu0 %v18279_v52  ;;  %1130 = vmatprep.mubr.bf16.mxu0 %v27601_v2  ;;  %v18366_v52 = vld [vmem:[%s27645_s27 + $0x94] ss:$24 sps:$4 sm:$0xff]   ;;  %v18364_v53 = vld [vmem:[%s27645_s27 + $0x90] ss:$24 sps:$4 sm:$0xff]  }
  0x50   : > { %1528 = vmatprep.mubr.bf16.mxu1 %v27601_v2  ;;  %1505 = vmatpush1.bf16.msra.mxu1 %v18298_v55  ;;  %v18372_v55 = vld [vmem:[%s27645_s27 + $0x34] ss:$24 sps:$4 sm:$0xff]  }
  0x51   : > { %1506 = vmatprep.subr.bf16.mxu1 %v18306_v57  ;;  %v18375_v57 = vld [vmem:[%s27645_s27 + $0x4] ss:$24 sps:$4 sm:$0xff]  }
  0x52   : > { %1109 = vmatpush1.bf16.msra.mxu0 %v18277_v54  ;;  %v18369_v54 = vld [vmem:[%s27645_s27 + $0x64] ss:$24 sps:$4 sm:$0xff]  }
  0x53   : > { %1110 = vmatprep.subr.bf16.mxu0 %v18282_v56  ;;  %v18370_v56 = vld [vmem:[%s27645_s27 + $0x30] ss:$24 sps:$4 sm:$0xff]  }
  0x54   : > { %1507 = vmatpush1.bf16.msra.mxu1 %v18304_v59  ;;  %v18376_v59 = vld [vmem:[%s27645_s27 + $0x100] ss:$24 sps:$4 sm:$0xff]  }
  0x55   : > { %1508 = vmatprep.subr.bf16.mxu1 %v18312_v60  ;;  %v18381_v60 = vld [vmem:[%s27645_s27 + $0xd4] ss:$24 sps:$4 sm:$0xff]  }
  0x56   : > { %1111 = vmatpush1.bf16.msra.mxu0 %v18280_v58  ;;  %v18378_v58 = vld [vmem:[%s27645_s27 + $0x104] ss:$24 sps:$4 sm:$0xff]  }
  0x57   : > { %1112 = vmatprep.subr.bf16.mxu0 %v18285_v61  ;;  %v18379_v61 = vld [vmem:[%s27645_s27 + $0xd0] ss:$24 sps:$4 sm:$0xff]  }
  0x58   : > { %1509 = vmatpush1.bf16.msra.mxu1 %v18310_v63  ;;  %v18382_v63 = vld [vmem:[%s27645_s27 + $0xa0] ss:$24 sps:$4 sm:$0xff]  }
  0x59   : > { %1510 = vmatprep.subr.bf16.mxu1 %v18318_v0  ;;  %v18387_v0 = vld [vmem:[%s27645_s27 + $0x74] ss:$24 sps:$4 sm:$0xff]  }
  0x5a   : > { %1113 = vmatpush1.bf16.msra.mxu0 %v18283_v62  ;;  %v18384_v62 = vld [vmem:[%s27645_s27 + $0xa4] ss:$24 sps:$4 sm:$0xff]  }
  0x5b   : > { %1155 = vmatprep.subr.bf16.mxu0 %v18291_v1  ;;  %v18385_v1 = vld [vmem:[%s27645_s27 + $0x70] ss:$24 sps:$4 sm:$0xff]  }
  0x5c   : > { %1511 = vmatpush1.bf16.msra.mxu1 %v18316_v4  ;;  %v18388_v4 = vld [vmem:[%s27645_s27 + $0x40] ss:$24 sps:$4 sm:$0xff]  }
  0x5d   : > { %16243 = vmatmul.mubr.msk.bf16.vlgmr.msra.gmra.mxu0 %vm770_vm1, %v20749_v36  ;;  %1834 = vmatprep.subr.bf16.mxu1 %v18324_v6  ;;  %v18391_v6 = vld [vmem:[%s27645_s27 + $0x10] ss:$24 sps:$4 sm:$0xff]  }
  0x5e   : > { %1156 = vmatpush1.bf16.msra.mxu0 %v18289_v3  ;;  %1140 = vmatprep.mubr.bf16.mxu0 %v27601_v2  ;;  %v18390_v3 = vld [vmem:[%s27645_s27 + $0x44] ss:$24 sps:$4 sm:$0xff]  }
  0x5f   : > { %1157 = vmatprep.subr.bf16.mxu0 %v18297_v5  ;;  %16287 = vmatmul.mubr.msk.bf16.vlgmr.msra.gmra.mxu1 %vm770_vm1, %v20751_v38  ;;  %v18393_v5 = vld [vmem:[%s27645_s27 + $0x14] ss:$24 sps:$4 sm:$0xff]  }
  0x60   : > { %1835 = vmatpush1.bf16.msra.mxu1 %v18322_v9  ;;  %1538 = vmatprep.mubr.bf16.mxu1 %v27601_v2 }
  0x61   : > { %1836 = vmatprep.subr.bf16.mxu1 %v18330_v10  ;;  %v21062_v10 = vld [vmem:[%s27647_s9] sm:$0x3f] }
  0x62   : > { %1158 = vmatpush1.bf16.msra.mxu0 %v18295_v7  ;;  %v27605_v7 = vlaneseq }
  0x63   : > { %1159 = vmatprep.subr.bf16.mxu0 %v18303_v11 }
  0x64   : > { %1837 = vmatpush1.bf16.msra.mxu1 %v18328_v13  ;;  %v21057_v9 = vshrl.u32 %v27605_v7, 7  ;;  %vm2506_vm4 = vcmp.lt.s32.totalorder %v27605_v7, 720 }
  0x65   : > { %16244 = vmatmul.mubr.msk.bf16.gmra.mxu0 %vm770_vm1, %v20771_v47  ;;  %1838 = vmatprep.subr.bf16.mxu1 %v18336_v15  ;;  %2508 = vst.msk [vmem:[#allocation3] ss:$8 sm:$0xf] %vm2506_vm4, %v27603_v8  ;;  %2509 = vst.msk [vmem:[#allocation3] ss:$8 sm:$0x30] %vm2506_vm4, %v27603_v8 }
  0x66   : > { %1160 = vmatpush1.bf16.msra.mxu0 %v18301_v12  ;;  %1183 = vmatprep.mubr.bf16.mxu0 %v27601_v2  ;;  %27646 = vst [vmem:[#allocation17_spill] sm:$0xff] %v21057_v9  ;;  %v1984_v11 = vsub.s32 5, %v21057_v9  ;;  %2511 = vst.msk [vmem:[#allocation3 + $0x97] ss:$8 sm:$0xf] %vm2506_vm4, %v27603_v8 }
  0x67   : > { %1161 = vmatprep.subr.bf16.mxu0 %v18309_v14  ;;  %16288 = vmatmul.mubr.msk.bf16.gmra.mxu1 %vm770_vm1, %v20782_v51  ;;  %2512 = vst.msk [vmem:[#allocation3 + $0x97] ss:$8 sm:$0x30] %vm2506_vm4, %v27603_v8  ;;  %vm12097_vm4 = vcmask 982016  }
  0x68   : > { %1839 = vmatpush1.bf16.msra.mxu1 %v18334_v16  ;;  %1862 = vmatprep.mubr.bf16.mxu1 %v27601_v2  ;;  %v21066_v12 = vrot.slane %v21062_v10, %v1984_v11 }
  0x69   : > { %1840 = vmatprep.subr.bf16.mxu1 %v18342_v18 }
  0x6a   : > { %1162 = vmatpush1.bf16.msra.mxu0 %v18307_v17 }
  0x6b   : > { %1163 = vmatprep.subr.bf16.mxu0 %v18315_v19 }
  0x6c   : > { %1841 = vmatpush1.bf16.msra.mxu1 %v18340_v21 }
  0x6d   : > { %1842 = vmatprep.subr.bf16.mxu1 %v18348_v22 }
  0x6e   : > { %1164 = vmatpush1.bf16.msra.mxu0 %v18313_v20 }
  0x6f   : > { %1165 = vmatprep.subr.bf16.mxu0 %v18321_v23 }
  0x70   : > { %1843 = vmatpush1.bf16.msra.mxu1 %v18346_v25 }
  0x71   : > { %1844 = vmatprep.subr.bf16.mxu1 %v18354_v26 }
  0x72   : > { %1166 = vmatpush1.bf16.msra.mxu0 %v18319_v24 }
  0x73   : > { %1447 = vmatprep.subr.bf16.mxu0 %v18327_v27 }
  0x74   : > { %1845 = vmatpush1.bf16.msra.mxu1 %v18352_v28 }
  0x75   : > { %16245 = vmatmul.mubr.msk.bf16.vlgmr.msra.gmra.mxu0 %vm770_vm1, %v20749_v36  ;;  %v18345_v36 = vld [vmem:[%s27643_s8 + $0x6c] ss:$24 sps:$4 sm:$0xff]  }
  0x76   : > { %1448 = vmatpush1.bf16.msra.mxu0 %v18325_v31  ;;  %1193 = vmatprep.mubr.bf16.mxu0 %v27601_v2 }
  0x77   : > { %1449 = vmatprep.subr.bf16.mxu0 %v18333_v32  ;;  %16327 = vmatmul.mubr.msk.bf16.vlgmr.msra.gmra.mxu1 %vm770_vm1, %v20925_v33 }
  0x78   : > { %1872 = vmatprep.mubr.bf16.mxu1 %v27601_v2 }
  0x7a   : > { %1450 = vmatpush1.bf16.msra.mxu0 %v18331_v34 }
  0x7b   : > { %1451 = vmatprep.subr.bf16.mxu0 %v18339_v35 }
  0x7d   : > { %16246 = vmatmul.mubr.msk.bf16.gmra.mxu0 %vm770_vm1, %v20771_v47  ;;  %v18360_v47 = vld [vmem:[%s27645_s27 + $0xf4] ss:$24 sps:$4 sm:$0xff]  }
  0x7e   : > { %1452 = vmatpush1.bf16.msra.mxu0 %v18337_v40  ;;  %1475 = vmatprep.mubr.bf16.mxu0 %v27601_v2 }
  0x7f   : > { %1453 = vmatprep.subr.bf16.mxu0 %v18345_v36  ;;  %16328 = vmatmul.mubr.msk.bf16.gmra.mxu1 %vm770_vm1, %v20948_v42 }
  0x82   : > { %1454 = vmatpush1.bf16.msra.mxu0 %v18343_v41 }
  0x83   : > { %1455 = vmatprep.subr.bf16.mxu0 %v18351_v43 }
  0x86   : > { %1456 = vmatpush1.bf16.msra.mxu0 %v18349_v44 }
  0x87   : > { %1457 = vmatprep.subr.bf16.mxu0 %v18357_v45 }
  0x8a   : > { %1458 = vmatpush1.bf16.msra.mxu0 %v18355_v46 }
  0x8b   : > { %1781 = vmatprep.subr.bf16.mxu0 %v18360_v47 }
  0x8d   : > { %16285 = vmatmul.mubr.msk.bf16.vlgmr.msra.gmra.mxu0 %vm770_vm1, %v20751_v38  ;;  %v18367_v38 = vld [vmem:[%s27645_s27 + $0x60] ss:$24 sps:$4 sm:$0xff]  }
  0x8e   : > { %1782 = vmatpush1.bf16.msra.mxu0 %v18358_v48  ;;  %1485 = vmatprep.mubr.bf16.mxu0 %v27601_v2 }
  0x8f   : > { %1783 = vmatprep.subr.bf16.mxu0 %v18363_v49 }
  0x92   : > { %1784 = vmatpush1.bf16.msra.mxu0 %v18361_v50 }
  0x93   : > { %1785 = vmatprep.subr.bf16.mxu0 %v18366_v52 }
  0x95   : > { %16286 = vmatmul.mubr.msk.bf16.gmra.mxu0 %vm770_vm1, %v20782_v51  ;;  %v18373_v51 = vld [vmem:[%s27645_s27] ss:$24 sps:$4 sm:$0xff]  }
  0x96   : > { %1786 = vmatpush1.bf16.msra.mxu0 %v18364_v53  ;;  %1809 = vmatprep.mubr.bf16.mxu0 %v27601_v2 }
  0x97   : > { %1787 = vmatprep.subr.bf16.mxu0 %v18369_v54 }
  0x9a   : > { %1788 = vmatpush1.bf16.msra.mxu0 %v18367_v38 }
  0x9b   : > { %1789 = vmatprep.subr.bf16.mxu0 %v18372_v55 }
  0x9e   : > { %1790 = vmatpush1.bf16.msra.mxu0 %v18370_v56 }
  0x9f   : > { %1791 = vmatprep.subr.bf16.mxu0 %v18375_v57 }
  0xa2   : > { %1792 = vmatpush1.bf16.msra.mxu0 %v18373_v51 }
  0xa3   : > { %1887 = vmatprep.subr.bf16.mxu0 %v18378_v58 }
  0xa5   : > { %16325 = vmatmul.mubr.msk.bf16.vlgmr.msra.gmra.mxu0 %vm770_vm1, %v20925_v33 }
  0xa6   : > { %1888 = vmatpush1.bf16.msra.mxu0 %v18376_v59  ;;  %1819 = vmatprep.mubr.bf16.mxu0 %v27601_v2 }
  0xa7   : > { %1889 = vmatprep.subr.bf16.mxu0 %v18381_v60 }
  0xaa   : > { %1890 = vmatpush1.bf16.msra.mxu0 %v18379_v61 }
  0xab   : > { %1891 = vmatprep.subr.bf16.mxu0 %v18384_v62 }
  0xad   : > { %16326 = vmatmul.mubr.msk.bf16.gmra.mxu0 %vm770_vm1, %v20948_v42 }
  0xae   : > { %1892 = vmatpush1.bf16.msra.mxu0 %v18382_v63  ;;  %1915 = vmatprep.mubr.bf16.mxu0 %v27601_v2  ;;  %v27610_v63 = vsub.s32 2, %v21057_v9 }
  0xaf   : > { %1893 = vmatprep.subr.bf16.mxu0 %v18387_v0 }
  0xb2   : > { %1894 = vmatpush1.bf16.msra.mxu0 %v18385_v1 }
  0xb3   : > { %1895 = vmatprep.subr.bf16.mxu0 %v18390_v3 }
  0xb6   : > { %1896 = vmatpush1.bf16.msra.mxu0 %v18388_v4  ;;  %v1973_v4 = vrot.slane %v21062_v10, %v27610_v63 }
  0xb7   : > { %1897 = vmatprep.subr.bf16.mxu0 %v18393_v5 }
  0xba   : > { %1898 = vmatpush1.bf16.msra.mxu0 %v18391_v6  ;;  %v27609_v6 = vsub.s32 3, %v21057_v9 }
  0xbd   : > { %16329 = vmatmul.mubr.msk.bf16.vlgmr.msra.gmra.mxu0 %vm770_vm1, %v20925_v33 }
  0xbe   : > { %1925 = vmatprep.mubr.bf16.mxu0 %v27601_v2 }
  0xc5   : > { %16330 = vmatmul.mubr.msk.bf16.gmra.mxu0 %vm770_vm1, %v20948_v42 }
 0x105   : > { %v1079_v13 = vpop.f32.mrf.mxu0 }
 0x106   : > { %v1424_v14 = vpop.f32.mrf.mxu1 }
 0x107   : > { %v21068_v15 = vadd.f32 %v1424_v14, %v1079_v13  ;;  %v1081_v16 = vpop.f32.mrf.mxu0 }
 0x108   : > { %v1426_v17 = vpop.f32.mrf.mxu1 }
 0x109   : > { %v21070_v18 = vadd.f32 %v1426_v17, %v1081_v16  ;;  %v21072_v19 = vpop.f32.mrf.mxu0 }
 0x10a   : > { %v21074_v20 = vpop.f32.mrf.mxu1 }
 0x10b   : > { %v21076_v21 = vpop.f32.mrf.mxu0 }
 0x10c   : > { %v21078_v22 = vpop.f32.mrf.mxu1 }
 0x10d   : > { %v21080_v23 = vpop.f32.mrf.mxu0 }
 0x10e   : > { %v21082_v24 = vpop.f32.mrf.mxu1 }
 0x10f   : > { %v21084_v25 = vpop.f32.mrf.mxu0 }
 0x110   : > { %v21086_v26 = vpop.f32.mrf.mxu1 }
 0x111   : > { %v1093_v27 = vpop.f32.mrf.mxu0 }
 0x112   : > { %v1438_v28 = vpop.f32.mrf.mxu1 }
 0x113   : > { %v21088_v29 = vadd.f32 %v1438_v28, %v1093_v27  ;;  %v21090_v30 = vpop.f32.mrf.mxu0 }
 0x114   : > { %v21092_v34 = vpop.f32.mrf.mxu1 }
 0x11d   : > { %v1132_v31 = vpop.f32.mrf.mxu0 }
 0x11f   : > { %v1134_v32 = vpop.f32.mrf.mxu0  ;;  %v1530_v39 = vpop.f32.mrf.mxu1 }
 0x121   : > { %v1136_v33 = vpop.f32.mrf.mxu0  ;;  %v1532_v36 = vpop.f32.mrf.mxu1 }
 0x123   : > { %v1138_v35 = vpop.f32.mrf.mxu0  ;;  %v21094_v42 = vpop.f32.mrf.mxu1 }
 0x125   : > { %v1142_v37 = vpop.f32.mrf.mxu0  ;;  %v21098_v44 = vpop.f32.mrf.mxu1 }
 0x127   : > { %v1144_v40 = vpop.f32.mrf.mxu0  ;;  %v1540_v46 = vpop.f32.mrf.mxu1 }
 0x129   : > { %v1146_v41 = vpop.f32.mrf.mxu0  ;;  %v1542_v52 = vpop.f32.mrf.mxu1 }
 0x12b   : > { %v21096_v43 = vpop.f32.mrf.mxu0  ;;  %v1544_v38 = vpop.f32.mrf.mxu1 }
 0x12d   : > { %v21112_v58 = vpop.f32.mrf.mxu1 }
 0x135   : > { %v1185_v45 = vpop.f32.mrf.mxu0 }
 0x136   : > { %v21100_v47 = vadd.f32 %v1530_v39, %v1185_v45  ;;  %v1977_v39 = vrot.slane %v21062_v10, %v27609_v6 }
 0x137   : > { %v1187_v48 = vpop.f32.mrf.mxu0  ;;  %v1864_v60 = vpop.f32.mrf.mxu1 }
 0x138   : > { %v21102_v49 = vadd.f32 %v1532_v36, %v1187_v48 }
 0x139   : > { %v21104_v50 = vpop.f32.mrf.mxu0  ;;  %v1866_v61 = vpop.f32.mrf.mxu1 }
 0x13b   : > { %v21106_v53 = vpop.f32.mrf.mxu0  ;;  %v1868_v0 = vpop.f32.mrf.mxu1 }
 0x13d   : > { %v1195_v54 = vpop.f32.mrf.mxu0  ;;  %v1870_v11 = vpop.f32.mrf.mxu1 }
 0x13e   : > { %v21108_v55 = vadd.f32 %v1540_v46, %v1195_v54 }
 0x13f   : > { %v1197_v56 = vpop.f32.mrf.mxu0  ;;  %v1874_v36 = vpop.f32.mrf.mxu1 }
 0x140   : > { %v21110_v57 = vadd.f32 %v1542_v52, %v1197_v56 }
 0x141   : > { %v1199_v51 = vpop.f32.mrf.mxu0 }
 0x142   : > { %v21114_v59 = vadd.f32 %v1544_v38, %v1199_v51 }
 0x143   : > { %v21116_v62 = vpop.f32.mrf.mxu0 }
 0x14d   : > { %v1477_v1 = vpop.f32.mrf.mxu0 }
 0x14e   : > { %v1478_v3 = vadd.f32 %v1477_v1, %v1132_v31 }
 0x14f   : > { %v1479_v5 = vpop.f32.mrf.mxu0 }
 0x150   : > { %v1938_v13 = vadd.f32 %v1864_v60, %v1478_v3  ;;  %v1480_v14 = vadd.f32 %v1479_v5, %v1134_v32  ;;  %v1876_v32 = vpop.f32.mrf.mxu1 }
 0x151   : > { %v1481_v16 = vpop.f32.mrf.mxu0 }
 0x152   : > { %v1482_v17 = vadd.f32 %v1481_v16, %v1136_v33  ;;  %v1994_v27 = vadd.f32 %v1973_v4, %v1938_v13  ;;  %v1939_v28 = vadd.f32 %v1866_v61, %v1480_v14 }
 0x153   : > { %v1483_v31 = vpop.f32.mrf.mxu0 }
 0x154   : > { %v1944_v45 = vadd.f32 %v1868_v0, %v1482_v17  ;;  %v1484_v46 = vadd.f32 %v1483_v31, %v1138_v35  ;;  %v2047_v38 = vrot.slane %v1994_v27, 1  ;;  %v1995_v56 = vadd.f32 %v1977_v39, %v1939_v28  ;;  %v1878_v28 = vpop.f32.mrf.mxu1 }
 0x155   : > { %v1487_v48 = vpop.f32.mrf.mxu0  ;;  %v2138_v5 = vrot.slane %v1994_v27, 2 }
 0x156   : > { %v2000_v52 = vadd.f32 %v1973_v4, %v1944_v45  ;;  %v1488_v54 = vadd.f32 %v1487_v48, %v1142_v37  ;;  %v1945_v51 = vadd.f32 %v1870_v11, %v1484_v46  ;;  %v2050_v17 = vrot.slane %v1995_v56, 1 }
 0x157   : > { %v1489_v60 = vpop.f32.mrf.mxu0 }
 0x158   : > { %v2048_v33 = vrot.slane %v2000_v52, 1  ;;  %v2139_v61 = vrot.slane %v2000_v52, 2  ;;  %v1950_v1 = vadd.f32 %v1874_v36, %v1488_v54  ;;  %v1490_v3 = vadd.f32 %v1489_v60, %v1144_v40 }
 0x159   : > { %v2001_v13 = vadd.f32 %v1977_v39, %v1945_v51  ;;  %v1491_v14 = vpop.f32.mrf.mxu0  ;;  %v2141_v60 = vrot.slane %v1995_v56, 2 }
 0x15a   : > { %v21126_v16 = vadd.f32 %v1973_v4, %v1950_v1  ;;  %v1951_v35 = vadd.f32 %v1876_v32, %v1490_v3  ;;  %v1492_v0 = vadd.f32 %v1491_v14, %v1146_v41  ;;  %v2049_v37 = vsel %vm2040_vm2, %v2047_v38, %v2048_v33 }
 0x15b   : > { %v2051_v31 = vrot.slane %v2001_v13, 1  ;;  %v1493_v11 = vpop.f32.mrf.mxu0  ;;  %v2109_v45 = vmax.f32 %v1994_v27, %v2049_v37  ;;  %v2140_v46 = vsel %vm2131_vm3, %v2138_v5, %v2139_v61  ;;  %v2142_v54 = vrot.slane %v2001_v13, 2  ;;  %v1880_v5 = vpop.f32.mrf.mxu1 }
 0x15c   : > { %v2063_v48 = vrot.slane %v21126_v16, 1  ;;  %v21131_v36 = vadd.f32 %v1977_v39, %v1951_v35  ;;  %v1956_v40 = vadd.f32 %v1878_v28, %v1492_v0  ;;  %v2154_v51 = vrot.slane %v21126_v16, 2 }
 0x15d   : > { %v1494_v32 = vadd.f32 %v1493_v11, %v21096_v43  ;;  %v21135_v41 = vmax.f32 %v2109_v45, %v2140_v46  ;;  %v2052_v38 = vsel %vm2040_vm2, %v2050_v17, %v2051_v31  ;;  %v2143_v14 = vsel %vm2131_vm3, %v2141_v60, %v2142_v54 }
 0x15e   : > { %v2065_v1 = vrot.slane %v21131_v36, 1  ;;  %v21139_v27 = vadd.f32 %v1973_v4, %v1956_v40  ;;  %v2110_v3 = vmax.f32 %v1995_v56, %v2052_v38  ;;  %v2064_v43 = vsel %vm2040_vm2, %v2048_v33, %v2063_v48 }
 0x15f   : > { %2367 = vrot.lane.b32.xlu1 %v21135_v41, %s27598_s3  ;;  %2250 = vrot.lane.b32.xlu0 %v21135_v41, %s20469_s5  ;;  %v2115_v35 = vmax.f32 %v2000_v52, %v2064_v43  ;;  %v1957_v0 = vadd.f32 %v1880_v5, %v1494_v32  ;;  %v2155_v4 = vsel %vm2131_vm3, %v2139_v61, %v2154_v51  ;;  %v21159_v33 = vsub.s32 0, %v21057_v9 }
 0x160   : > { %v21147_v37 = vmax.f32 %v2110_v3, %v2143_v14  ;;  %v2066_v17 = vsel %vm2040_vm2, %v2051_v31, %v2065_v1  ;;  %v2075_v28 = vrot.slane %v21139_v27, 1  ;;  %v2156_v52 = vrot.slane %v21131_v36, 2 }
 0x161   : > { %v21152_v56 = vmax.f32 %v2115_v35, %v2155_v4  ;;  %v21164_v11 = vadd.f32 %v1977_v39, %v1957_v0  ;;  %v2116_v45 = vmax.f32 %v2001_v13, %v2066_v17  ;;  %v1965_v40 = vrot.slane %v21062_v10, %v21159_v33 }
 0x162   : > { %v2127_v46 = vmax.f32 %v21139_v27, %v2075_v28  ;;  %v1429_v38 = vadd.f32 %v21074_v20, %v21072_v19  ;;  %v21175_v60 = vsub.s32 1, %v21057_v9  ;;  %v2166_v39 = vrot.slane %v21139_v27, 2 }
 0x163   : > { %2252 = vrot.lane.b32.xlu0 %v21147_v37, %s20469_s5  ;;  %2262 = vrot.lane.b32.xlu1 %v21152_v56, %s20469_s5  ;;  %v2077_v43 = vrot.slane %v21164_v11, 1  ;;  %v2076_v5 = vsel %vm2040_vm2, %v2063_v48, %v2075_v28  ;;  %v1435_v14 = vadd.f32 %v21082_v24, %v21080_v23  ;;  %v1431_v0 = vadd.f32 %v21078_v22, %v21076_v21 }
 0x164   : > { %v21187_v20 = vmax.f32 %v2127_v46, %v2166_v39  ;;  %v21200_v35 = vrot.slane %v21062_v10, %v21175_v60  ;;  %v2121_v17 = vmax.f32 %v21126_v16, %v2076_v5  ;;  %v1437_v23 = vadd.f32 %v21086_v26, %v21084_v25 }
 0x165   : > { %v1811_v61 = vpop.f32.mrf.mxu0  ;;  %v2128_v28 = vmax.f32 %v21164_v11, %v2077_v43  ;;  %v2167_v21 = vsel %vm2131_vm3, %v2154_v51, %v2166_v39  ;;  %v2168_v22 = vrot.slane %v21164_v11, 2 }
 0x166   : > { %v1936_v31 = vadd.f32 %v1811_v61, %v21068_v15  ;;  %v2157_v15 = vsel %vm2131_vm3, %v2142_v54, %v2156_v52  ;;  %v2078_v61 = vsel %vm2040_vm2, %v2065_v1, %v2077_v43  ;;  %v21220_v43 = vmax.f32 %v2121_v17, %v2167_v21 }
 0x167   : > { %v1813_v32 = vpop.f32.mrf.mxu0  ;;  %2369 = vrot.lane.b32.xlu0 %v21147_v37, %s27598_s3  ;;  %2379 = vrot.lane.b32.xlu1 %v21152_v56, %s27598_s3  ;;  %v21183_v3 = vmax.f32 %v2116_v45, %v2157_v15  ;;  %v2122_v25 = vmax.f32 %v21131_v36, %v2078_v61  ;;  %v1980_v21 = vsub.s32 4, %v21057_v9 }
 0x168   : > { %v1992_v54 = vadd.f32 %v1965_v40, %v1936_v31 }
 0x169   : > { %v1815_v13 = vpop.f32.mrf.mxu0 }
 0x16a   : > { %v1942_v19 = vadd.f32 %v1815_v13, %v1429_v38  ;;  %v2041_v46 = vrot.slane %v1992_v54, 1  ;;  %v2132_v31 = vrot.slane %v1992_v54, 2 }
 0x16b   : > { %v1817_v27 = vpop.f32.mrf.mxu0  ;;  %2264 = vrot.lane.b32.xlu0 %v21183_v3, %s20469_s5  ;;  %2286 = vrot.lane.b32.xlu1 %v21187_v20, %s20469_s5 }
 0x16c   : > { %v1998_v48 = vadd.f32 %v1965_v40, %v1942_v19  ;;  %v1943_v15 = vadd.f32 %v1817_v27, %v1431_v0  ;;  %v21222_v19 = vmax.f32 %v2128_v28, %v2168_v22  ;;  %v1937_v0 = vadd.f32 %v1813_v32, %v21070_v18  ;;  %v18394_v28 = vld [vmem:[%s27649_s26 + $0xe0] ss:$16 sps:$4 sm:$0xff]  }
 0x16d   : > { %v1821_v4 = vpop.f32.mrf.mxu0 }
 0x16e   : > { %v2042_v24 = vrot.slane %v1998_v48, 1  ;;  %v2133_v10 = vrot.slane %v1998_v48, 2  ;;  %v1948_v45 = vadd.f32 %v1821_v4, %v1435_v14  ;;  %v18396_v14 = vld [vmem:[%s27648_s30 + $0xe4] ss:$16 sps:$4 sm:$0xff]   ;;  %v2169_v4 = vsel %vm2131_vm3, %v2156_v52, %v2168_v22  ;;  %s27652_s30 = sld [smem:[#allocation45_spill]] }
 0x16f   : > { %v1823_v38 = vpop.f32.mrf.mxu0  ;;  %2381 = vrot.lane.b32.xlu0 %v21183_v3, %s27598_s3  ;;  %2403 = vrot.lane.b32.xlu1 %v21187_v20, %s27598_s3  ;;  %v21249_v18 = vmax.f32 %v2122_v25, %v2169_v4 }
 0x170   : > { %v2004_v1 = vadd.f32 %v1965_v40, %v1948_v45  ;;  %v1949_v13 = vadd.f32 %v1823_v38, %v1437_v23  ;;  %v2043_v5 = vsel %vm2040_vm2, %v2041_v46, %v2042_v24  ;;  %v2134_v16 = vsel %vm2131_vm3, %v2132_v31, %v2133_v10  ;;  %4057 = vmatprep.subr.bf16.mxu1 %v18396_v14  ;;  %v18399_v46 = vld [vmem:[%s27649_s26 + $0xc4] ss:$16 sps:$4 sm:$0xff]   ;;  %v18409_v14 = vld [vmem:[%s27649_s26 + $0x80] ss:$16 sps:$4 sm:$0xff]  }
 0x171   : > { %v1825_v26 = vpop.f32.mrf.mxu0  ;;  %v2107_v17 = vmax.f32 %v1992_v54, %v2043_v5  ;;  %4058 = vmatpush1.bf16.msra.mxu1 %v18394_v28  ;;  %v21273_v31 = vadd.f32 %v21200_v35, %v1937_v0  ;;  %v18411_v0 = vld [vmem:[%s27649_s26 + $0x84] ss:$16 sps:$4 sm:$0xff]  }
 0x172   : > { %v2059_v51 = vrot.slane %v2004_v1, 1  ;;  %v2150_v39 = vrot.slane %v2004_v1, 2  ;;  %v21227_v11 = vadd.f32 %v21200_v35, %v1949_v13  ;;  %v1954_v27 = vadd.f32 %v1825_v26, %v21088_v29  ;;  %4059 = vmatprep.subr.bf16.mxu1 %v18399_v46  ;;  %v18405_v13 = vld [vmem:[%s27649_s26 + $0xa4] ss:$16 sps:$4 sm:$0xff]  }
 0x173   : > { %2288 = vrot.lane.b32.xlu0 %v21222_v19, %s20469_s5  ;;  %v21243_v29 = vadd.f32 %v21200_v35, %v1943_v15  ;;  %2274 = vrot.lane.b32.xlu1 %v21220_v43, %s20469_s5  ;;  %v21254_v54 = vmax.f32 %v2107_v17, %v2134_v16  ;;  %v18403_v15 = vld [vmem:[%s27649_s26 + $0xa0] ss:$16 sps:$4 sm:$0xff]   ;;  %v2044_v4 = vrot.slane %v21273_v31, 1  ;;  %v18414_v28 = vld [vmem:[%s27649_s26 + $0x2a4] ss:$16 sps:$4 sm:$0xff]  }
 0x174   : > { %v21245_v61 = vadd.f32 %v1965_v40, %v1954_v27  ;;  %v2061_v36 = vrot.slane %v21227_v11, 1  ;;  %v2060_v52 = vsel %vm2040_vm2, %v2042_v24, %v2059_v51  ;;  %v2151_v32 = vsel %vm2131_vm3, %v2133_v10, %v2150_v39  ;;  %v18397_v40 = vld [vmem:[%s27649_s26 + $0xc0] ss:$16 sps:$4 sm:$0xff]   ;;  %v21297_v27 = vpop.f32.mrf.mxu0  ;;  %s27653_s8 = smov %s27652_s30 }
 0x175   : > { %v2113_v45 = vmax.f32 %v1998_v48, %v2060_v52  ;;  %v18400_v10 = vld [vmem:[%s27649_s26 + $0x2e0] ss:$16 sps:$4 sm:$0xff]   ;;  %v18402_v48 = vld [vmem:[%s27649_s26 + $0x2e4] ss:$16 sps:$4 sm:$0xff]   ;;  %v2045_v25 = vrot.slane %v21243_v29, 1  ;;  %4060 = vmatpush1.bf16.msra.mxu1 %v18397_v40  ;;  %v2152_v52 = vrot.slane %v21227_v11, 2 }
 0x176   : > { %v2071_v23 = vrot.slane %v21245_v61, 1  ;;  %v2162_v24 = vrot.slane %v21245_v61, 2  ;;  %4110 = vmatprep.subr.bf16.mxu0 %v18402_v48  ;;  %v18406_v16 = vld [vmem:[%s27649_s26 + $0x2c0] ss:$16 sps:$4 sm:$0xff]   ;;  %4061 = vmatprep.subr.bf16.mxu1 %v18405_v13 }
 0x177   : > { %2276 = vrot.lane.b32.xlu0 %v21249_v18, %s20469_s5  ;;  %2391 = vrot.lane.b32.xlu1 %v21220_v43, %s27598_s3  ;;  %v21277_v38 = vmax.f32 %v2113_v45, %v2151_v32  ;;  %v18412_v17 = vld [vmem:[%s27649_s26 + $0x2a0] ss:$16 sps:$4 sm:$0xff]   ;;  %v2046_v48 = vsel %vm2040_vm2, %v2044_v4, %v2045_v25 }
 0x178   : > { %v2072_v22 = vsel %vm2040_vm2, %v2059_v51, %v2071_v23  ;;  %v2163_v5 = vsel %vm2131_vm3, %v2150_v39, %v2162_v24  ;;  %v18408_v51 = vld [vmem:[%s27649_s26 + $0x2c4] ss:$16 sps:$4 sm:$0xff]   ;;  %4111 = vmatpush1.bf16.msra.mxu0 %v18400_v10 }
 0x179   : > { %v2119_v26 = vmax.f32 %v2004_v1, %v2072_v22  ;;  %v2062_v1 = vsel %vm2040_vm2, %v2045_v25, %v2061_v36  ;;  %4112 = vmatprep.subr.bf16.mxu0 %v18408_v51  ;;  %v20362_v45 = vld [vmem:[%s27647_s9] sm:$0x3f]  ;;  %4062 = vmatpush1.bf16.msra.mxu1 %v18403_v15  ;;  %v2136_v22 = vrot.slane %v21243_v29, 2  ;;  %v1537_v15 = vadd.f32 %v21098_v44, %v21106_v53  ;;  %s27709_s9 = sld [smem:[#allocation51_spill]] }
 0x17a   : > { %v21325_v40 = vrot.slane %v20362_v45, %v1980_v21  ;;  %v2114_v10 = vmax.f32 %v21243_v29, %v2062_v1  ;;  %4063 = vmatprep.subr.bf16.mxu1 %v18411_v0  ;;  %v1535_v21 = vadd.f32 %v21094_v42, %v21104_v50  ;;  %v2108_v42 = vmax.f32 %v21273_v31, %v2046_v48  ;;  %v18418_v1 = vld [vmem:[%s27649_s26 + $0x280] ss:$16 sps:$4 sm:$0xff]  }
 0x17b   : > { %2393 = vrot.lane.b32.xlu0 %v21249_v18, %s27598_s3  ;;  %v21304_v39 = vmax.f32 %v2119_v26, %v2163_v5  ;;  %2258 = vrot.lane.b32.xlu1 %v21277_v38, %s20469_s5  ;;  %v2153_v26 = vsel %vm2131_vm3, %v2136_v22, %v2152_v52  ;;  %v2125_v5 = vmax.f32 %v21245_v61, %v2071_v23  ;;  %v2135_v44 = vrot.slane %v21273_v31, 2  ;;  %v18420_v23 = vld [vmem:[%s27649_s26 + $0x284] ss:$16 sps:$4 sm:$0xff]   ;;  %v18415_v31 = vld [vmem:[%s27649_s26 + $0x60] ss:$16 sps:$4 sm:$0xff]  }
 0x17c   : > { %4113 = vmatpush1.bf16.msra.mxu0 %v18406_v16  ;;  %v21352_v53 = vmax.f32 %v2114_v10, %v2153_v26  ;;  %v18417_v16 = vld [vmem:[%s27649_s26 + $0x64] ss:$16 sps:$4 sm:$0xff]  }
 0x17d   : > { %v1917_v32 = vpop.f32.mrf.mxu0  ;;  %4114 = vmatprep.subr.bf16.mxu0 %v18414_v28  ;;  %4064 = vmatpush1.bf16.msra.mxu1 %v18409_v14  ;;  %v2137_v4 = vsel %vm2131_vm3, %v2135_v44, %v2136_v22  ;;  %v21379_v45 = vmax.f32 %v2125_v5, %v2162_v24  ;;  %v18426_v61 = vld [vmem:[%s27649_s26 + $0x264] ss:$16 sps:$4 sm:$0xff]   ;;  %v1547_v24 = vadd.f32 %v21112_v58, %v21116_v62 }
 0x17e   : > { %v1940_v46 = vadd.f32 %v1917_v32, %v21100_v47  ;;  %4065 = vmatprep.subr.bf16.mxu1 %v18417_v16 }
 0x17f   : > { %v1919_v13 = vpop.f32.mrf.mxu0  ;;  %2246 = vrot.lane.b32.xlu0 %v21254_v54, %s20469_s5  ;;  %2375 = vrot.lane.b32.xlu1 %v21277_v38, %s27598_s3 }
 0x180   : > { %v1941_v47 = vadd.f32 %v1919_v13, %v21102_v49  ;;  %v21341_v25 = vadd.f32 %v21325_v40, %v1940_v46  ;;  %4115 = vmatpush1.bf16.msra.mxu0 %v18412_v17  ;;  %v1441_v17 = vadd.f32 %v21092_v34, %v21090_v30  ;;  %v21381_v46 = vmax.f32 %v2108_v42, %v2137_v4  ;;  %v18423_v34 = vld [vmem:[%s27649_s26 + $0x44] ss:$16 sps:$4 sm:$0xff]  }
 0x181   : > { %v1921_v29 = vpop.f32.mrf.mxu0  ;;  %4116 = vmatprep.subr.bf16.mxu0 %v18420_v23  ;;  %4066 = vmatpush1.bf16.msra.mxu1 %v18415_v31  ;;  %v18429_v31 = vld [vmem:[%s27649_s26 + $0x24] ss:$16 sps:$4 sm:$0xff]  }
 0x182   : > { %v21350_v49 = vadd.f32 %v21066_v12, %v1941_v47  ;;  %v1946_v50 = vadd.f32 %v1921_v29, %v1535_v21  ;;  %v2053_v28 = vrot.slane %v21341_v25, 1  ;;  %v1955_v13 = vadd.f32 %v21297_v27, %v1441_v17  ;;  %v18424_v47 = vld [vmem:[%s27649_s26 + $0x260] ss:$16 sps:$4 sm:$0xff]   ;;  %4067 = vmatprep.subr.bf16.mxu1 %v18423_v34 }
 0x183   : > { %v1923_v51 = vpop.f32.mrf.mxu0  ;;  %2363 = vrot.lane.b32.xlu0 %v21254_v54, %s27598_s3  ;;  %2260 = vrot.lane.b32.xlu1 %v21352_v53, %s20469_s5  ;;  %v2144_v21 = vrot.slane %v21341_v25, 2 }
 0x184   : > { %v21369_v14 = vadd.f32 %v21325_v40, %v1946_v50  ;;  %v1947_v0 = vadd.f32 %v1923_v51, %v1537_v15  ;;  %4117 = vmatpush1.bf16.msra.mxu0 %v18418_v1  ;;  %v2056_v26 = vrot.slane %v21350_v49, 1  ;;  %v2147_v5 = vrot.slane %v21350_v49, 2  ;;  %v18432_v1 = vld [vmem:[%s27649_s26 + $0x244] ss:$16 sps:$4 sm:$0xff]  }
 0x185   : > { %v1927_v32 = vpop.f32.mrf.mxu0  ;;  %4118 = vmatprep.subr.bf16.mxu0 %v18426_v61 }
 0x186   : > { %v2054_v10 = vrot.slane %v21369_v14, 1  ;;  %v2145_v48 = vrot.slane %v21369_v14, 2  ;;  %v21386_v22 = vadd.f32 %v21066_v12, %v1947_v0  ;;  %v1952_v30 = vadd.f32 %v1927_v32, %v21108_v55  ;;  %v18421_v55 = vld [vmem:[%s27649_s26 + $0x40] ss:$16 sps:$4 sm:$0xff]  }
 0x187   : > { %v1929_v15 = vpop.f32.mrf.mxu0  ;;  %2248 = vrot.lane.b32.xlu0 %v21381_v46, %s20469_s5  ;;  %2282 = vrot.lane.b32.xlu1 %v21379_v45, %s20469_s5  ;;  %v21432_v0 = vadd.f32 %v21200_v35, %v1955_v13  ;;  %v18427_v32 = vld [vmem:[%s27649_s26 + $0x20] ss:$16 sps:$4 sm:$0xff]  }
 0x188   : > { %v2057_v29 = vrot.slane %v21386_v22, 1  ;;  %v2148_v58 = vrot.slane %v21386_v22, 2  ;;  %v21410_v62 = vadd.f32 %v21325_v40, %v1952_v30  ;;  %v1953_v27 = vadd.f32 %v1929_v15, %v21110_v57  ;;  %4068 = vmatpush1.bf16.msra.mxu1 %v18421_v55  ;;  %4119 = vmatpush1.bf16.msra.mxu0 %v18424_v47  ;;  %v18430_v30 = vld [vmem:[%s27649_s26 + $0x240] ss:$16 sps:$4 sm:$0xff]  }
 0x189   : > { %v1931_v42 = vpop.f32.mrf.mxu0  ;;  %v2055_v44 = vsel %vm2040_vm2, %v2053_v28, %v2054_v10  ;;  %v2146_v50 = vsel %vm2131_vm3, %v2144_v21, %v2145_v48  ;;  %4069 = vmatprep.subr.bf16.mxu1 %v18429_v31  ;;  %4120 = vmatprep.subr.bf16.mxu0 %v18432_v1 }
 0x18a   : > { %v2067_v16 = vrot.slane %v21410_v62, 1  ;;  %v2158_v23 = vrot.slane %v21410_v62, 2  ;;  %v21422_v57 = vadd.f32 %v21066_v12, %v1953_v27  ;;  %v1958_v51 = vadd.f32 %v1931_v42, %v21114_v59 }
 0x18b   : > { %v1933_v4 = vpop.f32.mrf.mxu0  ;;  %2365 = vrot.lane.b32.xlu0 %v21381_v46, %s27598_s3  ;;  %v2111_v17 = vmax.f32 %v21341_v25, %v2055_v44  ;;  %v2058_v59 = vsel %vm2040_vm2, %v2056_v26, %v2057_v29  ;;  %v2149_v28 = vsel %vm2131_vm3, %v2147_v5, %v2148_v58  ;;  %2399 = vrot.lane.b32.xlu1 %v21379_v45, %s27598_s3  ;;  %v18436_v26 = vld [vmem:[%s27649_s26 + $0x220] ss:$16 sps:$4 sm:$0xff]   ;;  %v18438_v5 = vld [vmem:[%s27649_s26 + $0x224] ss:$16 sps:$4 sm:$0xff]   ;;  %v2073_v44 = vrot.slane %v21432_v0, 1 }
 0x18c   : > { %v2069_v35 = vrot.slane %v21422_v57, 1  ;;  %v2160_v34 = vrot.slane %v21422_v57, 2  ;;  %v21448_v61 = vadd.f32 %v21325_v40, %v1958_v51  ;;  %v1959_v25 = vadd.f32 %v1933_v4, %v1547_v24  ;;  %4070 = vmatpush1.bf16.msra.mxu1 %v18427_v32  ;;  %4121 = vmatpush1.bf16.msra.mxu0 %v18430_v30 }
 0x18d   : > { %v21452_v13 = vmax.f32 %v2111_v17, %v2146_v50  ;;  %v2068_v21 = vsel %vm2040_vm2, %v2054_v10, %v2067_v16  ;;  %v2159_v15 = vsel %vm2131_vm3, %v2145_v48, %v2158_v23  ;;  %v2112_v55 = vmax.f32 %v21350_v49, %v2058_v59  ;;  %v18433_v10 = vld [vmem:[%s27649_s26] ss:$16 sps:$4 sm:$0xff]   ;;  %v18435_v49 = vld [vmem:[%s27649_s26 + $0x4] ss:$16 sps:$4 sm:$0xff]   ;;  %4122 = vmatprep.subr.bf16.mxu0 %v18438_v5 }
 0x18e   : > { %v2079_v47 = vrot.slane %v21448_v61, 1  ;;  %v21459_v27 = vadd.f32 %v21066_v12, %v1959_v25  ;;  %v2117_v40 = vmax.f32 %v21369_v14, %v2068_v21  ;;  %v2170_v24 = vrot.slane %v21448_v61, 2  ;;  %4071 = vmatprep.subr.bf16.mxu1 %v18435_v49  ;;  %v18439_v17 = vld [vmem:[%s27649_s26 + $0x1e0] ss:$16 sps:$4 sm:$0xff]   ;;  %v18447_v25 = vld [vmem:[%s27649_s26 + $0x1c4] ss:$16 sps:$4 sm:$0xff]  }
 0x18f   : > { %2377 = vrot.lane.b32.xlu0 %v21352_v53, %s27598_s3  ;;  %v2070_v12 = vsel %vm2040_vm2, %v2057_v29, %v2069_v35  ;;  %v2161_v48 = vsel %vm2131_vm3, %v2148_v58, %v2160_v34  ;;  %v21473_v14 = vmax.f32 %v2112_v55, %v2149_v28  ;;  %2254 = vrot.lane.b32.xlu1 %v21452_v13, %s20469_s5  ;;  %v18442_v59 = vld [vmem:[%s27649_s26 + $0x200] ss:$16 sps:$4 sm:$0xff]   ;;  %v18456_v49 = vld [vmem:[%s27649_s26 + $0x3c4] ss:$16 sps:$4 sm:$0xff]  }
 0x190   : > { %v21483_v42 = vmax.f32 %v2117_v40, %v2159_v15  ;;  %v2080_v29 = vsel %vm2040_vm2, %v2067_v16, %v2079_v47  ;;  %v2171_v58 = vsel %vm2131_vm3, %v2158_v23, %v2170_v24  ;;  %v2118_v51 = vmax.f32 %v21386_v22, %v2070_v12  ;;  %4072 = vmatpush1.bf16.msra.mxu1 %v18433_v10  ;;  %v18441_v16 = vld [vmem:[%s27649_s26 + $0x1e4] ss:$16 sps:$4 sm:$0xff]   ;;  %v18445_v21 = vld [vmem:[%s27649_s26 + $0x1c0] ss:$16 sps:$4 sm:$0xff]  }
 0x191   : > { %v2123_v50 = vmax.f32 %v21410_v62, %v2080_v29  ;;  %v2081_v31 = vrot.slane %v21459_v27, 1  ;;  %v2172_v1 = vrot.slane %v21459_v27, 2  ;;  %4123 = vmatpush1.bf16.msra.mxu0 %v18436_v26  ;;  %v18444_v23 = vld [vmem:[%s27649_s26 + $0x204] ss:$16 sps:$4 sm:$0xff]   ;;  %4073 = vmatprep.subr.bf16.mxu1 %v18441_v16  ;;  %v2126_v30 = vmax.f32 %v21432_v0, %v2073_v44  ;;  %v18448_v15 = vld [vmem:[%s27649_s26 + $0x3e0] ss:$16 sps:$4 sm:$0xff]  }
 0x192   : > { %v21504_v62 = vmax.f32 %v2118_v51, %v2161_v48  ;;  %4124 = vmatprep.subr.bf16.mxu0 %v18444_v23  ;;  %v18451_v55 = vld [vmem:[%s27649_s26 + $0x1a0] ss:$16 sps:$4 sm:$0xff]   ;;  %v2129_v12 = vmax.f32 %v21448_v61, %v2079_v47  ;;  %v2074_v48 = vsel %vm2040_vm2, %v2061_v36, %v2073_v44  ;;  %v18459_v36 = vld [vmem:[%s27649_s26 + $0x184] ss:$16 sps:$4 sm:$0xff]  }
 0x193   : > { %2270 = vrot.lane.b32.xlu0 %v21304_v39, %s20469_s5  ;;  %v21502_v22 = vmax.f32 %v2123_v50, %v2171_v58  ;;  %v2082_v4 = vsel %vm2040_vm2, %v2069_v35, %v2081_v31  ;;  %2371 = vrot.lane.b32.xlu1 %v21452_v13, %s27598_s3  ;;  %v2173_v32 = vsel %vm2131_vm3, %v2160_v34, %v2172_v1  ;;  %v2164_v34 = vrot.slane %v21432_v0, 2  ;;  %v18453_v0 = vld [vmem:[%s27649_s26 + $0x1a4] ss:$16 sps:$4 sm:$0xff]   ;;  %v18454_v40 = vld [vmem:[%s27649_s26 + $0x3c0] ss:$16 sps:$4 sm:$0xff]  }
 0x194   : > { %v2124_v28 = vmax.f32 %v21422_v57, %v2082_v4  ;;  %4074 = vmatpush2.bf16.msra.mxu1 %v18439_v17  ;;  %v18450_v57 = vld [vmem:[%s27649_s26 + $0x3e4] ss:$16 sps:$4 sm:$0xff]   ;;  %v2120_v26 = vmax.f32 %v21227_v11, %v2074_v48  ;;  %v21566_v5 = vmax.f32 %v2129_v12, %v2170_v24  ;;  %v18457_v44 = vld [vmem:[%s27649_s26 + $0x180] ss:$16 sps:$4 sm:$0xff]  }
 0x195   : > { %4125 = vmatpush1.bf16.msra.mxu0 %v18442_v59  ;;  %4075 = vmatprep.subr.bf16.mxu1 %v18447_v25  ;;  %v21550_v10 = vmax.f32 %v2126_v30, %v2164_v34  ;;  %v18462_v47 = vld [vmem:[%s27649_s26 + $0x3a4] ss:$16 sps:$4 sm:$0xff]   ;;  %v18460_v61 = vld [vmem:[%s27649_s26 + $0x3a0] ss:$16 sps:$4 sm:$0xff]   ;;  %v2165_v24 = vsel %vm2131_vm3, %v2152_v52, %v2164_v34 }
 0x196   : > { %v21522_v35 = vmax.f32 %v2124_v28, %v2173_v32  ;;  %4126 = vmatprep.subr.bf16.mxu0 %v18450_v57  ;;  %v21587_v29 = vmax.f32 %v2120_v26, %v2165_v24  ;;  %v18465_v58 = vld [vmem:[%s27649_s26 + $0x164] ss:$16 sps:$4 sm:$0xff]   ;;  %v18463_v11 = vld [vmem:[%s27649_s26 + $0x160] ss:$16 sps:$4 sm:$0xff]  }
 0x197   : > { %2387 = vrot.lane.b32.xlu0 %v21304_v39, %s27598_s3  ;;  %2266 = vrot.lane.b32.xlu1 %v21483_v42, %s20469_s5  ;;  %v18468_v50 = vld [vmem:[%s27649_s26 + $0x384] ss:$16 sps:$4 sm:$0xff]   ;;  %v18466_v52 = vld [vmem:[%s27649_s26 + $0x380] ss:$16 sps:$4 sm:$0xff]  }
 0x198   : > { %4076 = vmatpush2.bf16.msra.mxu1 %v18445_v21  ;;  %v18471_v51 = vld [vmem:[%s27649_s26 + $0x144] ss:$16 sps:$4 sm:$0xff]   ;;  %v18469_v23 = vld [vmem:[%s27649_s26 + $0x140] ss:$16 sps:$4 sm:$0xff]   ;;  %v2130_v21 = vmax.f32 %v21459_v27, %v2081_v31 }
 0x199   : > { %4127 = vmatpush2.bf16.msra.mxu0 %v18448_v15  ;;  %4077 = vmatprep.subr.bf16.mxu1 %v18453_v0  ;;  %v18474_v16 = vld [vmem:[%s27649_s26 + $0x364] ss:$16 sps:$4 sm:$0xff]   ;;  %v18472_v4 = vld [vmem:[%s27649_s26 + $0x360] ss:$16 sps:$4 sm:$0xff]  }
 0x19a   : > { %4128 = vmatprep.subr.bf16.mxu0 %v18456_v49  ;;  %v18477_v17 = vld [vmem:[%s27649_s26 + $0x124] ss:$16 sps:$4 sm:$0xff]   ;;  %v18475_v28 = vld [vmem:[%s27649_s26 + $0x120] ss:$16 sps:$4 sm:$0xff]   ;;  %v21671_v31 = vmax.f32 %v2130_v21, %v2172_v1 }
 0x19b   : > { %2284 = vrot.lane.b32.xlu0 %v21550_v10, %s20469_s5  ;;  %2383 = vrot.lane.b32.xlu1 %v21483_v42, %s27650_s0  ;;  %v18480_v59 = vld [vmem:[%s27649_s26 + $0x344] ss:$16 sps:$4 sm:$0xff]   ;;  %v18478_v32 = vld [vmem:[%s27649_s26 + $0x340] ss:$16 sps:$4 sm:$0xff]  }
 0x19c   : > { %4078 = vmatpush2.bf16.msra.mxu1 %v18451_v55  ;;  %v18483_v30 = vld [vmem:[%s27649_s26 + $0x104] ss:$16 sps:$4 sm:$0xff]   ;;  %v18481_v57 = vld [vmem:[%s27649_s26 + $0x100] ss:$16 sps:$4 sm:$0xff]  }
 0x19d   : > { %4129 = vmatpush2.bf16.msra.mxu0 %v18454_v40  ;;  %4079 = vmatprep.subr.bf16.mxu1 %v18459_v36  ;;  %v18486_v25 = vld [vmem:[%s27649_s26 + $0x324] ss:$16 sps:$4 sm:$0xff]   ;;  %v18484_v34 = vld [vmem:[%s27649_s26 + $0x320] ss:$16 sps:$4 sm:$0xff]   ;;  %v18498_v40 = vld [vmem:[%s27649_s26 + $0xec] ss:$16 sps:$4 sm:$0xff]  }
 0x19e   : > { %4130 = vmatprep.subr.bf16.mxu0 %v18462_v47  ;;  %v18489_v15 = vld [vmem:[%s27649_s26 + $0x304] ss:$16 sps:$4 sm:$0xff]   ;;  %v18487_v0 = vld [vmem:[%s27649_s26 + $0x300] ss:$16 sps:$4 sm:$0xff]  }
 0x19f   : > { %2401 = vrot.lane.b32.xlu0 %v21550_v10, %s27650_s0  ;;  %2290 = vrot.lane.b32.xlu1 %v21566_v5, %s20469_s5  ;;  %v18492_v55 = vld [vmem:[%s27649_s26 + $0x4e4] ss:$16 sps:$4 sm:$0xff]  }
 0x1a0   : > { %4080 = vmatpush2.bf16.msra.mxu1 %v18457_v44 }
 0x1a1   : > { %4131 = vmatpush2.bf16.msra.mxu0 %v18460_v61  ;;  %4081 = vmatprep.subr.bf16.mxu1 %v18465_v58 }
 0x1a2   : > { %4132 = vmatprep.subr.bf16.mxu0 %v18468_v50 }
 0x1a3   : > { %2272 = vrot.lane.b32.xlu0 %v21587_v29, %s20469_s5  ;;  %2278 = vrot.lane.b32.xlu1 %v21502_v22, %s20469_s5 }
 0x1a4   : > { %4082 = vmatpush2.bf16.msra.mxu1 %v18463_v11 }
 0x1a5   : > { %4133 = vmatpush2.bf16.msra.mxu0 %v18466_v52  ;;  %4083 = vmatprep.subr.bf16.mxu1 %v18471_v51 }
 0x1a6   : > { %4134 = vmatprep.subr.bf16.mxu0 %v18474_v16 }
 0x1a7   : > { %2389 = vrot.lane.b32.xlu0 %v21587_v29, %s27650_s0  ;;  %2395 = vrot.lane.b32.xlu1 %v21502_v22, %s27650_s0 }
 0x1a8   : > { %4084 = vmatpush2.bf16.msra.mxu1 %v18469_v23 }
 0x1a9   : > { %4135 = vmatpush2.bf16.msra.mxu0 %v18472_v4  ;;  %4085 = vmatprep.subr.bf16.mxu1 %v18477_v17 }
 0x1aa   : > { %4136 = vmatprep.subr.bf16.mxu0 %v18480_v59 }
 0x1ab   : > { %2405 = vrot.lane.b32.xlu0 %v21222_v19, %s27650_s0  ;;  %2407 = vrot.lane.b32.xlu1 %v21566_v5, %s27650_s0 }
 0x1ac   : > { %4086 = vmatpush2.bf16.msra.mxu1 %v18475_v28 }
 0x1ad   : > { %4137 = vmatpush2.bf16.msra.mxu0 %v18478_v32  ;;  %4087 = vmatprep.subr.bf16.mxu1 %v18483_v30 }
 0x1ae   : > { %4138 = vmatprep.subr.bf16.mxu0 %v18486_v25 }
 0x1af   : > { %2256 = vrot.lane.b32.xlu0 %v21473_v14, %s20469_s5  ;;  %2268 = vrot.lane.b32.xlu1 %v21504_v62, %s20469_s5 }
 0x1b0   : > { %4088 = vmatpush2.bf16.msra.mxu1 %v18481_v57 }
 0x1b1   : > { %4139 = vmatpush2.bf16.msra.mxu0 %v18484_v34  ;;  %4163 = vmatprep.subr.bf16.mxu1 %v18492_v55 }
 0x1b2   : > { %4140 = vmatprep.subr.bf16.mxu0 %v18489_v15 }
 0x1b3   : > { %2373 = vrot.lane.b32.xlu0 %v21473_v14, %s27650_s0  ;;  %2385 = vrot.lane.b32.xlu1 %v21504_v62, %s27650_s0 }
 0x1b5   : > { %4141 = vmatpush2.bf16.msra.mxu0 %v18487_v0 }
 0x1b6   : > { %4216 = vmatprep.subr.bf16.mxu0 %v18498_v40 }
 0x1b7   : > { %2280 = vrot.lane.b32.xlu0 %v21522_v35, %s20469_s5  ;;  %2292 = vrot.lane.b32.xlu1 %v21671_v31, %s20469_s5  ;;  %s20470_s5 = smov 112  }
 0x1bb   : > { %2397 = vrot.lane.b32.xlu0 %v21522_v35, %s27650_s0  ;;  %2409 = vrot.lane.b32.xlu1 %v21671_v31, %s27650_s0  ;;  %s27614_s0 = smov 96  }
 0x1d1   : > { %v2368_v27 = vpop.permute.xlu1 %2367  ;;  %v2251_v1 = vpop.permute.xlu0 %2250 }
 0x1d5   : > { %v21684_v49 = vpop.permute.xlu0 %2252  ;;  %v2263_v48 = vpop.permute.xlu1 %2262 }
 0x1d6   : > { %v2297_v12 = vsel %vm2294_vm5, %v2251_v1, %v21684_v49 }
 0x1d7   : > { %v2341_v26 = vmax.f32 %v21135_v41, %v2297_v12 }
 0x1d9   : > { %v21689_v36 = vpop.permute.xlu0 %2369  ;;  %v2380_v44 = vpop.permute.xlu1 %2379 }
 0x1da   : > { %v2414_v47 = vsel %vm2411_vm6, %v2368_v27, %v21689_v36 }
 0x1db   : > { %v2458_v61 = vmax.f32 %v2341_v26, %v2414_v47 }
 0x1dd   : > { %v2482_v24 = vmax.f32 %v2458_v61, 0.0  ;;  %v21693_v58 = vpop.permute.xlu0 %2264  ;;  %v21697_v11 = vpop.permute.xlu1 %2286 }
 0x1de   : > { %v2302_v50 = vsel %vm2294_vm5, %v2263_v48, %v21693_v58 }
 0x1df   : > { %v2540_v52 = vrot.slane %v2482_v24, 7  ;;  %v2347_v51 = vmax.f32 %v21152_v56, %v2302_v50 }
 0x1e1   : > { %2606 = vst [vmem:[#allocation3 + $0x10] sm:$0xfe] %v2540_v52  ;;  %v21700_v41 = vpop.permute.xlu0 %2381  ;;  %v21704_v23 = vpop.permute.xlu1 %2403 }
 0x1e2   : > { %v2419_v16 = vsel %vm2411_vm6, %v2380_v44, %v21700_v41 }
 0x1e3   : > { %v2464_v4 = vmax.f32 %v2347_v51, %v2419_v16 }
 0x1e5   : > { %v2488_v17 = vmax.f32 %v2464_v4, 0.0  ;;  %v21706_v59 = vpop.permute.xlu0 %2288  ;;  %v21708_v28 = vpop.permute.xlu1 %2274 }
 0x1e7   : > { %v2548_v32 = vrot.slane %v2488_v17, 7 }
 0x1e9   : > { %v21711_v30 = vsel %vm2537_vm7, %v2540_v52, %v2548_v32  ;;  %v21713_v25 = vpop.permute.xlu0 %2276  ;;  %v21716_v56 = vpop.permute.xlu1 %2391 }
 0x1ea   : > { %2613 = vst [vmem:[#allocation3 + $0x40] sm:$0xff] %v21711_v30  ;;  %v2307_v57 = vsel %vm2294_vm5, %v21708_v28, %v21713_v25 }
 0x1eb   : > { %v2353_v34 = vmax.f32 %v21220_v43, %v2307_v57 }
 0x1ed   : > { %v21722_v21 = vpop.permute.xlu0 %2393  ;;  %v2259_v55 = vpop.permute.xlu1 %2258 }
 0x1ee   : > { %v2424_v15 = vsel %vm2411_vm6, %v21716_v56, %v21722_v21 }
 0x1ef   : > { %v2470_v0 = vmax.f32 %v2353_v34, %v2424_v15 }
 0x1f1   : > { %v2494_v40 = vmax.f32 %v2470_v0, 0.0  ;;  %v2247_v12 = vpop.permute.xlu0 %2246  ;;  %v2376_v26 = vpop.permute.xlu1 %2375 }
 0x1f3   : > { %v21727_v47 = vrot.slane %v2494_v40, 7 }
 0x1f5   : > { %v21731_v61 = vsel %vm2537_vm7, %v2548_v32, %v21727_v47  ;;  %v2364_v24 = vpop.permute.xlu0 %2363  ;;  %v2261_v43 = vpop.permute.xlu1 %2260 }
 0x1f6   : > { %2619 = vst [vmem:[#allocation3 + $0x70] sm:$0xff] %v21731_v61  ;;  %v2300_v34 = vsel %vm2294_vm5, %v2259_v55, %v2261_v43  ;;  %v2301_v40 = vsel %vm2294_vm5, %v2261_v43, %v2263_v48 }
 0x1f9   : > { %v2249_v50 = vpop.permute.xlu0 %2248  ;;  %v2283_v52 = vpop.permute.xlu1 %2282 }
 0x1fa   : > { %v2295_v51 = vsel %vm2294_vm5, %v2247_v12, %v2249_v50  ;;  %v2296_v16 = vsel %vm2294_vm5, %v2249_v50, %v2251_v1  ;;  %v2345_v12 = vmax.f32 %v21277_v38, %v2300_v34 }
 0x1fb   : > { %v2339_v4 = vmax.f32 %v21254_v54, %v2295_v51  ;;  %v2340_v17 = vmax.f32 %v21381_v46, %v2296_v16  ;;  %v2346_v54 = vmax.f32 %v21352_v53, %v2301_v40 }
 0x1fd   : > { %v2366_v57 = vpop.permute.xlu0 %2365  ;;  %v2400_v15 = vpop.permute.xlu1 %2399 }
 0x1fe   : > { %v2412_v32 = vsel %vm2411_vm6, %v2364_v24, %v2366_v57  ;;  %v2413_v0 = vsel %vm2411_vm6, %v2366_v57, %v2368_v27 }
 0x1ff   : > { %v2456_v2 = vmax.f32 %v2339_v4, %v2412_v32  ;;  %v2457_v8 = vmax.f32 %v2340_v17, %v2413_v0 }
 0x201   : > { %v2480_v7 = vmax.f32 %v2456_v2, 0.0  ;;  %v2481_v1 = vmax.f32 %v2457_v8, 0.0  ;;  %v2378_v50 = vpop.permute.xlu0 %2377  ;;  %v21744_v46 = vpop.permute.xlu1 %2254 }
 0x202   : > { %v2417_v55 = vsel %vm2411_vm6, %v2376_v26, %v2378_v50  ;;  %v2418_v51 = vsel %vm2411_vm6, %v2378_v50, %v2380_v44  ;;  %v2298_v27 = vsel %vm2294_vm5, %v21684_v49, %v21744_v46 }
 0x203   : > { %v2538_v24 = vrot.slane %v2480_v7, 7  ;;  %v2539_v16 = vrot.slane %v2481_v1, 7  ;;  %v2462_v48 = vmax.f32 %v2345_v12, %v2417_v55  ;;  %v2463_v43 = vmax.f32 %v2346_v54, %v2418_v51 }
 0x204   : > { %v2342_v38 = vmax.f32 %v21147_v37, %v2298_v27 }
 0x205   : > { %2604 = vst [vmem:[#allocation3] sm:$0xfe] %v2538_v24  ;;  %2605 = vst [vmem:[#allocation3 + $0x8] sm:$0xfe] %v2539_v16  ;;  %v2486_v2 = vmax.f32 %v2462_v48, 0.0  ;;  %v2271_v8 = vpop.permute.xlu0 %2270  ;;  %v2487_v53 = vmax.f32 %v2463_v43, 0.0  ;;  %v21752_v4 = vpop.permute.xlu1 %2371 }
 0x206   : > { %v2415_v7 = vsel %vm2411_vm6, %v21689_v36, %v21752_v4 }
 0x207   : > { %v21754_v26 = vrot.slane %v2486_v2, 7  ;;  %v21759_v44 = vrot.slane %v2487_v53, 7  ;;  %v2459_v49 = vmax.f32 %v2342_v38, %v2415_v7 }
 0x209   : > { %v2545_v17 = vsel %vm2537_vm7, %v2538_v24, %v21754_v26  ;;  %v2388_v57 = vpop.permute.xlu0 %2387  ;;  %v2547_v34 = vsel %vm2537_vm7, %v2539_v16, %v21759_v44  ;;  %v2483_v37 = vmax.f32 %v2459_v49, 0.0  ;;  %v21765_v32 = vpop.permute.xlu1 %2266 }
 0x20a   : > { %2611 = vst [vmem:[#allocation3 + $0x30] sm:$0xff] %v2545_v17  ;;  %2612 = vst [vmem:[#allocation3 + $0x38] sm:$0xff] %v2547_v34  ;;  %v2303_v0 = vsel %vm2294_vm5, %v21693_v58, %v21765_v32 }
 0x20b   : > { %v2541_v36 = vrot.slane %v2483_v37, 7  ;;  %v2348_v12 = vmax.f32 %v21183_v3, %v2303_v0  ;;  %v2848_v0 = vld [vmem:[#allocation3 + $0x10] sm:$0xfe] }
 0x20c   : > { %v2847_v37 = vld [vmem:[#allocation3 + $0x8] sm:$0xfe] }
 0x20d   : > { %v2285_v40 = vpop.permute.xlu0 %2284  ;;  %2607 = vst [vmem:[#allocation3 + $0x18] sm:$0xfe] %v2541_v36  ;;  %v21771_v1 = vpop.permute.xlu1 %2383 }
 0x20e   : > { %v2420_v50 = vsel %vm2411_vm6, %v21700_v41, %v21771_v1  ;;  %v2310_v55 = vsel %vm2294_vm5, %v2283_v52, %v2285_v40  ;;  %v2311_v51 = vsel %vm2294_vm5, %v2285_v40, %v21697_v11 }
 0x20f   : > { %v2465_v54 = vmax.f32 %v2348_v12, %v2420_v50  ;;  %v2357_v3 = vmax.f32 %v21379_v45, %v2310_v55  ;;  %v2358_v41 = vmax.f32 %v21550_v10, %v2311_v51  ;;  %v2312_v10 = vsel %vm2294_vm5, %v21697_v11, %v21706_v59  ;;  %v2846_v50 = vld [vmem:[#allocation3] sm:$0xfe] }
 0x211   : > { %v2402_v24 = vpop.permute.xlu0 %2401  ;;  %v2489_v16 = vmax.f32 %v2465_v54, 0.0  ;;  %v21779_v58 = vpop.permute.xlu1 %2290 }
 0x212   : > { %v2427_v27 = vsel %vm2411_vm6, %v2400_v15, %v2402_v24  ;;  %v2428_v48 = vsel %vm2411_vm6, %v2402_v24, %v21704_v23 }
 0x213   : > { %v2550_v43 = vrot.slane %v2489_v16, 7  ;;  %v2474_v2 = vmax.f32 %v2357_v3, %v2427_v27  ;;  %v2475_v53 = vmax.f32 %v2358_v41, %v2428_v48  ;;  %v21816_v27 = vpack.c.bf16 %v2547_v34, %v2847_v37 }
 0x214   : > { %v21818_v3 = vpack.c.bf16 %v2545_v17, %v2846_v50  ;;  %v2849_v37 = vld [vmem:[#allocation3 + $0x18] sm:$0xfe] }
 0x215   : > { %v2273_v38 = vpop.permute.xlu0 %2272  ;;  %v21787_v52 = vsel %vm2537_vm7, %v2541_v36, %v2550_v43  ;;  %v21789_v7 = vpop.permute.xlu1 %2278  ;;  %v2313_v36 = vsel %vm2294_vm5, %v21706_v59, %v21779_v58  ;;  %v2499_v54 = vmax.f32 %v2475_v53, 0.0 }
 0x216   : > { %v2305_v49 = vsel %vm2294_vm5, %v2271_v8, %v2273_v38  ;;  %v2306_v15 = vsel %vm2294_vm5, %v2273_v38, %v21708_v28  ;;  %2614 = vst [vmem:[#allocation3 + $0x48] sm:$0xff] %v21787_v52  ;;  %v2308_v45 = vsel %vm2294_vm5, %v21713_v25, %v21789_v7  ;;  %v2498_v8 = vmax.f32 %v2474_v2, 0.0 }
 0x217   : > { %v2351_v40 = vmax.f32 %v21304_v39, %v2305_v49  ;;  %v2352_v28 = vmax.f32 %v21587_v29, %v2306_v15  ;;  %v2354_v25 = vmax.f32 %v21249_v18, %v2308_v45  ;;  %v2359_v29 = vmax.f32 %v21187_v20, %v2312_v10 }
 0x218   : > { %v2360_v18 = vmax.f32 %v21222_v19, %v2313_v36  ;;  %v2568_v2 = vrot.slane %v2498_v8, 7  ;;  %v2570_v38 = vrot.slane %v2499_v54, 7  ;;  %v3066_v10 = vshll.u32 %v21816_v27, 16 }
 0x219   : > { %v2390_v12 = vpop.permute.xlu0 %2389  ;;  %v21807_v55 = vpop.permute.xlu1 %2395 }
 0x21a   : > { %v2422_v11 = vsel %vm2411_vm6, %v2388_v57, %v2390_v12  ;;  %v2423_v51 = vsel %vm2411_vm6, %v2390_v12, %v21716_v56  ;;  %v2425_v59 = vsel %vm2411_vm6, %v21722_v21, %v21807_v55  ;;  %v21822_v56 = vpack.c.bf16 %v21711_v30, %v2848_v0 }
 0x21b   : > { %v2468_v24 = vmax.f32 %v2351_v40, %v2422_v11  ;;  %v2469_v39 = vmax.f32 %v2352_v28, %v2423_v51  ;;  %v2471_v16 = vmax.f32 %v2354_v25, %v2425_v59  ;;  %v3054_v30 = vshll.u32 %v21818_v3, 16 }
 0x21c   : > { %v3052_v25 = vshrl.u32 %v21818_v3, 16  ;;  %v21855_v11 = vpack.c.bf16 %v21787_v52, %v2849_v37 }
 0x21d   : > { %v2492_v48 = vmax.f32 %v2468_v24, 0.0  ;;  %v2493_v57 = vmax.f32 %v2469_v39, 0.0  ;;  %v2406_v41 = vpop.permute.xlu0 %2405  ;;  %v2495_v21 = vmax.f32 %v2471_v16, 0.0  ;;  %v21824_v53 = vpop.permute.xlu1 %2407  ;;  %v3068_v39 = vrot.slane %v3066_v10, 1 }
 0x21e   : > { %v2429_v20 = vsel %vm2411_vm6, %v21704_v23, %v2406_v41  ;;  %v2430_v17 = vsel %vm2411_vm6, %v2406_v41, %v21824_v53 }
 0x21f   : > { %v2556_v34 = vrot.slane %v2492_v48, 7  ;;  %v2558_v49 = vrot.slane %v2493_v57, 7  ;;  %v2476_v19 = vmax.f32 %v2359_v29, %v2429_v20  ;;  %v2562_v15 = vrot.slane %v2495_v21, 7 }
 0x220   : > { %v2477_v45 = vmax.f32 %v2360_v18, %v2430_v17 }
 0x221   : > { %v21834_v0 = vsel %vm2537_vm7, %v21754_v26, %v2556_v34  ;;  %v21838_v23 = vsel %vm2537_vm7, %v21759_v44, %v2558_v49  ;;  %v2569_v36 = vsel %vm2537_vm7, %v2556_v34, %v2568_v2  ;;  %v2571_v8 = vsel %vm2537_vm7, %v2558_v49, %v2570_v38  ;;  %v2257_v40 = vpop.permute.xlu0 %2256  ;;  %v2269_v50 = vpop.permute.xlu1 %2268 }
 0x222   : > { %v21843_v28 = vsel %vm2537_vm7, %v2550_v43, %v2562_v15  ;;  %2617 = vst [vmem:[#allocation3 + $0x60] sm:$0xff] %v21834_v0  ;;  %2618 = vst [vmem:[#allocation3 + $0x68] sm:$0xff] %v21838_v23  ;;  %v2500_v26 = vmax.f32 %v2476_v19, 0.0  ;;  %v2501_v12 = vmax.f32 %v2477_v45, 0.0  ;;  %v2299_v44 = vsel %vm2294_vm5, %v21744_v46, %v2257_v40 }
 0x223   : > { %2623 = vst [vmem:[#allocation3 + $0x90] sm:$0x7f] %v2569_v36  ;;  %2624 = vst [vmem:[#allocation3 + $0x98] sm:$0x7f] %v2571_v8  ;;  %v2304_v54 = vsel %vm2294_vm5, %v21765_v32, %v2269_v50  ;;  %v3064_v43 = vshrl.u32 %v21816_v27, 16  ;;  %v2344_v24 = vmax.f32 %v21473_v14, %v2257_v40  ;;  %v2350_v46 = vmax.f32 %v21504_v62, %v2269_v50 }
 0x224   : > { %2620 = vst [vmem:[#allocation3 + $0x78] sm:$0xff] %v21843_v28  ;;  %v2572_v51 = vrot.slane %v2500_v26, 7  ;;  %v2574_v59 = vrot.slane %v2501_v12, 7  ;;  %v2349_v29 = vmax.f32 %v21483_v42, %v2304_v54  ;;  %v2343_v16 = vmax.f32 %v21452_v13, %v2299_v44 }
 0x225   : > { %v2374_v18 = vpop.permute.xlu0 %2373  ;;  %v3056_v32 = vrot.slane %v3054_v30, 1  ;;  %v2386_v52 = vpop.permute.xlu1 %2385  ;;  %v3090_v13 = vshll.u32 %v21855_v11, 16  ;;  %v3078_v38 = vshll.u32 %v21822_v56, 16  ;;  %v3069_v49 = vor.u32 %v3068_v39, %v3064_v43 }
 0x226   : > { %v2573_v27 = vsel %vm2537_vm7, %v21727_v47, %v2572_v51  ;;  %v2575_v3 = vsel %vm2537_vm7, %v2562_v15, %v2574_v59  ;;  %v2416_v48 = vsel %vm2411_vm6, %v21752_v4, %v2374_v18  ;;  %v2461_v57 = vmax.f32 %v2344_v24, %v2374_v18 }
 0x227   : > { %2625 = vst [vmem:[#allocation3 + $0xa0] sm:$0x7f] %v2573_v27  ;;  %2626 = vst [vmem:[#allocation3 + $0xa8] sm:$0x7f] %v2575_v3  ;;  %v2421_v14 = vsel %vm2411_vm6, %v21771_v1, %v2386_v52  ;;  %v2467_v42 = vmax.f32 %v2350_v46, %v2386_v52  ;;  %v2460_v62 = vmax.f32 %v2343_v16, %v2416_v48  ;;  %v3076_v47 = vshrl.u32 %v21822_v56, 16 }
 0x228   : > { %v2466_v41 = vmax.f32 %v2349_v29, %v2421_v14  ;;  %v2485_v2 = vmax.f32 %v2461_v57, 0.0  ;;  %v3057_v17 = vor.u32 %v3056_v32, %v3052_v25  ;;  %v3088_v30 = vshrl.u32 %v21855_v11, 16  ;;  %v18490_v16 = vld [vmem:[%s27649_s26 + $0x4e0] ss:$16 sps:$4 sm:$0xff]  }
 0x229   : > { %v2491_v21 = vmax.f32 %v2467_v42, 0.0  ;;  %v2484_v20 = vmax.f32 %v2460_v62, 0.0  ;;  %v2281_v4 = vpop.permute.xlu0 %2280  ;;  %v2293_v1 = vpop.permute.xlu1 %2292  ;;  %v3092_v40 = vrot.slane %v3090_v13, 1  ;;  %v18495_v42 = vld [vmem:[%s27649_s26 + $0x4c4] ss:$16 sps:$4 sm:$0xff]  }
 0x22a   : > { %v2853_v34 = vld [vmem:[#allocation3 + $0x98] sm:$0x1f]  ;;  %v2490_v19 = vmax.f32 %v2466_v41, 0.0  ;;  %v2543_v15 = vrot.slane %v2485_v2, 7  ;;  %v2309_v45 = vsel %vm2294_vm5, %v21789_v7, %v2281_v4  ;;  %v2852_v10 = vld [vmem:[#allocation3 + $0x90] sm:$0x1f]  ;;  %v2314_v8 = vsel %vm2294_vm5, %v21779_v58, %v2293_v1 }
 0x22b   : > { %v2554_v37 = vrot.slane %v2491_v21, 7  ;;  %v2542_v36 = vrot.slane %v2484_v20, 7  ;;  %v2362_v12 = vmax.f32 %v21671_v31, %v2293_v1  ;;  %v2356_v50 = vmax.f32 %v21522_v35, %v2281_v4  ;;  %v18493_v1 = vld [vmem:[%s27649_s26 + $0x4c0] ss:$16 sps:$4 sm:$0xff]  }
 0x22c   : > { %v2552_v26 = vrot.slane %v2490_v19, 7  ;;  %2610 = vst.msk [vmem:[#allocation3 + $0x28] sm:$0xfe] %vm2609_vm8, %v2543_v15  ;;  %v2865_v44 = vpack.c.bf16 %v2853_v34, %v21838_v23  ;;  %v2361_v54 = vmax.f32 %v21566_v5, %v2314_v8  ;;  %v2355_v43 = vmax.f32 %v21502_v22, %v2309_v45  ;;  %v18496_v8 = vld [vmem:[%s27649_s26 + $0xe8] ss:$16 sps:$4 sm:$0xff]  }
 0x22d   : > { %v2555_v7 = vsel %vm2537_vm7, %v2543_v15, %v2554_v37  ;;  %2608 = vst [vmem:[#allocation3 + $0x20] sm:$0xfe] %v2542_v36  ;;  %v2398_v25 = vpop.permute.xlu0 %2397  ;;  %v21884_v58 = vpack.c.bf16 %v2852_v10, %v21834_v0  ;;  %v2410_v31 = vpop.permute.xlu1 %2409  ;;  %v3080_v34 = vrot.slane %v3078_v38, 1  ;;  %vm12178_vm5 = vcmask 523265  }
 0x22e   : > { %v21887_v11 = vsel %vm2537_vm7, %v2542_v36, %v2552_v26  ;;  %2616 = vst.msk [vmem:[#allocation3 + $0x58] sm:$0xff] %vm2411_vm6, %v2555_v7  ;;  %v2426_v35 = vsel %vm2411_vm6, %v21807_v55, %v2398_v25  ;;  %v2473_v23 = vmax.f32 %v2356_v50, %v2398_v25  ;;  %v3071_v51 = vshll.u32 %v2865_v44, 16  ;;  %v2855_v59 = vld [vmem:[#allocation3 + $0xa8] sm:$0x1f]  ;;  %v2854_v52 = vld [vmem:[#allocation3 + $0xa0] sm:$0x1f] }
 0x22f   : > { %2615 = vst [vmem:[#allocation3 + $0x50] sm:$0xff] %v21887_v11  ;;  %v2431_v22 = vsel %vm2411_vm6, %v21824_v53, %v2410_v31  ;;  %v2479_v5 = vmax.f32 %v2362_v12, %v2410_v31  ;;  %v2472_v0 = vmax.f32 %v2355_v43, %v2426_v35  ;;  %v3059_v24 = vshll.u32 %v21884_v58, 16  ;;  %v18504_v50 = vld [vmem:[%s27649_s26 + $0xcc] ss:$16 sps:$4 sm:$0xff]   ;;  %v18507_v43 = vld [vmem:[%s27649_s26 + $0x484] ss:$16 sps:$4 sm:$0xff]  }
 0x230   : > { %v2478_v39 = vmax.f32 %v2361_v54, %v2431_v22  ;;  %v2497_v29 = vmax.f32 %v2473_v23, 0.0  ;;  %v3073_v46 = vrot.slane %v3071_v51, 1  ;;  %v3126_v55 = vshrl.u32 %v2865_v44, 16  ;;  %v18499_v54 = vld [vmem:[%s27649_s26 + $0x4a0] ss:$16 sps:$4 sm:$0xff]  }
 0x231   : > { %v2503_v18 = vmax.f32 %v2479_v5, 0.0  ;;  %v2496_v32 = vmax.f32 %v2472_v0, 0.0  ;;  %v3061_v27 = vrot.slane %v3059_v24, 1  ;;  %v2867_v3 = vpack.c.bf16 %v2855_v59, %v21843_v28  ;;  %v18502_v25 = vld [vmem:[%s27649_s26 + $0xc8] ss:$16 sps:$4 sm:$0xff]  }
 0x232   : > { %v2502_v48 = vmax.f32 %v2478_v39, 0.0  ;;  %v2566_v53 = vrot.slane %v2497_v29, 7  ;;  %v21901_v57 = vsel %vm3050_vm9, %v3069_v49, %v3073_v46  ;;  %v21903_v14 = vor.u32 %v3126_v55, %v3073_v46  ;;  %v18510_v31 = vld [vmem:[%s27649_s26 + $0xac] ss:$16 sps:$4 sm:$0xff]   ;;  %v18505_v23 = vld [vmem:[%s27649_s26 + $0x480] ss:$16 sps:$4 sm:$0xff]  }
 0x233   : > { %v2578_v62 = vrot.slane %v2503_v18, 7  ;;  %v2564_v13 = vrot.slane %v2496_v32, 7  ;;  %4089 = vmatprep.mubr.bf16.mxu1 %v21901_v57  ;;  %v21910_v41 = vsel %vm3050_vm9, %v3057_v17, %v3061_v27  ;;  %v3095_v28 = vshll.u32 %v2867_v3, 16  ;;  %v2851_v2 = vld [vmem:[#allocation3 + $0x28] sm:$0xfe] }
 0x234   : > { %v2576_v21 = vrot.slane %v2502_v48, 7  ;;  %v2567_v20 = vsel %vm2537_vm7, %v2554_v37, %v2566_v53  ;;  %4090 = vmatmul.mubr.bf16.vlgmr.msra.gmra.mxu1 %v21910_v41  ;;  %v2866_v4 = vpack.c.bf16 %v2854_v52, %v21731_v61  ;;  %v3093_v17 = vor.u32 %v3092_v40, %v3088_v30  ;;  %v18501_v37 = vld [vmem:[%s27649_s26 + $0x4a4] ss:$16 sps:$4 sm:$0xff]   ;;  %v18508_v0 = vld [vmem:[%s27649_s26 + $0xa8] ss:$16 sps:$4 sm:$0xff]  }
 0x235   : > { %v21918_v49 = vsel %vm2537_vm7, %v2552_v26, %v2564_v13  ;;  %v2579_v19 = vsel %vm2537_vm7, %v2566_v53, %v2578_v62  ;;  %2622 = vst.msk [vmem:[#allocation3 + $0x88] sm:$0xff] %vm2411_vm6, %v2567_v20  ;;  %4164 = vmatpush1.bf16.msra.mxu1 %v18490_v16  ;;  %4099 = vmatprep.mubr.bf16.mxu1 %v21903_v14  ;;  %v3097_v15 = vrot.slane %v3095_v28, 1  ;;  %v2641_v61 = vld [vmem:[#allocation3 + $0x58] sm:$0xff]  ;;  %v3132_v10 = vshrl.u32 %v2867_v3, 16  ;;  %v18516_v46 = vld [vmem:[%s27649_s26 + $0x8c] ss:$16 sps:$4 sm:$0xff]  }
 0x236   : > { %v2577_v45 = vsel %vm2537_vm7, %v2564_v13, %v2576_v21  ;;  %2621 = vst [vmem:[#allocation3 + $0x80] sm:$0xff] %v21918_v49  ;;  %2629 = vst.msk [vmem:[#allocation3 + $0xb8] sm:$0x7f] %vm2628_vm10, %v2579_v19  ;;  %4165 = vmatprep.subr.bf16.mxu1 %v18495_v42  ;;  %v3083_v38 = vshll.u32 %v2866_v4, 16  ;;  %v2863_v30 = vpack.c.bf16 %v2641_v61, %v2851_v2  ;;  %v3123_v44 = vshrl.u32 %v21884_v58, 16 }
 0x237   : > { %2627 = vst [vmem:[#allocation3 + $0xb0] sm:$0x7f] %v2577_v45  ;;  %v21933_v36 = vsel %vm3050_vm9, %v3093_v17, %v3097_v15  ;;  %v3081_v40 = vor.u32 %v3080_v34, %v3076_v47  ;;  %v21941_v12 = vor.u32 %v3132_v10, %v3097_v15  ;;  %v3129_v22 = vshrl.u32 %v2866_v4, 16  ;;  %v18513_v5 = vld [vmem:[%s27649_s26 + $0x464] ss:$16 sps:$4 sm:$0xff]  }
 0x238   : > { %4142 = vmatprep.mubr.bf16.mxu0 %v21933_v36  ;;  %v3085_v26 = vrot.slane %v3083_v38, 1  ;;  %v3114_v56 = vshll.u32 %v2863_v30, 16  ;;  %v21954_v47 = vor.u32 %v3123_v44, %v3061_v27  ;;  %v3112_v24 = vshrl.u32 %v2863_v30, 16  ;;  %v18511_v16 = vld [vmem:[%s27649_s26 + $0x460] ss:$16 sps:$4 sm:$0xff]  }
 0x239   : > { %4166 = vmatpush1.bf16.msra.mxu1 %v18493_v1  ;;  %v18519_v32 = vld [vmem:[%s27649_s26 + $0x444] ss:$16 sps:$4 sm:$0xff]   ;;  %v18514_v27 = vld [vmem:[%s27649_s26 + $0x88] ss:$16 sps:$4 sm:$0xff]   ;;  %v18522_v52 = vld [vmem:[%s27649_s26 + $0x6c] ss:$16 sps:$4 sm:$0xff]  }
 0x23a   : > { %v21948_v7 = vsel %vm3050_vm9, %v3081_v40, %v3085_v26  ;;  %4167 = vmatprep.subr.bf16.mxu1 %v18501_v37  ;;  %v3116_v59 = vrot.slane %v3114_v56, 1  ;;  %v21979_v29 = vor.u32 %v3129_v22, %v3085_v26  ;;  %v18517_v48 = vld [vmem:[%s27649_s26 + $0x440] ss:$16 sps:$4 sm:$0xff]   ;;  %v18525_v53 = vld [vmem:[%s27649_s26 + $0x424] ss:$16 sps:$4 sm:$0xff]   ;;  %vm12186_vm8 = vcmask 516096  }
 0x23b   : > { %4143 = vmatmul.mubr.bf16.vlgmr.msra.gmra.mxu0 %v21948_v7  ;;  %v18528_v42 = vld [vmem:[%s27649_s26 + $0x4c] ss:$16 sps:$4 sm:$0xff]   ;;  %v18523_v62 = vld [vmem:[%s27649_s26 + $0x420] ss:$16 sps:$4 sm:$0xff]   ;;  %v18531_v13 = vld [vmem:[%s27649_s26 + $0x404] ss:$16 sps:$4 sm:$0xff]  }
 0x23c   : > { %4217 = vmatpush1.bf16.msra.mxu0 %v18496_v8  ;;  %4152 = vmatprep.mubr.bf16.mxu0 %v21941_v12  ;;  %v2647_v58 = vld [vmem:[#allocation3 + $0x88] sm:$0xff]  ;;  %v3117_v55 = vor.u32 %v3116_v59, %v3112_v24  ;;  %v18526_v28 = vld [vmem:[%s27649_s26 + $0x48] ss:$16 sps:$4 sm:$0xff]   ;;  %v18534_v2 = vld [vmem:[%s27649_s26 + $0x2c] ss:$16 sps:$4 sm:$0xff]  }
 0x23d   : > { %4218 = vmatprep.subr.bf16.mxu0 %v18504_v50  ;;  %4100 = vmatmul.mubr.bf16.gmra.mxu1 %v21954_v47  ;;  %v2857_v35 = vld [vmem:[#allocation3 + $0xb8] sm:$0x1f]  ;;  %v18532_v4 = vld [vmem:[%s27649_s26 + $0x28] ss:$16 sps:$4 sm:$0xff]   ;;  %v18540_v19 = vld [vmem:[%s27649_s26 + $0xc] ss:$16 sps:$4 sm:$0xff]  }
 0x23e   : > { %4168 = vmatpush1.bf16.msra.mxu1 %v18499_v54  ;;  %v21970_v51 = vpack.c.bf16 %v2857_v35, %v2647_v58  ;;  %v18529_v21 = vld [vmem:[%s27649_s26 + $0x400] ss:$16 sps:$4 sm:$0xff]   ;;  %v18537_v20 = vld [vmem:[%s27649_s26 + $0x584] ss:$16 sps:$4 sm:$0xff]   ;;  %v18538_v15 = vld [vmem:[%s27649_s26 + $0x8] ss:$16 sps:$4 sm:$0xff]  }
 0x23f   : > { %4169 = vmatprep.subr.bf16.mxu1 %v18507_v43  ;;  %v18535_v34 = vld [vmem:[%s27649_s26 + $0x580] ss:$16 sps:$4 sm:$0xff]   ;;  %v18543_v17 = vld [vmem:[%s27649_s26 + $0x564] ss:$16 sps:$4 sm:$0xff]   ;;  %v18546_v61 = vld [vmem:[%s27649_s26 + $0x1ec] ss:$16 sps:$4 sm:$0xff]  }
 0x240   : > { %4219 = vmatpush1.bf16.msra.mxu0 %v18502_v25  ;;  %v3119_v39 = vshll.u32 %v21970_v51, 16  ;;  %v18541_v1 = vld [vmem:[%s27649_s26 + $0x560] ss:$16 sps:$4 sm:$0xff]   ;;  %v18549_v45 = vld [vmem:[%s27649_s26 + $0x544] ss:$16 sps:$4 sm:$0xff]  }
 0x241   : > { %4220 = vmatprep.subr.bf16.mxu0 %v18510_v31  ;;  %v2850_v38 = vld [vmem:[#allocation3 + $0x20] sm:$0xfe]  ;;  %v18547_v37 = vld [vmem:[%s27649_s26 + $0x540] ss:$16 sps:$4 sm:$0xff]   ;;  %v18555_v8 = vld [vmem:[%s27649_s26 + $0x524] ss:$16 sps:$4 sm:$0xff]  }
 0x242   : > { %4170 = vmatpush1.bf16.msra.mxu1 %v18505_v23  ;;  %v21987_v18 = vrot.slane %v3119_v39, 1  ;;  %v18544_v10 = vld [vmem:[%s27649_s26 + $0x1e8] ss:$16 sps:$4 sm:$0xff]   ;;  %v18552_v30 = vld [vmem:[%s27649_s26 + $0x1cc] ss:$16 sps:$4 sm:$0xff]   ;;  %v2862_v26 = vpack.c.bf16 %v21887_v11, %v2850_v38 }
 0x243   : > { %4153 = vmatmul.mubr.bf16.gmra.mxu0 %v21979_v29  ;;  %4171 = vmatprep.subr.bf16.mxu1 %v18513_v5  ;;  %v2856_v40 = vld [vmem:[#allocation3 + $0xb0] sm:$0x1f]  ;;  %v18553_v44 = vld [vmem:[%s27649_s26 + $0x520] ss:$16 sps:$4 sm:$0xff]   ;;  %v18561_v11 = vld [vmem:[%s27649_s26 + $0x504] ss:$16 sps:$4 sm:$0xff]  }
 0x244   : > { %4221 = vmatpush1.bf16.msra.mxu0 %v18508_v0  ;;  %4248 = vmatprep.mubr.bf16.mxu0 %v21901_v57  ;;  %v21999_v3 = vsel %vm3050_vm9, %v3117_v55, %v21987_v18  ;;  %v18520_v57 = vld [vmem:[%s27649_s26 + $0x68] ss:$16 sps:$4 sm:$0xff]   ;;  %v18558_v54 = vld [vmem:[%s27649_s26 + $0x1ac] ss:$16 sps:$4 sm:$0xff]   ;;  %v2868_v56 = vpack.c.bf16 %v2856_v40, %v21918_v49  ;;  %v3102_v25 = vshll.u32 %v2862_v26, 16  ;;  %v3100_v22 = vshrl.u32 %v2862_v26, 16 }
 0x245   : > { %4222 = vmatprep.subr.bf16.mxu0 %v18516_v46  ;;  %16511 = vmatprep.mubr.msk.bf16.mxu1 %vm2411_vm6, %v21999_v3  ;;  %v18550_v50 = vld [vmem:[%s27649_s26 + $0x1c8] ss:$16 sps:$4 sm:$0xff]   ;;  %v18559_v58 = vld [vmem:[%s27649_s26 + $0x500] ss:$16 sps:$4 sm:$0xff]   ;;  %v18564_v49 = vld [vmem:[%s27649_s26 + $0x18c] ss:$16 sps:$4 sm:$0xff]  }
 0x246   : > { %4172 = vmatpush1.bf16.msra.mxu1 %v18511_v16  ;;  %v18556_v43 = vld [vmem:[%s27649_s26 + $0x1a8] ss:$16 sps:$4 sm:$0xff]   ;;  %v3107_v31 = vshll.u32 %v2868_v56, 16  ;;  %v18570_v35 = vld [vmem:[%s27649_s26 + $0x2ec] ss:$16 sps:$4 sm:$0xff]   ;;  %v3104_v59 = vrot.slane %v3102_v25, 1 }
 0x247   : > { %4173 = vmatprep.subr.bf16.mxu1 %v18519_v32  ;;  %v18562_v23 = vld [vmem:[%s27649_s26 + $0x188] ss:$16 sps:$4 sm:$0xff]   ;;  %v18567_v0 = vld [vmem:[%s27649_s26 + $0x16c] ss:$16 sps:$4 sm:$0xff]   ;;  %v3138_v55 = vshrl.u32 %v21970_v51, 16 }
 0x248   : > { %4223 = vmatpush1.bf16.msra.mxu0 %v18514_v27  ;;  %v3109_v5 = vrot.slane %v3107_v31, 1  ;;  %v18568_v24 = vld [vmem:[%s27649_s26 + $0x2e8] ss:$16 sps:$4 sm:$0xff]   ;;  %v18576_v39 = vld [vmem:[%s27649_s26 + $0x2cc] ss:$16 sps:$4 sm:$0xff]   ;;  %v3105_v46 = vor.u32 %v3104_v59, %v3100_v22 }
 0x249   : > { %4224 = vmatprep.subr.bf16.mxu0 %v18522_v52  ;;  %v18565_v16 = vld [vmem:[%s27649_s26 + $0x168] ss:$16 sps:$4 sm:$0xff]   ;;  %v22118_v27 = vor.u32 %v3138_v55, %v21987_v18  ;;  %v18573_v52 = vld [vmem:[%s27649_s26 + $0x14c] ss:$16 sps:$4 sm:$0xff]  }
 0x24a   : > { %4174 = vmatpush1.bf16.msra.mxu1 %v18517_v48  ;;  %v22115_v32 = vsel %vm3050_vm9, %v3105_v46, %v3109_v5  ;;  %v18574_v48 = vld [vmem:[%s27649_s26 + $0x2c8] ss:$16 sps:$4 sm:$0xff]   ;;  %v18582_v18 = vld [vmem:[%s27649_s26 + $0x2ac] ss:$16 sps:$4 sm:$0xff]  }
 0x24b   : > { %4175 = vmatprep.subr.bf16.mxu1 %v18525_v53  ;;  %v18571_v51 = vld [vmem:[%s27649_s26 + $0x148] ss:$16 sps:$4 sm:$0xff]   ;;  %v18579_v53 = vld [vmem:[%s27649_s26 + $0x12c] ss:$16 sps:$4 sm:$0xff]  }
 0x24c   : > { %4225 = vmatpush1.bf16.msra.mxu0 %v18520_v57  ;;  %v18580_v57 = vld [vmem:[%s27649_s26 + $0x2a8] ss:$16 sps:$4 sm:$0xff]   ;;  %v18606_v38 = vld [vmem:[%s27649_s26 + $0x4ac] ss:$16 sps:$4 sm:$0xff]  }
 0x24d   : > { %4226 = vmatprep.subr.bf16.mxu0 %v18528_v42  ;;  %v3135_v42 = vshrl.u32 %v2868_v56, 16  ;;  %v18615_v40 = vld [vmem:[%s27649_s26 + $0x3ec] ss:$16 sps:$4 sm:$0xff]   ;;  %v18631_v31 = vld [vmem:[%s27649_s26 + $0x388] ss:$16 sps:$4 sm:$0xff]  }
 0x24e   : > { %4176 = vmatpush1.bf16.msra.mxu1 %v18523_v62  ;;  %v18618_v26 = vld [vmem:[%s27649_s26 + $0x46c] ss:$16 sps:$4 sm:$0xff]   ;;  %v18634_v59 = vld [vmem:[%s27649_s26 + $0x408] ss:$16 sps:$4 sm:$0xff]  }
 0x24f   : > { %4177 = vmatprep.subr.bf16.mxu1 %v18531_v13  ;;  %v22141_v62 = vor.u32 %v3135_v42, %v3109_v5  ;;  %v18588_v13 = vld [vmem:[%s27649_s26 + $0x28c] ss:$16 sps:$4 sm:$0xff]   ;;  %v18637_v22 = vld [vmem:[%s27649_s26 + $0x368] ss:$16 sps:$4 sm:$0xff]   ;;  %v18666_v42 = vld [vmem:[%s27651_s25 + $0xe4] ss:$16 sps:$4 sm:$0xff]  }
 0x250   : > { %4227 = vmatpush1.bf16.msra.mxu0 %v18526_v28  ;;  %v18577_v28 = vld [vmem:[%s27649_s26 + $0x128] ss:$16 sps:$4 sm:$0xff]   ;;  %v18627_v56 = vld [vmem:[%s27649_s26 + $0x3ac] ss:$16 sps:$4 sm:$0xff]  }
 0x251   : > { %4228 = vmatprep.subr.bf16.mxu0 %v18534_v2  ;;  %v18585_v2 = vld [vmem:[%s27649_s26 + $0x10c] ss:$16 sps:$4 sm:$0xff]   ;;  %v18646_v55 = vld [vmem:[%s27649_s26 + $0x568] ss:$16 sps:$4 sm:$0xff]  }
 0x252   : > { %4178 = vmatpush1.bf16.msra.mxu1 %v18529_v21  ;;  %v18586_v21 = vld [vmem:[%s27649_s26 + $0x288] ss:$16 sps:$4 sm:$0xff]   ;;  %v18630_v25 = vld [vmem:[%s27649_s26 + $0x42c] ss:$16 sps:$4 sm:$0xff]  }
 0x253   : > { %4185 = vmatprep.subr.bf16.mxu1 %v18537_v20  ;;  %v18583_v20 = vld [vmem:[%s27649_s26 + $0x108] ss:$16 sps:$4 sm:$0xff]   ;;  %v18642_v5 = vld [vmem:[%s27649_s26 + $0x58c] ss:$16 sps:$4 sm:$0xff]  }
 0x254   : > { %4229 = vmatpush1.bf16.msra.mxu0 %v18532_v4  ;;  %v18591_v4 = vld [vmem:[%s27649_s26 + $0x26c] ss:$16 sps:$4 sm:$0xff]  }
 0x255   : > { %4230 = vmatprep.subr.bf16.mxu0 %v18540_v19  ;;  %v18589_v19 = vld [vmem:[%s27649_s26 + $0x268] ss:$16 sps:$4 sm:$0xff]   ;;  %v18648_v46 = vld [vmem:[%s27649_s26 + $0x56c] ss:$16 sps:$4 sm:$0xff]  }
 0x256   : > { %4186 = vmatpush2.bf16.msra.mxu1 %v18535_v34  ;;  %v18594_v34 = vld [vmem:[%s27649_s26 + $0x4ec] ss:$16 sps:$4 sm:$0xff]  }
 0x257   : > { %4187 = vmatprep.subr.bf16.mxu1 %v18543_v17  ;;  %v18592_v17 = vld [vmem:[%s27649_s26 + $0x4e8] ss:$16 sps:$4 sm:$0xff]  }
 0x258   : > { %4231 = vmatpush1.bf16.msra.mxu0 %v18538_v15  ;;  %v18595_v15 = vld [vmem:[%s27649_s26 + $0x248] ss:$16 sps:$4 sm:$0xff]  }
 0x259   : > { %4232 = vmatprep.subr.bf16.mxu0 %v18546_v61  ;;  %v18603_v61 = vld [vmem:[%s27649_s26 + $0x22c] ss:$16 sps:$4 sm:$0xff]  }
 0x25a   : > { %4188 = vmatpush2.bf16.msra.mxu1 %v18541_v1  ;;  %v18600_v1 = vld [vmem:[%s27649_s26 + $0x4cc] ss:$16 sps:$4 sm:$0xff]  }
 0x25b   : > { %4189 = vmatprep.subr.bf16.mxu1 %v18549_v45  ;;  %v18598_v45 = vld [vmem:[%s27649_s26 + $0x4c8] ss:$16 sps:$4 sm:$0xff]  }
 0x25c   : > { %4233 = vmatpush2.bf16.msra.mxu0 %v18544_v10  ;;  %v18601_v10 = vld [vmem:[%s27649_s26 + $0x228] ss:$16 sps:$4 sm:$0xff]  }
 0x25d   : > { %4234 = vmatprep.subr.bf16.mxu0 %v18552_v30  ;;  %v18607_v30 = vld [vmem:[%s27649_s26 + $0x208] ss:$16 sps:$4 sm:$0xff]  }
 0x25e   : > { %4190 = vmatpush2.bf16.msra.mxu1 %v18547_v37  ;;  %v18604_v37 = vld [vmem:[%s27649_s26 + $0x4a8] ss:$16 sps:$4 sm:$0xff]  }
 0x25f   : > { %4191 = vmatprep.subr.bf16.mxu1 %v18555_v8  ;;  %v18610_v8 = vld [vmem:[%s27649_s26 + $0x488] ss:$16 sps:$4 sm:$0xff]  }
 0x260   : > { %4235 = vmatpush2.bf16.msra.mxu0 %v18550_v50  ;;  %v18613_v50 = vld [vmem:[%s27649_s26 + $0x3e8] ss:$16 sps:$4 sm:$0xff]  }
 0x261   : > { %4236 = vmatprep.subr.bf16.mxu0 %v18558_v54  ;;  %v18624_v54 = vld [vmem:[%s27649_s26 + $0x44c] ss:$16 sps:$4 sm:$0xff]  }
 0x262   : > { %4192 = vmatpush2.bf16.msra.mxu1 %v18553_v44  ;;  %v18616_v44 = vld [vmem:[%s27649_s26 + $0x468] ss:$16 sps:$4 sm:$0xff]  }
 0x263   : > { %4193 = vmatprep.subr.bf16.mxu1 %v18561_v11  ;;  %v18622_v11 = vld [vmem:[%s27649_s26 + $0x448] ss:$16 sps:$4 sm:$0xff]  }
 0x264   : > { %4237 = vmatpush2.bf16.msra.mxu0 %v18556_v43  ;;  %v18625_v43 = vld [vmem:[%s27649_s26 + $0x3a8] ss:$16 sps:$4 sm:$0xff]  }
 0x265   : > { %4238 = vmatprep.subr.bf16.mxu0 %v18564_v49  ;;  %v18628_v49 = vld [vmem:[%s27649_s26 + $0x428] ss:$16 sps:$4 sm:$0xff]  }
 0x266   : > { %4194 = vmatpush2.bf16.msra.mxu1 %v18559_v58  ;;  %v18633_v58 = vld [vmem:[%s27649_s26 + $0x38c] ss:$16 sps:$4 sm:$0xff]  }
 0x267   : > { %4269 = vmatprep.subr.bf16.mxu1 %v18570_v35  ;;  %v18636_v35 = vld [vmem:[%s27649_s26 + $0x40c] ss:$16 sps:$4 sm:$0xff]  }
 0x268   : > { %4239 = vmatpush2.bf16.msra.mxu0 %v18562_v23  ;;  %v18639_v23 = vld [vmem:[%s27649_s26 + $0x36c] ss:$16 sps:$4 sm:$0xff]  }
 0x269   : > { %4196 = vmatmul.mubr.bf16.vlgmr.msra.gmra.mxu1 %v22115_v32  ;;  %4240 = vmatprep.subr.bf16.mxu0 %v18567_v0  ;;  %v18645_v0 = vld [vmem:[%s27649_s26 + $0x34c] ss:$16 sps:$4 sm:$0xff]  }
 0x26a   : > { %16512 = vmatprep.mubr.msk.bf16.mxu1 %vm2411_vm6, %v22118_v27  ;;  %4270 = vmatpush1.bf16.msra.mxu1 %v18568_v24  ;;  %v18640_v24 = vld [vmem:[%s27649_s26 + $0x588] ss:$16 sps:$4 sm:$0xff]  }
 0x26b   : > { %4271 = vmatprep.subr.bf16.mxu1 %v18576_v39  ;;  %v18643_v39 = vld [vmem:[%s27649_s26 + $0x348] ss:$16 sps:$4 sm:$0xff]  }
 0x26c   : > { %4241 = vmatpush2.bf16.msra.mxu0 %v18565_v16  ;;  %v18651_v16 = vld [vmem:[%s27649_s26 + $0x32c] ss:$16 sps:$4 sm:$0xff]  }
 0x26d   : > { %4242 = vmatprep.subr.bf16.mxu0 %v18573_v52  ;;  %v18649_v52 = vld [vmem:[%s27649_s26 + $0x328] ss:$16 sps:$4 sm:$0xff]  }
 0x26e   : > { %4272 = vmatpush1.bf16.msra.mxu1 %v18574_v48  ;;  %v18654_v48 = vld [vmem:[%s27649_s26 + $0x54c] ss:$16 sps:$4 sm:$0xff]  }
 0x26f   : > { %4273 = vmatprep.subr.bf16.mxu1 %v18582_v18  ;;  %v18652_v18 = vld [vmem:[%s27649_s26 + $0x548] ss:$16 sps:$4 sm:$0xff]  }
 0x270   : > { %4243 = vmatpush2.bf16.msra.mxu0 %v18571_v51  ;;  %v18657_v51 = vld [vmem:[%s27649_s26 + $0x30c] ss:$16 sps:$4 sm:$0xff]  }
 0x271   : > { %4206 = vmatmul.mubr.bf16.gmra.mxu1 %v22141_v62  ;;  %4244 = vmatprep.subr.bf16.mxu0 %v18579_v53  ;;  %v18655_v53 = vld [vmem:[%s27649_s26 + $0x308] ss:$16 sps:$4 sm:$0xff]  }
 0x272   : > { %4274 = vmatpush1.bf16.msra.mxu1 %v18580_v57  ;;  %4301 = vmatprep.mubr.bf16.mxu1 %v21933_v36  ;;  %v18597_v36 = vld [vmem:[%s27649_s26 + $0x24c] ss:$16 sps:$4 sm:$0xff]  }
 0x273   : > { %4275 = vmatprep.subr.bf16.mxu1 %v18588_v13  ;;  %v18660_v57 = vld [vmem:[%s27649_s26 + $0x52c] ss:$16 sps:$4 sm:$0xff]   ;;  %v18658_v13 = vld [vmem:[%s27649_s26 + $0x528] ss:$16 sps:$4 sm:$0xff]  }
 0x274   : > { %4245 = vmatpush2.bf16.msra.mxu0 %v18577_v28  ;;  %v18663_v28 = vld [vmem:[%s27649_s26 + $0x50c] ss:$16 sps:$4 sm:$0xff]  }
 0x275   : > { %4246 = vmatprep.subr.bf16.mxu0 %v18585_v2  ;;  %v18664_v2 = vld [vmem:[%s27651_s25 + $0xe0] ss:$16 sps:$4 sm:$0xff]  }
 0x276   : > { %4276 = vmatpush1.bf16.msra.mxu1 %v18586_v21  ;;  %v18661_v21 = vld [vmem:[%s27649_s26 + $0x508] ss:$16 sps:$4 sm:$0xff]  }
 0x277   : > { %4277 = vmatprep.subr.bf16.mxu1 %v18591_v4  ;;  %v18672_v4 = vld [vmem:[%s27651_s25 + $0x2e4] ss:$16 sps:$4 sm:$0xff]  }
 0x278   : > { %4247 = vmatpush2.bf16.msra.mxu0 %v18583_v20  ;;  %v18669_v20 = vld [vmem:[%s27651_s25 + $0xc4] ss:$16 sps:$4 sm:$0xff]  }
 0x279   : > { %4322 = vmatprep.subr.bf16.mxu0 %v18594_v34  ;;  %v18667_v34 = vld [vmem:[%s27651_s25 + $0xc0] ss:$16 sps:$4 sm:$0xff]  }
 0x27a   : > { %4278 = vmatpush1.bf16.msra.mxu1 %v18589_v19  ;;  %v18670_v19 = vld [vmem:[%s27651_s25 + $0x2e0] ss:$16 sps:$4 sm:$0xff]  }
 0x27b   : > { %4249 = vmatmul.mubr.bf16.vlgmr.msra.gmra.mxu0 %v21910_v41  ;;  %4279 = vmatprep.subr.bf16.mxu1 %v18597_v36  ;;  %v18609_v41 = vld [vmem:[%s27649_s26 + $0x20c] ss:$16 sps:$4 sm:$0xff]   ;;  %v18675_v36 = vld [vmem:[%s27651_s25 + $0xa4] ss:$16 sps:$4 sm:$0xff]  }
 0x27c   : > { %4258 = vmatprep.mubr.bf16.mxu0 %v21903_v14  ;;  %4323 = vmatpush1.bf16.msra.mxu0 %v18592_v17  ;;  %v18612_v14 = vld [vmem:[%s27649_s26 + $0x48c] ss:$16 sps:$4 sm:$0xff]   ;;  %v2631_v17 = vld [vmem:[#allocation3 + $0x8] sm:$0xff] }
 0x27d   : > { %4324 = vmatprep.subr.bf16.mxu0 %v18600_v1  ;;  %v18681_v1 = vld [vmem:[%s27651_s25 + $0x84] ss:$16 sps:$4 sm:$0xff]  }
 0x27e   : > { %4280 = vmatpush1.bf16.msra.mxu1 %v18595_v15  ;;  %v18676_v15 = vld [vmem:[%s27651_s25 + $0x2c0] ss:$16 sps:$4 sm:$0xff]  }
 0x27f   : > { %4281 = vmatprep.subr.bf16.mxu1 %v18603_v61  ;;  %v20363_v61 = vld [vmem:[#allocation3 + $0x38] sm:$0xff] }
 0x280   : > { %4325 = vmatpush1.bf16.msra.mxu0 %v18598_v45  ;;  %v22353_v45 = vpack.c.bf16 %v20363_v61, %v2631_v17  ;;  %v2630_v17 = vld [vmem:[#allocation3] sm:$0xff]  ;;  %v18760_v61 = vld [vmem:[%s27651_s25 + $0x4e0] ss:$16 sps:$4 sm:$0xff]  }
 0x281   : > { %4326 = vmatprep.subr.bf16.mxu0 %v18606_v38  ;;  %v2633_v38 = vld [vmem:[#allocation3 + $0x18] sm:$0xff] }
 0x282   : > { %4282 = vmatpush1.bf16.msra.mxu1 %v18601_v10  ;;  %v18679_v10 = vld [vmem:[%s27651_s25 + $0x80] ss:$16 sps:$4 sm:$0xff]  }
 0x283   : > { %4259 = vmatmul.mubr.bf16.gmra.mxu0 %v21954_v47  ;;  %4283 = vmatprep.subr.bf16.mxu1 %v18609_v41  ;;  %v18621_v47 = vld [vmem:[%s27649_s26 + $0x3cc] ss:$16 sps:$4 sm:$0xff]   ;;  %v18685_v41 = vld [vmem:[%s27651_s25 + $0x60] ss:$16 sps:$4 sm:$0xff]  }
 0x284   : > { %4327 = vmatpush1.bf16.msra.mxu0 %v18604_v37  ;;  %16513 = vmatprep.mubr.msk.bf16.mxu0 %vm2411_vm6, %v21999_v3  ;;  %v18619_v3 = vld [vmem:[%s27649_s26 + $0x3c8] ss:$16 sps:$4 sm:$0xff]   ;;  %v18687_v37 = vld [vmem:[%s27651_s25 + $0x64] ss:$16 sps:$4 sm:$0xff]  }
 0x285   : > { %4328 = vmatprep.subr.bf16.mxu0 %v18612_v14  ;;  %v20364_v14 = vld [vmem:[#allocation3 + $0x48] sm:$0xff] }
 0x286   : > { %4284 = vmatpush1.bf16.msra.mxu1 %v18607_v30  ;;  %v22375_v30 = vpack.c.bf16 %v20364_v14, %v2633_v38  ;;  %v18757_v38 = vld [vmem:[%s27651_s25 + $0x300] ss:$16 sps:$4 sm:$0xff]  }
 0x287   : > { %4285 = vmatprep.subr.bf16.mxu1 %v18615_v40  ;;  %v18693_v40 = vld [vmem:[%s27651_s25 + $0x44] ss:$16 sps:$4 sm:$0xff]  }
 0x288   : > { %4329 = vmatpush1.bf16.msra.mxu0 %v18610_v8  ;;  %v18688_v8 = vld [vmem:[%s27651_s25 + $0x280] ss:$16 sps:$4 sm:$0xff]  }
 0x289   : > { %4330 = vmatprep.subr.bf16.mxu0 %v18618_v26  ;;  %v18691_v26 = vld [vmem:[%s27651_s25 + $0x40] ss:$16 sps:$4 sm:$0xff]  }
 0x28a   : > { %4286 = vmatpush2.bf16.msra.mxu1 %v18613_v50  ;;  %v18694_v50 = vld [vmem:[%s27651_s25 + $0x260] ss:$16 sps:$4 sm:$0xff]  }
 0x28b   : > { %4287 = vmatprep.subr.bf16.mxu1 %v18621_v47  ;;  %v18697_v47 = vld [vmem:[%s27651_s25 + $0x20] ss:$16 sps:$4 sm:$0xff]  }
 0x28c   : > { %4331 = vmatpush1.bf16.msra.mxu0 %v18616_v44  ;;  %v18699_v44 = vld [vmem:[%s27651_s25 + $0x24] ss:$16 sps:$4 sm:$0xff]  }
 0x28d   : > { %4332 = vmatprep.subr.bf16.mxu0 %v18624_v54  ;;  %v18702_v54 = vld [vmem:[%s27651_s25 + $0x244] ss:$16 sps:$4 sm:$0xff]  }
 0x28e   : > { %4288 = vmatpush2.bf16.msra.mxu1 %v18619_v3  ;;  %v18700_v3 = vld [vmem:[%s27651_s25 + $0x240] ss:$16 sps:$4 sm:$0xff]  }
 0x28f   : > { %4289 = vmatprep.subr.bf16.mxu1 %v18627_v56  ;;  %v18705_v56 = vld [vmem:[%s27651_s25 + $0x4] ss:$16 sps:$4 sm:$0xff]  }
 0x290   : > { %4333 = vmatpush1.bf16.msra.mxu0 %v18622_v11  ;;  %v18703_v11 = vld [vmem:[%s27651_s25] ss:$16 sps:$4 sm:$0xff]  }
 0x291   : > { %4334 = vmatprep.subr.bf16.mxu0 %v18630_v25  ;;  %v18706_v25 = vld [vmem:[%s27651_s25 + $0x220] ss:$16 sps:$4 sm:$0xff]  }
 0x292   : > { %4290 = vmatpush2.bf16.msra.mxu1 %v18625_v43  ;;  %v18708_v43 = vld [vmem:[%s27651_s25 + $0x224] ss:$16 sps:$4 sm:$0xff]  }
 0x293   : > { %4291 = vmatprep.subr.bf16.mxu1 %v18633_v58  ;;  %v18711_v58 = vld [vmem:[%s27651_s25 + $0x1e4] ss:$16 sps:$4 sm:$0xff]  }
 0x294   : > { %4335 = vmatpush1.bf16.msra.mxu0 %v18628_v49  ;;  %v18709_v49 = vld [vmem:[%s27651_s25 + $0x1e0] ss:$16 sps:$4 sm:$0xff]  }
 0x295   : > { %4336 = vmatprep.subr.bf16.mxu0 %v18636_v35  ;;  %v18717_v35 = vld [vmem:[%s27651_s25 + $0x1c4] ss:$16 sps:$4 sm:$0xff]  }
 0x296   : > { %4292 = vmatpush2.bf16.msra.mxu1 %v18631_v31  ;;  %v18714_v31 = vld [vmem:[%s27651_s25 + $0x204] ss:$16 sps:$4 sm:$0xff]  }
 0x297   : > { %4293 = vmatprep.subr.bf16.mxu1 %v18639_v23  ;;  %v18712_v23 = vld [vmem:[%s27651_s25 + $0x200] ss:$16 sps:$4 sm:$0xff]  }
 0x298   : > { %4337 = vmatpush1.bf16.msra.mxu0 %v18634_v59  ;;  %v18715_v59 = vld [vmem:[%s27651_s25 + $0x1c0] ss:$16 sps:$4 sm:$0xff]  }
 0x299   : > { %4344 = vmatprep.subr.bf16.mxu0 %v18642_v5  ;;  %v18723_v5 = vld [vmem:[%s27651_s25 + $0x1a4] ss:$16 sps:$4 sm:$0xff]  }
 0x29a   : > { %4294 = vmatpush2.bf16.msra.mxu1 %v18637_v22  ;;  %v18720_v22 = vld [vmem:[%s27651_s25 + $0x3e4] ss:$16 sps:$4 sm:$0xff]  }
 0x29b   : > { %4295 = vmatprep.subr.bf16.mxu1 %v18645_v0  ;;  %v18718_v0 = vld [vmem:[%s27651_s25 + $0x3e0] ss:$16 sps:$4 sm:$0xff]  }
 0x29c   : > { %4345 = vmatpush2.bf16.msra.mxu0 %v18640_v24  ;;  %v18721_v24 = vld [vmem:[%s27651_s25 + $0x1a0] ss:$16 sps:$4 sm:$0xff]  }
 0x29d   : > { %4346 = vmatprep.subr.bf16.mxu0 %v18648_v46  ;;  %v18729_v46 = vld [vmem:[%s27651_s25 + $0x184] ss:$16 sps:$4 sm:$0xff]  }
 0x29e   : > { %4296 = vmatpush2.bf16.msra.mxu1 %v18643_v39  ;;  %v18726_v39 = vld [vmem:[%s27651_s25 + $0x3c4] ss:$16 sps:$4 sm:$0xff]  }
 0x29f   : > { %4297 = vmatprep.subr.bf16.mxu1 %v18651_v16  ;;  %v18724_v16 = vld [vmem:[%s27651_s25 + $0x3c0] ss:$16 sps:$4 sm:$0xff]  }
 0x2a0   : > { %4347 = vmatpush2.bf16.msra.mxu0 %v18646_v55  ;;  %v18727_v55 = vld [vmem:[%s27651_s25 + $0x180] ss:$16 sps:$4 sm:$0xff]  }
 0x2a1   : > { %4348 = vmatprep.subr.bf16.mxu0 %v18654_v48  ;;  %v18735_v48 = vld [vmem:[%s27651_s25 + $0x164] ss:$16 sps:$4 sm:$0xff]  }
 0x2a2   : > { %4298 = vmatpush2.bf16.msra.mxu1 %v18649_v52  ;;  %v18732_v52 = vld [vmem:[%s27651_s25 + $0x3a4] ss:$16 sps:$4 sm:$0xff]  }
 0x2a3   : > { %4299 = vmatprep.subr.bf16.mxu1 %v18657_v51  ;;  %v18730_v51 = vld [vmem:[%s27651_s25 + $0x3a0] ss:$16 sps:$4 sm:$0xff]  }
 0x2a4   : > { %4349 = vmatpush2.bf16.msra.mxu0 %v18652_v18  ;;  %v18733_v18 = vld [vmem:[%s27651_s25 + $0x160] ss:$16 sps:$4 sm:$0xff]  }
 0x2a5   : > { %4350 = vmatprep.subr.bf16.mxu0 %v18660_v57  ;;  %v18741_v57 = vld [vmem:[%s27651_s25 + $0x144] ss:$16 sps:$4 sm:$0xff]  }
 0x2a6   : > { %4300 = vmatpush2.bf16.msra.mxu1 %v18655_v53  ;;  %v18738_v53 = vld [vmem:[%s27651_s25 + $0x384] ss:$16 sps:$4 sm:$0xff]  }
 0x2a7   : > { %5281 = vmatprep.subr.bf16.mxu1 %v18666_v42  ;;  %v18736_v42 = vld [vmem:[%s27651_s25 + $0x380] ss:$16 sps:$4 sm:$0xff]  }
 0x2a8   : > { %4351 = vmatpush2.bf16.msra.mxu0 %v18658_v13  ;;  %v18739_v13 = vld [vmem:[%s27651_s25 + $0x140] ss:$16 sps:$4 sm:$0xff]  }
 0x2a9   : > { %4302 = vmatmul.mubr.bf16.vlgmr.msra.gmra.mxu1 %v21948_v7  ;;  %4352 = vmatprep.subr.bf16.mxu0 %v18663_v28  ;;  %v18678_v7 = vld [vmem:[%s27651_s25 + $0x2c4] ss:$16 sps:$4 sm:$0xff]  }
 0x2aa   : > { %4311 = vmatprep.mubr.bf16.mxu1 %v21941_v12  ;;  %5282 = vmatpush1.bf16.msra.mxu1 %v18664_v2  ;;  %v18673_v12 = vld [vmem:[%s27651_s25 + $0xa0] ss:$16 sps:$4 sm:$0xff]   ;;  %v18744_v28 = vld [vmem:[%s27651_s25 + $0x364] ss:$16 sps:$4 sm:$0xff]  }
 0x2ab   : > { %5283 = vmatprep.subr.bf16.mxu1 %v18669_v20  ;;  %v18747_v2 = vld [vmem:[%s27651_s25 + $0x124] ss:$16 sps:$4 sm:$0xff]   ;;  %v18745_v20 = vld [vmem:[%s27651_s25 + $0x120] ss:$16 sps:$4 sm:$0xff]  }
 0x2ac   : > { %4353 = vmatpush2.bf16.msra.mxu0 %v18661_v21  ;;  %v18742_v21 = vld [vmem:[%s27651_s25 + $0x360] ss:$16 sps:$4 sm:$0xff]  }
 0x2ad   : > { %5334 = vmatprep.subr.bf16.mxu0 %v18672_v4  ;;  %v18750_v4 = vld [vmem:[%s27651_s25 + $0x344] ss:$16 sps:$4 sm:$0xff]  }
 0x2ae   : > { %5284 = vmatpush1.bf16.msra.mxu1 %v18667_v34  ;;  %v18748_v34 = vld [vmem:[%s27651_s25 + $0x340] ss:$16 sps:$4 sm:$0xff]  }
 0x2af   : > { %4355 = vmatmul.mubr.bf16.vlgmr.msra.gmra.mxu0 %v22115_v32  ;;  %5285 = vmatprep.subr.bf16.mxu1 %v18675_v36  ;;  %v18684_v32 = vld [vmem:[%s27651_s25 + $0x2a4] ss:$16 sps:$4 sm:$0xff]  }
 0x2b0   : > { %16514 = vmatprep.mubr.msk.bf16.mxu0 %vm2411_vm6, %v22118_v27  ;;  %5335 = vmatpush1.bf16.msra.mxu0 %v18670_v19  ;;  %v18682_v27 = vld [vmem:[%s27651_s25 + $0x2a0] ss:$16 sps:$4 sm:$0xff]   ;;  %v18753_v19 = vld [vmem:[%s27651_s25 + $0x104] ss:$16 sps:$4 sm:$0xff]  }
 0x2b1   : > { %4312 = vmatmul.mubr.bf16.gmra.mxu1 %v21979_v29  ;;  %5336 = vmatprep.subr.bf16.mxu0 %v18678_v7  ;;  %v18690_v29 = vld [vmem:[%s27651_s25 + $0x284] ss:$16 sps:$4 sm:$0xff]   ;;  %v18751_v7 = vld [vmem:[%s27651_s25 + $0x100] ss:$16 sps:$4 sm:$0xff]  }
 0x2b2   : > { %5286 = vmatpush1.bf16.msra.mxu1 %v18673_v12  ;;  %5313 = vmatprep.mubr.bf16.mxu1 %v22353_v45  ;;  %v18756_v36 = vld [vmem:[%s27651_s25 + $0x324] ss:$16 sps:$4 sm:$0xff]  }
 0x2b3   : > { %5287 = vmatprep.subr.bf16.mxu1 %v18681_v1  ;;  %v18762_v12 = vld [vmem:[%s27651_s25 + $0x4e4] ss:$16 sps:$4 sm:$0xff]  }
 0x2b4   : > { %5337 = vmatpush1.bf16.msra.mxu0 %v18676_v15  ;;  %v18754_v15 = vld [vmem:[%s27651_s25 + $0x320] ss:$16 sps:$4 sm:$0xff]   ;;  %v18759_v1 = vld [vmem:[%s27651_s25 + $0x304] ss:$16 sps:$4 sm:$0xff]  }
 0x2b5   : > { %5338 = vmatprep.subr.bf16.mxu0 %v18684_v32  ;;  %v2649_v32 = vld [vmem:[#allocation3 + $0x98] sm:$0xf] }
 0x2b6   : > { %5288 = vmatpush1.bf16.msra.mxu1 %v18679_v10  ;;  %v18765_v10 = vld [vmem:[%s27651_s25 + $0x4c4] ss:$16 sps:$4 sm:$0xff]  }
 0x2b7   : > { %4365 = vmatmul.mubr.bf16.gmra.mxu0 %v22141_v62  ;;  %5289 = vmatprep.subr.bf16.mxu1 %v18687_v37  ;;  %v18696_v62 = vld [vmem:[%s27651_s25 + $0x264] ss:$16 sps:$4 sm:$0xff]  }
 0x2b8   : > { %5339 = vmatpush1.bf16.msra.mxu0 %v18682_v27  ;;  %5366 = vmatprep.mubr.bf16.mxu0 %v22375_v30  ;;  %v20365_v27 = vld [vmem:[#allocation3 + $0x30] sm:$0xff] }
 0x2b9   : > { %5340 = vmatprep.subr.bf16.mxu0 %v18690_v29  ;;  %v22529_v37 = vpack.c.bf16 %v20365_v27, %v2630_v17  ;;  %v18768_v29 = vld [vmem:[%s27651_s25 + $0xec] ss:$16 sps:$4 sm:$0xff]  }
 0x2ba   : > { %5290 = vmatpush1.bf16.msra.mxu1 %v18685_v41  ;;  %v22534_v41 = vld [vmem:[#allocation3 + $0x68] sm:$0xff] }
 0x2bb   : > { %5291 = vmatprep.subr.bf16.mxu1 %v18693_v40  ;;  %v22537_v14 = vpack.c.bf16 %v2649_v32, %v22534_v41  ;;  %v18763_v40 = vld [vmem:[%s27651_s25 + $0x4c0] ss:$16 sps:$4 sm:$0xff]   ;;  %v18804_v32 = vld [vmem:[%s27651_s25 + $0x2c] ss:$16 sps:$4 sm:$0xff]  }
 0x2bc   : > { %5341 = vmatpush1.bf16.msra.mxu0 %v18688_v8  ;;  %v2632_v8 = vld [vmem:[#allocation3 + $0x10] sm:$0xff] }
 0x2bd   : > { %5342 = vmatprep.subr.bf16.mxu0 %v18696_v62  ;;  %v18766_v62 = vld [vmem:[%s27651_s25 + $0xe8] ss:$16 sps:$4 sm:$0xff]  }
 0x2be   : > { %5292 = vmatpush1.bf16.msra.mxu1 %v18691_v26  ;;  %v2648_v26 = vld [vmem:[#allocation3 + $0x90] sm:$0xf] }
 0x2bf   : > { %5293 = vmatprep.subr.bf16.mxu1 %v18699_v44  ;;  %v18771_v44 = vld [vmem:[%s27651_s25 + $0x4a4] ss:$16 sps:$4 sm:$0xff]  }
 0x2c0   : > { %5343 = vmatpush1.bf16.msra.mxu0 %v18694_v50  ;;  %v2651_v50 = vld [vmem:[#allocation3 + $0xa8] sm:$0xf] }
 0x2c1   : > { %5344 = vmatprep.subr.bf16.mxu0 %v18702_v54  ;;  %v18769_v54 = vld [vmem:[%s27651_s25 + $0x4a0] ss:$16 sps:$4 sm:$0xff]  }
 0x2c2   : > { %5294 = vmatpush1.bf16.msra.mxu1 %v18697_v47  ;;  %v2635_v47 = vld [vmem:[#allocation3 + $0x28] sm:$0xff] }
 0x2c3   : > { %5295 = vmatprep.subr.bf16.mxu1 %v18705_v56  ;;  %v20367_v56 = vld [vmem:[#allocation3 + $0x40] sm:$0xff] }
 0x2c4   : > { %5345 = vmatpush1.bf16.msra.mxu0 %v18700_v3  ;;  %v18774_v3 = vld [vmem:[%s27651_s25 + $0xcc] ss:$16 sps:$4 sm:$0xff]  }
 0x2c5   : > { %5346 = vmatprep.subr.bf16.mxu0 %v18708_v43  ;;  %v18777_v43 = vld [vmem:[%s27651_s25 + $0x484] ss:$16 sps:$4 sm:$0xff]  }
 0x2c6   : > { %5296 = vmatpush1.bf16.msra.mxu1 %v18703_v11  ;;  %v22556_v11 = vpack.c.bf16 %v20367_v56, %v2632_v8 }
 0x2c7   : > { %5297 = vmatprep.subr.bf16.mxu1 %v18711_v58 }
 0x2c8   : > { %5347 = vmatpush1.bf16.msra.mxu0 %v18706_v25  ;;  %v22561_v25 = vld [vmem:[#allocation3 + $0x78] sm:$0xff] }
 0x2c9   : > { %5348 = vmatprep.subr.bf16.mxu0 %v18714_v31  ;;  %v22564_v58 = vpack.c.bf16 %v2651_v50, %v22561_v25 }
 0x2ca   : > { %5298 = vmatpush2.bf16.msra.mxu1 %v18709_v49  ;;  %v20369_v49 = vld [vmem:[#allocation3 + $0x60] sm:$0xff] }
 0x2cb   : > { %5299 = vmatprep.subr.bf16.mxu1 %v18717_v35  ;;  %v22567_v31 = vpack.c.bf16 %v2648_v26, %v20369_v49  ;;  %v18772_v35 = vld [vmem:[%s27651_s25 + $0xc8] ss:$16 sps:$4 sm:$0xff]   ;;  %v18805_v26 = vld [vmem:[%s27651_s25 + $0x580] ss:$16 sps:$4 sm:$0xff]  }
 0x2cc   : > { %5349 = vmatpush1.bf16.msra.mxu0 %v18712_v23  ;;  %v20370_v23 = vld [vmem:[#allocation3 + $0x58] sm:$0xff] }
 0x2cd   : > { %5350 = vmatprep.subr.bf16.mxu0 %v18720_v22  ;;  %v2650_v22 = vld [vmem:[#allocation3 + $0xa0] sm:$0xf]  ;;  %v18811_v49 = vld [vmem:[%s27651_s25 + $0x560] ss:$16 sps:$4 sm:$0xff]  }
 0x2ce   : > { %5300 = vmatpush2.bf16.msra.mxu1 %v18715_v59  ;;  %v22573_v59 = vpack.c.bf16 %v20370_v23, %v2635_v47  ;;  %v18819_v23 = vld [vmem:[%s27651_s25 + $0x544] ss:$16 sps:$4 sm:$0xff]  }
 0x2cf   : > { %5301 = vmatprep.subr.bf16.mxu1 %v18723_v5  ;;  %v18775_v5 = vld [vmem:[%s27651_s25 + $0x480] ss:$16 sps:$4 sm:$0xff]  }
 0x2d0   : > { %5351 = vmatpush2.bf16.msra.mxu0 %v18718_v0  ;;  %v18780_v0 = vld [vmem:[%s27651_s25 + $0xac] ss:$16 sps:$4 sm:$0xff]  }
 0x2d1   : > { %5352 = vmatprep.subr.bf16.mxu0 %v18726_v39  ;;  %v18778_v39 = vld [vmem:[%s27651_s25 + $0xa8] ss:$16 sps:$4 sm:$0xff]  }
 0x2d2   : > { %5302 = vmatpush2.bf16.msra.mxu1 %v18721_v24  ;;  %v18783_v24 = vld [vmem:[%s27651_s25 + $0x464] ss:$16 sps:$4 sm:$0xff]  }
 0x2d3   : > { %5303 = vmatprep.subr.bf16.mxu1 %v18729_v46 }
 0x2d4   : > { %5353 = vmatpush2.bf16.msra.mxu0 %v18724_v16  ;;  %v18781_v16 = vld [vmem:[%s27651_s25 + $0x460] ss:$16 sps:$4 sm:$0xff]  }
 0x2d5   : > { %5354 = vmatprep.subr.bf16.mxu0 %v18732_v52  ;;  %v20371_v52 = vld [vmem:[#allocation3 + $0x70] sm:$0xff] }
 0x2d6   : > { %5304 = vmatpush2.bf16.msra.mxu1 %v18727_v55  ;;  %v18786_v55 = vld [vmem:[%s27651_s25 + $0x8c] ss:$16 sps:$4 sm:$0xff]  }
 0x2d7   : > { %5305 = vmatprep.subr.bf16.mxu1 %v18735_v48  ;;  %v22596_v48 = vpack.c.bf16 %v2650_v22, %v20371_v52  ;;  %v18814_v22 = vld [vmem:[%s27651_s25 + $0x1e8] ss:$16 sps:$4 sm:$0xff]  }
 0x2d8   : > { %5355 = vmatpush2.bf16.msra.mxu0 %v18730_v51  ;;  %v18789_v51 = vld [vmem:[%s27651_s25 + $0x444] ss:$16 sps:$4 sm:$0xff]   ;;  %v18826_v52 = vld [vmem:[%s27651_s25 + $0x1a8] ss:$16 sps:$4 sm:$0xff]  }
 0x2d9   : > { %5356 = vmatprep.subr.bf16.mxu0 %v18738_v53  ;;  %v18784_v53 = vld [vmem:[%s27651_s25 + $0x88] ss:$16 sps:$4 sm:$0xff]  }
 0x2da   : > { %5306 = vmatpush2.bf16.msra.mxu1 %v18733_v18 }
 0x2db   : > { %5307 = vmatprep.subr.bf16.mxu1 %v18741_v57 }
 0x2dc   : > { %5357 = vmatpush2.bf16.msra.mxu0 %v18736_v42  ;;  %v18787_v42 = vld [vmem:[%s27651_s25 + $0x440] ss:$16 sps:$4 sm:$0xff]  }
 0x2dd   : > { %5358 = vmatprep.subr.bf16.mxu0 %v18744_v28  ;;  %v18795_v28 = vld [vmem:[%s27651_s25 + $0x424] ss:$16 sps:$4 sm:$0xff]  }
 0x2de   : > { %5308 = vmatpush2.bf16.msra.mxu1 %v18739_v13  ;;  %v18792_v13 = vld [vmem:[%s27651_s25 + $0x6c] ss:$16 sps:$4 sm:$0xff]  }
 0x2df   : > { %5309 = vmatprep.subr.bf16.mxu1 %v18747_v2 }
 0x2e0   : > { %5359 = vmatpush2.bf16.msra.mxu0 %v18742_v21 }
 0x2e1   : > { %5360 = vmatprep.subr.bf16.mxu0 %v18750_v4 }
 0x2e2   : > { %5310 = vmatpush2.bf16.msra.mxu1 %v18745_v20  ;;  %v18790_v20 = vld [vmem:[%s27651_s25 + $0x68] ss:$16 sps:$4 sm:$0xff]  }
 0x2e3   : > { %5311 = vmatprep.subr.bf16.mxu1 %v18753_v19 }
 0x2e4   : > { %5361 = vmatpush2.bf16.msra.mxu0 %v18748_v34  ;;  %v18798_v34 = vld [vmem:[%s27651_s25 + $0x4c] ss:$16 sps:$4 sm:$0xff]  }
 0x2e5   : > { %5362 = vmatprep.subr.bf16.mxu0 %v18756_v36  ;;  %v18793_v36 = vld [vmem:[%s27651_s25 + $0x420] ss:$16 sps:$4 sm:$0xff]  }
 0x2e6   : > { %5312 = vmatpush2.bf16.msra.mxu1 %v18751_v7 }
 0x2e7   : > { %5387 = vmatprep.subr.bf16.mxu1 %v18762_v12  ;;  %v18801_v12 = vld [vmem:[%s27651_s25 + $0x404] ss:$16 sps:$4 sm:$0xff]  }
 0x2e8   : > { %5363 = vmatpush2.bf16.msra.mxu0 %v18754_v15 }
 0x2e9   : > { %5314 = vmatmul.mubr.bf16.vlgmr.msra.gmra.mxu1 %v22529_v37  ;;  %5364 = vmatprep.subr.bf16.mxu0 %v18759_v1  ;;  %v18796_v1 = vld [vmem:[%s27651_s25 + $0x48] ss:$16 sps:$4 sm:$0xff]  }
 0x2ea   : > { %5323 = vmatprep.mubr.bf16.mxu1 %v22537_v14  ;;  %5388 = vmatpush1.bf16.msra.mxu1 %v18760_v61  ;;  %v18799_v61 = vld [vmem:[%s27651_s25 + $0x400] ss:$16 sps:$4 sm:$0xff]  }
 0x2eb   : > { %5389 = vmatprep.subr.bf16.mxu1 %v18765_v10  ;;  %v18807_v10 = vld [vmem:[%s27651_s25 + $0x584] ss:$16 sps:$4 sm:$0xff]  }
 0x2ec   : > { %5365 = vmatpush2.bf16.msra.mxu0 %v18757_v38 }
 0x2ed   : > { %5440 = vmatprep.subr.bf16.mxu0 %v18768_v29 }
 0x2ee   : > { %5390 = vmatpush1.bf16.msra.mxu1 %v18763_v40  ;;  %v18802_v40 = vld [vmem:[%s27651_s25 + $0x28] ss:$16 sps:$4 sm:$0xff]  }
 0x2ef   : > { %5367 = vmatmul.mubr.bf16.vlgmr.msra.gmra.mxu0 %v22556_v11  ;;  %5391 = vmatprep.subr.bf16.mxu1 %v18771_v44  ;;  %v18813_v44 = vld [vmem:[%s27651_s25 + $0x564] ss:$16 sps:$4 sm:$0xff]  }
 0x2f0   : > { %5376 = vmatprep.mubr.bf16.mxu0 %v22564_v58  ;;  %5441 = vmatpush1.bf16.msra.mxu0 %v18766_v62  ;;  %v18810_v62 = vld [vmem:[%s27651_s25 + $0xc] ss:$16 sps:$4 sm:$0xff]  }
 0x2f1   : > { %5324 = vmatmul.mubr.bf16.gmra.mxu1 %v22567_v31  ;;  %5442 = vmatprep.subr.bf16.mxu0 %v18774_v3 }
 0x2f2   : > { %5392 = vmatpush1.bf16.msra.mxu1 %v18769_v54  ;;  %16695 = vmatprep.mubr.msk.bf16.mxu1 %vm2411_vm6, %v22573_v59 }
 0x2f3   : > { %5393 = vmatprep.subr.bf16.mxu1 %v18777_v43  ;;  %v18808_v43 = vld [vmem:[%s27651_s25 + $0x8] ss:$16 sps:$4 sm:$0xff]  }
 0x2f4   : > { %5443 = vmatpush1.bf16.msra.mxu0 %v18772_v35  ;;  %v4091_v46 = vpop.f32.mrf.mxu1  ;;  %v18816_v35 = vld [vmem:[%s27651_s25 + $0x1ec] ss:$16 sps:$4 sm:$0xff]  }
 0x2f5   : > { %5444 = vmatprep.subr.bf16.mxu0 %v18780_v0  ;;  %v18822_v0 = vld [vmem:[%s27651_s25 + $0x1cc] ss:$16 sps:$4 sm:$0xff]  }
 0x2f6   : > { %5394 = vmatpush1.bf16.msra.mxu1 %v18775_v5  ;;  %v4093_v18 = vpop.f32.mrf.mxu1  ;;  %v18817_v5 = vld [vmem:[%s27651_s25 + $0x540] ss:$16 sps:$4 sm:$0xff]  }
 0x2f7   : > { %5377 = vmatmul.mubr.bf16.gmra.mxu0 %v22596_v48  ;;  %5395 = vmatprep.subr.bf16.mxu1 %v18783_v24  ;;  %v18825_v24 = vld [vmem:[%s27651_s25 + $0x524] ss:$16 sps:$4 sm:$0xff]  }
 0x2f8   : > { %5445 = vmatpush1.bf16.msra.mxu0 %v18778_v39  ;;  %5472 = vmatprep.mubr.bf16.mxu0 %v22353_v45  ;;  %v4095_v57 = vpop.f32.mrf.mxu1  ;;  %v18820_v39 = vld [vmem:[%s27651_s25 + $0x1c8] ss:$16 sps:$4 sm:$0xff]  }
 0x2f9   : > { %5446 = vmatprep.subr.bf16.mxu0 %v18786_v55  ;;  %v18831_v55 = vld [vmem:[%s27651_s25 + $0x504] ss:$16 sps:$4 sm:$0xff]  }
 0x2fa   : > { %5396 = vmatpush1.bf16.msra.mxu1 %v18781_v16  ;;  %v22615_v2 = vpop.f32.mrf.mxu1  ;;  %v18828_v16 = vld [vmem:[%s27651_s25 + $0x1ac] ss:$16 sps:$4 sm:$0xff]  }
 0x2fb   : > { %v4144_v45 = vpop.f32.mrf.mxu0  ;;  %5397 = vmatprep.subr.bf16.mxu1 %v18789_v51  ;;  %v18829_v51 = vld [vmem:[%s27651_s25 + $0x500] ss:$16 sps:$4 sm:$0xff]  }
 0x2fc   : > { %v22617_v21 = vadd.f32 %v4144_v45, %v4091_v46  ;;  %5447 = vmatpush1.bf16.msra.mxu0 %v18784_v53  ;;  %v18823_v46 = vld [vmem:[%s27651_s25 + $0x520] ss:$16 sps:$4 sm:$0xff]   ;;  %v18840_v53 = vld [vmem:[%s27651_s25 + $0x2ec] ss:$16 sps:$4 sm:$0xff]   ;;  %v18838_v45 = vld [vmem:[%s27651_s25 + $0x2e8] ss:$16 sps:$4 sm:$0xff]  }
 0x2fd   : > { %v4146_v4 = vpop.f32.mrf.mxu0  ;;  %5448 = vmatprep.subr.bf16.mxu0 %v18792_v13  ;;  %v4101_v7 = vpop.f32.mrf.mxu1  ;;  %v18832_v13 = vld [vmem:[%s27651_s25 + $0x188] ss:$16 sps:$4 sm:$0xff]  }
 0x2fe   : > { %v22625_v19 = vadd.f32 %v4146_v4, %v4093_v18  ;;  %5398 = vmatpush1.bf16.msra.mxu1 %v18787_v42  ;;  %v18834_v18 = vld [vmem:[%s27651_s25 + $0x18c] ss:$16 sps:$4 sm:$0xff]   ;;  %v2653_v42 = vld [vmem:[#allocation3 + $0xb8] sm:$0xf]  ;;  %v18835_v4 = vld [vmem:[%s27651_s25 + $0x168] ss:$16 sps:$4 sm:$0xff]  }
 0x2ff   : > { %v4148_v17 = vpop.f32.mrf.mxu0  ;;  %5399 = vmatprep.subr.bf16.mxu1 %v18795_v28  ;;  %v4103_v27 = vpop.f32.mrf.mxu1  ;;  %v18837_v28 = vld [vmem:[%s27651_s25 + $0x16c] ss:$16 sps:$4 sm:$0xff]  }
 0x300   : > { %v22633_v15 = vadd.f32 %v4148_v17, %v4095_v57  ;;  %5449 = vmatpush1.bf16.msra.mxu0 %v18790_v20  ;;  %v2634_v57 = vld [vmem:[#allocation3 + $0x20] sm:$0xff] }
 0x301   : > { %v22644_v38 = vpop.f32.mrf.mxu0  ;;  %5450 = vmatprep.subr.bf16.mxu0 %v18798_v34  ;;  %v4105_v54 = vpop.f32.mrf.mxu1  ;;  %v18846_v20 = vld [vmem:[%s27651_s25 + $0x2cc] ss:$16 sps:$4 sm:$0xff]  }
 0x302   : > { %5400 = vmatpush1.bf16.msra.mxu1 %v18793_v36  ;;  %v20372_v34 = vld [vmem:[#allocation3 + $0x50] sm:$0xff] }
 0x303   : > { %v4154_v29 = vpop.f32.mrf.mxu0  ;;  %5401 = vmatprep.subr.bf16.mxu1 %v18801_v12  ;;  %v22730_v36 = vpack.c.bf16 %v20372_v34, %v2634_v57  ;;  %v18843_v12 = vld [vmem:[%s27651_s25 + $0x14c] ss:$16 sps:$4 sm:$0xff]   ;;  %v18883_v34 = vld [vmem:[%s27651_s25 + $0x3e8] ss:$16 sps:$4 sm:$0xff]  }
 0x304   : > { %v22649_v8 = vadd.f32 %v4154_v29, %v4101_v7  ;;  %5451 = vmatpush1.bf16.msra.mxu0 %v18796_v1  ;;  %v22732_v7 = vld [vmem:[#allocation3 + $0x88] sm:$0xff]  ;;  %v18844_v1 = vld [vmem:[%s27651_s25 + $0x2c8] ss:$16 sps:$4 sm:$0xff]  }
 0x305   : > { %v4156_v50 = vpop.f32.mrf.mxu0  ;;  %5452 = vmatprep.subr.bf16.mxu0 %v18804_v32  ;;  %v22735_v17 = vpack.c.bf16 %v2653_v42, %v22732_v7  ;;  %v2652_v32 = vld [vmem:[#allocation3 + $0xb0] sm:$0xf] }
 0x306   : > { %v22663_v47 = vadd.f32 %v4156_v50, %v4103_v27  ;;  %5402 = vmatpush1.bf16.msra.mxu1 %v18799_v61  ;;  %v18841_v61 = vld [vmem:[%s27651_s25 + $0x148] ss:$16 sps:$4 sm:$0xff]   ;;  %v18849_v27 = vld [vmem:[%s27651_s25 + $0x12c] ss:$16 sps:$4 sm:$0xff]  }
 0x307   : > { %v4158_v3 = vpop.f32.mrf.mxu0  ;;  %5409 = vmatprep.subr.bf16.mxu1 %v18807_v10  ;;  %v18852_v10 = vld [vmem:[%s27651_s25 + $0x2ac] ss:$16 sps:$4 sm:$0xff]   ;;  %v18850_v29 = vld [vmem:[%s27651_s25 + $0x2a8] ss:$16 sps:$4 sm:$0xff]  }
 0x308   : > { %v22665_v56 = vadd.f32 %v4158_v3, %v4105_v54  ;;  %5453 = vmatpush1.bf16.msra.mxu0 %v18802_v40  ;;  %v20374_v40 = vld [vmem:[#allocation3 + $0x80] sm:$0xff] }
 0x309   : > { %5454 = vmatprep.subr.bf16.mxu0 %v18810_v62  ;;  %v18858_v62 = vld [vmem:[%s27651_s25 + $0x28c] ss:$16 sps:$4 sm:$0xff]   ;;  %v18847_v50 = vld [vmem:[%s27651_s25 + $0x128] ss:$16 sps:$4 sm:$0xff]  }
 0x30a   : > { %5410 = vmatpush2.bf16.msra.mxu1 %v18805_v26  ;;  %v22758_v26 = vpack.c.bf16 %v2652_v32, %v20374_v40  ;;  %v18856_v54 = vld [vmem:[%s27651_s25 + $0x288] ss:$16 sps:$4 sm:$0xff]  }
 0x30b   : > { %5411 = vmatprep.subr.bf16.mxu1 %v18813_v44  ;;  %v18855_v44 = vld [vmem:[%s27651_s25 + $0x10c] ss:$16 sps:$4 sm:$0xff]   ;;  %v18853_v3 = vld [vmem:[%s27651_s25 + $0x108] ss:$16 sps:$4 sm:$0xff]  }
 0x30c   : > { %5455 = vmatpush1.bf16.msra.mxu0 %v18808_v43  ;;  %v18861_v43 = vld [vmem:[%s27651_s25 + $0x26c] ss:$16 sps:$4 sm:$0xff]   ;;  %v18892_v32 = vld [vmem:[%s27651_s25 + $0x448] ss:$16 sps:$4 sm:$0xff]  }
 0x30d   : > { %5456 = vmatprep.subr.bf16.mxu0 %v18816_v35  ;;  %v18864_v35 = vld [vmem:[%s27651_s25 + $0x4ec] ss:$16 sps:$4 sm:$0xff]   ;;  %v18898_v40 = vld [vmem:[%s27651_s25 + $0x428] ss:$16 sps:$4 sm:$0xff]  }
 0x30e   : > { %5412 = vmatpush2.bf16.msra.mxu1 %v18811_v49  ;;  %v22780_v49 = vpop.f32.mrf.mxu1 }
 0x30f   : > { %5413 = vmatprep.subr.bf16.mxu1 %v18819_v23 }
 0x310   : > { %5457 = vmatpush2.bf16.msra.mxu0 %v18814_v22 }
 0x311   : > { %5458 = vmatprep.subr.bf16.mxu0 %v18822_v0  ;;  %v18862_v0 = vld [vmem:[%s27651_s25 + $0x4e8] ss:$16 sps:$4 sm:$0xff]  }
 0x312   : > { %5414 = vmatpush2.bf16.msra.mxu1 %v18817_v5 }
 0x313   : > { %5415 = vmatprep.subr.bf16.mxu1 %v18825_v24  ;;  %v18867_v24 = vld [vmem:[%s27651_s25 + $0x24c] ss:$16 sps:$4 sm:$0xff]  }
 0x314   : > { %5459 = vmatpush2.bf16.msra.mxu0 %v18820_v39 }
 0x315   : > { %5460 = vmatprep.subr.bf16.mxu0 %v18828_v16 }
 0x316   : > { %5416 = vmatpush2.bf16.msra.mxu1 %v18823_v46  ;;  %v18870_v46 = vld [vmem:[%s27651_s25 + $0x4cc] ss:$16 sps:$4 sm:$0xff]  }
 0x317   : > { %5417 = vmatprep.subr.bf16.mxu1 %v18831_v55  ;;  %v18873_v55 = vld [vmem:[%s27651_s25 + $0x22c] ss:$16 sps:$4 sm:$0xff]  }
 0x318   : > { %5461 = vmatpush2.bf16.msra.mxu0 %v18826_v52 }
 0x319   : > { %5462 = vmatprep.subr.bf16.mxu0 %v18834_v18  ;;  %v18871_v18 = vld [vmem:[%s27651_s25 + $0x228] ss:$16 sps:$4 sm:$0xff]  }
 0x31a   : > { %5418 = vmatpush2.bf16.msra.mxu1 %v18829_v51  ;;  %v18868_v51 = vld [vmem:[%s27651_s25 + $0x4c8] ss:$16 sps:$4 sm:$0xff]  }
 0x31b   : > { %5493 = vmatprep.subr.bf16.mxu1 %v18840_v53 }
 0x31c   : > { %5463 = vmatpush2.bf16.msra.mxu0 %v18832_v13  ;;  %v18874_v13 = vld [vmem:[%s27651_s25 + $0x4a8] ss:$16 sps:$4 sm:$0xff]  }
 0x31d   : > { %5420 = vmatmul.mubr.bf16.vlgmr.msra.gmra.mxu1 %v22730_v36  ;;  %5464 = vmatprep.subr.bf16.mxu0 %v18837_v28  ;;  %v18877_v28 = vld [vmem:[%s27651_s25 + $0x208] ss:$16 sps:$4 sm:$0xff]  }
 0x31e   : > { %16696 = vmatprep.mubr.msk.bf16.mxu1 %vm2411_vm6, %v22735_v17  ;;  %5494 = vmatpush1.bf16.msra.mxu1 %v18838_v45 }
 0x31f   : > { %5495 = vmatprep.subr.bf16.mxu1 %v18846_v20  ;;  %v18885_v20 = vld [vmem:[%s27651_s25 + $0x3ec] ss:$16 sps:$4 sm:$0xff]  }
 0x320   : > { %5465 = vmatpush2.bf16.msra.mxu0 %v18835_v4  ;;  %v18880_v4 = vld [vmem:[%s27651_s25 + $0x488] ss:$16 sps:$4 sm:$0xff]  }
 0x321   : > { %5466 = vmatprep.subr.bf16.mxu0 %v18843_v12  ;;  %v18894_v12 = vld [vmem:[%s27651_s25 + $0x44c] ss:$16 sps:$4 sm:$0xff]  }
 0x322   : > { %5496 = vmatpush1.bf16.msra.mxu1 %v18844_v1  ;;  %v18889_v1 = vld [vmem:[%s27651_s25 + $0x3c8] ss:$16 sps:$4 sm:$0xff]  }
 0x323   : > { %5497 = vmatprep.subr.bf16.mxu1 %v18852_v10  ;;  %v18895_v10 = vld [vmem:[%s27651_s25 + $0x3a8] ss:$16 sps:$4 sm:$0xff]  }
 0x324   : > { %5467 = vmatpush2.bf16.msra.mxu0 %v18841_v61  ;;  %v18897_v61 = vld [vmem:[%s27651_s25 + $0x3ac] ss:$16 sps:$4 sm:$0xff]  }
 0x325   : > { %5430 = vmatmul.mubr.bf16.gmra.mxu1 %v22758_v26  ;;  %5468 = vmatprep.subr.bf16.mxu0 %v18849_v27  ;;  %v18900_v27 = vld [vmem:[%s27651_s25 + $0x42c] ss:$16 sps:$4 sm:$0xff]  }
 0x326   : > { %5498 = vmatpush1.bf16.msra.mxu1 %v18850_v29  ;;  %5525 = vmatprep.mubr.bf16.mxu1 %v22375_v30  ;;  %v18859_v30 = vld [vmem:[%s27651_s25 + $0x268] ss:$16 sps:$4 sm:$0xff]   ;;  %v18903_v29 = vld [vmem:[%s27651_s25 + $0x38c] ss:$16 sps:$4 sm:$0xff]  }
 0x327   : > { %5499 = vmatprep.subr.bf16.mxu1 %v18858_v62  ;;  %v18906_v62 = vld [vmem:[%s27651_s25 + $0x40c] ss:$16 sps:$4 sm:$0xff]  }
 0x328   : > { %5469 = vmatpush2.bf16.msra.mxu0 %v18847_v50  ;;  %v18901_v50 = vld [vmem:[%s27651_s25 + $0x388] ss:$16 sps:$4 sm:$0xff]  }
 0x329   : > { %v4197_v23 = vpop.f32.mrf.mxu1  ;;  %5470 = vmatprep.subr.bf16.mxu0 %v18855_v44  ;;  %v18909_v44 = vld [vmem:[%s27651_s25 + $0x36c] ss:$16 sps:$4 sm:$0xff]  }
 0x32a   : > { %v22789_v22 = vadd.f32 %v4197_v23, %v22617_v21  ;;  %5500 = vmatpush1.bf16.msra.mxu1 %v18856_v54  ;;  %v18865_v21 = vld [vmem:[%s27651_s25 + $0x248] ss:$16 sps:$4 sm:$0xff]   ;;  %v18918_v23 = vld [vmem:[%s27651_s25 + $0x56c] ss:$16 sps:$4 sm:$0xff]  }
 0x32b   : > { %v4199_v5 = vpop.f32.mrf.mxu1  ;;  %5501 = vmatprep.subr.bf16.mxu1 %v18861_v43  ;;  %v18904_v54 = vld [vmem:[%s27651_s25 + $0x408] ss:$16 sps:$4 sm:$0xff]  }
 0x32c   : > { %5471 = vmatpush2.bf16.msra.mxu0 %v18853_v3  ;;  %v22798_v39 = vadd.f32 %v4199_v5, %v22625_v19  ;;  %v18912_v3 = vld [vmem:[%s27651_s25 + $0x58c] ss:$16 sps:$4 sm:$0xff]   ;;  %v18907_v43 = vld [vmem:[%s27651_s25 + $0x368] ss:$16 sps:$4 sm:$0xff]  }
 0x32d   : > { %v4201_v16 = vpop.f32.mrf.mxu1  ;;  %5546 = vmatprep.subr.bf16.mxu0 %v18864_v35  ;;  %v18915_v35 = vld [vmem:[%s27651_s25 + $0x34c] ss:$16 sps:$4 sm:$0xff]   ;;  %v18913_v5 = vld [vmem:[%s27651_s25 + $0x348] ss:$16 sps:$4 sm:$0xff]  }
 0x32e   : > { %v22810_v52 = vadd.f32 %v4201_v16, %v22633_v15  ;;  %5502 = vmatpush1.bf16.msra.mxu1 %v18859_v30  ;;  %v18876_v15 = vld [vmem:[%s27651_s25 + $0x4ac] ss:$16 sps:$4 sm:$0xff]   ;;  %v18910_v30 = vld [vmem:[%s27651_s25 + $0x588] ss:$16 sps:$4 sm:$0xff]  }
 0x32f   : > { %5473 = vmatmul.mubr.bf16.vlgmr.msra.gmra.mxu0 %v22529_v37  ;;  %v22813_v19 = vpop.f32.mrf.mxu1  ;;  %5503 = vmatprep.subr.bf16.mxu1 %v18867_v24  ;;  %v18879_v37 = vld [vmem:[%s27651_s25 + $0x20c] ss:$16 sps:$4 sm:$0xff]  }
 0x330   : > { %5482 = vmatprep.mubr.bf16.mxu0 %v22537_v14  ;;  %5547 = vmatpush1.bf16.msra.mxu0 %v18862_v0  ;;  %v22921_v0 = vpop.f32.mrf.mxu0  ;;  %v18921_v24 = vld [vmem:[%s27651_s25 + $0x32c] ss:$16 sps:$4 sm:$0xff]  }
 0x331   : > { %v4207_v53 = vpop.f32.mrf.mxu1  ;;  %5548 = vmatprep.subr.bf16.mxu0 %v18870_v46  ;;  %v18924_v16 = vld [vmem:[%s27651_s25 + $0x54c] ss:$16 sps:$4 sm:$0xff]  }
 0x332   : > { %v22829_v14 = vadd.f32 %v4207_v53, %v22649_v8  ;;  %5504 = vmatpush1.bf16.msra.mxu1 %v18865_v21  ;;  %v18882_v8 = vld [vmem:[%s27651_s25 + $0x48c] ss:$16 sps:$4 sm:$0xff]   ;;  %v18916_v21 = vld [vmem:[%s27651_s25 + $0x568] ss:$16 sps:$4 sm:$0xff]  }
 0x333   : > { %v4209_v57 = vpop.f32.mrf.mxu1  ;;  %5505 = vmatprep.subr.bf16.mxu1 %v18873_v55  ;;  %v18919_v55 = vld [vmem:[%s27651_s25 + $0x328] ss:$16 sps:$4 sm:$0xff]   ;;  %v18930_v53 = vld [vmem:[%s27651_s25 + $0x52c] ss:$16 sps:$4 sm:$0xff]  }
 0x334   : > { %5549 = vmatpush1.bf16.msra.mxu0 %v18868_v51  ;;  %v22832_v42 = vadd.f32 %v4209_v57, %v22663_v47  ;;  %v18927_v51 = vld [vmem:[%s27651_s25 + $0x30c] ss:$16 sps:$4 sm:$0xff]   ;;  %v18936_v57 = vld [vmem:[%s27652_s30 + $0xe4] ss:$16 sps:$4 sm:$0xff]   ;;  %s18144_s30 = sshll.u32 %s27707_s4, 4 }
 0x335   : > { %v4211_v45 = vpop.f32.mrf.mxu1  ;;  %5550 = vmatprep.subr.bf16.mxu0 %v18876_v15 }
 0x336   : > { %v22847_v47 = vadd.f32 %v4211_v45, %v22665_v56  ;;  %5506 = vmatpush1.bf16.msra.mxu1 %v18871_v18  ;;  %v18888_v56 = vld [vmem:[%s27651_s25 + $0x46c] ss:$16 sps:$4 sm:$0xff]   ;;  %v18922_v18 = vld [vmem:[%s27651_s25 + $0x548] ss:$16 sps:$4 sm:$0xff]   ;;  %v18934_v45 = vld [vmem:[%s27653_s8 + $0xe0] ss:$16 sps:$4 sm:$0xff]  }
 0x337   : > { %5483 = vmatmul.mubr.bf16.gmra.mxu0 %v22567_v31  ;;  %5507 = vmatprep.subr.bf16.mxu1 %v18879_v37  ;;  %v18891_v31 = vld [vmem:[%s27651_s25 + $0x3cc] ss:$16 sps:$4 sm:$0xff]   ;;  %v18925_v37 = vld [vmem:[%s27651_s25 + $0x308] ss:$16 sps:$4 sm:$0xff]  }
 0x338   : > { %5551 = vmatpush1.bf16.msra.mxu0 %v18874_v13  ;;  %16697 = vmatprep.mubr.msk.bf16.mxu0 %vm2411_vm6, %v22573_v59  ;;  %v18886_v59 = vld [vmem:[%s27651_s25 + $0x468] ss:$16 sps:$4 sm:$0xff]  }
 0x339   : > { %5552 = vmatprep.subr.bf16.mxu0 %v18882_v8  ;;  %v18928_v13 = vld [vmem:[%s27651_s25 + $0x528] ss:$16 sps:$4 sm:$0xff]   ;;  %v18933_v8 = vld [vmem:[%s27651_s25 + $0x50c] ss:$16 sps:$4 sm:$0xff]  }
 0x33a   : > { %5508 = vmatpush1.bf16.msra.mxu1 %v18877_v28 }
 0x33b   : > { %5509 = vmatprep.subr.bf16.mxu1 %v18885_v20  ;;  %v22929_v46 = vpop.f32.mrf.mxu0  ;;  %v5606_v20 = vld [vmem:[#allocation3 + $0x98] sm:$0x3f] }
 0x33c   : > { %5553 = vmatpush1.bf16.msra.mxu0 %v18880_v4  ;;  %v18939_v4 = vld [vmem:[%s27653_s8 + $0xc4] ss:$16 sps:$4 sm:$0xff]  }
 0x33d   : > { %5554 = vmatprep.subr.bf16.mxu0 %v18888_v56  ;;  %v22943_v15 = vpop.f32.mrf.mxu0  ;;  %v5600_v56 = vld [vmem:[#allocation3 + $0x8] sm:$0xfc] }
 0x33e   : > { %5510 = vmatpush2.bf16.msra.mxu1 %v18883_v34  ;;  %v18931_v34 = vld [vmem:[%s27651_s25 + $0x508] ss:$16 sps:$4 sm:$0xff]  }
 0x33f   : > { %5511 = vmatprep.subr.bf16.mxu1 %v18891_v31  ;;  %v22957_v28 = vpop.f32.mrf.mxu0 }
 0x340   : > { %5555 = vmatpush1.bf16.msra.mxu0 %v18886_v59  ;;  %v18942_v59 = vld [vmem:[%s27653_s8 + $0x2e4] ss:$16 sps:$4 sm:$0xff]  }
 0x341   : > { %5556 = vmatprep.subr.bf16.mxu0 %v18894_v12  ;;  %v22971_v31 = vpop.f32.mrf.mxu0  ;;  %v5618_v12 = vpack.c.bf16 %v5606_v20, %v22534_v41  ;;  %v18940_v41 = vld [vmem:[%s27653_s8 + $0x2e0] ss:$16 sps:$4 sm:$0xff]   ;;  %v18966_v20 = vld [vmem:[%s27653_s8 + $0x264] ss:$16 sps:$4 sm:$0xff]  }
 0x342   : > { %5512 = vmatpush2.bf16.msra.mxu1 %v18889_v1  ;;  %27654 = vst [vmem:[#allocation18_spill] sm:$0xff] %v22971_v31  ;;  %v18937_v1 = vld [vmem:[%s27653_s8 + $0xc0] ss:$16 sps:$4 sm:$0xff]  }
 0x343   : > { %5513 = vmatprep.subr.bf16.mxu1 %v18897_v61  ;;  %v18945_v61 = vld [vmem:[%s27653_s8 + $0xa4] ss:$16 sps:$4 sm:$0xff]  }
 0x344   : > { %5557 = vmatpush1.bf16.msra.mxu0 %v18892_v32 }
 0x345   : > { %5558 = vmatprep.subr.bf16.mxu0 %v18900_v27  ;;  %v18948_v27 = vld [vmem:[%s27653_s8 + $0x2c4] ss:$16 sps:$4 sm:$0xff]  }
 0x346   : > { %5514 = vmatpush2.bf16.msra.mxu1 %v18895_v10  ;;  %v22991_v10 = vpop.f32.mrf.mxu0 }
 0x347   : > { %5515 = vmatprep.subr.bf16.mxu1 %v18903_v29  ;;  %v22996_v29 = vrot.slane %v5618_v12, 1 }
 0x348   : > { %5559 = vmatpush1.bf16.msra.mxu0 %v18898_v40  ;;  %v18943_v40 = vld [vmem:[%s27653_s8 + $0xa0] ss:$16 sps:$4 sm:$0xff]  }
 0x349   : > { %5560 = vmatprep.subr.bf16.mxu0 %v18906_v62  ;;  %v5602_v62 = vld [vmem:[#allocation3 + $0x18] sm:$0xfc] }
 0x34a   : > { %5516 = vmatpush2.bf16.msra.mxu1 %v18901_v50 }
 0x34b   : > { %5517 = vmatprep.subr.bf16.mxu1 %v18909_v44  ;;  %v18951_v44 = vld [vmem:[%s27653_s8 + $0x84] ss:$16 sps:$4 sm:$0xff]  }
 0x34c   : > { %5561 = vmatpush1.bf16.msra.mxu0 %v18904_v54 }
 0x34d   : > { %5568 = vmatprep.subr.bf16.mxu0 %v18912_v3  ;;  %v18946_v3 = vld [vmem:[%s27653_s8 + $0x2c0] ss:$16 sps:$4 sm:$0xff]  }
 0x34e   : > { %5518 = vmatpush2.bf16.msra.mxu1 %v18907_v43  ;;  %v4262_v43 = vpop.f32.mrf.mxu0 }
 0x34f   : > { %5519 = vmatprep.subr.bf16.mxu1 %v18915_v35  ;;  %v23019_v35 = vld [vmem:[#allocation3 + $0x48] sm:$0xff] }
 0x350   : > { %5569 = vmatpush2.bf16.msra.mxu0 %v18910_v30  ;;  %v23026_v30 = vpop.f32.mrf.mxu1 }
 0x351   : > { %5570 = vmatprep.subr.bf16.mxu0 %v18918_v23 }
 0x352   : > { %5520 = vmatpush2.bf16.msra.mxu1 %v18913_v5  ;;  %v18957_v5 = vld [vmem:[%s27653_s8 + $0x64] ss:$16 sps:$4 sm:$0xff]  }
 0x353   : > { %5521 = vmatprep.subr.bf16.mxu1 %v18921_v24  ;;  %v18952_v24 = vld [vmem:[%s27653_s8 + $0x2a0] ss:$16 sps:$4 sm:$0xff]  }
 0x354   : > { %5571 = vmatpush2.bf16.msra.mxu0 %v18916_v21  ;;  %v4264_v21 = vpop.f32.mrf.mxu0 }
 0x355   : > { %5572 = vmatprep.subr.bf16.mxu0 %v18924_v16 }
 0x356   : > { %5522 = vmatpush2.bf16.msra.mxu1 %v18919_v55 }
 0x357   : > { %5523 = vmatprep.subr.bf16.mxu1 %v18927_v51  ;;  %v18960_v51 = vld [vmem:[%s27653_s8 + $0x284] ss:$16 sps:$4 sm:$0xff]  }
 0x358   : > { %5573 = vmatpush2.bf16.msra.mxu0 %v18922_v18 }
 0x359   : > { %5574 = vmatprep.subr.bf16.mxu0 %v18930_v53  ;;  %v18955_v53 = vld [vmem:[%s27653_s8 + $0x60] ss:$16 sps:$4 sm:$0xff]  }
 0x35a   : > { %5524 = vmatpush2.bf16.msra.mxu1 %v18925_v37 }
 0x35b   : > { %6750 = vmatprep.subr.bf16.mxu1 %v18936_v57 }
 0x35c   : > { %5575 = vmatpush2.bf16.msra.mxu0 %v18928_v13  ;;  %v18963_v13 = vld [vmem:[%s27653_s8 + $0x44] ss:$16 sps:$4 sm:$0xff]  }
 0x35d   : > { %5526 = vmatmul.mubr.bf16.vlgmr.msra.gmra.mxu1 %v22556_v11  ;;  %5576 = vmatprep.subr.bf16.mxu0 %v18933_v8  ;;  %v22985_v11 = vld [vmem:[#allocation3 + $0x38] sm:$0xff] }
 0x35e   : > { %5535 = vmatprep.mubr.bf16.mxu1 %v22564_v58  ;;  %6751 = vmatpush1.bf16.msra.mxu1 %v18934_v45  ;;  %v5612_v32 = vpack.c.bf16 %v22985_v11, %v5600_v56  ;;  %v5608_v58 = vld [vmem:[#allocation3 + $0xa8] sm:$0x3f] }
 0x35f   : > { %6752 = vmatprep.subr.bf16.mxu1 %v18939_v4  ;;  %v5620_v54 = vpack.c.bf16 %v5608_v58, %v22561_v25  ;;  %v18954_v25 = vld [vmem:[%s27653_s8 + $0x2a4] ss:$16 sps:$4 sm:$0xff]   ;;  %v18958_v8 = vld [vmem:[%s27653_s8 + $0x280] ss:$16 sps:$4 sm:$0xff]  }
 0x360   : > { %5577 = vmatpush2.bf16.msra.mxu0 %v18931_v34  ;;  %v5819_v50 = vrot.slane %v5612_v32, 1  ;;  %v18961_v34 = vld [vmem:[%s27653_s8 + $0x40] ss:$16 sps:$4 sm:$0xff]   ;;  %v18972_v32 = vld [vmem:[%s27653_s8 + $0x244] ss:$16 sps:$4 sm:$0xff]  }
 0x361   : > { %6803 = vmatprep.subr.bf16.mxu0 %v18942_v59  ;;  %v23028_v23 = vrot.slane %v5620_v54, 1  ;;  %v18969_v59 = vld [vmem:[%s27653_s8 + $0x24] ss:$16 sps:$4 sm:$0xff]  }
 0x362   : > { %6753 = vmatpush1.bf16.msra.mxu1 %v18937_v1 }
 0x363   : > { %5579 = vmatmul.mubr.bf16.vlgmr.msra.gmra.mxu0 %v22730_v36  ;;  %6754 = vmatprep.subr.bf16.mxu1 %v18945_v61  ;;  %v23014_v36 = vsel %vm2040_vm2, %v5819_v50, %v22996_v29  ;;  %v18975_v50 = vld [vmem:[%s27653_s8 + $0x4] ss:$16 sps:$4 sm:$0xff]  }
 0x364   : > { %16698 = vmatprep.mubr.msk.bf16.mxu0 %vm2411_vm6, %v22735_v17  ;;  %6804 = vmatpush1.bf16.msra.mxu0 %v18940_v41  ;;  %v5614_v17 = vpack.c.bf16 %v23019_v35, %v5602_v62 }
 0x365   : > { %5536 = vmatmul.mubr.bf16.gmra.mxu1 %v22596_v48  ;;  %6805 = vmatprep.subr.bf16.mxu0 %v18948_v27  ;;  %v18949_v48 = vld [vmem:[%s27653_s8 + $0x80] ss:$16 sps:$4 sm:$0xff]  }
 0x366   : > { %6755 = vmatpush1.bf16.msra.mxu1 %v18943_v40  ;;  %6782 = vmatprep.mubr.bf16.mxu1 %v23014_v36  ;;  %v5825_v55 = vrot.slane %v5614_v17, 1  ;;  %v18967_v27 = vld [vmem:[%s27653_s8 + $0x20] ss:$16 sps:$4 sm:$0xff]   ;;  %v18978_v17 = vld [vmem:[%s27653_s8 + $0x224] ss:$16 sps:$4 sm:$0xff]  }
 0x367   : > { %6756 = vmatprep.subr.bf16.mxu1 %v18951_v44 }
 0x368   : > { %6806 = vmatpush1.bf16.msra.mxu0 %v18946_v3  ;;  %v23046_v37 = vsel %vm2040_vm2, %v5825_v55, %v23028_v23  ;;  %v18976_v55 = vld [vmem:[%s27653_s8 + $0x220] ss:$16 sps:$4 sm:$0xff]  }
 0x369   : > { %v4303_v16 = vpop.f32.mrf.mxu1  ;;  %6807 = vmatprep.subr.bf16.mxu0 %v18954_v25 }
 0x36a   : > { %v4304_v18 = vadd.f32 %v4303_v16, %v22929_v46  ;;  %6757 = vmatpush1.bf16.msra.mxu1 %v18949_v48 }
 0x36b   : > { %5589 = vmatmul.mubr.bf16.gmra.mxu0 %v22758_v26  ;;  %v4305_v57 = vpop.f32.mrf.mxu1  ;;  %6758 = vmatprep.subr.bf16.mxu1 %v18957_v5  ;;  %v23056_v26 = vpop.f32.mrf.mxu0  ;;  %v18973_v5 = vld [vmem:[%s27653_s8] ss:$16 sps:$4 sm:$0xff]  }
 0x36c   : > { %6808 = vmatpush1.bf16.msra.mxu0 %v18952_v24  ;;  %6835 = vmatprep.mubr.bf16.mxu0 %v23046_v37  ;;  %v4306_v46 = vadd.f32 %v4305_v57, %v22943_v15  ;;  %27655 = vst [vmem:[#allocation19_spill] sm:$0xff] %v23056_v26 }
 0x36d   : > { %v4307_v45 = vpop.f32.mrf.mxu1  ;;  %6809 = vmatprep.subr.bf16.mxu0 %v18960_v51 }
 0x36e   : > { %v4308_v4 = vadd.f32 %v4307_v45, %v22957_v28  ;;  %6759 = vmatpush1.bf16.msra.mxu1 %v18955_v53  ;;  %v18964_v28 = vld [vmem:[%s27653_s8 + $0x260] ss:$16 sps:$4 sm:$0xff]   ;;  %v18990_v45 = vld [vmem:[%s27653_s8 + $0x3e4] ss:$16 sps:$4 sm:$0xff]  }
 0x36f   : > { %v4356_v15 = vpop.f32.mrf.mxu0  ;;  %v23065_v56 = vpop.f32.mrf.mxu1  ;;  %6760 = vmatprep.subr.bf16.mxu1 %v18963_v13  ;;  %v18979_v53 = vld [vmem:[%s27653_s8 + $0x1e0] ss:$16 sps:$4 sm:$0xff]   ;;  %v18987_v13 = vld [vmem:[%s27653_s8 + $0x1c4] ss:$16 sps:$4 sm:$0xff]  }
 0x370   : > { %27656 = vst [vmem:[#allocation20_spill] sm:$0xff] %v23065_v56  ;;  %v23070_v12 = vadd.f32 %v4356_v15, %v4304_v18  ;;  %6810 = vmatpush1.bf16.msra.mxu0 %v18958_v8  ;;  %v18982_v8 = vld [vmem:[%s27653_s8 + $0x200] ss:$16 sps:$4 sm:$0xff]   ;;  %v18996_v15 = vld [vmem:[%s27653_s8 + $0x3c4] ss:$16 sps:$4 sm:$0xff]  }
 0x371   : > { %v4358_v1 = vpop.f32.mrf.mxu0  ;;  %v4313_v61 = vpop.f32.mrf.mxu1  ;;  %6811 = vmatprep.subr.bf16.mxu0 %v18966_v20  ;;  %v18985_v20 = vld [vmem:[%s27653_s8 + $0x1c0] ss:$16 sps:$4 sm:$0xff]  }
 0x372   : > { %v23078_v41 = vadd.f32 %v4358_v1, %v4306_v46  ;;  %v4314_v58 = vadd.f32 %v4313_v61, %v22991_v10  ;;  %6761 = vmatpush1.bf16.msra.mxu1 %v18961_v34  ;;  %v18970_v10 = vld [vmem:[%s27653_s8 + $0x240] ss:$16 sps:$4 sm:$0xff]   ;;  %v19002_v61 = vld [vmem:[%s27653_s8 + $0x3a4] ss:$16 sps:$4 sm:$0xff]  }
 0x373   : > { %v4360_v40 = vpop.f32.mrf.mxu0  ;;  %v4315_v62 = vpop.f32.mrf.mxu1  ;;  %6762 = vmatprep.subr.bf16.mxu1 %v18969_v59  ;;  %v18988_v34 = vld [vmem:[%s27653_s8 + $0x3e0] ss:$16 sps:$4 sm:$0xff]  }
 0x374   : > { %v23087_v44 = vadd.f32 %v4360_v40, %v4308_v4  ;;  %6812 = vmatpush1.bf16.msra.mxu0 %v18964_v28  ;;  %v4316_v54 = vadd.f32 %v4315_v62, %v4262_v43  ;;  %v18981_v43 = vld [vmem:[%s27653_s8 + $0x1e4] ss:$16 sps:$4 sm:$0xff]   ;;  %v18991_v59 = vld [vmem:[%s27653_s8 + $0x1a0] ss:$16 sps:$4 sm:$0xff]  }
 0x375   : > { %v23092_v3 = vpop.f32.mrf.mxu0  ;;  %v4317_v25 = vpop.f32.mrf.mxu1  ;;  %6813 = vmatprep.subr.bf16.mxu0 %v18972_v32  ;;  %v18993_v4 = vld [vmem:[%s27653_s8 + $0x1a4] ss:$16 sps:$4 sm:$0xff]   ;;  %v18994_v1 = vld [vmem:[%s27653_s8 + $0x3c0] ss:$16 sps:$4 sm:$0xff]  }
 0x376   : > { %27657 = vst [vmem:[#allocation21_spill] sm:$0xff] %v23092_v3  ;;  %v4318_v48 = vadd.f32 %v4317_v25, %v4264_v21  ;;  %6763 = vmatpush1.bf16.msra.mxu1 %v18967_v27  ;;  %v18984_v21 = vld [vmem:[%s27653_s8 + $0x204] ss:$16 sps:$4 sm:$0xff]   ;;  %v18997_v32 = vld [vmem:[%s27653_s8 + $0x180] ss:$16 sps:$4 sm:$0xff]  }
 0x377   : > { %v4366_v24 = vpop.f32.mrf.mxu0  ;;  %6764 = vmatprep.subr.bf16.mxu1 %v18975_v50  ;;  %v18999_v28 = vld [vmem:[%s27653_s8 + $0x184] ss:$16 sps:$4 sm:$0xff]   ;;  %v19000_v27 = vld [vmem:[%s27653_s8 + $0x3a0] ss:$16 sps:$4 sm:$0xff]  }
 0x378   : > { %v23103_v16 = vadd.f32 %v4366_v24, %v4314_v58  ;;  %6814 = vmatpush1.bf16.msra.mxu0 %v18970_v10  ;;  %v19005_v58 = vld [vmem:[%s27653_s8 + $0x164] ss:$16 sps:$4 sm:$0xff]   ;;  %v19003_v62 = vld [vmem:[%s27653_s8 + $0x160] ss:$16 sps:$4 sm:$0xff]   ;;  %v5605_v24 = vld [vmem:[#allocation3 + $0x90] sm:$0x3f] }
 0x379   : > { %v4368_v51 = vpop.f32.mrf.mxu0  ;;  %6815 = vmatprep.subr.bf16.mxu0 %v18978_v17  ;;  %v19008_v40 = vld [vmem:[%s27653_s8 + $0x384] ss:$16 sps:$4 sm:$0xff]   ;;  %v19009_v25 = vld [vmem:[%s27653_s8 + $0x140] ss:$16 sps:$4 sm:$0xff]  }
 0x37a   : > { %v23111_v18 = vadd.f32 %v4368_v51, %v4316_v54  ;;  %6765 = vmatpush1.bf16.msra.mxu1 %v18973_v5  ;;  %v19011_v50 = vld [vmem:[%s27653_s8 + $0x144] ss:$16 sps:$4 sm:$0xff]   ;;  %v19006_v54 = vld [vmem:[%s27653_s8 + $0x380] ss:$16 sps:$4 sm:$0xff]   ;;  %v5599_v51 = vld [vmem:[#allocation3] sm:$0xfc] }
 0x37b   : > { %v4370_v57 = vpop.f32.mrf.mxu0  ;;  %6766 = vmatprep.subr.bf16.mxu1 %v18981_v43  ;;  %v19014_v10 = vld [vmem:[%s27653_s8 + $0x364] ss:$16 sps:$4 sm:$0xff]   ;;  %v19015_v43 = vld [vmem:[%s27653_s8 + $0x120] ss:$16 sps:$4 sm:$0xff]  }
 0x37c   : > { %v23119_v46 = vadd.f32 %v4370_v57, %v4318_v48  ;;  %6816 = vmatpush1.bf16.msra.mxu0 %v18976_v55  ;;  %v19017_v17 = vld [vmem:[%s27653_s8 + $0x124] ss:$16 sps:$4 sm:$0xff]   ;;  %v19012_v48 = vld [vmem:[%s27653_s8 + $0x360] ss:$16 sps:$4 sm:$0xff]  }
 0x37d   : > { %6817 = vmatprep.subr.bf16.mxu0 %v18984_v21  ;;  %v19020_v5 = vld [vmem:[%s27653_s8 + $0x344] ss:$16 sps:$4 sm:$0xff]   ;;  %v19018_v21 = vld [vmem:[%s27653_s8 + $0x340] ss:$16 sps:$4 sm:$0xff]  }
 0x37e   : > { %6767 = vmatpush2.bf16.msra.mxu1 %v18979_v53  ;;  %v19023_v55 = vld [vmem:[%s27653_s8 + $0x104] ss:$16 sps:$4 sm:$0xff]   ;;  %v23196_v53 = vld [vmem:[#allocation3 + $0x60] sm:$0xff] }
 0x37f   : > { %6768 = vmatprep.subr.bf16.mxu1 %v18987_v13  ;;  %v5617_v57 = vpack.c.bf16 %v5605_v24, %v23196_v53  ;;  %v19026_v13 = vld [vmem:[%s27653_s8 + $0x324] ss:$16 sps:$4 sm:$0xff]  }
 0x380   : > { %6818 = vmatpush1.bf16.msra.mxu0 %v18982_v8  ;;  %v19021_v8 = vld [vmem:[%s27653_s8 + $0x100] ss:$16 sps:$4 sm:$0xff]  }
 0x381   : > { %6819 = vmatprep.subr.bf16.mxu0 %v18990_v45  ;;  %v23205_v45 = vld [vmem:[#allocation3 + $0x30] sm:$0xff] }
 0x382   : > { %6769 = vmatpush2.bf16.msra.mxu1 %v18985_v20  ;;  %v5611_v20 = vpack.c.bf16 %v23205_v45, %v5599_v51  ;;  %v20381_v51 = vld [vmem:[#allocation3 + $0x58] sm:$0xff] }
 0x383   : > { %6770 = vmatprep.subr.bf16.mxu1 %v18993_v4  ;;  %v19032_v4 = vld [vmem:[%s27653_s8 + $0x4e4] ss:$16 sps:$4 sm:$0xff]  }
 0x384   : > { %6820 = vmatpush2.bf16.msra.mxu0 %v18988_v34  ;;  %v5607_v34 = vld [vmem:[#allocation3 + $0xa0] sm:$0x3f] }
 0x385   : > { %6821 = vmatprep.subr.bf16.mxu0 %v18996_v15  ;;  %v19024_v15 = vld [vmem:[%s27653_s8 + $0x320] ss:$16 sps:$4 sm:$0xff]  }
 0x386   : > { %6771 = vmatpush2.bf16.msra.mxu1 %v18991_v59  ;;  %v23214_v59 = vrot.slane %v5617_v57, 1 }
 0x387   : > { %6772 = vmatprep.subr.bf16.mxu1 %v18999_v28  ;;  %v19029_v28 = vld [vmem:[%s27653_s8 + $0x304] ss:$16 sps:$4 sm:$0xff]  }
 0x388   : > { %6822 = vmatpush2.bf16.msra.mxu0 %v18994_v1  ;;  %v5601_v1 = vld [vmem:[#allocation3 + $0x10] sm:$0xfc] }
 0x389   : > { %6823 = vmatprep.subr.bf16.mxu0 %v19002_v61  ;;  %v5816_v61 = vrot.slane %v5611_v20, 1 }
 0x38a   : > { %6773 = vmatpush2.bf16.msra.mxu1 %v18997_v32  ;;  %v19030_v32 = vld [vmem:[%s27653_s8 + $0x4e0] ss:$16 sps:$4 sm:$0xff]  }
 0x38b   : > { %6774 = vmatprep.subr.bf16.mxu1 %v19005_v58  ;;  %v20379_v58 = vld [vmem:[#allocation3 + $0x70] sm:$0xff] }
 0x38c   : > { %6824 = vmatpush2.bf16.msra.mxu0 %v19000_v27  ;;  %v5619_v27 = vpack.c.bf16 %v5607_v34, %v20379_v58  ;;  %v23282_v58 = vpop.f32.mrf.mxu1 }
 0x38d   : > { %6825 = vmatprep.subr.bf16.mxu0 %v19008_v40  ;;  %v5610_v40 = vld [vmem:[#allocation3 + $0xb8] sm:$0x3f]  ;;  %27658 = vst [vmem:[#allocation22_spill] sm:$0xff] %v23282_v58 }
 0x38e   : > { %6775 = vmatpush2.bf16.msra.mxu1 %v19003_v62  ;;  %v19035_v62 = vld [vmem:[%s27653_s8 + $0x4c4] ss:$16 sps:$4 sm:$0xff]   ;;  %v23238_v24 = vrot.slane %v5619_v27, 1 }
 0x38f   : > { %6776 = vmatprep.subr.bf16.mxu1 %v19011_v50  ;;  %v23227_v50 = vsel %vm2040_vm2, %v5816_v61, %v23214_v59  ;;  %v19050_v61 = vld [vmem:[%s27653_s8 + $0xac] ss:$16 sps:$4 sm:$0xff]   ;;  %v19053_v27 = vld [vmem:[%s27653_s8 + $0x464] ss:$16 sps:$4 sm:$0xff]  }
 0x390   : > { %6826 = vmatpush2.bf16.msra.mxu0 %v19006_v54  ;;  %v19027_v54 = vld [vmem:[%s27653_s8 + $0x300] ss:$16 sps:$4 sm:$0xff]  }
 0x391   : > { %6827 = vmatprep.subr.bf16.mxu0 %v19014_v10  ;;  %v20380_v10 = vld [vmem:[#allocation3 + $0x40] sm:$0xff] }
 0x392   : > { %6777 = vmatpush2.bf16.msra.mxu1 %v19009_v25  ;;  %v5613_v25 = vpack.c.bf16 %v20380_v10, %v5601_v1 }
 0x393   : > { %6778 = vmatprep.subr.bf16.mxu1 %v19017_v17  ;;  %v5604_v17 = vld [vmem:[#allocation3 + $0x28] sm:$0xfc] }
 0x394   : > { %6828 = vmatpush2.bf16.msra.mxu0 %v19012_v48  ;;  %v19038_v48 = vld [vmem:[%s27653_s8 + $0xec] ss:$16 sps:$4 sm:$0xff]   ;;  %v5822_v57 = vrot.slane %v5613_v25, 1  ;;  %v19051_v25 = vld [vmem:[%s27653_s8 + $0x460] ss:$16 sps:$4 sm:$0xff]  }
 0x395   : > { %6829 = vmatprep.subr.bf16.mxu0 %v19020_v5  ;;  %v5622_v5 = vpack.c.bf16 %v5610_v40, %v22732_v7  ;;  %v19036_v7 = vld [vmem:[%s27653_s8 + $0xe8] ss:$16 sps:$4 sm:$0xff]  }
 0x396   : > { %6779 = vmatpush2.bf16.msra.mxu1 %v19015_v43  ;;  %v19033_v43 = vld [vmem:[%s27653_s8 + $0x4c0] ss:$16 sps:$4 sm:$0xff]   ;;  %v23256_v20 = vsel %vm2040_vm2, %v5822_v57, %v23238_v24  ;;  %v19048_v40 = vld [vmem:[%s27653_s8 + $0xa8] ss:$16 sps:$4 sm:$0xff]  }
 0x397   : > { %6780 = vmatprep.subr.bf16.mxu1 %v19023_v55  ;;  %v19041_v55 = vld [vmem:[%s27653_s8 + $0x4a4] ss:$16 sps:$4 sm:$0xff]  }
 0x398   : > { %6830 = vmatpush2.bf16.msra.mxu0 %v19018_v21  ;;  %v5616_v21 = vpack.c.bf16 %v20381_v51, %v5604_v17  ;;  %v19062_v51 = vld [vmem:[%s27653_s8 + $0x6c] ss:$16 sps:$4 sm:$0xff]  }
 0x399   : > { %6831 = vmatprep.subr.bf16.mxu0 %v19026_v13  ;;  %v19044_v13 = vld [vmem:[%s27653_s8 + $0xcc] ss:$16 sps:$4 sm:$0xff]  }
 0x39a   : > { %6781 = vmatpush2.bf16.msra.mxu1 %v19021_v8  ;;  %v23252_v8 = vrot.slane %v5622_v5, 1  ;;  %v5831_v34 = vrot.slane %v5616_v21, 1 }
 0x39b   : > { %6856 = vmatprep.subr.bf16.mxu1 %v19032_v4  ;;  %v19039_v4 = vld [vmem:[%s27653_s8 + $0x4a0] ss:$16 sps:$4 sm:$0xff]  }
 0x39c   : > { %6832 = vmatpush2.bf16.msra.mxu0 %v19024_v15  ;;  %v19047_v15 = vld [vmem:[%s27653_s8 + $0x484] ss:$16 sps:$4 sm:$0xff]   ;;  %v23272_v1 = vsel %vm2040_vm2, %v5831_v34, %v23252_v8 }
 0x39d   : > { %6783 = vmatmul.mubr.bf16.vlgmr.msra.gmra.mxu1 %v23227_v50  ;;  %6833 = vmatprep.subr.bf16.mxu0 %v19029_v28  ;;  %v19042_v28 = vld [vmem:[%s27653_s8 + $0xc8] ss:$16 sps:$4 sm:$0xff]  }
 0x39e   : > { %6792 = vmatprep.mubr.bf16.mxu1 %v22996_v29  ;;  %6857 = vmatpush1.bf16.msra.mxu1 %v19030_v32  ;;  %v19045_v32 = vld [vmem:[%s27653_s8 + $0x480] ss:$16 sps:$4 sm:$0xff]  }
 0x39f   : > { %6858 = vmatprep.subr.bf16.mxu1 %v19035_v62 }
 0x3a0   : > { %6834 = vmatpush2.bf16.msra.mxu0 %v19027_v54  ;;  %v19056_v54 = vld [vmem:[%s27653_s8 + $0x8c] ss:$16 sps:$4 sm:$0xff]  }
 0x3a1   : > { %6909 = vmatprep.subr.bf16.mxu0 %v19038_v48  ;;  %v19059_v48 = vld [vmem:[%s27653_s8 + $0x444] ss:$16 sps:$4 sm:$0xff]  }
 0x3a2   : > { %6859 = vmatpush1.bf16.msra.mxu1 %v19033_v43  ;;  %v23306_v43 = vpop.f32.mrf.mxu0 }
 0x3a3   : > { %6836 = vmatmul.mubr.bf16.vlgmr.msra.gmra.mxu0 %v23256_v20  ;;  %6860 = vmatprep.subr.bf16.mxu1 %v19041_v55  ;;  %27659 = vst [vmem:[#allocation23_spill] sm:$0xff] %v23306_v43 }
 0x3a4   : > { %6845 = vmatprep.mubr.bf16.mxu0 %v23028_v23  ;;  %6910 = vmatpush1.bf16.msra.mxu0 %v19036_v7  ;;  %v19065_v7 = vld [vmem:[%s27653_s8 + $0x424] ss:$16 sps:$4 sm:$0xff]  }
 0x3a5   : > { %6793 = vmatmul.mubr.bf16.gmra.mxu1 %v23214_v59  ;;  %6911 = vmatprep.subr.bf16.mxu0 %v19044_v13 }
 0x3a6   : > { %6861 = vmatpush1.bf16.msra.mxu1 %v19039_v4  ;;  %16879 = vmatprep.mubr.msk.bf16.mxu1 %vm2411_vm6, %v23272_v1 }
 0x3a7   : > { %6862 = vmatprep.subr.bf16.mxu1 %v19047_v15  ;;  %v19068_v15 = vld [vmem:[%s27653_s8 + $0x4c] ss:$16 sps:$4 sm:$0xff]  }
 0x3a8   : > { %6912 = vmatpush1.bf16.msra.mxu0 %v19042_v28 }
 0x3a9   : > { %v5315_v62 = vpop.f32.mrf.mxu1  ;;  %6913 = vmatprep.subr.bf16.mxu0 %v19050_v61 }
 0x3aa   : > { %v5316_v10 = vadd.f32 %v5315_v62, %v22789_v22  ;;  %6863 = vmatpush1.bf16.msra.mxu1 %v19045_v32  ;;  %v19054_v22 = vld [vmem:[%s27653_s8 + $0x88] ss:$16 sps:$4 sm:$0xff]   ;;  %v19063_v32 = vld [vmem:[%s27653_s8 + $0x420] ss:$16 sps:$4 sm:$0xff]   ;;  %v19071_v62 = vld [vmem:[%s27653_s8 + $0x404] ss:$16 sps:$4 sm:$0xff]  }
 0x3ab   : > { %6846 = vmatmul.mubr.bf16.gmra.mxu0 %v23238_v24  ;;  %v5317_v17 = vpop.f32.mrf.mxu1  ;;  %6864 = vmatprep.subr.bf16.mxu1 %v19053_v27 }
 0x3ac   : > { %6914 = vmatpush1.bf16.msra.mxu0 %v19048_v40  ;;  %6941 = vmatprep.mubr.bf16.mxu0 %v23014_v36  ;;  %v5318_v5 = vadd.f32 %v5317_v17, %v22798_v39  ;;  %v19057_v36 = vld [vmem:[%s27653_s8 + $0x440] ss:$16 sps:$4 sm:$0xff]  }
 0x3ad   : > { %v5319_v55 = vpop.f32.mrf.mxu1  ;;  %6915 = vmatprep.subr.bf16.mxu0 %v19056_v54 }
 0x3ae   : > { %v5320_v21 = vadd.f32 %v5319_v55, %v22810_v52  ;;  %6865 = vmatpush1.bf16.msra.mxu1 %v19051_v25  ;;  %v19060_v52 = vld [vmem:[%s27653_s8 + $0x68] ss:$16 sps:$4 sm:$0xff]   ;;  %v19077_v55 = vld [vmem:[%s27653_s8 + $0x584] ss:$16 sps:$4 sm:$0xff]  }
 0x3af   : > { %v5368_v39 = vpop.f32.mrf.mxu0  ;;  %v23315_v57 = vpop.f32.mrf.mxu1  ;;  %6866 = vmatprep.subr.bf16.mxu1 %v19059_v48  ;;  %v19074_v48 = vld [vmem:[%s27653_s8 + $0x2c] ss:$16 sps:$4 sm:$0xff]  }
 0x3b0   : > { %v23320_v13 = vadd.f32 %v5368_v39, %v5316_v10  ;;  %6916 = vmatpush1.bf16.msra.mxu0 %v19054_v22  ;;  %v19069_v22 = vld [vmem:[%s27653_s8 + $0x400] ss:$16 sps:$4 sm:$0xff]  }
 0x3b1   : > { %v5370_v4 = vpop.f32.mrf.mxu0  ;;  %v5325_v34 = vpop.f32.mrf.mxu1  ;;  %6917 = vmatprep.subr.bf16.mxu0 %v19062_v51 }
 0x3b2   : > { %v23328_v28 = vadd.f32 %v5370_v4, %v5318_v5  ;;  %v5326_v61 = vadd.f32 %v5325_v34, %v22829_v14  ;;  %6867 = vmatpush1.bf16.msra.mxu1 %v19057_v36  ;;  %v19066_v14 = vld [vmem:[%s27653_s8 + $0x48] ss:$16 sps:$4 sm:$0xff]   ;;  %v19083_v4 = vld [vmem:[%s27653_s8 + $0x564] ss:$16 sps:$4 sm:$0xff]  }
 0x3b3   : > { %v5372_v27 = vpop.f32.mrf.mxu0  ;;  %v5327_v40 = vpop.f32.mrf.mxu1  ;;  %6868 = vmatprep.subr.bf16.mxu1 %v19065_v7  ;;  %v19075_v7 = vld [vmem:[%s27653_s8 + $0x580] ss:$16 sps:$4 sm:$0xff]  }
 0x3b4   : > { %v23337_v54 = vadd.f32 %v5372_v27, %v5320_v21  ;;  %6918 = vmatpush1.bf16.msra.mxu0 %v19060_v52  ;;  %v5328_v10 = vadd.f32 %v5327_v40, %v22832_v42  ;;  %v19072_v21 = vld [vmem:[%s27653_s8 + $0x28] ss:$16 sps:$4 sm:$0xff]   ;;  %v19089_v27 = vld [vmem:[%s27653_s8 + $0x544] ss:$16 sps:$4 sm:$0xff]  }
 0x3b5   : > { %v23343_v25 = vpop.f32.mrf.mxu0  ;;  %v5329_v17 = vpop.f32.mrf.mxu1  ;;  %6919 = vmatprep.subr.bf16.mxu0 %v19068_v15  ;;  %v19078_v15 = vld [vmem:[%s27653_s8 + $0x8] ss:$16 sps:$4 sm:$0xff]  }
 0x3b6   : > { %v5330_v5 = vadd.f32 %v5329_v17, %v22847_v47  ;;  %6869 = vmatpush1.bf16.msra.mxu1 %v19063_v32  ;;  %v19080_v47 = vld [vmem:[%s27653_s8 + $0xc] ss:$16 sps:$4 sm:$0xff]   ;;  %v19081_v32 = vld [vmem:[%s27653_s8 + $0x560] ss:$16 sps:$4 sm:$0xff]   ;;  %v19084_v40 = vld [vmem:[%s27653_s8 + $0x1e8] ss:$16 sps:$4 sm:$0xff]  }
 0x3b7   : > { %v5378_v42 = vpop.f32.mrf.mxu0  ;;  %6870 = vmatprep.subr.bf16.mxu1 %v19071_v62  ;;  %v19092_v62 = vld [vmem:[%s27653_s8 + $0x1cc] ss:$16 sps:$4 sm:$0xff]   ;;  %v19090_v17 = vld [vmem:[%s27653_s8 + $0x1c8] ss:$16 sps:$4 sm:$0xff]  }
 0x3b8   : > { %v23355_v51 = vadd.f32 %v5378_v42, %v5326_v61  ;;  %6920 = vmatpush1.bf16.msra.mxu0 %v19066_v14  ;;  %v19086_v61 = vld [vmem:[%s27653_s8 + $0x1ec] ss:$16 sps:$4 sm:$0xff]   ;;  %v19095_v14 = vld [vmem:[%s27653_s8 + $0x524] ss:$16 sps:$4 sm:$0xff]  }
 0x3b9   : > { %v5380_v36 = vpop.f32.mrf.mxu0  ;;  %6921 = vmatprep.subr.bf16.mxu0 %v19074_v48  ;;  %v19098_v48 = vld [vmem:[%s27653_s8 + $0x1ac] ss:$16 sps:$4 sm:$0xff]   ;;  %v19101_v42 = vld [vmem:[%s27653_s8 + $0x504] ss:$16 sps:$4 sm:$0xff]  }
 0x3ba   : > { %v23363_v39 = vadd.f32 %v5380_v36, %v5328_v10  ;;  %6871 = vmatpush1.bf16.msra.mxu1 %v19069_v22  ;;  %v19087_v10 = vld [vmem:[%s27653_s8 + $0x540] ss:$16 sps:$4 sm:$0xff]   ;;  %v20382_v36 = vld [vmem:[#allocation3 + $0x80] sm:$0xff] }
 0x3bb   : > { %v5382_v52 = vpop.f32.mrf.mxu0  ;;  %6878 = vmatprep.subr.bf16.mxu1 %v19077_v55  ;;  %v19093_v22 = vld [vmem:[%s27653_s8 + $0x520] ss:$16 sps:$4 sm:$0xff]   ;;  %v5603_v55 = vld [vmem:[#allocation3 + $0x20] sm:$0xfc] }
 0x3bc   : > { %v23371_v34 = vadd.f32 %v5382_v52, %v5330_v5  ;;  %6922 = vmatpush1.bf16.msra.mxu0 %v19072_v21  ;;  %v5609_v5 = vld [vmem:[#allocation3 + $0xb0] sm:$0x3f]  ;;  %v19099_v52 = vld [vmem:[%s27653_s8 + $0x500] ss:$16 sps:$4 sm:$0xff]  }
 0x3bd   : > { %6923 = vmatprep.subr.bf16.mxu0 %v19080_v47  ;;  %v19096_v21 = vld [vmem:[%s27653_s8 + $0x1a8] ss:$16 sps:$4 sm:$0xff]   ;;  %v5621_v47 = vpack.c.bf16 %v5609_v5, %v20382_v36  ;;  %v19113_v5 = vld [vmem:[%s27653_s8 + $0x14c] ss:$16 sps:$4 sm:$0xff]  }
 0x3be   : > { %6879 = vmatpush2.bf16.msra.mxu1 %v19075_v7  ;;  %v19104_v7 = vld [vmem:[%s27653_s8 + $0x18c] ss:$16 sps:$4 sm:$0xff]   ;;  %v19120_v36 = vld [vmem:[%s27653_s8 + $0x2a8] ss:$16 sps:$4 sm:$0xff]  }
 0x3bf   : > { %6880 = vmatprep.subr.bf16.mxu1 %v19083_v4  ;;  %v20383_v4 = vld [vmem:[#allocation3 + $0x50] sm:$0xff] }
 0x3c0   : > { %6924 = vmatpush1.bf16.msra.mxu0 %v19078_v15  ;;  %v5615_v15 = vpack.c.bf16 %v20383_v4, %v5603_v55  ;;  %v19111_v55 = vld [vmem:[%s27653_s8 + $0x148] ss:$16 sps:$4 sm:$0xff]  }
 0x3c1   : > { %6925 = vmatprep.subr.bf16.mxu0 %v19086_v61  ;;  %v19110_v61 = vld [vmem:[%s27653_s8 + $0x2ec] ss:$16 sps:$4 sm:$0xff]   ;;  %v19126_v4 = vld [vmem:[%s27653_s8 + $0x288] ss:$16 sps:$4 sm:$0xff]  }
 0x3c2   : > { %6881 = vmatpush2.bf16.msra.mxu1 %v19081_v32  ;;  %v19102_v32 = vld [vmem:[%s27653_s8 + $0x188] ss:$16 sps:$4 sm:$0xff]  }
 0x3c3   : > { %6882 = vmatprep.subr.bf16.mxu1 %v19089_v27  ;;  %v23424_v27 = vrot.slane %v5621_v47, 1  ;;  %v19128_v47 = vld [vmem:[%s27653_s8 + $0x28c] ss:$16 sps:$4 sm:$0xff]  }
 0x3c4   : > { %6926 = vmatpush2.bf16.msra.mxu0 %v19084_v40  ;;  %v19107_v40 = vld [vmem:[%s27653_s8 + $0x16c] ss:$16 sps:$4 sm:$0xff]  }
 0x3c5   : > { %6927 = vmatprep.subr.bf16.mxu0 %v19092_v62  ;;  %v5828_v62 = vrot.slane %v5615_v15, 1  ;;  %v23477_v15 = vpop.f32.mrf.mxu1 }
 0x3c6   : > { %6883 = vmatpush2.bf16.msra.mxu1 %v19087_v10  ;;  %v19108_v10 = vld [vmem:[%s27653_s8 + $0x2e8] ss:$16 sps:$4 sm:$0xff]  }
 0x3c7   : > { %6884 = vmatprep.subr.bf16.mxu1 %v19095_v14  ;;  %v19116_v14 = vld [vmem:[%s27653_s8 + $0x2cc] ss:$16 sps:$4 sm:$0xff]  }
 0x3c8   : > { %6928 = vmatpush2.bf16.msra.mxu0 %v19090_v17  ;;  %v23437_v17 = vsel %vm2040_vm2, %v5828_v62, %v23424_v27 }
 0x3c9   : > { %6929 = vmatprep.subr.bf16.mxu0 %v19098_v48  ;;  %v19105_v48 = vld [vmem:[%s27653_s8 + $0x168] ss:$16 sps:$4 sm:$0xff]  }
 0x3ca   : > { %6885 = vmatpush2.bf16.msra.mxu1 %v19093_v22  ;;  %v19114_v22 = vld [vmem:[%s27653_s8 + $0x2c8] ss:$16 sps:$4 sm:$0xff]  }
 0x3cb   : > { %6886 = vmatprep.subr.bf16.mxu1 %v19101_v42  ;;  %v19122_v42 = vld [vmem:[%s27653_s8 + $0x2ac] ss:$16 sps:$4 sm:$0xff]  }
 0x3cc   : > { %6930 = vmatpush2.bf16.msra.mxu0 %v19096_v21  ;;  %v19119_v21 = vld [vmem:[%s27653_s8 + $0x12c] ss:$16 sps:$4 sm:$0xff]  }
 0x3cd   : > { %6931 = vmatprep.subr.bf16.mxu0 %v19104_v7  ;;  %v19117_v7 = vld [vmem:[%s27653_s8 + $0x128] ss:$16 sps:$4 sm:$0xff]  }
 0x3ce   : > { %6887 = vmatpush2.bf16.msra.mxu1 %v19099_v52  ;;  %v19125_v52 = vld [vmem:[%s27653_s8 + $0x10c] ss:$16 sps:$4 sm:$0xff]  }
 0x3cf   : > { %6962 = vmatprep.subr.bf16.mxu1 %v19110_v61  ;;  %v19131_v61 = vld [vmem:[%s27653_s8 + $0x26c] ss:$16 sps:$4 sm:$0xff]  }
 0x3d0   : > { %6932 = vmatpush2.bf16.msra.mxu0 %v19102_v32  ;;  %v19123_v32 = vld [vmem:[%s27653_s8 + $0x108] ss:$16 sps:$4 sm:$0xff]  }
 0x3d1   : > { %6889 = vmatmul.mubr.bf16.vlgmr.msra.gmra.mxu1 %v23437_v17  ;;  %6933 = vmatprep.subr.bf16.mxu0 %v19107_v40 }
 0x3d2   : > { %16880 = vmatprep.mubr.msk.bf16.mxu1 %vm2411_vm6, %v23252_v8  ;;  %6963 = vmatpush1.bf16.msra.mxu1 %v19108_v10  ;;  %v19129_v10 = vld [vmem:[%s27653_s8 + $0x268] ss:$16 sps:$4 sm:$0xff]  }
 0x3d3   : > { %6964 = vmatprep.subr.bf16.mxu1 %v19116_v14 }
 0x3d4   : > { %6934 = vmatpush2.bf16.msra.mxu0 %v19105_v48  ;;  %v19137_v48 = vld [vmem:[%s27653_s8 + $0x24c] ss:$16 sps:$4 sm:$0xff]  }
 0x3d5   : > { %6935 = vmatprep.subr.bf16.mxu0 %v19113_v5 }
 0x3d6   : > { %6965 = vmatpush1.bf16.msra.mxu1 %v19114_v22 }
 0x3d7   : > { %6966 = vmatprep.subr.bf16.mxu1 %v19122_v42  ;;  %v19140_v42 = vld [vmem:[%s27653_s8 + $0x4cc] ss:$16 sps:$4 sm:$0xff]  }
 0x3d8   : > { %6936 = vmatpush2.bf16.msra.mxu0 %v19111_v55 }
 0x3d9   : > { %6899 = vmatmul.mubr.bf16.gmra.mxu1 %v23424_v27  ;;  %6937 = vmatprep.subr.bf16.mxu0 %v19119_v21  ;;  %v19135_v21 = vld [vmem:[%s27653_s8 + $0x248] ss:$16 sps:$4 sm:$0xff]  }
 0x3da   : > { %6967 = vmatpush1.bf16.msra.mxu1 %v19120_v36  ;;  %6994 = vmatprep.mubr.bf16.mxu1 %v23046_v37  ;;  %v19134_v37 = vld [vmem:[%s27653_s8 + $0x4ec] ss:$16 sps:$4 sm:$0xff]  }
 0x3db   : > { %6968 = vmatprep.subr.bf16.mxu1 %v19128_v47  ;;  %v19143_v36 = vld [vmem:[%s27653_s8 + $0x22c] ss:$16 sps:$4 sm:$0xff]  }
 0x3dc   : > { %6938 = vmatpush2.bf16.msra.mxu0 %v19117_v7 }
 0x3dd   : > { %v5421_v40 = vpop.f32.mrf.mxu1  ;;  %6939 = vmatprep.subr.bf16.mxu0 %v19125_v52  ;;  %v19141_v52 = vld [vmem:[%s27653_s8 + $0x228] ss:$16 sps:$4 sm:$0xff]  }
 0x3de   : > { %v23489_v62 = vadd.f32 %v5421_v40, %v23320_v13  ;;  %6969 = vmatpush1.bf16.msra.mxu1 %v19126_v4  ;;  %v19132_v13 = vld [vmem:[%s27653_s8 + $0x4e8] ss:$16 sps:$4 sm:$0xff]   ;;  %v19149_v4 = vld [vmem:[%s27653_s8 + $0x20c] ss:$16 sps:$4 sm:$0xff]  }
 0x3df   : > { %v5423_v14 = vpop.f32.mrf.mxu1  ;;  %6970 = vmatprep.subr.bf16.mxu1 %v19131_v61  ;;  %v19152_v40 = vld [vmem:[%s27653_s8 + $0x48c] ss:$16 sps:$4 sm:$0xff]  }
 0x3e0   : > { %6940 = vmatpush2.bf16.msra.mxu0 %v19123_v32  ;;  %v23498_v5 = vadd.f32 %v5423_v14, %v23328_v28  ;;  %v23558_v14 = vpop.f32.mrf.mxu0 }
 0x3e1   : > { %v5425_v22 = vpop.f32.mrf.mxu1  ;;  %7015 = vmatprep.subr.bf16.mxu0 %v19134_v37 }
 0x3e2   : > { %v23507_v55 = vadd.f32 %v5425_v22, %v23337_v54  ;;  %6971 = vmatpush1.bf16.msra.mxu1 %v19129_v10  ;;  %v19138_v54 = vld [vmem:[%s27653_s8 + $0x4c8] ss:$16 sps:$4 sm:$0xff]  }
 0x3e3   : > { %6942 = vmatmul.mubr.bf16.vlgmr.msra.gmra.mxu0 %v23227_v50  ;;  %v23513_v28 = vpop.f32.mrf.mxu1  ;;  %6972 = vmatprep.subr.bf16.mxu1 %v19137_v48  ;;  %v19146_v50 = vld [vmem:[%s27653_s8 + $0x4ac] ss:$16 sps:$4 sm:$0xff]   ;;  %v19147_v10 = vld [vmem:[%s27653_s8 + $0x208] ss:$16 sps:$4 sm:$0xff]  }
 0x3e4   : > { %6951 = vmatprep.mubr.bf16.mxu0 %v22996_v29  ;;  %7016 = vmatpush1.bf16.msra.mxu0 %v19132_v13  ;;  %v19153_v48 = vld [vmem:[%s27653_s8 + $0x3e8] ss:$16 sps:$4 sm:$0xff]  }
 0x3e5   : > { %v5431_v47 = vpop.f32.mrf.mxu1  ;;  %7017 = vmatprep.subr.bf16.mxu0 %v19140_v42  ;;  %v19156_v42 = vld [vmem:[%s27653_s8 + $0x468] ss:$16 sps:$4 sm:$0xff]  }
 0x3e6   : > { %v23526_v7 = vadd.f32 %v5431_v47, %v23355_v51  ;;  %6973 = vmatpush1.bf16.msra.mxu1 %v19135_v21  ;;  %v19144_v51 = vld [vmem:[%s27653_s8 + $0x4a8] ss:$16 sps:$4 sm:$0xff]  }
 0x3e7   : > { %v5433_v29 = vpop.f32.mrf.mxu1  ;;  %6974 = vmatprep.subr.bf16.mxu1 %v19143_v36  ;;  %v19164_v36 = vld [vmem:[%s27653_s8 + $0x44c] ss:$16 sps:$4 sm:$0xff]  }
 0x3e8   : > { %7018 = vmatpush1.bf16.msra.mxu0 %v19138_v54  ;;  %v23535_v61 = vadd.f32 %v5433_v29, %v23363_v39  ;;  %v19155_v39 = vld [vmem:[%s27653_s8 + $0x3ec] ss:$16 sps:$4 sm:$0xff]  }
 0x3e9   : > { %v5435_v32 = vpop.f32.mrf.mxu1  ;;  %7019 = vmatprep.subr.bf16.mxu0 %v19146_v50  ;;  %v19167_v50 = vld [vmem:[%s27653_s8 + $0x3ac] ss:$16 sps:$4 sm:$0xff]  }
 0x3ea   : > { %v23544_v37 = vadd.f32 %v5435_v32, %v23371_v34  ;;  %6975 = vmatpush1.bf16.msra.mxu1 %v19141_v52  ;;  %v19150_v34 = vld [vmem:[%s27653_s8 + $0x488] ss:$16 sps:$4 sm:$0xff]  }
 0x3eb   : > { %6952 = vmatmul.mubr.bf16.gmra.mxu0 %v23214_v59  ;;  %6976 = vmatprep.subr.bf16.mxu1 %v19149_v4  ;;  %v19158_v59 = vld [vmem:[%s27653_s8 + $0x46c] ss:$16 sps:$4 sm:$0xff]  }
 0x3ec   : > { %7020 = vmatpush1.bf16.msra.mxu0 %v19144_v51  ;;  %16881 = vmatprep.mubr.msk.bf16.mxu0 %vm2411_vm6, %v23272_v1  ;;  %v19161_v1 = vld [vmem:[%s27653_s8 + $0x3cc] ss:$16 sps:$4 sm:$0xff]   ;;  %v19165_v51 = vld [vmem:[%s27653_s8 + $0x3a8] ss:$16 sps:$4 sm:$0xff]  }
 0x3ed   : > { %7021 = vmatprep.subr.bf16.mxu0 %v19152_v40  ;;  %v19170_v4 = vld [vmem:[%s27653_s8 + $0x42c] ss:$16 sps:$4 sm:$0xff]  }
 0x3ee   : > { %6977 = vmatpush1.bf16.msra.mxu1 %v19147_v10  ;;  %v19168_v10 = vld [vmem:[%s27653_s8 + $0x428] ss:$16 sps:$4 sm:$0xff]  }
 0x3ef   : > { %v5474_v13 = vpop.f32.mrf.mxu0  ;;  %6978 = vmatprep.subr.bf16.mxu1 %v19155_v39 }
 0x3f0   : > { %v23570_v22 = vadd.f32 %v5474_v13, %v23070_v12  ;;  %7022 = vmatpush1.bf16.msra.mxu0 %v19150_v34  ;;  %v19159_v12 = vld [vmem:[%s27653_s8 + $0x3c8] ss:$16 sps:$4 sm:$0xff]   ;;  %v19176_v34 = vld [vmem:[%s27653_s8 + $0x40c] ss:$16 sps:$4 sm:$0xff]  }
 0x3f1   : > { %v5476_v21 = vpop.f32.mrf.mxu0  ;;  %7023 = vmatprep.subr.bf16.mxu0 %v19158_v59  ;;  %v19179_v13 = vld [vmem:[%s27653_s8 + $0x36c] ss:$16 sps:$4 sm:$0xff]  }
 0x3f2   : > { %v23579_v54 = vadd.f32 %v5476_v21, %v23078_v41  ;;  %6979 = vmatpush2.bf16.msra.mxu1 %v19153_v48  ;;  %v19162_v41 = vld [vmem:[%s27653_s8 + $0x448] ss:$16 sps:$4 sm:$0xff]  }
 0x3f3   : > { %v5478_v47 = vpop.f32.mrf.mxu0  ;;  %6980 = vmatprep.subr.bf16.mxu1 %v19161_v1  ;;  %v19177_v21 = vld [vmem:[%s27653_s8 + $0x368] ss:$16 sps:$4 sm:$0xff]  }
 0x3f4   : > { %v23588_v52 = vadd.f32 %v5478_v47, %v23087_v44  ;;  %7024 = vmatpush1.bf16.msra.mxu0 %v19156_v42  ;;  %v19173_v44 = vld [vmem:[%s27653_s8 + $0x38c] ss:$16 sps:$4 sm:$0xff]   ;;  %v19183_v47 = vld [vmem:[%s27653_s8 + $0x348] ss:$16 sps:$4 sm:$0xff]  }
 0x3f5   : > { %v23593_v29 = vpop.f32.mrf.mxu0  ;;  %7025 = vmatprep.subr.bf16.mxu0 %v19164_v36  ;;  %v19182_v42 = vld [vmem:[%s27653_s8 + $0x58c] ss:$16 sps:$4 sm:$0xff]   ;;  %v19180_v36 = vld [vmem:[%s27653_s8 + $0x588] ss:$16 sps:$4 sm:$0xff]  }
 0x3f6   : > { %27660 = vst [vmem:[#allocation24_spill] sm:$0xff] %v23593_v29  ;;  %6981 = vmatpush2.bf16.msra.mxu1 %v19159_v12  ;;  %v19188_v12 = vld [vmem:[%s27653_s8 + $0x56c] ss:$16 sps:$4 sm:$0xff]  }
 0x3f7   : > { %v5484_v32 = vpop.f32.mrf.mxu0  ;;  %6982 = vmatprep.subr.bf16.mxu1 %v19167_v50  ;;  %v19191_v50 = vld [vmem:[%s27653_s8 + $0x32c] ss:$16 sps:$4 sm:$0xff]  }
 0x3f8   : > { %v23605_v40 = vadd.f32 %v5484_v32, %v23103_v16  ;;  %7026 = vmatpush1.bf16.msra.mxu0 %v19162_v41  ;;  %v19171_v16 = vld [vmem:[%s27653_s8 + $0x388] ss:$16 sps:$4 sm:$0xff]   ;;  %v7091_v32 = vld [vmem:[#allocation3 + $0x98] sm:$0x7f] }
 0x3f9   : > { %v5486_v39 = vpop.f32.mrf.mxu0  ;;  %7027 = vmatprep.subr.bf16.mxu0 %v19170_v4  ;;  %v19186_v41 = vld [vmem:[%s27653_s8 + $0x568] ss:$16 sps:$4 sm:$0xff]   ;;  %v19194_v4 = vld [vmem:[%s27653_s8 + $0x54c] ss:$16 sps:$4 sm:$0xff]  }
 0x3fa   : > { %v23614_v59 = vadd.f32 %v5486_v39, %v23111_v18  ;;  %6983 = vmatpush2.bf16.msra.mxu1 %v19165_v51  ;;  %v19174_v18 = vld [vmem:[%s27653_s8 + $0x408] ss:$16 sps:$4 sm:$0xff]   ;;  %v7085_v39 = vld [vmem:[#allocation3 + $0x8] sm:$0xf8] }
 0x3fb   : > { %v5488_v48 = vpop.f32.mrf.mxu0  ;;  %6984 = vmatprep.subr.bf16.mxu1 %v19173_v44  ;;  %v19189_v51 = vld [vmem:[%s27653_s8 + $0x328] ss:$16 sps:$4 sm:$0xff]   ;;  %v19197_v44 = vld [vmem:[%s27653_s8 + $0x30c] ss:$16 sps:$4 sm:$0xff]  }
 0x3fc   : > { %v23623_v1 = vadd.f32 %v5488_v48, %v23119_v46  ;;  %7028 = vmatpush1.bf16.msra.mxu0 %v19168_v10  ;;  %v19185_v46 = vld [vmem:[%s27653_s8 + $0x34c] ss:$16 sps:$4 sm:$0xff]   ;;  %v19192_v10 = vld [vmem:[%s27653_s8 + $0x548] ss:$16 sps:$4 sm:$0xff]  }
 0x3fd   : > { %7029 = vmatprep.subr.bf16.mxu0 %v19176_v34  ;;  %v19200_v34 = vld [vmem:[%s27653_s8 + $0x52c] ss:$16 sps:$4 sm:$0xff]  }
 0x3fe   : > { %6985 = vmatpush2.bf16.msra.mxu1 %v19171_v16  ;;  %v20384_v16 = vld [vmem:[#allocation3 + $0x68] sm:$0xff] }
 0x3ff   : > { %6986 = vmatprep.subr.bf16.mxu1 %v19179_v13  ;;  %v7103_v48 = vpack.c.bf16 %v7091_v32, %v20384_v16  ;;  %v19195_v13 = vld [vmem:[%s27653_s8 + $0x308] ss:$16 sps:$4 sm:$0xff]   ;;  %v20385_v32 = vld [vmem:[#allocation3 + $0x78] sm:$0xff] }
 0x400   : > { %7030 = vmatpush1.bf16.msra.mxu0 %v19174_v18  ;;  %v19206_v18 = vld [vmem:[%s27661_s29 + $0xe4] ss:$16 sps:$4 sm:$0xff]  }
 0x401   : > { %7037 = vmatprep.subr.bf16.mxu0 %v19182_v42  ;;  %v7097_v42 = vpack.c.bf16 %v22985_v11, %v7085_v39  ;;  %v19209_v11 = vld [vmem:[%s27662_s1 + $0xc4] ss:$16 sps:$4 sm:$0xff]  }
 0x402   : > { %6987 = vmatpush2.bf16.msra.mxu1 %v19177_v21  ;;  %v19198_v21 = vld [vmem:[%s27653_s8 + $0x528] ss:$16 sps:$4 sm:$0xff]   ;;  %v19212_v39 = vld [vmem:[%s27662_s1 + $0x2e4] ss:$16 sps:$4 sm:$0xff]  }
 0x403   : > { %6988 = vmatprep.subr.bf16.mxu1 %v19185_v46  ;;  %v7093_v46 = vld [vmem:[#allocation3 + $0xa8] sm:$0x7f] }
 0x404   : > { %7038 = vmatpush2.bf16.msra.mxu0 %v19180_v36  ;;  %v19203_v36 = vld [vmem:[%s27653_s8 + $0x50c] ss:$16 sps:$4 sm:$0xff]  }
 0x405   : > { %7039 = vmatprep.subr.bf16.mxu0 %v19188_v12  ;;  %v7315_v12 = vshrl.u32 %v7103_v48, 16 }
 0x406   : > { %6989 = vmatpush2.bf16.msra.mxu1 %v19183_v47  ;;  %v7318_v47 = vshll.u32 %v7103_v48, 16 }
 0x407   : > { %6990 = vmatprep.subr.bf16.mxu1 %v19191_v50  ;;  %v19204_v50 = vld [vmem:[%s27662_s1 + $0xe0] ss:$16 sps:$4 sm:$0xff]  }
 0x408   : > { %7040 = vmatpush2.bf16.msra.mxu0 %v19186_v41  ;;  %v7087_v41 = vld [vmem:[#allocation3 + $0x18] sm:$0xf8]  ;;  %v7320_v16 = vrot.slane %v7318_v47, 2 }
 0x409   : > { %7041 = vmatprep.subr.bf16.mxu0 %v19194_v4  ;;  %v7307_v4 = vshrl.u32 %v7097_v42, 16  ;;  %v7099_v48 = vpack.c.bf16 %v23019_v35, %v7087_v41  ;;  %v19210_v35 = vld [vmem:[%s27662_s1 + $0x2e0] ss:$16 sps:$4 sm:$0xff]  }
 0x40a   : > { %6991 = vmatpush2.bf16.msra.mxu1 %v19189_v51  ;;  %v7310_v51 = vshll.u32 %v7097_v42, 16 }
 0x40b   : > { %6992 = vmatprep.subr.bf16.mxu1 %v19197_v44  ;;  %v7105_v44 = vpack.c.bf16 %v7093_v46, %v20385_v32  ;;  %v7344_v47 = vshll.u32 %v7099_v48, 16  ;;  %v19216_v32 = vld [vmem:[%s27662_s1 + $0x2c0] ss:$16 sps:$4 sm:$0xff]  }
 0x40c   : > { %7042 = vmatpush2.bf16.msra.mxu0 %v19192_v10  ;;  %v19201_v10 = vld [vmem:[%s27653_s8 + $0x508] ss:$16 sps:$4 sm:$0xff]   ;;  %v7312_v42 = vrot.slane %v7310_v51, 2  ;;  %s27669_s8 = sld [smem:[#allocation47_spill]] }
 0x40d   : > { %7043 = vmatprep.subr.bf16.mxu0 %v19200_v34  ;;  %v7317_v34 = vrot.slane %v7315_v12, 1  ;;  %v7352_v46 = vshll.u32 %v7105_v44, 16  ;;  %v7341_v12 = vshrl.u32 %v7099_v48, 16  ;;  %v19222_v48 = vld [vmem:[%s27662_s1 + $0x2a0] ss:$16 sps:$4 sm:$0xff]  }
 0x40e   : > { %6993 = vmatpush2.bf16.msra.mxu1 %v19195_v13  ;;  %v19207_v13 = vld [vmem:[%s27662_s1 + $0xc0] ss:$16 sps:$4 sm:$0xff]  }
 0x40f   : > { %8307 = vmatprep.subr.bf16.mxu1 %v19206_v18  ;;  %v7309_v18 = vrot.slane %v7307_v4, 1  ;;  %v7354_v51 = vrot.slane %v7352_v46, 2 }
 0x410   : > { %7044 = vmatpush2.bf16.msra.mxu0 %v19198_v21  ;;  %v7349_v21 = vshrl.u32 %v7105_v44, 16  ;;  %v19224_v44 = vld [vmem:[%s27662_s1 + $0x2a4] ss:$16 sps:$4 sm:$0xff]  }
 0x411   : > { %6995 = vmatmul.mubr.bf16.vlgmr.msra.gmra.mxu1 %v23256_v20  ;;  %7045 = vmatprep.subr.bf16.mxu0 %v19203_v36  ;;  %v19215_v20 = vld [vmem:[%s27662_s1 + $0xa4] ss:$16 sps:$4 sm:$0xff]   ;;  %v23707_v36 = vor.u32 %v7320_v16, %v7317_v34  ;;  %v7313_v41 = vor.u32 %v7312_v42, %v7309_v18  ;;  %v23733_v34 = vpop.f32.mrf.mxu1 }
 0x412   : > { %7004 = vmatprep.mubr.bf16.mxu1 %v23028_v23  ;;  %8308 = vmatpush1.bf16.msra.mxu1 %v19204_v50  ;;  %v19218_v23 = vld [vmem:[%s27662_s1 + $0x2c4] ss:$16 sps:$4 sm:$0xff]   ;;  %v19213_v50 = vld [vmem:[%s27662_s1 + $0xa0] ss:$16 sps:$4 sm:$0xff]   ;;  %v7351_v4 = vrot.slane %v7349_v21, 1  ;;  %27663 = vst [vmem:[#allocation25_spill] sm:$0xff] %v23733_v34 }
 0x413   : > { %8309 = vmatprep.subr.bf16.mxu1 %v19209_v11  ;;  %v19221_v11 = vld [vmem:[%s27662_s1 + $0x84] ss:$16 sps:$4 sm:$0xff]   ;;  %v19225_v21 = vld [vmem:[%s27662_s1 + $0x60] ss:$16 sps:$4 sm:$0xff]   ;;  %v20403_v34 = vld [vmem:[#allocation3 + $0x50] sm:$0xff] }
 0x414   : > { %7046 = vmatpush2.bf16.msra.mxu0 %v19201_v10  ;;  %v7343_v10 = vrot.slane %v7341_v12, 1  ;;  %v19227_v16 = vld [vmem:[%s27662_s1 + $0x64] ss:$16 sps:$4 sm:$0xff]   ;;  %v19228_v12 = vld [vmem:[%s27662_s1 + $0x280] ss:$16 sps:$4 sm:$0xff]  }
 0x415   : > { %8360 = vmatprep.subr.bf16.mxu0 %v19212_v39  ;;  %v7346_v39 = vrot.slane %v7344_v47, 2  ;;  %v19230_v18 = vld [vmem:[%s27662_s1 + $0x284] ss:$16 sps:$4 sm:$0xff]  }
 0x416   : > { %8310 = vmatpush1.bf16.msra.mxu1 %v19207_v13 }
 0x417   : > { %7048 = vmatmul.mubr.bf16.vlgmr.msra.gmra.mxu0 %v23437_v17  ;;  %8311 = vmatprep.subr.bf16.mxu1 %v19215_v20  ;;  %v23724_v17 = vsel %vm7288_vm11, %v7313_v41, %v23707_v36  ;;  %v7347_v20 = vor.u32 %v7346_v39, %v7343_v10  ;;  %v19242_v39 = vld [vmem:[%s27662_s1 + $0x244] ss:$16 sps:$4 sm:$0xff]  }
 0x418   : > { %16882 = vmatprep.mubr.msk.bf16.mxu0 %vm2411_vm6, %v23252_v8  ;;  %8361 = vmatpush1.bf16.msra.mxu0 %v19210_v35  ;;  %v19219_v8 = vld [vmem:[%s27662_s1 + $0x80] ss:$16 sps:$4 sm:$0xff]  }
 0x419   : > { %7005 = vmatmul.mubr.bf16.gmra.mxu1 %v23238_v24  ;;  %8362 = vmatprep.subr.bf16.mxu0 %v19218_v23  ;;  %v23735_v24 = vor.u32 %v7354_v51, %v7351_v4  ;;  %v19233_v23 = vld [vmem:[%s27662_s1 + $0x44] ss:$16 sps:$4 sm:$0xff]  }
 0x41a   : > { %8312 = vmatpush1.bf16.msra.mxu1 %v19213_v50  ;;  %8339 = vmatprep.mubr.bf16.mxu1 %v23724_v17  ;;  %v19236_v50 = vld [vmem:[%s27662_s1 + $0x264] ss:$16 sps:$4 sm:$0xff]  }
 0x41b   : > { %8313 = vmatprep.subr.bf16.mxu1 %v19221_v11  ;;  %v23753_v46 = vsel %vm7288_vm11, %v7347_v20, %v23735_v24  ;;  %v19231_v11 = vld [vmem:[%s27662_s1 + $0x40] ss:$16 sps:$4 sm:$0xff]   ;;  %v19239_v51 = vld [vmem:[%s27662_s1 + $0x24] ss:$16 sps:$4 sm:$0xff]  }
 0x41c   : > { %8363 = vmatpush1.bf16.msra.mxu0 %v19216_v32 }
 0x41d   : > { %v5527_v13 = vpop.f32.mrf.mxu1  ;;  %8364 = vmatprep.subr.bf16.mxu0 %v19224_v44 }
 0x41e   : > { %v5528_v42 = vadd.f32 %v5527_v13, %v23570_v22  ;;  %8314 = vmatpush1.bf16.msra.mxu1 %v19219_v8 }
 0x41f   : > { %7058 = vmatmul.mubr.bf16.gmra.mxu0 %v23424_v27  ;;  %v5529_v35 = vpop.f32.mrf.mxu1  ;;  %8315 = vmatprep.subr.bf16.mxu1 %v19227_v16  ;;  %v23763_v27 = vpop.f32.mrf.mxu0 }
 0x420   : > { %8365 = vmatpush1.bf16.msra.mxu0 %v19222_v48  ;;  %8392 = vmatprep.mubr.bf16.mxu0 %v23753_v46  ;;  %v5530_v22 = vadd.f32 %v5529_v35, %v23579_v54  ;;  %27664 = vst [vmem:[#allocation26_spill] sm:$0xff] %v23763_v27  ;;  %v19237_v48 = vld [vmem:[%s27662_s1 + $0x20] ss:$16 sps:$4 sm:$0xff]  }
 0x421   : > { %v5531_v47 = vpop.f32.mrf.mxu1  ;;  %8366 = vmatprep.subr.bf16.mxu0 %v19230_v18  ;;  %v19245_v18 = vld [vmem:[%s27662_s1 + $0x4] ss:$16 sps:$4 sm:$0xff]  }
 0x422   : > { %v5532_v41 = vadd.f32 %v5531_v47, %v23588_v52  ;;  %8316 = vmatpush1.bf16.msra.mxu1 %v19225_v21  ;;  %v19234_v52 = vld [vmem:[%s27662_s1 + $0x260] ss:$16 sps:$4 sm:$0xff]  }
 0x423   : > { %v5580_v54 = vpop.f32.mrf.mxu0  ;;  %v23772_v4 = vpop.f32.mrf.mxu1  ;;  %8317 = vmatprep.subr.bf16.mxu1 %v19233_v23  ;;  %v19243_v47 = vld [vmem:[%s27662_s1] ss:$16 sps:$4 sm:$0xff]  }
 0x424   : > { %27665 = vst [vmem:[#allocation27_spill] sm:$0xff] %v23772_v4  ;;  %v23777_v32 = vadd.f32 %v5580_v54, %v5528_v42  ;;  %8367 = vmatpush1.bf16.msra.mxu0 %v19228_v12 }
 0x425   : > { %v5582_v44 = vpop.f32.mrf.mxu0  ;;  %v5537_v10 = vpop.f32.mrf.mxu1  ;;  %8368 = vmatprep.subr.bf16.mxu0 %v19236_v50  ;;  %v19251_v50 = vld [vmem:[%s27662_s1 + $0x1e4] ss:$16 sps:$4 sm:$0xff]  }
 0x426   : > { %v23785_v8 = vadd.f32 %v5582_v44, %v5530_v22  ;;  %v5538_v16 = vadd.f32 %v5537_v10, %v23605_v40  ;;  %8318 = vmatpush1.bf16.msra.mxu1 %v19231_v11  ;;  %v19240_v40 = vld [vmem:[%s27662_s1 + $0x240] ss:$16 sps:$4 sm:$0xff]   ;;  %v19248_v22 = vld [vmem:[%s27662_s1 + $0x224] ss:$16 sps:$4 sm:$0xff]  }
 0x427   : > { %v5584_v13 = vpop.f32.mrf.mxu0  ;;  %v5539_v20 = vpop.f32.mrf.mxu1  ;;  %8319 = vmatprep.subr.bf16.mxu1 %v19239_v51  ;;  %v19246_v11 = vld [vmem:[%s27662_s1 + $0x220] ss:$16 sps:$4 sm:$0xff]   ;;  %v19257_v10 = vld [vmem:[%s27662_s1 + $0x1c4] ss:$16 sps:$4 sm:$0xff]  }
 0x428   : > { %v23794_v42 = vadd.f32 %v5584_v13, %v5532_v41  ;;  %8369 = vmatpush1.bf16.msra.mxu0 %v19234_v52  ;;  %v5540_v21 = vadd.f32 %v5539_v20, %v23614_v59  ;;  %v19249_v52 = vld [vmem:[%s27662_s1 + $0x1e0] ss:$16 sps:$4 sm:$0xff]   ;;  %v19263_v20 = vld [vmem:[%s27662_s1 + $0x1a4] ss:$16 sps:$4 sm:$0xff]  }
 0x429   : > { %v23800_v35 = vpop.f32.mrf.mxu0  ;;  %v5541_v23 = vpop.f32.mrf.mxu1  ;;  %8370 = vmatprep.subr.bf16.mxu0 %v19242_v39  ;;  %v19255_v13 = vld [vmem:[%s27662_s1 + $0x1c0] ss:$16 sps:$4 sm:$0xff]  }
 0x42a   : > { %27666 = vst [vmem:[#allocation28_spill] sm:$0xff] %v23800_v35  ;;  %v5542_v12 = vadd.f32 %v5541_v23, %v23623_v1  ;;  %8320 = vmatpush1.bf16.msra.mxu1 %v19237_v48  ;;  %v19254_v1 = vld [vmem:[%s27662_s1 + $0x204] ss:$16 sps:$4 sm:$0xff]   ;;  %v20391_v35 = vld [vmem:[#allocation3 + $0x50] sm:$0xff] }
 0x42b   : > { %v5590_v59 = vpop.f32.mrf.mxu0  ;;  %8321 = vmatprep.subr.bf16.mxu1 %v19245_v18  ;;  %v19260_v48 = vld [vmem:[%s27662_s1 + $0x3e4] ss:$16 sps:$4 sm:$0xff]   ;;  %v19258_v18 = vld [vmem:[%s27662_s1 + $0x3e0] ss:$16 sps:$4 sm:$0xff]  }
 0x42c   : > { %v23812_v41 = vadd.f32 %v5590_v59, %v5538_v16  ;;  %8371 = vmatpush1.bf16.msra.mxu0 %v19240_v40  ;;  %v19252_v16 = vld [vmem:[%s27662_s1 + $0x200] ss:$16 sps:$4 sm:$0xff]   ;;  %v19269_v23 = vld [vmem:[%s27662_s1 + $0x184] ss:$16 sps:$4 sm:$0xff]  }
 0x42d   : > { %v5592_v54 = vpop.f32.mrf.mxu0  ;;  %8372 = vmatprep.subr.bf16.mxu0 %v19248_v22  ;;  %v19261_v40 = vld [vmem:[%s27662_s1 + $0x1a0] ss:$16 sps:$4 sm:$0xff]   ;;  %v19275_v59 = vld [vmem:[%s27662_s1 + $0x164] ss:$16 sps:$4 sm:$0xff]  }
 0x42e   : > { %v23820_v51 = vadd.f32 %v5592_v54, %v5540_v21  ;;  %8322 = vmatpush1.bf16.msra.mxu1 %v19243_v47  ;;  %v19266_v21 = vld [vmem:[%s27662_s1 + $0x3c4] ss:$16 sps:$4 sm:$0xff]   ;;  %v19264_v22 = vld [vmem:[%s27662_s1 + $0x3c0] ss:$16 sps:$4 sm:$0xff]   ;;  %v7090_v54 = vld [vmem:[#allocation3 + $0x90] sm:$0x7f] }
 0x42f   : > { %v5594_v44 = vpop.f32.mrf.mxu0  ;;  %8323 = vmatprep.subr.bf16.mxu1 %v19251_v50  ;;  %v19267_v47 = vld [vmem:[%s27662_s1 + $0x180] ss:$16 sps:$4 sm:$0xff]  }
 0x430   : > { %v23828_v39 = vadd.f32 %v5594_v44, %v5542_v12  ;;  %8373 = vmatpush1.bf16.msra.mxu0 %v19246_v11  ;;  %v19272_v12 = vld [vmem:[%s27662_s1 + $0x3a4] ss:$16 sps:$4 sm:$0xff]   ;;  %v19270_v50 = vld [vmem:[%s27662_s1 + $0x3a0] ss:$16 sps:$4 sm:$0xff]   ;;  %v7084_v44 = vld [vmem:[#allocation3] sm:$0xf8] }
 0x431   : > { %8374 = vmatprep.subr.bf16.mxu0 %v19254_v1  ;;  %v19278_v11 = vld [vmem:[%s27662_s1 + $0x384] ss:$16 sps:$4 sm:$0xff]   ;;  %v19273_v1 = vld [vmem:[%s27662_s1 + $0x160] ss:$16 sps:$4 sm:$0xff]  }
 0x432   : > { %8324 = vmatpush2.bf16.msra.mxu1 %v19249_v52  ;;  %v19281_v52 = vld [vmem:[%s27662_s1 + $0x144] ss:$16 sps:$4 sm:$0xff]  }
 0x433   : > { %8325 = vmatprep.subr.bf16.mxu1 %v19257_v10  ;;  %v19276_v10 = vld [vmem:[%s27662_s1 + $0x380] ss:$16 sps:$4 sm:$0xff]  }
 0x434   : > { %8375 = vmatpush1.bf16.msra.mxu0 %v19252_v16  ;;  %v7102_v16 = vpack.c.bf16 %v7090_v54, %v23196_v53  ;;  %v19282_v53 = vld [vmem:[%s27662_s1 + $0x360] ss:$16 sps:$4 sm:$0xff]  }
 0x435   : > { %8376 = vmatprep.subr.bf16.mxu0 %v19260_v48  ;;  %v19284_v48 = vld [vmem:[%s27662_s1 + $0x364] ss:$16 sps:$4 sm:$0xff]  }
 0x436   : > { %8326 = vmatpush2.bf16.msra.mxu1 %v19255_v13  ;;  %v19279_v13 = vld [vmem:[%s27662_s1 + $0x140] ss:$16 sps:$4 sm:$0xff]  }
 0x437   : > { %8327 = vmatprep.subr.bf16.mxu1 %v19263_v20  ;;  %v7096_v20 = vpack.c.bf16 %v23205_v45, %v7084_v44  ;;  %v19285_v45 = vld [vmem:[%s27662_s1 + $0x120] ss:$16 sps:$4 sm:$0xff]  }
 0x438   : > { %8377 = vmatpush2.bf16.msra.mxu0 %v19258_v18  ;;  %v19287_v18 = vld [vmem:[%s27662_s1 + $0x124] ss:$16 sps:$4 sm:$0xff]  }
 0x439   : > { %8378 = vmatprep.subr.bf16.mxu0 %v19266_v21  ;;  %v7092_v21 = vld [vmem:[#allocation3 + $0xa0] sm:$0x7f]  ;;  %v7095_v54 = vld [vmem:[#allocation3 + $0xb8] sm:$0x7f] }
 0x43a   : > { %8328 = vmatpush2.bf16.msra.mxu1 %v19261_v40  ;;  %v7298_v40 = vshrl.u32 %v7102_v16, 16 }
 0x43b   : > { %8329 = vmatprep.subr.bf16.mxu1 %v19269_v23  ;;  %v7301_v23 = vshll.u32 %v7102_v16, 16  ;;  %v20387_v16 = vld [vmem:[#allocation3 + $0x40] sm:$0xff] }
 0x43c   : > { %8379 = vmatpush2.bf16.msra.mxu0 %v19264_v22  ;;  %v19290_v22 = vld [vmem:[%s27662_s1 + $0x344] ss:$16 sps:$4 sm:$0xff]   ;;  %v7300_v44 = vrot.slane %v7298_v40, 1 }
 0x43d   : > { %8380 = vmatprep.subr.bf16.mxu0 %v19272_v12  ;;  %v7086_v12 = vld [vmem:[#allocation3 + $0x10] sm:$0xf8] }
 0x43e   : > { %8330 = vmatpush2.bf16.msra.mxu1 %v19267_v47  ;;  %v7290_v47 = vshrl.u32 %v7096_v20, 16 }
 0x43f   : > { %8331 = vmatprep.subr.bf16.mxu1 %v19275_v59  ;;  %v7293_v59 = vshll.u32 %v7096_v20, 16  ;;  %v19296_v20 = vld [vmem:[%s27662_s1 + $0x324] ss:$16 sps:$4 sm:$0xff]  }
 0x440   : > { %8381 = vmatpush2.bf16.msra.mxu0 %v19270_v50  ;;  %v20386_v50 = vld [vmem:[#allocation3 + $0x70] sm:$0xff] }
 0x441   : > { %8382 = vmatprep.subr.bf16.mxu0 %v19278_v11  ;;  %v7104_v11 = vpack.c.bf16 %v7092_v21, %v20386_v50  ;;  %v7292_v50 = vrot.slane %v7290_v47, 1  ;;  %v7295_v6 = vrot.slane %v7293_v59, 2  ;;  %v19299_v47 = vld [vmem:[%s27662_s1 + $0x304] ss:$16 sps:$4 sm:$0xff]  }
 0x442   : > { %8332 = vmatpush2.bf16.msra.mxu1 %v19273_v1  ;;  %v19293_v1 = vld [vmem:[%s27662_s1 + $0x104] ss:$16 sps:$4 sm:$0xff]  }
 0x443   : > { %8333 = vmatprep.subr.bf16.mxu1 %v19281_v52  ;;  %v19288_v52 = vld [vmem:[%s27662_s1 + $0x340] ss:$16 sps:$4 sm:$0xff]   ;;  %v7332_v63 = vshrl.u32 %v7104_v11, 16  ;;  %v7335_v40 = vshll.u32 %v7104_v11, 16 }
 0x444   : > { %8383 = vmatpush2.bf16.msra.mxu0 %v19276_v10  ;;  %v7303_v10 = vrot.slane %v7301_v23, 2  ;;  %v19302_v23 = vld [vmem:[%s27662_s1 + $0x4e4] ss:$16 sps:$4 sm:$0xff]  }
 0x445   : > { %8384 = vmatprep.subr.bf16.mxu0 %v19284_v48  ;;  %v7098_v48 = vpack.c.bf16 %v20387_v16, %v7086_v12 }
 0x446   : > { %8334 = vmatpush2.bf16.msra.mxu1 %v19279_v13  ;;  %v7089_v13 = vld [vmem:[#allocation3 + $0x28] sm:$0xf8] }
 0x447   : > { %8335 = vmatprep.subr.bf16.mxu1 %v19287_v18  ;;  %v20388_v18 = vld [vmem:[#allocation3 + $0x88] sm:$0xff]  ;;  %v7324_v16 = vshrl.u32 %v7098_v48, 16 }
 0x448   : > { %8385 = vmatpush2.bf16.msra.mxu0 %v19282_v53  ;;  %v7107_v21 = vpack.c.bf16 %v7095_v54, %v20388_v18  ;;  %v19291_v53 = vld [vmem:[%s27662_s1 + $0x100] ss:$16 sps:$4 sm:$0xff]   ;;  %v23919_v54 = vor.u32 %v7303_v10, %v7300_v44  ;;  %v7327_v18 = vshll.u32 %v7098_v48, 16  ;;  %v19305_v44 = vld [vmem:[%s27662_s1 + $0x4c4] ss:$16 sps:$4 sm:$0xff]  }
 0x449   : > { %8386 = vmatprep.subr.bf16.mxu0 %v19290_v22  ;;  %v20389_v22 = vld [vmem:[#allocation3 + $0x58] sm:$0xff] }
 0x44a   : > { %8336 = vmatpush2.bf16.msra.mxu1 %v19285_v45  ;;  %v7101_v12 = vpack.c.bf16 %v20389_v22, %v7089_v13  ;;  %v19294_v45 = vld [vmem:[%s27662_s1 + $0x320] ss:$16 sps:$4 sm:$0xff]   ;;  %v7383_v59 = vshrl.u32 %v7107_v21, 16  ;;  %v7386_v11 = vshll.u32 %v7107_v21, 16  ;;  %v7334_v13 = vrot.slane %v7332_v63, 1 }
 0x44b   : > { %8337 = vmatprep.subr.bf16.mxu1 %v19293_v1  ;;  %v7296_v1 = vor.u32 %v7295_v6, %v7292_v50  ;;  %v7337_v22 = vrot.slane %v7335_v40, 2  ;;  %v19297_v6 = vld [vmem:[%s27662_s1 + $0x300] ss:$16 sps:$4 sm:$0xff]   ;;  %v7326_v21 = vrot.slane %v7324_v16, 1  ;;  %v19308_v63 = vld [vmem:[%s27662_s1 + $0xec] ss:$16 sps:$4 sm:$0xff]  }
 0x44c   : > { %8387 = vmatpush2.bf16.msra.mxu0 %v19288_v52  ;;  %v19300_v52 = vld [vmem:[%s27662_s1 + $0x4e0] ss:$16 sps:$4 sm:$0xff]   ;;  %v7375_v10 = vshrl.u32 %v7101_v12, 16  ;;  %v7378_v48 = vshll.u32 %v7101_v12, 16  ;;  %v7385_v50 = vrot.slane %v7383_v59, 1  ;;  %v7388_v40 = vrot.slane %v7386_v11, 2 }
 0x44d   : > { %8388 = vmatprep.subr.bf16.mxu0 %v19296_v20  ;;  %v23932_v20 = vsel %vm7288_vm11, %v7296_v1, %v23919_v54  ;;  %v19303_v12 = vld [vmem:[%s27662_s1 + $0x4c0] ss:$16 sps:$4 sm:$0xff]   ;;  %v19306_v59 = vld [vmem:[%s27662_s1 + $0xe8] ss:$16 sps:$4 sm:$0xff]   ;;  %v19314_v11 = vld [vmem:[%s27662_s1 + $0xcc] ss:$16 sps:$4 sm:$0xff]  }
 0x44e   : > { %8338 = vmatpush2.bf16.msra.mxu1 %v19291_v53  ;;  %v7329_v53 = vrot.slane %v7327_v18, 2  ;;  %v7377_v16 = vrot.slane %v7375_v10, 1  ;;  %v7380_v18 = vrot.slane %v7378_v48, 2  ;;  %v23956_v1 = vor.u32 %v7388_v40, %v7385_v50  ;;  %v19312_v10 = vld [vmem:[%s27662_s1 + $0xc8] ss:$16 sps:$4 sm:$0xff]  }
 0x44f   : > { %8413 = vmatprep.subr.bf16.mxu1 %v19302_v23  ;;  %v23942_v23 = vor.u32 %v7337_v22, %v7334_v13  ;;  %v19309_v13 = vld [vmem:[%s27662_s1 + $0x4a0] ss:$16 sps:$4 sm:$0xff]   ;;  %v19318_v50 = vld [vmem:[%s27662_s1 + $0xa8] ss:$16 sps:$4 sm:$0xff]  }
 0x450   : > { %8389 = vmatpush2.bf16.msra.mxu0 %v19294_v45  ;;  %v19311_v45 = vld [vmem:[%s27662_s1 + $0x4a4] ss:$16 sps:$4 sm:$0xff]   ;;  %v7381_v22 = vor.u32 %v7380_v18, %v7377_v16 }
 0x451   : > { %8340 = vmatmul.mubr.bf16.vlgmr.msra.gmra.mxu1 %v23932_v20  ;;  %8390 = vmatprep.subr.bf16.mxu0 %v19299_v47  ;;  %v7330_v47 = vor.u32 %v7329_v53, %v7326_v21  ;;  %v19315_v21 = vld [vmem:[%s27662_s1 + $0x480] ss:$16 sps:$4 sm:$0xff]   ;;  %v23986_v53 = vpop.f32.mrf.mxu1  ;;  %v19329_v18 = vld [vmem:[%s27662_s1 + $0x444] ss:$16 sps:$4 sm:$0xff]  }
 0x452   : > { %8349 = vmatprep.mubr.bf16.mxu1 %v23707_v36  ;;  %8414 = vmatpush1.bf16.msra.mxu1 %v19300_v52  ;;  %v23976_v48 = vsel %vm7288_vm11, %v7381_v22, %v23956_v1  ;;  %27667 = vst [vmem:[#allocation29_spill] sm:$0xff] %v23986_v53  ;;  %v19327_v22 = vld [vmem:[%s27662_s1 + $0x440] ss:$16 sps:$4 sm:$0xff]  }
 0x453   : > { %8415 = vmatprep.subr.bf16.mxu1 %v19305_v44  ;;  %v23960_v52 = vsel %vm7288_vm11, %v7330_v47, %v23942_v23  ;;  %v19317_v44 = vld [vmem:[%s27662_s1 + $0x484] ss:$16 sps:$4 sm:$0xff]   ;;  %v19324_v47 = vld [vmem:[%s27662_s1 + $0x88] ss:$16 sps:$4 sm:$0xff]  }
 0x454   : > { %8391 = vmatpush2.bf16.msra.mxu0 %v19297_v6  ;;  %v19320_v6 = vld [vmem:[%s27662_s1 + $0xac] ss:$16 sps:$4 sm:$0xff]  }
 0x455   : > { %8466 = vmatprep.subr.bf16.mxu0 %v19308_v63  ;;  %v19323_v63 = vld [vmem:[%s27662_s1 + $0x464] ss:$16 sps:$4 sm:$0xff]  }
 0x456   : > { %8416 = vmatpush1.bf16.msra.mxu1 %v19303_v12  ;;  %v19326_v12 = vld [vmem:[%s27662_s1 + $0x8c] ss:$16 sps:$4 sm:$0xff]  }
 0x457   : > { %8393 = vmatmul.mubr.bf16.vlgmr.msra.gmra.mxu0 %v23960_v52  ;;  %8417 = vmatprep.subr.bf16.mxu1 %v19311_v45  ;;  %v19321_v45 = vld [vmem:[%s27662_s1 + $0x460] ss:$16 sps:$4 sm:$0xff]  }
 0x458   : > { %8402 = vmatprep.mubr.bf16.mxu0 %v23735_v24  ;;  %8467 = vmatpush1.bf16.msra.mxu0 %v19306_v59  ;;  %v24008_v59 = vpop.f32.mrf.mxu0 }
 0x459   : > { %8350 = vmatmul.mubr.bf16.gmra.mxu1 %v23919_v54  ;;  %8468 = vmatprep.subr.bf16.mxu0 %v19314_v11  ;;  %27668 = vst [vmem:[#allocation30_spill] sm:$0xff] %v24008_v59 }
 0x45a   : > { %8418 = vmatpush1.bf16.msra.mxu1 %v19309_v13  ;;  %17063 = vmatprep.mubr.msk.bf16.mxu1 %vm2411_vm6, %v23976_v48  ;;  %v19332_v13 = vld [vmem:[%s27662_s1 + $0x6c] ss:$16 sps:$4 sm:$0xff]  }
 0x45b   : > { %8419 = vmatprep.subr.bf16.mxu1 %v19317_v44 }
 0x45c   : > { %8469 = vmatpush1.bf16.msra.mxu0 %v19312_v10 }
 0x45d   : > { %v6784_v40 = vpop.f32.mrf.mxu1  ;;  %8470 = vmatprep.subr.bf16.mxu0 %v19320_v6 }
 0x45e   : > { %8420 = vmatpush1.bf16.msra.mxu1 %v19315_v21  ;;  %v19330_v21 = vld [vmem:[%s27662_s1 + $0x68] ss:$16 sps:$4 sm:$0xff]  }
 0x45f   : > { %8403 = vmatmul.mubr.bf16.gmra.mxu0 %v23942_v23  ;;  %v6786_v16 = vpop.f32.mrf.mxu1  ;;  %8421 = vmatprep.subr.bf16.mxu1 %v19323_v63 }
 0x460   : > { %8471 = vmatpush1.bf16.msra.mxu0 %v19318_v50  ;;  %8498 = vmatprep.mubr.bf16.mxu0 %v23724_v17  ;;  %v19335_v17 = vld [vmem:[%s27662_s1 + $0x424] ss:$16 sps:$4 sm:$0xff]   ;;  %v19338_v50 = vld [vmem:[%s27662_s1 + $0x4c] ss:$16 sps:$4 sm:$0xff]  }
 0x461   : > { %v6788_v11 = vpop.f32.mrf.mxu1  ;;  %8472 = vmatprep.subr.bf16.mxu0 %v19326_v12 }
 0x462   : > { %8422 = vmatpush1.bf16.msra.mxu1 %v19321_v45  ;;  %v19333_v45 = vld [vmem:[%s27662_s1 + $0x420] ss:$16 sps:$4 sm:$0xff]  }
 0x463   : > { %v6837_v44 = vpop.f32.mrf.mxu0  ;;  %v24016_v10 = vpop.f32.mrf.mxu1  ;;  %8423 = vmatprep.subr.bf16.mxu1 %v19329_v18 }
 0x464   : > { %v24021_v6 = vadd.f32 %v6837_v44, %v6784_v40  ;;  %8473 = vmatpush1.bf16.msra.mxu0 %v19324_v47  ;;  %v19341_v47 = vld [vmem:[%s27662_s1 + $0x404] ss:$16 sps:$4 sm:$0xff]  }
 0x465   : > { %v6839_v63 = vpop.f32.mrf.mxu0  ;;  %8474 = vmatprep.subr.bf16.mxu0 %v19332_v13  ;;  %v6794_v40 = vpop.f32.mrf.mxu1 }
 0x466   : > { %v24029_v12 = vadd.f32 %v6839_v63, %v6786_v16  ;;  %8424 = vmatpush1.bf16.msra.mxu1 %v19327_v22  ;;  %v19336_v16 = vld [vmem:[%s27662_s1 + $0x48] ss:$16 sps:$4 sm:$0xff]   ;;  %v19344_v22 = vld [vmem:[%s27662_s1 + $0x2c] ss:$16 sps:$4 sm:$0xff]  }
 0x467   : > { %v6841_v18 = vpop.f32.mrf.mxu0  ;;  %8425 = vmatprep.subr.bf16.mxu1 %v19335_v17  ;;  %v19339_v17 = vld [vmem:[%s27662_s1 + $0x400] ss:$16 sps:$4 sm:$0xff]   ;;  %v6796_v63 = vpop.f32.mrf.mxu1 }
 0x468   : > { %v24037_v44 = vadd.f32 %v6841_v18, %v6788_v11  ;;  %8475 = vmatpush1.bf16.msra.mxu0 %v19330_v21  ;;  %v19347_v21 = vld [vmem:[%s27662_s1 + $0x584] ss:$16 sps:$4 sm:$0xff]  }
 0x469   : > { %v24042_v13 = vpop.f32.mrf.mxu0  ;;  %8476 = vmatprep.subr.bf16.mxu0 %v19338_v50  ;;  %v19342_v50 = vld [vmem:[%s27662_s1 + $0x28] ss:$16 sps:$4 sm:$0xff]  }
 0x46a   : > { %8426 = vmatpush1.bf16.msra.mxu1 %v19333_v45  ;;  %v19350_v45 = vld [vmem:[%s27662_s1 + $0xc] ss:$16 sps:$4 sm:$0xff]  }
 0x46b   : > { %v6847_v11 = vpop.f32.mrf.mxu0  ;;  %8427 = vmatprep.subr.bf16.mxu1 %v19341_v47  ;;  %v19345_v47 = vld [vmem:[%s27662_s1 + $0x580] ss:$16 sps:$4 sm:$0xff]  }
 0x46c   : > { %v24053_v18 = vadd.f32 %v6847_v11, %v6794_v40  ;;  %8477 = vmatpush1.bf16.msra.mxu0 %v19336_v16  ;;  %v6798_v40 = vpop.f32.mrf.mxu1  ;;  %v19353_v16 = vld [vmem:[%s27662_s1 + $0x564] ss:$16 sps:$4 sm:$0xff]  }
 0x46d   : > { %v6849_v59 = vpop.f32.mrf.mxu0  ;;  %8478 = vmatprep.subr.bf16.mxu0 %v19344_v22  ;;  %v19356_v22 = vld [vmem:[%s27662_s1 + $0x1ec] ss:$16 sps:$4 sm:$0xff]  }
 0x46e   : > { %v24061_v53 = vadd.f32 %v6849_v59, %v6796_v63  ;;  %8428 = vmatpush1.bf16.msra.mxu1 %v19339_v17  ;;  %v19348_v59 = vld [vmem:[%s27662_s1 + $0x8] ss:$16 sps:$4 sm:$0xff]   ;;  %v19351_v63 = vld [vmem:[%s27662_s1 + $0x560] ss:$16 sps:$4 sm:$0xff]  }
 0x46f   : > { %v6851_v11 = vpop.f32.mrf.mxu0  ;;  %8435 = vmatprep.subr.bf16.mxu1 %v19347_v21  ;;  %v7094_v17 = vld [vmem:[#allocation3 + $0xb0] sm:$0x7f]  ;;  %v19359_v21 = vld [vmem:[%s27662_s1 + $0x544] ss:$16 sps:$4 sm:$0xff]  }
 0x470   : > { %v24069_v27 = vadd.f32 %v6851_v11, %v6798_v40  ;;  %8479 = vmatpush1.bf16.msra.mxu0 %v19342_v50  ;;  %v7088_v50 = vld [vmem:[#allocation3 + $0x20] sm:$0xf8] }
 0x471   : > { %8480 = vmatprep.subr.bf16.mxu0 %v19350_v45  ;;  %v19354_v45 = vld [vmem:[%s27662_s1 + $0x1e8] ss:$16 sps:$4 sm:$0xff]   ;;  %v7100_v9 = vpack.c.bf16 %v20391_v35, %v7088_v50  ;;  %v19363_v35 = vld [vmem:[%s27662_s1 + $0x520] ss:$16 sps:$4 sm:$0xff]  }
 0x472   : > { %8436 = vmatpush2.bf16.msra.mxu1 %v19345_v47  ;;  %v20390_v40 = vld [vmem:[#allocation3 + $0x80] sm:$0xff] }
 0x473   : > { %8437 = vmatprep.subr.bf16.mxu1 %v19353_v16  ;;  %v7106_v11 = vpack.c.bf16 %v7094_v17, %v20390_v40  ;;  %v19362_v47 = vld [vmem:[%s27662_s1 + $0x1cc] ss:$16 sps:$4 sm:$0xff]   ;;  %v19357_v16 = vld [vmem:[%s27662_s1 + $0x540] ss:$16 sps:$4 sm:$0xff]   ;;  %v7361_v50 = vshll.u32 %v7100_v9, 16 }
 0x474   : > { %8481 = vmatpush1.bf16.msra.mxu0 %v19348_v59  ;;  %v19365_v59 = vld [vmem:[%s27662_s1 + $0x524] ss:$16 sps:$4 sm:$0xff]  }
 0x475   : > { %8482 = vmatprep.subr.bf16.mxu0 %v19356_v22  ;;  %v19360_v22 = vld [vmem:[%s27662_s1 + $0x1c8] ss:$16 sps:$4 sm:$0xff]   ;;  %v7366_v17 = vshrl.u32 %v7106_v11, 16  ;;  %v7369_v40 = vshll.u32 %v7106_v11, 16  ;;  %v7363_v4 = vrot.slane %v7361_v50, 2 }
 0x476   : > { %8438 = vmatpush2.bf16.msra.mxu1 %v19351_v63  ;;  %v19368_v63 = vld [vmem:[%s27662_s1 + $0x1ac] ss:$16 sps:$4 sm:$0xff]   ;;  %v19366_v11 = vld [vmem:[%s27662_s1 + $0x1a8] ss:$16 sps:$4 sm:$0xff]  }
 0x477   : > { %8439 = vmatprep.subr.bf16.mxu1 %v19359_v21  ;;  %v7358_v21 = vshrl.u32 %v7100_v9, 16  ;;  %v7371_v43 = vrot.slane %v7369_v40, 2  ;;  %v19369_v9 = vld [vmem:[%s27662_s1 + $0x500] ss:$16 sps:$4 sm:$0xff]   ;;  %v19386_v50 = vld [vmem:[%s27662_s1 + $0x2cc] ss:$16 sps:$4 sm:$0xff]  }
 0x478   : > { %8483 = vmatpush2.bf16.msra.mxu0 %v19354_v45  ;;  %v19371_v45 = vld [vmem:[%s27662_s1 + $0x504] ss:$16 sps:$4 sm:$0xff]  }
 0x479   : > { %8484 = vmatprep.subr.bf16.mxu0 %v19362_v47  ;;  %v7368_v47 = vrot.slane %v7366_v17, 1  ;;  %v19372_v17 = vld [vmem:[%s27662_s1 + $0x188] ss:$16 sps:$4 sm:$0xff]  }
 0x47a   : > { %8440 = vmatpush2.bf16.msra.mxu1 %v19357_v16  ;;  %v19374_v16 = vld [vmem:[%s27662_s1 + $0x18c] ss:$16 sps:$4 sm:$0xff]  }
 0x47b   : > { %8441 = vmatprep.subr.bf16.mxu1 %v19365_v59  ;;  %v7360_v59 = vrot.slane %v7358_v21, 1  ;;  %v24122_v40 = vor.u32 %v7371_v43, %v7368_v47  ;;  %v19378_v21 = vld [vmem:[%s27662_s1 + $0x2e8] ss:$16 sps:$4 sm:$0xff]   ;;  %v19392_v47 = vld [vmem:[%s27662_s1 + $0x2ac] ss:$16 sps:$4 sm:$0xff]  }
 0x47c   : > { %8485 = vmatpush2.bf16.msra.mxu0 %v19360_v22  ;;  %v19380_v22 = vld [vmem:[%s27662_s1 + $0x2ec] ss:$16 sps:$4 sm:$0xff]  }
 0x47d   : > { %8486 = vmatprep.subr.bf16.mxu0 %v19368_v63  ;;  %v19377_v63 = vld [vmem:[%s27662_s1 + $0x16c] ss:$16 sps:$4 sm:$0xff]  }
 0x47e   : > { %8442 = vmatpush2.bf16.msra.mxu1 %v19363_v35  ;;  %v7364_v35 = vor.u32 %v7363_v4, %v7360_v59  ;;  %v19383_v4 = vld [vmem:[%s27662_s1 + $0x14c] ss:$16 sps:$4 sm:$0xff]   ;;  %v19390_v59 = vld [vmem:[%s27662_s1 + $0x2a8] ss:$16 sps:$4 sm:$0xff]  }
 0x47f   : > { %8443 = vmatprep.subr.bf16.mxu1 %v19371_v45  ;;  %v19375_v45 = vld [vmem:[%s27662_s1 + $0x168] ss:$16 sps:$4 sm:$0xff]  }
 0x480   : > { %8487 = vmatpush2.bf16.msra.mxu0 %v19366_v11  ;;  %v24135_v43 = vsel %vm7288_vm11, %v7364_v35, %v24122_v40  ;;  %v19384_v11 = vld [vmem:[%s27662_s1 + $0x2c8] ss:$16 sps:$4 sm:$0xff]  }
 0x481   : > { %8488 = vmatprep.subr.bf16.mxu0 %v19374_v16  ;;  %v19381_v16 = vld [vmem:[%s27662_s1 + $0x148] ss:$16 sps:$4 sm:$0xff]  }
 0x482   : > { %8444 = vmatpush2.bf16.msra.mxu1 %v19369_v9  ;;  %v19389_v9 = vld [vmem:[%s27662_s1 + $0x12c] ss:$16 sps:$4 sm:$0xff]   ;;  %v19396_v35 = vld [vmem:[%s27662_s1 + $0x288] ss:$16 sps:$4 sm:$0xff]  }
 0x483   : > { %8519 = vmatprep.subr.bf16.mxu1 %v19380_v22  ;;  %v19398_v22 = vld [vmem:[%s27662_s1 + $0x28c] ss:$16 sps:$4 sm:$0xff]  }
 0x484   : > { %8489 = vmatpush2.bf16.msra.mxu0 %v19372_v17  ;;  %v19387_v17 = vld [vmem:[%s27662_s1 + $0x128] ss:$16 sps:$4 sm:$0xff]  }
 0x485   : > { %8446 = vmatmul.mubr.bf16.vlgmr.msra.gmra.mxu1 %v24135_v43  ;;  %8490 = vmatprep.subr.bf16.mxu0 %v19377_v63  ;;  %v19395_v63 = vld [vmem:[%s27662_s1 + $0x10c] ss:$16 sps:$4 sm:$0xff]  }
 0x486   : > { %17064 = vmatprep.mubr.msk.bf16.mxu1 %vm2411_vm6, %v23956_v1  ;;  %8520 = vmatpush1.bf16.msra.mxu1 %v19378_v21  ;;  %v24175_v21 = vpop.f32.mrf.mxu1 }
 0x487   : > { %8521 = vmatprep.subr.bf16.mxu1 %v19386_v50  ;;  %v19401_v50 = vld [vmem:[%s27662_s1 + $0x26c] ss:$16 sps:$4 sm:$0xff]  }
 0x488   : > { %8491 = vmatpush2.bf16.msra.mxu0 %v19375_v45  ;;  %v19393_v45 = vld [vmem:[%s27662_s1 + $0x108] ss:$16 sps:$4 sm:$0xff]  }
 0x489   : > { %8492 = vmatprep.subr.bf16.mxu0 %v19383_v4 }
 0x48a   : > { %8522 = vmatpush1.bf16.msra.mxu1 %v19384_v11 }
 0x48b   : > { %8523 = vmatprep.subr.bf16.mxu1 %v19392_v47  ;;  %v19399_v47 = vld [vmem:[%s27662_s1 + $0x268] ss:$16 sps:$4 sm:$0xff]  }
 0x48c   : > { %8493 = vmatpush2.bf16.msra.mxu0 %v19381_v16 }
 0x48d   : > { %8456 = vmatmul.mubr.bf16.gmra.mxu1 %v24122_v40  ;;  %8494 = vmatprep.subr.bf16.mxu0 %v19389_v9  ;;  %v19407_v9 = vld [vmem:[%s27662_s1 + $0x24c] ss:$16 sps:$4 sm:$0xff]  }
 0x48e   : > { %8524 = vmatpush1.bf16.msra.mxu1 %v19390_v59  ;;  %8551 = vmatprep.mubr.bf16.mxu1 %v23753_v46  ;;  %v19404_v46 = vld [vmem:[%s27662_s1 + $0x4ec] ss:$16 sps:$4 sm:$0xff]  }
 0x48f   : > { %8525 = vmatprep.subr.bf16.mxu1 %v19398_v22 }
 0x490   : > { %8495 = vmatpush2.bf16.msra.mxu0 %v19387_v17 }
 0x491   : > { %v6890_v4 = vpop.f32.mrf.mxu1  ;;  %8496 = vmatprep.subr.bf16.mxu0 %v19395_v63  ;;  %v19410_v63 = vld [vmem:[%s27662_s1 + $0x4cc] ss:$16 sps:$4 sm:$0xff]  }
 0x492   : > { %v6891_v11 = vadd.f32 %v6890_v4, %v24021_v6  ;;  %8526 = vmatpush1.bf16.msra.mxu1 %v19396_v35  ;;  %v19402_v6 = vld [vmem:[%s27662_s1 + $0x4e8] ss:$16 sps:$4 sm:$0xff]  }
 0x493   : > { %v6892_v16 = vpop.f32.mrf.mxu1  ;;  %8527 = vmatprep.subr.bf16.mxu1 %v19401_v50 }
 0x494   : > { %v24194_v59 = vadd.f32 %v6891_v11, %v23489_v62  ;;  %8497 = vmatpush2.bf16.msra.mxu0 %v19393_v45  ;;  %v6893_v22 = vadd.f32 %v6892_v16, %v24029_v12  ;;  %v19405_v62 = vld [vmem:[%s27662_s1 + $0x248] ss:$16 sps:$4 sm:$0xff]   ;;  %v19413_v45 = vld [vmem:[%s27662_s1 + $0x22c] ss:$16 sps:$4 sm:$0xff]  }
 0x495   : > { %v6894_v17 = vpop.f32.mrf.mxu1  ;;  %8572 = vmatprep.subr.bf16.mxu0 %v19404_v46 }
 0x496   : > { %v24204_v35 = vadd.f32 %v6893_v22, %v23498_v5  ;;  %v6895_v50 = vadd.f32 %v6894_v17, %v24037_v44  ;;  %8528 = vmatpush1.bf16.msra.mxu1 %v19399_v47  ;;  %v19408_v5 = vld [vmem:[%s27662_s1 + $0x4c8] ss:$16 sps:$4 sm:$0xff]   ;;  %v19422_v22 = vld [vmem:[%s27662_s1 + $0x48c] ss:$16 sps:$4 sm:$0xff]  }
 0x497   : > { %8499 = vmatmul.mubr.bf16.vlgmr.msra.gmra.mxu0 %v23932_v20  ;;  %v24211_v12 = vpop.f32.mrf.mxu1  ;;  %8529 = vmatprep.subr.bf16.mxu1 %v19407_v9  ;;  %v19416_v20 = vld [vmem:[%s27662_s1 + $0x4ac] ss:$16 sps:$4 sm:$0xff]  }
 0x498   : > { %v24217_v4 = vadd.f32 %v6895_v50, %v23507_v55  ;;  %8508 = vmatprep.mubr.bf16.mxu0 %v23707_v36  ;;  %8573 = vmatpush1.bf16.msra.mxu0 %v19402_v6  ;;  %v19411_v55 = vld [vmem:[%s27662_s1 + $0x228] ss:$16 sps:$4 sm:$0xff]   ;;  %v19419_v36 = vld [vmem:[%s27662_s1 + $0x20c] ss:$16 sps:$4 sm:$0xff]  }
 0x499   : > { %v6900_v44 = vpop.f32.mrf.mxu1  ;;  %8574 = vmatprep.subr.bf16.mxu0 %v19410_v63  ;;  %v19434_v50 = vld [vmem:[%s27662_s1 + $0x44c] ss:$16 sps:$4 sm:$0xff]  }
 0x49a   : > { %v6901_v46 = vadd.f32 %v6900_v44, %v24053_v18  ;;  %8530 = vmatpush1.bf16.msra.mxu1 %v19405_v62  ;;  %v19414_v18 = vld [vmem:[%s27662_s1 + $0x4a8] ss:$16 sps:$4 sm:$0xff]   ;;  %v19440_v44 = vld [vmem:[%s27662_s1 + $0x42c] ss:$16 sps:$4 sm:$0xff]  }
 0x49b   : > { %v6902_v11 = vpop.f32.mrf.mxu1  ;;  %8531 = vmatprep.subr.bf16.mxu1 %v19413_v45  ;;  %v19429_v62 = vld [vmem:[%s27662_s1 + $0x3c8] ss:$16 sps:$4 sm:$0xff]   ;;  %v19437_v45 = vld [vmem:[%s27662_s1 + $0x3ac] ss:$16 sps:$4 sm:$0xff]  }
 0x49c   : > { %v24234_v47 = vadd.f32 %v6901_v46, %v23526_v7  ;;  %8575 = vmatpush1.bf16.msra.mxu0 %v19408_v5  ;;  %v6903_v16 = vadd.f32 %v6902_v11, %v24061_v53  ;;  %v19417_v7 = vld [vmem:[%s27662_s1 + $0x208] ss:$16 sps:$4 sm:$0xff]   ;;  %v19425_v53 = vld [vmem:[%s27662_s1 + $0x3ec] ss:$16 sps:$4 sm:$0xff]  }
 0x49d   : > { %v6904_v9 = vpop.f32.mrf.mxu1  ;;  %8576 = vmatprep.subr.bf16.mxu0 %v19416_v20  ;;  %v19432_v5 = vld [vmem:[%s27662_s1 + $0x448] ss:$16 sps:$4 sm:$0xff]   ;;  %v19443_v46 = vld [vmem:[%s27662_s1 + $0x38c] ss:$16 sps:$4 sm:$0xff]  }
 0x49e   : > { %v24244_v6 = vadd.f32 %v6903_v16, %v23535_v61  ;;  %v6905_v17 = vadd.f32 %v6904_v9, %v24069_v27  ;;  %8532 = vmatpush1.bf16.msra.mxu1 %v19411_v55  ;;  %v19420_v61 = vld [vmem:[%s27662_s1 + $0x488] ss:$16 sps:$4 sm:$0xff]   ;;  %v19428_v27 = vld [vmem:[%s27662_s1 + $0x46c] ss:$16 sps:$4 sm:$0xff]  }
 0x49f   : > { %8509 = vmatmul.mubr.bf16.gmra.mxu0 %v23919_v54  ;;  %8533 = vmatprep.subr.bf16.mxu1 %v19419_v36  ;;  %v19423_v54 = vld [vmem:[%s27662_s1 + $0x3e8] ss:$16 sps:$4 sm:$0xff]   ;;  %v19446_v11 = vld [vmem:[%s27662_s1 + $0x40c] ss:$16 sps:$4 sm:$0xff]  }
 0x4a0   : > { %v24255_v63 = vadd.f32 %v6905_v17, %v23544_v37  ;;  %8577 = vmatpush1.bf16.msra.mxu0 %v19414_v18  ;;  %17065 = vmatprep.mubr.msk.bf16.mxu0 %vm2411_vm6, %v23976_v48  ;;  %v19431_v37 = vld [vmem:[%s27662_s1 + $0x3cc] ss:$16 sps:$4 sm:$0xff]   ;;  %v19426_v48 = vld [vmem:[%s27662_s1 + $0x468] ss:$16 sps:$4 sm:$0xff]  }
 0x4a1   : > { %8578 = vmatprep.subr.bf16.mxu0 %v19422_v22  ;;  %v19435_v20 = vld [vmem:[%s27662_s1 + $0x3a8] ss:$16 sps:$4 sm:$0xff]   ;;  %v19449_v16 = vld [vmem:[%s27662_s1 + $0x36c] ss:$16 sps:$4 sm:$0xff]  }
 0x4a2   : > { %8534 = vmatpush1.bf16.msra.mxu1 %v19417_v7  ;;  %v19438_v55 = vld [vmem:[%s27662_s1 + $0x428] ss:$16 sps:$4 sm:$0xff]   ;;  %v19452_v9 = vld [vmem:[%s27662_s1 + $0x58c] ss:$16 sps:$4 sm:$0xff]  }
 0x4a3   : > { %8535 = vmatprep.subr.bf16.mxu1 %v19425_v53  ;;  %v19441_v36 = vld [vmem:[%s27662_s1 + $0x388] ss:$16 sps:$4 sm:$0xff]   ;;  %v19455_v17 = vld [vmem:[%s27662_s1 + $0x34c] ss:$16 sps:$4 sm:$0xff]  }
 0x4a4   : > { %8579 = vmatpush1.bf16.msra.mxu0 %v19420_v61  ;;  %v19444_v18 = vld [vmem:[%s27662_s1 + $0x408] ss:$16 sps:$4 sm:$0xff]   ;;  %v19458_v53 = vld [vmem:[%s27662_s1 + $0x56c] ss:$16 sps:$4 sm:$0xff]  }
 0x4a5   : > { %8580 = vmatprep.subr.bf16.mxu0 %v19428_v27  ;;  %v19447_v22 = vld [vmem:[%s27662_s1 + $0x368] ss:$16 sps:$4 sm:$0xff]   ;;  %v24328_v27 = vpop.f32.mrf.mxu0 }
 0x4a6   : > { %8536 = vmatpush2.bf16.msra.mxu1 %v19423_v54  ;;  %v19450_v7 = vld [vmem:[%s27662_s1 + $0x588] ss:$16 sps:$4 sm:$0xff]   ;;  %v19461_v54 = vld [vmem:[%s27662_s1 + $0x32c] ss:$16 sps:$4 sm:$0xff]  }
 0x4a7   : > { %8537 = vmatprep.subr.bf16.mxu1 %v19431_v37  ;;  %v19453_v61 = vld [vmem:[%s27662_s1 + $0x348] ss:$16 sps:$4 sm:$0xff]  }
 0x4a8   : > { %8581 = vmatpush1.bf16.msra.mxu0 %v19426_v48  ;;  %v19456_v37 = vld [vmem:[%s27662_s1 + $0x568] ss:$16 sps:$4 sm:$0xff]   ;;  %v24336_v48 = vpop.f32.mrf.mxu0 }
 0x4a9   : > { %8582 = vmatprep.subr.bf16.mxu0 %v19434_v50  ;;  %v19464_v50 = vld [vmem:[%s27662_s1 + $0x54c] ss:$16 sps:$4 sm:$0xff]  }
 0x4aa   : > { %8538 = vmatpush2.bf16.msra.mxu1 %v19429_v62  ;;  %v19459_v62 = vld [vmem:[%s27662_s1 + $0x328] ss:$16 sps:$4 sm:$0xff]  }
 0x4ab   : > { %8539 = vmatprep.subr.bf16.mxu1 %v19437_v45  ;;  %v19467_v45 = vld [vmem:[%s27662_s1 + $0x30c] ss:$16 sps:$4 sm:$0xff]  }
 0x4ac   : > { %8583 = vmatpush1.bf16.msra.mxu0 %v19432_v5  ;;  %v19462_v5 = vld [vmem:[%s27662_s1 + $0x548] ss:$16 sps:$4 sm:$0xff]  }
 0x4ad   : > { %8584 = vmatprep.subr.bf16.mxu0 %v19440_v44  ;;  %v24350_v44 = vpop.f32.mrf.mxu0 }
 0x4ae   : > { %8540 = vmatpush2.bf16.msra.mxu1 %v19435_v20  ;;  %v19470_v20 = vld [vmem:[%s27662_s1 + $0x52c] ss:$16 sps:$4 sm:$0xff]  }
 0x4af   : > { %8541 = vmatprep.subr.bf16.mxu1 %v19443_v46  ;;  %v19465_v46 = vld [vmem:[%s27662_s1 + $0x308] ss:$16 sps:$4 sm:$0xff]  }
 0x4b0   : > { %8585 = vmatpush1.bf16.msra.mxu0 %v19438_v55  ;;  %v19476_v55 = vld [vmem:[%s27669_s8 + $0xe4] ss:$16 sps:$4 sm:$0xff]  }
 0x4b1   : > { %8586 = vmatprep.subr.bf16.mxu0 %v19446_v11  ;;  %v19468_v11 = vld [vmem:[%s27662_s1 + $0x528] ss:$16 sps:$4 sm:$0xff]  }
 0x4b2   : > { %8542 = vmatpush2.bf16.msra.mxu1 %v19441_v36  ;;  %v24364_v36 = vpop.f32.mrf.mxu0 }
 0x4b3   : > { %8543 = vmatprep.subr.bf16.mxu1 %v19449_v16  ;;  %v19473_v16 = vld [vmem:[%s27662_s1 + $0x50c] ss:$16 sps:$4 sm:$0xff]  }
 0x4b4   : > { %8587 = vmatpush1.bf16.msra.mxu0 %v19444_v18  ;;  %v19474_v18 = vld [vmem:[%s27669_s8 + $0xe0] ss:$16 sps:$4 sm:$0xff]  }
 0x4b5   : > { %8594 = vmatprep.subr.bf16.mxu0 %v19452_v9  ;;  %v8648_v9 = vld [vmem:[#allocation3 + $0x98] sm:$0xff] }
 0x4b6   : > { %8544 = vmatpush2.bf16.msra.mxu1 %v19447_v22  ;;  %v19479_v22 = vld [vmem:[%s27669_s8 + $0xc4] ss:$16 sps:$4 sm:$0xff]  }
 0x4b7   : > { %8545 = vmatprep.subr.bf16.mxu1 %v19455_v17  ;;  %v19471_v17 = vld [vmem:[%s27662_s1 + $0x508] ss:$16 sps:$4 sm:$0xff]   ;;  %s20472_s1 = smov 120  }
 0x4b8   : > { %8595 = vmatpush2.bf16.msra.mxu0 %v19450_v7  ;;  %v8642_v7 = vld [vmem:[#allocation3 + $0x8] sm:$0xf0] }
 0x4b9   : > { %8596 = vmatprep.subr.bf16.mxu0 %v19458_v53  ;;  %v24378_v53 = vpop.f32.mrf.mxu0 }
 0x4ba   : > { %8546 = vmatpush2.bf16.msra.mxu1 %v19453_v61  ;;  %27670 = vst [vmem:[#allocation31_spill] sm:$0xff] %v24378_v53  ;;  %v19482_v61 = vld [vmem:[%s27669_s8 + $0x2e4] ss:$16 sps:$4 sm:$0xff]  }
 0x4bb   : > { %8547 = vmatprep.subr.bf16.mxu1 %v19461_v54  ;;  %v20392_v54 = vld [vmem:[#allocation3 + $0x68] sm:$0xff] }
 0x4bc   : > { %8597 = vmatpush2.bf16.msra.mxu0 %v19456_v37  ;;  %v8660_v37 = vpack.c.bf16 %v8648_v9, %v20392_v54  ;;  %v19491_v9 = vld [vmem:[%s27669_s8 + $0x84] ss:$16 sps:$4 sm:$0xff]  }
 0x4bd   : > { %8598 = vmatprep.subr.bf16.mxu0 %v19464_v50  ;;  %v19477_v50 = vld [vmem:[%s27669_s8 + $0xc0] ss:$16 sps:$4 sm:$0xff]   ;;  %v19494_v54 = vld [vmem:[%s27669_s8 + $0x2a4] ss:$16 sps:$4 sm:$0xff]  }
 0x4be   : > { %8548 = vmatpush2.bf16.msra.mxu1 %v19459_v62  ;;  %v19485_v62 = vld [vmem:[%s27669_s8 + $0xa4] ss:$16 sps:$4 sm:$0xff]  }
 0x4bf   : > { %8549 = vmatprep.subr.bf16.mxu1 %v19467_v45 }
 0x4c0   : > { %8599 = vmatpush2.bf16.msra.mxu0 %v19462_v5  ;;  %v19480_v5 = vld [vmem:[%s27669_s8 + $0x2e0] ss:$16 sps:$4 sm:$0xff]  }
 0x4c1   : > { %8600 = vmatprep.subr.bf16.mxu0 %v19470_v20  ;;  %v8650_v20 = vld [vmem:[#allocation3 + $0xa8] sm:$0xff] }
 0x4c2   : > { %8550 = vmatpush2.bf16.msra.mxu1 %v19465_v46  ;;  %v24394_v46 = vpop.f32.mrf.mxu0 }
 0x4c3   : > { %9792 = vmatprep.subr.bf16.mxu1 %v19476_v55  ;;  %v24399_v55 = vrot.slane %v8660_v37, 2  ;;  %v20395_v37 = vld [vmem:[#allocation3 + $0x48] sm:$0xff] }
 0x4c4   : > { %8601 = vmatpush2.bf16.msra.mxu0 %v19468_v11  ;;  %v19483_v11 = vld [vmem:[%s27669_s8 + $0xa0] ss:$16 sps:$4 sm:$0xff]  }
 0x4c5   : > { %8552 = vmatmul.mubr.bf16.vlgmr.msra.gmra.mxu1 %v23960_v52  ;;  %8602 = vmatprep.subr.bf16.mxu0 %v19473_v16  ;;  %v20393_v52 = vld [vmem:[#allocation3 + $0x38] sm:$0xff] }
 0x4c6   : > { %8561 = vmatprep.mubr.bf16.mxu1 %v23735_v24  ;;  %9793 = vmatpush1.bf16.msra.mxu1 %v19474_v18  ;;  %v8654_v45 = vpack.c.bf16 %v20393_v52, %v8642_v7  ;;  %v19488_v24 = vld [vmem:[%s27669_s8 + $0x2c4] ss:$16 sps:$4 sm:$0xff]   ;;  %v19486_v7 = vld [vmem:[%s27669_s8 + $0x2c0] ss:$16 sps:$4 sm:$0xff]  }
 0x4c7   : > { %9794 = vmatprep.subr.bf16.mxu1 %v19479_v22  ;;  %v8644_v16 = vld [vmem:[#allocation3 + $0x18] sm:$0xf0] }
 0x4c8   : > { %8603 = vmatpush2.bf16.msra.mxu0 %v19471_v17  ;;  %v8861_v18 = vrot.slane %v8654_v45, 2  ;;  %v20394_v22 = vld [vmem:[#allocation3 + $0x78] sm:$0xff] }
 0x4c9   : > { %9845 = vmatprep.subr.bf16.mxu0 %v19482_v61  ;;  %v8662_v17 = vpack.c.bf16 %v8650_v20, %v20394_v22  ;;  %v24413_v61 = vpop.f32.mrf.mxu0  ;;  %v19497_v52 = vld [vmem:[%s27669_s8 + $0x64] ss:$16 sps:$4 sm:$0xff]   ;;  %v19492_v45 = vld [vmem:[%s27669_s8 + $0x2a0] ss:$16 sps:$4 sm:$0xff]  }
 0x4ca   : > { %9795 = vmatpush1.bf16.msra.mxu1 %v19477_v50  ;;  %v19489_v50 = vld [vmem:[%s27669_s8 + $0x80] ss:$16 sps:$4 sm:$0xff]  }
 0x4cb   : > { %8605 = vmatmul.mubr.bf16.vlgmr.msra.gmra.mxu0 %v24135_v43  ;;  %9796 = vmatprep.subr.bf16.mxu1 %v19485_v62  ;;  %v24418_v43 = vsel %vm2131_vm3, %v8861_v18, %v24399_v55  ;;  %v24427_v62 = vpop.f32.mrf.mxu1  ;;  %v19495_v18 = vld [vmem:[%s27669_s8 + $0x60] ss:$16 sps:$4 sm:$0xff]  }
 0x4cc   : > { %17066 = vmatprep.mubr.msk.bf16.mxu0 %vm2411_vm6, %v23956_v1  ;;  %9846 = vmatpush1.bf16.msra.mxu0 %v19480_v5  ;;  %v8656_v1 = vpack.c.bf16 %v20395_v37, %v8644_v16  ;;  %27671 = vst [vmem:[#allocation32_spill] sm:$0xff] %v24427_v62  ;;  %v6957_v5 = vpop.f32.mrf.mxu0  ;;  %v19506_v37 = vld [vmem:[%s27669_s8 + $0x264] ss:$16 sps:$4 sm:$0xff]  }
 0x4cd   : > { %8562 = vmatmul.mubr.bf16.gmra.mxu1 %v23942_v23  ;;  %9847 = vmatprep.subr.bf16.mxu0 %v19488_v24  ;;  %v24429_v23 = vrot.slane %v8662_v17, 2  ;;  %v19503_v17 = vld [vmem:[%s27669_s8 + $0x44] ss:$16 sps:$4 sm:$0xff]  }
 0x4ce   : > { %9797 = vmatpush1.bf16.msra.mxu1 %v19483_v11  ;;  %9824 = vmatprep.mubr.bf16.mxu1 %v24418_v43  ;;  %v8867_v24 = vrot.slane %v8656_v1, 2  ;;  %v19500_v11 = vld [vmem:[%s27669_s8 + $0x284] ss:$16 sps:$4 sm:$0xff]  }
 0x4cf   : > { %9798 = vmatprep.subr.bf16.mxu1 %v19491_v9 }
 0x4d0   : > { %9848 = vmatpush1.bf16.msra.mxu0 %v19486_v7  ;;  %v24447_v9 = vsel %vm2131_vm3, %v8867_v24, %v24429_v23  ;;  %v19498_v7 = vld [vmem:[%s27669_s8 + $0x280] ss:$16 sps:$4 sm:$0xff]  }
 0x4d1   : > { %v6996_v20 = vpop.f32.mrf.mxu1  ;;  %9849 = vmatprep.subr.bf16.mxu0 %v19494_v54  ;;  %v19504_v24 = vld [vmem:[%s27669_s8 + $0x260] ss:$16 sps:$4 sm:$0xff]  }
 0x4d2   : > { %v6997_v16 = vadd.f32 %v6996_v20, %v24336_v48  ;;  %9799 = vmatpush1.bf16.msra.mxu1 %v19489_v50  ;;  %v19501_v50 = vld [vmem:[%s27669_s8 + $0x40] ss:$16 sps:$4 sm:$0xff]  }
 0x4d3   : > { %8615 = vmatmul.mubr.bf16.gmra.mxu0 %v24122_v40  ;;  %v6998_v22 = vpop.f32.mrf.mxu1  ;;  %9800 = vmatprep.subr.bf16.mxu1 %v19497_v52  ;;  %v24457_v40 = vpop.f32.mrf.mxu0 }
 0x4d4   : > { %9850 = vmatpush1.bf16.msra.mxu0 %v19492_v45  ;;  %9877 = vmatprep.mubr.bf16.mxu0 %v24447_v9  ;;  %v6999_v48 = vadd.f32 %v6998_v22, %v24350_v44  ;;  %27672 = vst [vmem:[#allocation33_spill] sm:$0xff] %v24457_v40  ;;  %v19509_v45 = vld [vmem:[%s27669_s8 + $0x24] ss:$16 sps:$4 sm:$0xff]  }
 0x4d5   : > { %v7000_v54 = vpop.f32.mrf.mxu1  ;;  %9851 = vmatprep.subr.bf16.mxu0 %v19500_v11 }
 0x4d6   : > { %v7001_v1 = vadd.f32 %v7000_v54, %v24364_v36  ;;  %9801 = vmatpush1.bf16.msra.mxu1 %v19495_v18  ;;  %v19512_v18 = vld [vmem:[%s27669_s8 + $0x244] ss:$16 sps:$4 sm:$0xff]  }
 0x4d7   : > { %v7049_v44 = vpop.f32.mrf.mxu0  ;;  %v24466_v52 = vpop.f32.mrf.mxu1  ;;  %9802 = vmatprep.subr.bf16.mxu1 %v19503_v17 }
 0x4d8   : > { %27673 = vst [vmem:[#allocation34_spill] sm:$0xff] %v24466_v52  ;;  %v7050_v20 = vadd.f32 %v7049_v44, %v6997_v16  ;;  %9852 = vmatpush1.bf16.msra.mxu0 %v19498_v7  ;;  %v19507_v16 = vld [vmem:[%s27669_s8 + $0x20] ss:$16 sps:$4 sm:$0xff]  }
 0x4d9   : > { %v7051_v36 = vpop.f32.mrf.mxu0  ;;  %v7006_v11 = vpop.f32.mrf.mxu1  ;;  %9853 = vmatprep.subr.bf16.mxu0 %v19506_v37  ;;  %v19515_v37 = vld [vmem:[%s27669_s8 + $0x4] ss:$16 sps:$4 sm:$0xff]  }
 0x4da   : > { %v24478_v22 = vadd.f32 %v7050_v20, %v23777_v32  ;;  %v7052_v17 = vadd.f32 %v7051_v36, %v6999_v48  ;;  %v7007_v54 = vadd.f32 %v7006_v11, %v24394_v46  ;;  %9803 = vmatpush1.bf16.msra.mxu1 %v19501_v50  ;;  %v19510_v46 = vld [vmem:[%s27669_s8 + $0x240] ss:$16 sps:$4 sm:$0xff]  }
 0x4db   : > { %v7053_v7 = vpop.f32.mrf.mxu0  ;;  %v7008_v44 = vpop.f32.mrf.mxu1  ;;  %9804 = vmatprep.subr.bf16.mxu1 %v19509_v45  ;;  %v19518_v45 = vld [vmem:[%s27669_s8 + $0x224] ss:$16 sps:$4 sm:$0xff]  }
 0x4dc   : > { %v24488_v40 = vadd.f32 %v7052_v17, %v23785_v8  ;;  %v7054_v32 = vadd.f32 %v7053_v7, %v7001_v1  ;;  %9854 = vmatpush1.bf16.msra.mxu0 %v19504_v24  ;;  %v7009_v48 = vadd.f32 %v7008_v44, %v24413_v61  ;;  %v19513_v61 = vld [vmem:[%s27669_s8] ss:$16 sps:$4 sm:$0xff]   ;;  %v19521_v24 = vld [vmem:[%s27669_s8 + $0x1e4] ss:$16 sps:$4 sm:$0xff]  }
 0x4dd   : > { %v24494_v50 = vpop.f32.mrf.mxu0  ;;  %v7010_v20 = vpop.f32.mrf.mxu1  ;;  %9855 = vmatprep.subr.bf16.mxu0 %v19512_v18  ;;  %v19516_v18 = vld [vmem:[%s27669_s8 + $0x220] ss:$16 sps:$4 sm:$0xff]   ;;  %v19527_v44 = vld [vmem:[%s27669_s8 + $0x1c4] ss:$16 sps:$4 sm:$0xff]  }
 0x4de   : > { %27674 = vst [vmem:[#allocation35_spill] sm:$0xff] %v24494_v50  ;;  %v24500_v36 = vadd.f32 %v7054_v32, %v23794_v42  ;;  %v7011_v8 = vadd.f32 %v7010_v20, %v6957_v5  ;;  %9805 = vmatpush1.bf16.msra.mxu1 %v19507_v16  ;;  %v19524_v5 = vld [vmem:[%s27669_s8 + $0x204] ss:$16 sps:$4 sm:$0xff]  }
 0x4df   : > { %v7059_v1 = vpop.f32.mrf.mxu0  ;;  %9806 = vmatprep.subr.bf16.mxu1 %v19515_v37  ;;  %v19533_v20 = vld [vmem:[%s27669_s8 + $0x1a4] ss:$16 sps:$4 sm:$0xff]  }
 0x4e0   : > { %v7060_v11 = vadd.f32 %v7059_v1, %v7007_v54  ;;  %9856 = vmatpush1.bf16.msra.mxu0 %v19510_v46  ;;  %v19519_v54 = vld [vmem:[%s27669_s8 + $0x1e0] ss:$16 sps:$4 sm:$0xff]  }
 0x4e1   : > { %v7061_v42 = vpop.f32.mrf.mxu0  ;;  %9857 = vmatprep.subr.bf16.mxu0 %v19518_v45  ;;  %v19528_v45 = vld [vmem:[%s27669_s8 + $0x3e0] ss:$16 sps:$4 sm:$0xff]  }
 0x4e2   : > { %v24515_v17 = vadd.f32 %v7060_v11, %v23812_v41  ;;  %v7062_v16 = vadd.f32 %v7061_v42, %v7009_v48  ;;  %9807 = vmatpush1.bf16.msra.mxu1 %v19513_v61  ;;  %v19522_v41 = vld [vmem:[%s27669_s8 + $0x200] ss:$16 sps:$4 sm:$0xff]   ;;  %v19530_v48 = vld [vmem:[%s27669_s8 + $0x3e4] ss:$16 sps:$4 sm:$0xff]  }
 0x4e3   : > { %v7063_v7 = vpop.f32.mrf.mxu0  ;;  %9808 = vmatprep.subr.bf16.mxu1 %v19521_v24  ;;  %v19539_v61 = vld [vmem:[%s27669_s8 + $0x184] ss:$16 sps:$4 sm:$0xff]   ;;  %v19534_v1 = vld [vmem:[%s27669_s8 + $0x3c0] ss:$16 sps:$4 sm:$0xff]  }
 0x4e4   : > { %v24524_v37 = vadd.f32 %v7062_v16, %v23820_v51  ;;  %v7064_v32 = vadd.f32 %v7063_v7, %v7011_v8  ;;  %9858 = vmatpush1.bf16.msra.mxu0 %v19516_v18  ;;  %v19525_v51 = vld [vmem:[%s27669_s8 + $0x1c0] ss:$16 sps:$4 sm:$0xff]   ;;  %v19542_v24 = vld [vmem:[%s27669_s8 + $0x3a4] ss:$16 sps:$4 sm:$0xff]  }
 0x4e5   : > { %9859 = vmatprep.subr.bf16.mxu0 %v19524_v5  ;;  %v19531_v8 = vld [vmem:[%s27669_s8 + $0x1a0] ss:$16 sps:$4 sm:$0xff]   ;;  %v19545_v18 = vld [vmem:[%s27669_s8 + $0x164] ss:$16 sps:$4 sm:$0xff]  }
 0x4e6   : > { %v24533_v46 = vadd.f32 %v7064_v32, %v23828_v39  ;;  %9809 = vmatpush2.bf16.msra.mxu1 %v19519_v54  ;;  %v19536_v39 = vld [vmem:[%s27669_s8 + $0x3c4] ss:$16 sps:$4 sm:$0xff]   ;;  %v19537_v11 = vld [vmem:[%s27669_s8 + $0x180] ss:$16 sps:$4 sm:$0xff]  }
 0x4e7   : > { %9810 = vmatprep.subr.bf16.mxu1 %v19527_v44  ;;  %v19540_v42 = vld [vmem:[%s27669_s8 + $0x3a0] ss:$16 sps:$4 sm:$0xff]   ;;  %v19548_v5 = vld [vmem:[%s27669_s8 + $0x384] ss:$16 sps:$4 sm:$0xff]  }
 0x4e8   : > { %9860 = vmatpush1.bf16.msra.mxu0 %v19522_v41  ;;  %v19543_v16 = vld [vmem:[%s27669_s8 + $0x160] ss:$16 sps:$4 sm:$0xff]   ;;  %v19551_v54 = vld [vmem:[%s27669_s8 + $0x144] ss:$16 sps:$4 sm:$0xff]  }
 0x4e9   : > { %9861 = vmatprep.subr.bf16.mxu0 %v19530_v48  ;;  %v19546_v7 = vld [vmem:[%s27669_s8 + $0x380] ss:$16 sps:$4 sm:$0xff]   ;;  %v19554_v44 = vld [vmem:[%s27669_s8 + $0x364] ss:$16 sps:$4 sm:$0xff]  }
 0x4ea   : > { %9811 = vmatpush2.bf16.msra.mxu1 %v19525_v51  ;;  %v19549_v32 = vld [vmem:[%s27669_s8 + $0x140] ss:$16 sps:$4 sm:$0xff]   ;;  %v19557_v41 = vld [vmem:[%s27669_s8 + $0x124] ss:$16 sps:$4 sm:$0xff]  }
 0x4eb   : > { %9812 = vmatprep.subr.bf16.mxu1 %v19533_v20  ;;  %v19552_v48 = vld [vmem:[%s27669_s8 + $0x360] ss:$16 sps:$4 sm:$0xff]   ;;  %v19560_v51 = vld [vmem:[%s27669_s8 + $0x344] ss:$16 sps:$4 sm:$0xff]   ;;  %v8647_v20 = vld [vmem:[#allocation3 + $0x90] sm:$0xff] }
 0x4ec   : > { %9862 = vmatpush2.bf16.msra.mxu0 %v19528_v45  ;;  %v19555_v45 = vld [vmem:[%s27669_s8 + $0x120] ss:$16 sps:$4 sm:$0xff]  }
 0x4ed   : > { %9863 = vmatprep.subr.bf16.mxu0 %v19536_v39  ;;  %v19563_v39 = vld [vmem:[%s27669_s8 + $0x104] ss:$16 sps:$4 sm:$0xff]  }
 0x4ee   : > { %9813 = vmatpush2.bf16.msra.mxu1 %v19531_v8  ;;  %v8641_v8 = vld [vmem:[#allocation3] sm:$0xf0] }
 0x4ef   : > { %9814 = vmatprep.subr.bf16.mxu1 %v19539_v61  ;;  %v19558_v61 = vld [vmem:[%s27669_s8 + $0x340] ss:$16 sps:$4 sm:$0xff]  }
 0x4f0   : > { %9864 = vmatpush2.bf16.msra.mxu0 %v19534_v1  ;;  %v20396_v1 = vld [vmem:[#allocation3 + $0x60] sm:$0xff] }
 0x4f1   : > { %9865 = vmatprep.subr.bf16.mxu0 %v19542_v24  ;;  %v8659_v24 = vpack.c.bf16 %v8647_v20, %v20396_v1  ;;  %v20398_v20 = vld [vmem:[#allocation3 + $0x70] sm:$0xff]  ;;  %v19567_v1 = vld [vmem:[%s27669_s8 + $0x300] ss:$16 sps:$4 sm:$0xff]  }
 0x4f2   : > { %9815 = vmatpush2.bf16.msra.mxu1 %v19537_v11  ;;  %v19566_v11 = vld [vmem:[%s27669_s8 + $0x324] ss:$16 sps:$4 sm:$0xff]  }
 0x4f3   : > { %9816 = vmatprep.subr.bf16.mxu1 %v19545_v18  ;;  %v19561_v18 = vld [vmem:[%s27669_s8 + $0x100] ss:$16 sps:$4 sm:$0xff]  }
 0x4f4   : > { %9866 = vmatpush2.bf16.msra.mxu0 %v19540_v42  ;;  %v20397_v42 = vld [vmem:[#allocation3 + $0x30] sm:$0xff] }
 0x4f5   : > { %9867 = vmatprep.subr.bf16.mxu0 %v19548_v5  ;;  %v8653_v5 = vpack.c.bf16 %v20397_v42, %v8641_v8  ;;  %v19575_v8 = vld [vmem:[%s27669_s8 + $0x4c4] ss:$16 sps:$4 sm:$0xff]   ;;  %v19578_v42 = vld [vmem:[%s27669_s8 + $0xec] ss:$16 sps:$4 sm:$0xff]  }
 0x4f6   : > { %9817 = vmatpush2.bf16.msra.mxu1 %v19543_v16  ;;  %v19572_v16 = vld [vmem:[%s27669_s8 + $0x4e4] ss:$16 sps:$4 sm:$0xff]  }
 0x4f7   : > { %9818 = vmatprep.subr.bf16.mxu1 %v19551_v54  ;;  %v8649_v54 = vld [vmem:[#allocation3 + $0xa0] sm:$0xff] }
 0x4f8   : > { %9868 = vmatpush2.bf16.msra.mxu0 %v19546_v7  ;;  %v19564_v7 = vld [vmem:[%s27669_s8 + $0x320] ss:$16 sps:$4 sm:$0xff]  }
 0x4f9   : > { %9869 = vmatprep.subr.bf16.mxu0 %v19554_v44  ;;  %v24616_v44 = vrot.slane %v8659_v24, 2  ;;  %v20399_v24 = vld [vmem:[#allocation3 + $0x40] sm:$0xff] }
 0x4fa   : > { %9819 = vmatpush2.bf16.msra.mxu1 %v19549_v32  ;;  %v19569_v32 = vld [vmem:[%s27669_s8 + $0x304] ss:$16 sps:$4 sm:$0xff]  }
 0x4fb   : > { %9820 = vmatprep.subr.bf16.mxu1 %v19557_v41  ;;  %v8643_v41 = vld [vmem:[#allocation3 + $0x10] sm:$0xf0] }
 0x4fc   : > { %9870 = vmatpush2.bf16.msra.mxu0 %v19552_v48  ;;  %v8858_v48 = vrot.slane %v8653_v5, 2  ;;  %v20400_v5 = vld [vmem:[#allocation3 + $0x88] sm:$0xff] }
 0x4fd   : > { %9871 = vmatprep.subr.bf16.mxu0 %v19560_v51  ;;  %v19570_v51 = vld [vmem:[%s27669_s8 + $0x4e0] ss:$16 sps:$4 sm:$0xff]  }
 0x4fe   : > { %9821 = vmatpush2.bf16.msra.mxu1 %v19555_v45  ;;  %v8661_v45 = vpack.c.bf16 %v8649_v54, %v20398_v20 }
 0x4ff   : > { %9822 = vmatprep.subr.bf16.mxu1 %v19563_v39  ;;  %v8652_v39 = vld [vmem:[#allocation3 + $0xb8] sm:$0xff] }
 0x500   : > { %9872 = vmatpush2.bf16.msra.mxu0 %v19558_v61  ;;  %v24629_v61 = vsel %vm2131_vm3, %v8858_v48, %v24616_v44  ;;  %v24639_v54 = vrot.slane %v8661_v45, 2 }
 0x501   : > { %9873 = vmatprep.subr.bf16.mxu0 %v19566_v11  ;;  %v8655_v11 = vpack.c.bf16 %v20399_v24, %v8643_v41  ;;  %v20401_v41 = vld [vmem:[#allocation3 + $0x58] sm:$0xff] }
 0x502   : > { %9823 = vmatpush2.bf16.msra.mxu1 %v19561_v18  ;;  %v8646_v18 = vld [vmem:[#allocation3 + $0x28] sm:$0xf0] }
 0x503   : > { %9898 = vmatprep.subr.bf16.mxu1 %v19572_v16  ;;  %v8664_v16 = vpack.c.bf16 %v8652_v39, %v20400_v5  ;;  %v8658_v48 = vpack.c.bf16 %v20401_v41, %v8646_v18  ;;  %v8864_v20 = vrot.slane %v8655_v11, 2  ;;  %v19576_v39 = vld [vmem:[%s27669_s8 + $0xe8] ss:$16 sps:$4 sm:$0xff]   ;;  %v19587_v11 = vld [vmem:[%s27669_s8 + $0x484] ss:$16 sps:$4 sm:$0xff]  }
 0x504   : > { %9874 = vmatpush2.bf16.msra.mxu0 %v19564_v7  ;;  %v19573_v7 = vld [vmem:[%s27669_s8 + $0x4c0] ss:$16 sps:$4 sm:$0xff]   ;;  %v19582_v18 = vld [vmem:[%s27669_s8 + $0xc8] ss:$16 sps:$4 sm:$0xff]   ;;  %v19590_v5 = vld [vmem:[%s27669_s8 + $0xac] ss:$16 sps:$4 sm:$0xff]  }
 0x505   : > { %9825 = vmatmul.mubr.bf16.vlgmr.msra.gmra.mxu1 %v24629_v61  ;;  %9875 = vmatprep.subr.bf16.mxu0 %v19569_v32  ;;  %v19581_v32 = vld [vmem:[%s27669_s8 + $0x4a4] ss:$16 sps:$4 sm:$0xff]   ;;  %v24653_v45 = vrot.slane %v8664_v16, 2  ;;  %v8873_v24 = vrot.slane %v8658_v48, 2  ;;  %v19585_v16 = vld [vmem:[%s27669_s8 + $0x480] ss:$16 sps:$4 sm:$0xff]  }
 0x506   : > { %9834 = vmatprep.mubr.bf16.mxu1 %v24399_v55  ;;  %9899 = vmatpush1.bf16.msra.mxu1 %v19570_v51  ;;  %v19584_v51 = vld [vmem:[%s27669_s8 + $0xcc] ss:$16 sps:$4 sm:$0xff]   ;;  %v19588_v41 = vld [vmem:[%s27669_s8 + $0xa8] ss:$16 sps:$4 sm:$0xff]  }
 0x507   : > { %9900 = vmatprep.subr.bf16.mxu1 %v19575_v8  ;;  %v24657_v8 = vsel %vm2131_vm3, %v8864_v20, %v24639_v54  ;;  %v19596_v20 = vld [vmem:[%s27669_s8 + $0x8c] ss:$16 sps:$4 sm:$0xff]  }
 0x508   : > { %9876 = vmatpush2.bf16.msra.mxu0 %v19567_v1  ;;  %v19579_v1 = vld [vmem:[%s27669_s8 + $0x4a0] ss:$16 sps:$4 sm:$0xff]  }
 0x509   : > { %9951 = vmatprep.subr.bf16.mxu0 %v19578_v42  ;;  %v24673_v42 = vsel %vm2131_vm3, %v8873_v24, %v24653_v45  ;;  %v19594_v24 = vld [vmem:[%s27669_s8 + $0x88] ss:$16 sps:$4 sm:$0xff]  }
 0x50a   : > { %9901 = vmatpush1.bf16.msra.mxu1 %v19573_v7  ;;  %v24683_v7 = vpop.f32.mrf.mxu1 }
 0x50b   : > { %9878 = vmatmul.mubr.bf16.vlgmr.msra.gmra.mxu0 %v24657_v8  ;;  %9902 = vmatprep.subr.bf16.mxu1 %v19581_v32  ;;  %27675 = vst [vmem:[#allocation36_spill] sm:$0xff] %v24683_v7  ;;  %v19593_v32 = vld [vmem:[%s27669_s8 + $0x464] ss:$16 sps:$4 sm:$0xff]  }
 0x50c   : > { %9887 = vmatprep.mubr.bf16.mxu0 %v24429_v23  ;;  %9952 = vmatpush1.bf16.msra.mxu0 %v19576_v39  ;;  %v19591_v39 = vld [vmem:[%s27669_s8 + $0x460] ss:$16 sps:$4 sm:$0xff]  }
 0x50d   : > { %9835 = vmatmul.mubr.bf16.gmra.mxu1 %v24616_v44  ;;  %9953 = vmatprep.subr.bf16.mxu0 %v19584_v51 }
 0x50e   : > { %9903 = vmatpush1.bf16.msra.mxu1 %v19579_v1  ;;  %17247 = vmatprep.mubr.msk.bf16.mxu1 %vm2411_vm6, %v24673_v42  ;;  %v19599_v1 = vld [vmem:[%s27669_s8 + $0x444] ss:$16 sps:$4 sm:$0xff]  }
 0x50f   : > { %9904 = vmatprep.subr.bf16.mxu1 %v19587_v11  ;;  %v24709_v11 = vpop.f32.mrf.mxu0 }
 0x510   : > { %9954 = vmatpush1.bf16.msra.mxu0 %v19582_v18  ;;  %27676 = vst [vmem:[#allocation37_spill] sm:$0xff] %v24709_v11 }
 0x511   : > { %v24691_v48 = vpop.f32.mrf.mxu1  ;;  %9955 = vmatprep.subr.bf16.mxu0 %v19590_v5  ;;  %v19602_v5 = vld [vmem:[%s27669_s8 + $0x6c] ss:$16 sps:$4 sm:$0xff]  }
 0x512   : > { %9905 = vmatpush1.bf16.msra.mxu1 %v19585_v16  ;;  %v19597_v16 = vld [vmem:[%s27669_s8 + $0x440] ss:$16 sps:$4 sm:$0xff]  }
 0x513   : > { %9888 = vmatmul.mubr.bf16.gmra.mxu0 %v24639_v54  ;;  %v24700_v51 = vpop.f32.mrf.mxu1  ;;  %9906 = vmatprep.subr.bf16.mxu1 %v19593_v32 }
 0x514   : > { %9956 = vmatpush1.bf16.msra.mxu0 %v19588_v41  ;;  %9983 = vmatprep.mubr.bf16.mxu0 %v24418_v43  ;;  %v19605_v41 = vld [vmem:[%s27669_s8 + $0x424] ss:$16 sps:$4 sm:$0xff]  }
 0x515   : > { %v24711_v18 = vpop.f32.mrf.mxu1  ;;  %9957 = vmatprep.subr.bf16.mxu0 %v19596_v20  ;;  %v19600_v20 = vld [vmem:[%s27669_s8 + $0x68] ss:$16 sps:$4 sm:$0xff]  }
 0x516   : > { %9907 = vmatpush1.bf16.msra.mxu1 %v19591_v39  ;;  %v19608_v39 = vld [vmem:[%s27669_s8 + $0x4c] ss:$16 sps:$4 sm:$0xff]  }
 0x517   : > { %v24719_v32 = vpop.f32.mrf.mxu0  ;;  %v24721_v43 = vpop.f32.mrf.mxu1  ;;  %9908 = vmatprep.subr.bf16.mxu1 %v19599_v1  ;;  %v19603_v1 = vld [vmem:[%s27669_s8 + $0x420] ss:$16 sps:$4 sm:$0xff]  }
 0x518   : > { %9958 = vmatpush1.bf16.msra.mxu0 %v19594_v24  ;;  %v19611_v24 = vld [vmem:[%s27669_s8 + $0x404] ss:$16 sps:$4 sm:$0xff]  }
 0x519   : > { %v24729_v11 = vpop.f32.mrf.mxu0  ;;  %9959 = vmatprep.subr.bf16.mxu0 %v19602_v5  ;;  %v24737_v7 = vpop.f32.mrf.mxu1  ;;  %v19606_v5 = vld [vmem:[%s27669_s8 + $0x48] ss:$16 sps:$4 sm:$0xff]  }
 0x51a   : > { %9909 = vmatpush1.bf16.msra.mxu1 %v19597_v16  ;;  %v19614_v16 = vld [vmem:[%s27669_s8 + $0x2c] ss:$16 sps:$4 sm:$0xff]  }
 0x51b   : > { %v24739_v50 = vpop.f32.mrf.mxu0  ;;  %9910 = vmatprep.subr.bf16.mxu1 %v19605_v41  ;;  %v19609_v41 = vld [vmem:[%s27669_s8 + $0x400] ss:$16 sps:$4 sm:$0xff]   ;;  %v8353_v26 = vpop.f32.mrf.mxu1 }
 0x51c   : > { %9960 = vmatpush1.bf16.msra.mxu0 %v19600_v20  ;;  %v19617_v20 = vld [vmem:[%s27669_s8 + $0x584] ss:$16 sps:$4 sm:$0xff]  }
 0x51d   : > { %v24747_v58 = vpop.f32.mrf.mxu0  ;;  %9961 = vmatprep.subr.bf16.mxu0 %v19608_v39  ;;  %v19612_v39 = vld [vmem:[%s27669_s8 + $0x28] ss:$16 sps:$4 sm:$0xff]   ;;  %v8355_v3 = vpop.f32.mrf.mxu1 }
 0x51e   : > { %9911 = vmatpush1.bf16.msra.mxu1 %v19603_v1  ;;  %v19620_v1 = vld [vmem:[%s27669_s8 + $0xc] ss:$16 sps:$4 sm:$0xff]  }
 0x51f   : > { %v24755_v52 = vpop.f32.mrf.mxu0  ;;  %9912 = vmatprep.subr.bf16.mxu1 %v19611_v24  ;;  %v19615_v24 = vld [vmem:[%s27669_s8 + $0x580] ss:$16 sps:$4 sm:$0xff]  }
 0x520   : > { %9962 = vmatpush1.bf16.msra.mxu0 %v19606_v5  ;;  %v19623_v5 = vld [vmem:[%s27669_s8 + $0x564] ss:$16 sps:$4 sm:$0xff]  }
 0x521   : > { %v8406_v53 = vpop.f32.mrf.mxu0  ;;  %9963 = vmatprep.subr.bf16.mxu0 %v19614_v16  ;;  %v19621_v16 = vld [vmem:[%s27669_s8 + $0x560] ss:$16 sps:$4 sm:$0xff]  }
 0x522   : > { %v24766_v29 = vadd.f32 %v8406_v53, %v8353_v26  ;;  %9913 = vmatpush1.bf16.msra.mxu1 %v19609_v41  ;;  %v19618_v26 = vld [vmem:[%s27669_s8 + $0x8] ss:$16 sps:$4 sm:$0xff]   ;;  %v19626_v53 = vld [vmem:[%s27669_s8 + $0x1ec] ss:$16 sps:$4 sm:$0xff]  }
 0x523   : > { %v8408_v56 = vpop.f32.mrf.mxu0  ;;  %9920 = vmatprep.subr.bf16.mxu1 %v19617_v20  ;;  %v19632_v41 = vld [vmem:[%s27669_s8 + $0x1cc] ss:$16 sps:$4 sm:$0xff]   ;;  %v19627_v20 = vld [vmem:[%s27669_s8 + $0x540] ss:$16 sps:$4 sm:$0xff]  }
 0x524   : > { %v24774_v31 = vadd.f32 %v8408_v56, %v8355_v3  ;;  %9964 = vmatpush1.bf16.msra.mxu0 %v19612_v39  ;;  %v19629_v56 = vld [vmem:[%s27669_s8 + $0x544] ss:$16 sps:$4 sm:$0xff]   ;;  %v19624_v3 = vld [vmem:[%s27669_s8 + $0x1e8] ss:$16 sps:$4 sm:$0xff]  }
 0x525   : > { %9965 = vmatprep.subr.bf16.mxu0 %v19620_v1  ;;  %v19635_v39 = vld [vmem:[%s27669_s8 + $0x524] ss:$16 sps:$4 sm:$0xff]   ;;  %v19630_v1 = vld [vmem:[%s27669_s8 + $0x1c8] ss:$16 sps:$4 sm:$0xff]  }
 0x526   : > { %9921 = vmatpush2.bf16.msra.mxu1 %v19615_v24  ;;  %v19638_v24 = vld [vmem:[%s27669_s8 + $0x1ac] ss:$16 sps:$4 sm:$0xff]  }
 0x527   : > { %9922 = vmatprep.subr.bf16.mxu1 %v19623_v5  ;;  %v8651_v5 = vld [vmem:[#allocation3 + $0xb0] sm:$0xff] }
 0x528   : > { %9966 = vmatpush1.bf16.msra.mxu0 %v19618_v26  ;;  %v19633_v26 = vld [vmem:[%s27669_s8 + $0x520] ss:$16 sps:$4 sm:$0xff]  }
 0x529   : > { %9967 = vmatprep.subr.bf16.mxu0 %v19626_v53  ;;  %v19641_v53 = vld [vmem:[%s27669_s8 + $0x504] ss:$16 sps:$4 sm:$0xff]  }
 0x52a   : > { %9923 = vmatpush2.bf16.msra.mxu1 %v19621_v16  ;;  %v8645_v16 = vld [vmem:[#allocation3 + $0x20] sm:$0xf0] }
 0x52b   : > { %9924 = vmatprep.subr.bf16.mxu1 %v19629_v56  ;;  %v19636_v56 = vld [vmem:[%s27669_s8 + $0x1a8] ss:$16 sps:$4 sm:$0xff]   ;;  %v8657_v62 = vpack.c.bf16 %v20403_v34, %v8645_v16 }
 0x52c   : > { %9968 = vmatpush2.bf16.msra.mxu0 %v19624_v3  ;;  %v20402_v3 = vld [vmem:[#allocation3 + $0x80] sm:$0xff] }
 0x52d   : > { %9969 = vmatprep.subr.bf16.mxu0 %v19632_v41  ;;  %v8663_v41 = vpack.c.bf16 %v8651_v5, %v20402_v3  ;;  %v8870_v3 = vrot.slane %v8657_v62, 2  ;;  %v19648_v34 = vld [vmem:[%s27669_s8 + $0x2e8] ss:$16 sps:$4 sm:$0xff]   ;;  %v19653_v62 = vld [vmem:[%s27669_s8 + $0x14c] ss:$16 sps:$4 sm:$0xff]  }
 0x52e   : > { %9925 = vmatpush2.bf16.msra.mxu1 %v19627_v20  ;;  %v19644_v20 = vld [vmem:[%s27669_s8 + $0x18c] ss:$16 sps:$4 sm:$0xff]  }
 0x52f   : > { %9926 = vmatprep.subr.bf16.mxu1 %v19635_v39  ;;  %v19639_v39 = vld [vmem:[%s27669_s8 + $0x500] ss:$16 sps:$4 sm:$0xff]   ;;  %v24827_v5 = vrot.slane %v8663_v41, 2  ;;  %v19654_v41 = vld [vmem:[%s27669_s8 + $0x2c8] ss:$16 sps:$4 sm:$0xff]  }
 0x530   : > { %9970 = vmatpush2.bf16.msra.mxu0 %v19630_v1  ;;  %v19650_v1 = vld [vmem:[%s27669_s8 + $0x2ec] ss:$16 sps:$4 sm:$0xff]  }
 0x531   : > { %9971 = vmatprep.subr.bf16.mxu0 %v19638_v24  ;;  %v19642_v24 = vld [vmem:[%s27669_s8 + $0x188] ss:$16 sps:$4 sm:$0xff]   ;;  %v24840_v16 = vsel %vm2131_vm3, %v8870_v3, %v24827_v5 }
 0x532   : > { %9927 = vmatpush2.bf16.msra.mxu1 %v19633_v26  ;;  %v19647_v26 = vld [vmem:[%s27669_s8 + $0x16c] ss:$16 sps:$4 sm:$0xff]   ;;  %v19657_v3 = vld [vmem:[%s27669_s8 + $0x128] ss:$16 sps:$4 sm:$0xff]  }
 0x533   : > { %9928 = vmatprep.subr.bf16.mxu1 %v19641_v53  ;;  %v19656_v53 = vld [vmem:[%s27669_s8 + $0x2cc] ss:$16 sps:$4 sm:$0xff]  }
 0x534   : > { %9972 = vmatpush2.bf16.msra.mxu0 %v19636_v56  ;;  %v19645_v56 = vld [vmem:[%s27669_s8 + $0x168] ss:$16 sps:$4 sm:$0xff]  }
 0x535   : > { %9973 = vmatprep.subr.bf16.mxu0 %v19644_v20  ;;  %v19662_v20 = vld [vmem:[%s27669_s8 + $0x2ac] ss:$16 sps:$4 sm:$0xff]  }
 0x536   : > { %9929 = vmatpush2.bf16.msra.mxu1 %v19639_v39  ;;  %v19651_v39 = vld [vmem:[%s27669_s8 + $0x148] ss:$16 sps:$4 sm:$0xff]  }
 0x537   : > { %10004 = vmatprep.subr.bf16.mxu1 %v19650_v1  ;;  %v19659_v1 = vld [vmem:[%s27669_s8 + $0x12c] ss:$16 sps:$4 sm:$0xff]  }
 0x538   : > { %9974 = vmatpush2.bf16.msra.mxu0 %v19642_v24  ;;  %v19660_v24 = vld [vmem:[%s27669_s8 + $0x2a8] ss:$16 sps:$4 sm:$0xff]  }
 0x539   : > { %9931 = vmatmul.mubr.bf16.vlgmr.msra.gmra.mxu1 %v24840_v16  ;;  %9975 = vmatprep.subr.bf16.mxu0 %v19647_v26  ;;  %v19668_v26 = vld [vmem:[%s27669_s8 + $0x28c] ss:$16 sps:$4 sm:$0xff]  }
 0x53a   : > { %17248 = vmatprep.mubr.msk.bf16.mxu1 %vm2411_vm6, %v24653_v45  ;;  %10005 = vmatpush1.bf16.msra.mxu1 %v19648_v34  ;;  %v19665_v34 = vld [vmem:[%s27669_s8 + $0x10c] ss:$16 sps:$4 sm:$0xff]  }
 0x53b   : > { %10006 = vmatprep.subr.bf16.mxu1 %v19656_v53  ;;  %v19666_v53 = vld [vmem:[%s27669_s8 + $0x288] ss:$16 sps:$4 sm:$0xff]  }
 0x53c   : > { %9976 = vmatpush2.bf16.msra.mxu0 %v19645_v56  ;;  %v24880_v56 = vpop.f32.mrf.mxu1 }
 0x53d   : > { %9977 = vmatprep.subr.bf16.mxu0 %v19653_v62  ;;  %v19671_v62 = vld [vmem:[%s27669_s8 + $0x26c] ss:$16 sps:$4 sm:$0xff]  }
 0x53e   : > { %10007 = vmatpush1.bf16.msra.mxu1 %v19654_v41  ;;  %v8395_v41 = vadd.f32 %v24719_v32, %v24691_v48  ;;  %v19669_v48 = vld [vmem:[%s27669_s8 + $0x268] ss:$16 sps:$4 sm:$0xff]  }
 0x53f   : > { %10008 = vmatprep.subr.bf16.mxu1 %v19662_v20  ;;  %v19663_v20 = vld [vmem:[%s27669_s8 + $0x108] ss:$16 sps:$4 sm:$0xff]  }
 0x540   : > { %9978 = vmatpush2.bf16.msra.mxu0 %v19651_v39  ;;  %v19674_v39 = vld [vmem:[%s27669_s8 + $0x4ec] ss:$16 sps:$4 sm:$0xff]  }
 0x541   : > { %9941 = vmatmul.mubr.bf16.gmra.mxu1 %v24827_v5  ;;  %9979 = vmatprep.subr.bf16.mxu0 %v19659_v1  ;;  %v8397_v1 = vadd.f32 %v24729_v11, %v24700_v51  ;;  %v19672_v51 = vld [vmem:[%s27669_s8 + $0x4e8] ss:$16 sps:$4 sm:$0xff]  }
 0x542   : > { %10009 = vmatpush1.bf16.msra.mxu1 %v19660_v24  ;;  %10036 = vmatprep.mubr.bf16.mxu1 %v24447_v9 }
 0x543   : > { %10010 = vmatprep.subr.bf16.mxu1 %v19668_v26  ;;  %v19677_v26 = vld [vmem:[%s27669_s8 + $0x24c] ss:$16 sps:$4 sm:$0xff]  }
 0x544   : > { %9980 = vmatpush2.bf16.msra.mxu0 %v19657_v3 }
 0x545   : > { %v8447_v9 = vpop.f32.mrf.mxu1  ;;  %9981 = vmatprep.subr.bf16.mxu0 %v19665_v34 }
 0x546   : > { %v8448_v24 = vadd.f32 %v8447_v9, %v8395_v41  ;;  %10011 = vmatpush1.bf16.msra.mxu1 %v19666_v53  ;;  %v19680_v53 = vld [vmem:[%s27669_s8 + $0x4cc] ss:$16 sps:$4 sm:$0xff]   ;;  %v8405_v9 = vadd.f32 %v24755_v52, %v24737_v7 }
 0x547   : > { %v8449_v32 = vpop.f32.mrf.mxu1  ;;  %10012 = vmatprep.subr.bf16.mxu1 %v19671_v62 }
 0x548   : > { %v24902_v3 = vadd.f32 %v8448_v24, %v24194_v59  ;;  %9982 = vmatpush2.bf16.msra.mxu0 %v19663_v20  ;;  %v8450_v34 = vadd.f32 %v8449_v32, %v8397_v1  ;;  %v19675_v59 = vld [vmem:[%s27669_s8 + $0x248] ss:$16 sps:$4 sm:$0xff]   ;;  %v19683_v20 = vld [vmem:[%s27669_s8 + $0x22c] ss:$16 sps:$4 sm:$0xff]  }
 0x549   : > { %v24907_v11 = vpop.f32.mrf.mxu1  ;;  %10057 = vmatprep.subr.bf16.mxu0 %v19674_v39  ;;  %v19681_v24 = vld [vmem:[%s27669_s8 + $0x228] ss:$16 sps:$4 sm:$0xff]  }
 0x54a   : > { %v24913_v62 = vadd.f32 %v8450_v34, %v24204_v35  ;;  %10013 = vmatpush1.bf16.msra.mxu1 %v19669_v48  ;;  %v19678_v35 = vld [vmem:[%s27669_s8 + $0x4c8] ss:$16 sps:$4 sm:$0xff]   ;;  %v19692_v34 = vld [vmem:[%s27669_s8 + $0x48c] ss:$16 sps:$4 sm:$0xff]  }
 0x54b   : > { %9984 = vmatmul.mubr.bf16.vlgmr.msra.gmra.mxu0 %v24629_v61  ;;  %v24919_v41 = vpop.f32.mrf.mxu1  ;;  %10014 = vmatprep.subr.bf16.mxu1 %v19677_v26  ;;  %v19686_v61 = vld [vmem:[%s27669_s8 + $0x4ac] ss:$16 sps:$4 sm:$0xff]   ;;  %v19684_v32 = vld [vmem:[%s27669_s8 + $0x4a8] ss:$16 sps:$4 sm:$0xff]  }
 0x54c   : > { %9993 = vmatprep.mubr.bf16.mxu0 %v24399_v55  ;;  %10058 = vmatpush1.bf16.msra.mxu0 %v19672_v51  ;;  %v19689_v55 = vld [vmem:[%s27669_s8 + $0x20c] ss:$16 sps:$4 sm:$0xff]  }
 0x54d   : > { %v8457_v39 = vpop.f32.mrf.mxu1  ;;  %10059 = vmatprep.subr.bf16.mxu0 %v19680_v53 }
 0x54e   : > { %v8458_v1 = vadd.f32 %v8457_v39, %v8405_v9  ;;  %10015 = vmatpush1.bf16.msra.mxu1 %v19675_v59  ;;  %v19699_v9 = vld [vmem:[%s27669_s8 + $0x3c8] ss:$16 sps:$4 sm:$0xff]  }
 0x54f   : > { %v8459_v52 = vpop.f32.mrf.mxu1  ;;  %10016 = vmatprep.subr.bf16.mxu1 %v19683_v20  ;;  %v19704_v20 = vld [vmem:[%s27669_s8 + $0x44c] ss:$16 sps:$4 sm:$0xff]   ;;  %v19702_v39 = vld [vmem:[%s27669_s8 + $0x448] ss:$16 sps:$4 sm:$0xff]  }
 0x550   : > { %v24940_v7 = vadd.f32 %v8458_v1, %v24234_v47  ;;  %10060 = vmatpush1.bf16.msra.mxu0 %v19678_v35  ;;  %v8460_v48 = vadd.f32 %v8459_v52, %v24766_v29  ;;  %v19687_v29 = vld [vmem:[%s27669_s8 + $0x208] ss:$16 sps:$4 sm:$0xff]   ;;  %v19695_v47 = vld [vmem:[%s27669_s8 + $0x3ec] ss:$16 sps:$4 sm:$0xff]  }
 0x551   : > { %v8461_v26 = vpop.f32.mrf.mxu1  ;;  %10061 = vmatprep.subr.bf16.mxu0 %v19686_v61  ;;  %v19707_v35 = vld [vmem:[%s27669_s8 + $0x3ac] ss:$16 sps:$4 sm:$0xff]   ;;  %v19705_v1 = vld [vmem:[%s27669_s8 + $0x3a8] ss:$16 sps:$4 sm:$0xff]  }
 0x552   : > { %v24950_v51 = vadd.f32 %v8460_v48, %v24244_v6  ;;  %v8462_v53 = vadd.f32 %v8461_v26, %v24774_v31  ;;  %10017 = vmatpush1.bf16.msra.mxu1 %v19681_v24  ;;  %v19690_v31 = vld [vmem:[%s27669_s8 + $0x488] ss:$16 sps:$4 sm:$0xff]   ;;  %v19698_v6 = vld [vmem:[%s27669_s8 + $0x46c] ss:$16 sps:$4 sm:$0xff]  }
 0x553   : > { %9994 = vmatmul.mubr.bf16.gmra.mxu0 %v24616_v44  ;;  %10018 = vmatprep.subr.bf16.mxu1 %v19689_v55  ;;  %v19693_v44 = vld [vmem:[%s27669_s8 + $0x3e8] ss:$16 sps:$4 sm:$0xff]   ;;  %v19710_v61 = vld [vmem:[%s27669_s8 + $0x42c] ss:$16 sps:$4 sm:$0xff]  }
 0x554   : > { %v24961_v59 = vadd.f32 %v8462_v53, %v24255_v63  ;;  %10062 = vmatpush1.bf16.msra.mxu0 %v19684_v32  ;;  %17249 = vmatprep.mubr.msk.bf16.mxu0 %vm2411_vm6, %v24673_v42  ;;  %v19701_v63 = vld [vmem:[%s27669_s8 + $0x3cc] ss:$16 sps:$4 sm:$0xff]   ;;  %v19696_v42 = vld [vmem:[%s27669_s8 + $0x468] ss:$16 sps:$4 sm:$0xff]  }
 0x555   : > { %10063 = vmatprep.subr.bf16.mxu0 %v19692_v34  ;;  %v19713_v24 = vld [vmem:[%s27669_s8 + $0x38c] ss:$16 sps:$4 sm:$0xff]   ;;  %v19708_v52 = vld [vmem:[%s27669_s8 + $0x428] ss:$16 sps:$4 sm:$0xff]  }
 0x556   : > { %10019 = vmatpush1.bf16.msra.mxu1 %v19687_v29  ;;  %v19716_v55 = vld [vmem:[%s27669_s8 + $0x40c] ss:$16 sps:$4 sm:$0xff]   ;;  %v19711_v48 = vld [vmem:[%s27669_s8 + $0x388] ss:$16 sps:$4 sm:$0xff]  }
 0x557   : > { %10020 = vmatprep.subr.bf16.mxu1 %v19695_v47  ;;  %v19719_v32 = vld [vmem:[%s27669_s8 + $0x36c] ss:$16 sps:$4 sm:$0xff]   ;;  %v19714_v26 = vld [vmem:[%s27669_s8 + $0x408] ss:$16 sps:$4 sm:$0xff]  }
 0x558   : > { %10064 = vmatpush1.bf16.msra.mxu0 %v19690_v31  ;;  %v19722_v34 = vld [vmem:[%s27669_s8 + $0x58c] ss:$16 sps:$4 sm:$0xff]   ;;  %v19717_v53 = vld [vmem:[%s27669_s8 + $0x368] ss:$16 sps:$4 sm:$0xff]  }
 0x559   : > { %10065 = vmatprep.subr.bf16.mxu0 %v19698_v6  ;;  %v19725_v29 = vld [vmem:[%s27669_s8 + $0x34c] ss:$16 sps:$4 sm:$0xff]   ;;  %v19720_v47 = vld [vmem:[%s27669_s8 + $0x588] ss:$16 sps:$4 sm:$0xff]  }
 0x55a   : > { %10021 = vmatpush2.bf16.msra.mxu1 %v19693_v44  ;;  %v19728_v31 = vld [vmem:[%s27669_s8 + $0x56c] ss:$16 sps:$4 sm:$0xff]   ;;  %v19723_v6 = vld [vmem:[%s27669_s8 + $0x348] ss:$16 sps:$4 sm:$0xff]   ;;  %v25034_v44 = vpop.f32.mrf.mxu0 }
 0x55b   : > { %10022 = vmatprep.subr.bf16.mxu1 %v19701_v63  ;;  %v19731_v63 = vld [vmem:[%s27669_s8 + $0x32c] ss:$16 sps:$4 sm:$0xff]  }
 0x55c   : > { %10066 = vmatpush1.bf16.msra.mxu0 %v19696_v42  ;;  %v19726_v42 = vld [vmem:[%s27669_s8 + $0x568] ss:$16 sps:$4 sm:$0xff]  }
 0x55d   : > { %10067 = vmatprep.subr.bf16.mxu0 %v19704_v20  ;;  %v8500_v20 = vpop.f32.mrf.mxu0 }
 0x55e   : > { %10023 = vmatpush2.bf16.msra.mxu1 %v19699_v9  ;;  %v19734_v9 = vld [vmem:[%s27669_s8 + $0x54c] ss:$16 sps:$4 sm:$0xff]  }
 0x55f   : > { %10024 = vmatprep.subr.bf16.mxu1 %v19707_v35  ;;  %v19729_v35 = vld [vmem:[%s27669_s8 + $0x328] ss:$16 sps:$4 sm:$0xff]  }
 0x560   : > { %10068 = vmatpush1.bf16.msra.mxu0 %v19702_v39  ;;  %v19737_v39 = vld [vmem:[%s27669_s8 + $0x30c] ss:$16 sps:$4 sm:$0xff]  }
 0x561   : > { %10069 = vmatprep.subr.bf16.mxu0 %v19710_v61  ;;  %v19732_v61 = vld [vmem:[%s27669_s8 + $0x548] ss:$16 sps:$4 sm:$0xff]  }
 0x562   : > { %10025 = vmatpush2.bf16.msra.mxu1 %v19705_v1  ;;  %v8502_v1 = vpop.f32.mrf.mxu0 }
 0x563   : > { %10026 = vmatprep.subr.bf16.mxu1 %v19713_v24  ;;  %v19740_v24 = vld [vmem:[%s27669_s8 + $0x52c] ss:$16 sps:$4 sm:$0xff]  }
 0x564   : > { %10070 = vmatpush1.bf16.msra.mxu0 %v19708_v52  ;;  %v19735_v52 = vld [vmem:[%s27669_s8 + $0x308] ss:$16 sps:$4 sm:$0xff]  }
 0x565   : > { %10071 = vmatprep.subr.bf16.mxu0 %v19716_v55  ;;  %v19738_v55 = vld [vmem:[%s27669_s8 + $0x528] ss:$16 sps:$4 sm:$0xff]  }
 0x566   : > { %10027 = vmatpush2.bf16.msra.mxu1 %v19711_v48  ;;  %v8504_v48 = vpop.f32.mrf.mxu0 }
 0x567   : > { %10028 = vmatprep.subr.bf16.mxu1 %v19719_v32  ;;  %v19743_v32 = vld [vmem:[%s27669_s8 + $0x50c] ss:$16 sps:$4 sm:$0xff]  }
 0x568   : > { %10072 = vmatpush1.bf16.msra.mxu0 %v19714_v26  ;;  %v19741_v26 = vld [vmem:[%s27669_s8 + $0x508] ss:$16 sps:$4 sm:$0xff]   ;;  %s16142_s8 = scalar_lea.hbm %s27709_s9, %s18144_s30 }
 0x569   : > { %10079 = vmatprep.subr.bf16.mxu0 %v19722_v34  ;;  %v25069_v34 = vpop.f32.mrf.mxu0 }
 0x56a   : > { %10029 = vmatpush2.bf16.msra.mxu1 %v19717_v53 }
 0x56b   : > { %10030 = vmatprep.subr.bf16.mxu1 %v19725_v29  ;;  %v8510_v53 = vpop.f32.mrf.mxu0 }
 0x56c   : > { %10080 = vmatpush2.bf16.msra.mxu0 %v19720_v47  ;;  %v25077_v47 = vpop.f32.mrf.mxu1 }
 0x56d   : > { %10081 = vmatprep.subr.bf16.mxu0 %v19728_v31  ;;  %v8512_v29 = vpop.f32.mrf.mxu0 }
 0x56e   : > { %10031 = vmatpush2.bf16.msra.mxu1 %v19723_v6 }
 0x56f   : > { %10032 = vmatprep.subr.bf16.mxu1 %v19731_v63  ;;  %v8514_v31 = vpop.f32.mrf.mxu0 }
 0x570   : > { %10082 = vmatpush2.bf16.msra.mxu0 %v19726_v42 }
 0x571   : > { %10083 = vmatprep.subr.bf16.mxu0 %v19734_v9 }
 0x572   : > { %10033 = vmatpush2.bf16.msra.mxu1 %v19729_v35 }
 0x573   : > { %10034 = vmatprep.subr.bf16.mxu1 %v19737_v39 }
 0x574   : > { %10084 = vmatpush2.bf16.msra.mxu0 %v19732_v61 }
 0x575   : > { %10085 = vmatprep.subr.bf16.mxu0 %v19740_v24 }
 0x576   : > { %10035 = vmatpush2.bf16.msra.mxu1 %v19735_v52 }
 0x578   : > { %10086 = vmatpush2.bf16.msra.mxu0 %v19738_v55 }
 0x579   : > { %10037 = vmatmul.mubr.bf16.vlgmr.msra.gmra.mxu1 %v24657_v8  ;;  %10087 = vmatprep.subr.bf16.mxu0 %v19743_v32 }
 0x57a   : > { %10046 = vmatprep.mubr.bf16.mxu1 %v24429_v23  ;;  %v8516_v23 = vpop.f32.mrf.mxu0 }
 0x57c   : > { %10088 = vmatpush2.bf16.msra.mxu0 %v19741_v26 }
 0x57f   : > { %10090 = vmatmul.mubr.bf16.vlgmr.msra.gmra.mxu0 %v24840_v16 }
 0x580   : > { %17250 = vmatprep.mubr.msk.bf16.mxu0 %vm2411_vm6, %v24653_v45  ;;  %vm12181_vm6 = vcmask 523264  }
 0x581   : > { %10047 = vmatmul.mubr.bf16.gmra.mxu1 %v24639_v54 }
 0x585   : > { %v8553_v6 = vpop.f32.mrf.mxu1 }
 0x586   : > { %v8554_v63 = vadd.f32 %v8553_v6, %v8500_v20 }
 0x587   : > { %10100 = vmatmul.mubr.bf16.gmra.mxu0 %v24827_v5  ;;  %v8555_v8 = vpop.f32.mrf.mxu1 }
 0x588   : > { %v8556_v42 = vadd.f32 %v8555_v8, %v8502_v1 }
 0x589   : > { %v8557_v9 = vpop.f32.mrf.mxu1 }
 0x58a   : > { %v8558_v35 = vadd.f32 %v8557_v9, %v8504_v48 }
 0x58b   : > { %v8606_v39 = vpop.f32.mrf.mxu0  ;;  %v25080_v16 = vpop.f32.mrf.mxu1 }
 0x58c   : > { %v8607_v61 = vadd.f32 %v8606_v39, %v8554_v63 }
 0x58d   : > { %v8608_v45 = vpop.f32.mrf.mxu0  ;;  %v8563_v24 = vpop.f32.mrf.mxu1 }
 0x58e   : > { %v25083_v54 = vadd.f32 %v8607_v61, %v24478_v22  ;;  %v8609_v52 = vadd.f32 %v8608_v45, %v8556_v42  ;;  %v8564_v55 = vadd.f32 %v8563_v24, %v8510_v53 }
 0x58f   : > { %v8610_v32 = vpop.f32.mrf.mxu0  ;;  %v8565_v20 = vpop.f32.mrf.mxu1 }
 0x590   : > { %v25086_v5 = vadd.f32 %v8609_v52, %v24488_v40  ;;  %v8611_v1 = vadd.f32 %v8610_v32, %v8558_v35  ;;  %v8566_v9 = vadd.f32 %v8565_v20, %v8512_v29 }
 0x591   : > { %v25088_v26 = vpop.f32.mrf.mxu0  ;;  %v8567_v48 = vpop.f32.mrf.mxu1 }
 0x592   : > { %v25091_v6 = vadd.f32 %v8611_v1, %v24500_v36  ;;  %v8568_v63 = vadd.f32 %v8567_v48, %v8514_v31 }
 0x593   : > { %v8616_v8 = vpop.f32.mrf.mxu0  ;;  %v8569_v22 = vpop.f32.mrf.mxu1 }
 0x594   : > { %v8617_v39 = vadd.f32 %v8616_v8, %v8564_v55  ;;  %v8570_v40 = vadd.f32 %v8569_v22, %v8516_v23  ;;  %v8399_v22 = vadd.f32 %v24739_v50, %v24711_v18  ;;  %v8401_v18 = vadd.f32 %v24747_v58, %v24721_v43 }
 0x595   : > { %v8618_v61 = vpop.f32.mrf.mxu0 }
 0x596   : > { %v25094_v53 = vadd.f32 %v8617_v39, %v24515_v17  ;;  %v8619_v42 = vadd.f32 %v8618_v61, %v8566_v9 }
 0x597   : > { %v8620_v45 = vpop.f32.mrf.mxu0 }
 0x598   : > { %v25097_v35 = vadd.f32 %v8619_v42, %v24524_v37  ;;  %v8621_v24 = vadd.f32 %v8620_v45, %v8568_v63  ;;  %v4151_v37 = vadd.f32 %v22644_v38, %v22615_v2  ;;  %v25114_v45 = vld [vmem:[%s27677_s10] sm:$0xf]  ;;  %v8452_v38 = vadd.f32 %v24907_v11, %v8399_v22  ;;  %s20474_s10 = smov [#allocation6]  }
 0x599   : > { %v8622_v52 = vpop.f32.mrf.mxu0 }
 0x59a   : > { %v25100_v36 = vadd.f32 %v8621_v24, %v24533_v46  ;;  %v25102_v31 = vadd.f32 %v8622_v52, %v8570_v40  ;;  %v4204_v63 = vadd.f32 %v22813_v19, %v4151_v37  ;;  %v6844_v24 = vadd.f32 %v24042_v13, %v24016_v10 }
 0x59c   : > { %v5322_v40 = vadd.f32 %v23315_v57, %v4204_v63  ;;  %v6897_v50 = vadd.f32 %v24211_v12, %v6844_v24 }
 0x59e   : > { %v5375_v37 = vadd.f32 %v23343_v25, %v5322_v40  ;;  %v8629_v25 = vadd.f32 %v8452_v38, %v24217_v4 }
 0x5a0   : > { %v5428_v11 = vadd.f32 %v23513_v28, %v5375_v37 }
 0x5a2   : > { %v7073_v22 = vadd.f32 %v6897_v50, %v5428_v11 }
 0x5c5   : > { %v9826_v29 = vpop.f32.mrf.mxu1 }
 0x5c7   : > { %v9828_v55 = vpop.f32.mrf.mxu1 }
 0x5c9   : > { %v9830_v32 = vpop.f32.mrf.mxu1 }
 0x5cb   : > { %v9832_v20 = vpop.f32.mrf.mxu1  ;;  %v9879_v1 = vpop.f32.mrf.mxu0 }
 0x5cc   : > { %v9880_v61 = vadd.f32 %v9879_v1, %v9826_v29  ;;  %v10131_v29 = vrot.slane %v25114_v45, %v21159_v33 }
 0x5cd   : > { %v9836_v17 = vpop.f32.mrf.mxu1  ;;  %v9881_v48 = vpop.f32.mrf.mxu0 }
 0x5ce   : > { %v9882_v19 = vadd.f32 %v9881_v48, %v9828_v55  ;;  %v8454_v55 = vadd.f32 %v24919_v41, %v8401_v18 }
 0x5cf   : > { %v9838_v8 = vpop.f32.mrf.mxu1  ;;  %v9883_v9 = vpop.f32.mrf.mxu0 }
 0x5d0   : > { %v9884_v57 = vadd.f32 %v9883_v9, %v9830_v32  ;;  %v8630_v28 = vadd.f32 %v8454_v55, %v7073_v22 }
 0x5d1   : > { %v9840_v23 = vpop.f32.mrf.mxu1  ;;  %v9885_v39 = vpop.f32.mrf.mxu0 }
 0x5d3   : > { %v25107_v46 = vpop.f32.mrf.mxu1  ;;  %v9889_v42 = vpop.f32.mrf.mxu0 }
 0x5d4   : > { %v9890_v40 = vadd.f32 %v9889_v42, %v9836_v17 }
 0x5d5   : > { %v9891_v63 = vpop.f32.mrf.mxu0 }
 0x5d6   : > { %v9892_v11 = vadd.f32 %v9891_v63, %v9838_v8 }
 0x5d7   : > { %v9893_v24 = vpop.f32.mrf.mxu0 }
 0x5d8   : > { %v9894_v4 = vadd.f32 %v9893_v24, %v9840_v23 }
 0x5f9   : > { %v9932_v2 = vpop.f32.mrf.mxu1 }
 0x5fa   : > { %v9933_v52 = vadd.f32 %v9932_v2, %v9880_v61  ;;  %v9886_v61 = vadd.f32 %v9885_v39, %v9832_v20 }
 0x5fb   : > { %v9934_v1 = vpop.f32.mrf.mxu1 }
 0x5fc   : > { %v10110_v10 = vadd.f32 %v9933_v52, %v24902_v3  ;;  %v9935_v13 = vadd.f32 %v9934_v1, %v9882_v19  ;;  %v25133_v3 = vrot.slane %v25114_v45, %v21175_v60 }
 0x5fd   : > { %v9936_v48 = vpop.f32.mrf.mxu1 }
 0x5fe   : > { %v9937_v12 = vadd.f32 %v9936_v48, %v9884_v57  ;;  %v10148_v58 = vadd.f32 %v10131_v29, %v10110_v10  ;;  %v10111_v32 = vadd.f32 %v9935_v13, %v24913_v62 }
 0x5ff   : > { %v9938_v43 = vpop.f32.mrf.mxu1 }
 0x600   : > { %v10114_v9 = vadd.f32 %v9937_v12, %v8629_v25  ;;  %v9939_v2 = vadd.f32 %v9938_v43, %v9886_v61  ;;  %v10180_v38 = vrot.slane %v10148_v58, 1  ;;  %v10149_v39 = vadd.f32 %v25133_v3, %v10111_v32 }
 0x601   : > { %v9942_v41 = vpop.f32.mrf.mxu1  ;;  %v10240_v50 = vrot.slane %v10148_v58, 2 }
 0x602   : > { %v10152_v19 = vadd.f32 %v10131_v29, %v10114_v9  ;;  %v9943_v52 = vadd.f32 %v9942_v41, %v9890_v40  ;;  %v10115_v37 = vadd.f32 %v9939_v2, %v8630_v28  ;;  %v10183_v25 = vrot.slane %v10149_v39, 1 }
 0x603   : > { %v9944_v20 = vpop.f32.mrf.mxu1  ;;  %v10243_v2 = vrot.slane %v10149_v39, 2 }
 0x604   : > { %v10181_v17 = vrot.slane %v10152_v19, 1  ;;  %v10241_v42 = vrot.slane %v10152_v19, 2  ;;  %v10118_v62 = vadd.f32 %v9943_v52, %v24940_v7  ;;  %v25138_v18 = vadd.f32 %v25133_v3, %v10115_v37 }
 0x605   : > { %v9946_v1 = vpop.f32.mrf.mxu1  ;;  %v9945_v43 = vadd.f32 %v9944_v20, %v9892_v11  ;;  %v8411_v11 = vadd.f32 %v25034_v44, %v24880_v56 }
 0x606   : > { %v10156_v57 = vadd.f32 %v10131_v29, %v10118_v62  ;;  %v9947_v10 = vadd.f32 %v9946_v1, %v9894_v4  ;;  %v10182_v13 = vsel %vm2040_vm2, %v10180_v38, %v10181_v17  ;;  %v10184_v23 = vrot.slane %v25138_v18, 1 }
 0x607   : > { %v10224_v55 = vmax.f32 %v10148_v58, %v10182_v13  ;;  %v10242_v48 = vsel %vm2131_vm3, %v10240_v50, %v10241_v42  ;;  %v10244_v58 = vrot.slane %v25138_v18, 2  ;;  %v10119_v41 = vadd.f32 %v9945_v43, %v24950_v51 }
 0x608   : > { %v10192_v12 = vrot.slane %v10156_v57, 1  ;;  %v10252_v22 = vrot.slane %v10156_v57, 2  ;;  %v10122_v7 = vadd.f32 %v9947_v10, %v24961_v59  ;;  %v10185_v24 = vsel %vm2040_vm2, %v10183_v25, %v10184_v23 }
 0x609   : > { %v25144_v61 = vmax.f32 %v10224_v55, %v10242_v48  ;;  %v10225_v9 = vmax.f32 %v10149_v39, %v10185_v24  ;;  %v10245_v38 = vsel %vm2131_vm3, %v10243_v2, %v10244_v58  ;;  %v10157_v20 = vadd.f32 %v25133_v3, %v10119_v41  ;;  %v27679_v55 = vld [vmem:[#allocation25_spill] sm:$0xff]  ;;  %v27680_v41 = vld [vmem:[#allocation18_spill] sm:$0xff] }
 0x60a   : > { %v10160_v40 = vadd.f32 %v10131_v29, %v10122_v7  ;;  %v10193_v8 = vsel %vm2040_vm2, %v10181_v17, %v10192_v12  ;;  %v10253_v63 = vsel %vm2131_vm3, %v10241_v42, %v10252_v22  ;;  %v4161_v17 = vadd.f32 %v22921_v0, %v22780_v49  ;;  %v27678_v49 = vld [vmem:[#allocation32_spill] sm:$0xff] }
 0x60b   : > { %10316 = vrot.lane.b32.xlu0 %v25144_v61, %s20470_s5  ;;  %v10228_v32 = vmax.f32 %v10152_v19, %v10193_v8  ;;  %v25160_v19 = vmax.f32 %v10225_v9, %v10245_v38  ;;  %v10194_v51 = vrot.slane %v10157_v20, 1  ;;  %v6854_v1 = vadd.f32 %v24328_v27, %v24175_v21 }
 0x60c   : > { %v10200_v28 = vrot.slane %v10160_v40, 1  ;;  %v10260_v59 = vrot.slane %v10160_v40, 2  ;;  %v4214_v42 = vadd.f32 %v23026_v30, %v4161_v17  ;;  %v10254_v10 = vrot.slane %v10157_v20, 2 }
 0x60d   : > { %v25153_v29 = vmax.f32 %v10228_v32, %v10253_v63  ;;  %v10195_v62 = vsel %vm2040_vm2, %v10184_v23, %v10194_v51  ;;  %v6907_v0 = vadd.f32 %v27678_v49, %v6854_v1  ;;  %v9948_v23 = vpop.f32.mrf.mxu1  ;;  %v8464_v48 = vadd.f32 %v25077_v47, %v8411_v11  ;;  %v27683_v1 = vld [vmem:[#allocation24_spill] sm:$0xff]  ;;  %v27686_v11 = vld [vmem:[#allocation19_spill] sm:$0xff] }
 0x60e   : > { %v10201_v52 = vsel %vm2040_vm2, %v10192_v12, %v10200_v28  ;;  %v10261_v4 = vsel %vm2131_vm3, %v10252_v22, %v10260_v59  ;;  %v5332_v50 = vadd.f32 %v23477_v15, %v4214_v42  ;;  %v10229_v30 = vmax.f32 %v25138_v18, %v10195_v62 }
 0x60f   : > { %10393 = vrot.lane.b32.xlu0 %v25144_v61, %s27614_s0  ;;  %v10232_v37 = vmax.f32 %v10156_v57, %v10201_v52  ;;  %v9895_v57 = vpop.f32.mrf.mxu0  ;;  %v10255_v27 = vsel %vm2131_vm3, %v10244_v58, %v10254_v10  ;;  %v10236_v7 = vmax.f32 %v10160_v40, %v10200_v28  ;;  %v27681_v52 = vld [vmem:[#allocation20_spill] sm:$0xff] }
 0x610   : > { %v5385_v13 = vadd.f32 %v23558_v14, %v5332_v50  ;;  %v9896_v21 = vadd.f32 %v9895_v57, %v25107_v46  ;;  %v25189_v22 = vmax.f32 %v10229_v30, %v10255_v27  ;;  %v27687_v30 = vld [vmem:[#allocation22_spill] sm:$0xff] }
 0x611   : > { %v25163_v39 = vmax.f32 %v10232_v37, %v10261_v4  ;;  %v9985_v12 = vpop.f32.mrf.mxu0  ;;  %v25196_v43 = vmax.f32 %v10236_v7, %v10260_v59  ;;  %v4310_v4 = vadd.f32 %v27681_v52, %v27680_v41  ;;  %v27682_v37 = vld [vmem:[#allocation21_spill] sm:$0xff]  ;;  %v8560_v7 = vadd.f32 %v25080_v16, %v25069_v34  ;;  %v27694_v34 = vld [vmem:[#allocation26_spill] sm:$0xff] }
 0x612   : > { %v5438_v15 = vadd.f32 %v27679_v55, %v5385_v13  ;;  %v9949_v25 = vadd.f32 %v9948_v23, %v9896_v21  ;;  %v27684_v13 = vld [vmem:[#allocation31_spill] sm:$0xff]  ;;  %v4320_v23 = vadd.f32 %v27687_v30, %v27686_v11  ;;  %v27699_v11 = vld [vmem:[#allocation29_spill] sm:$0xff] }
 0x613   : > { %10318 = vrot.lane.b32.xlu0 %v25160_v19, %s20470_s5  ;;  %v9987_v18 = vpop.f32.mrf.mxu0  ;;  %v4363_v17 = vadd.f32 %v27682_v37, %v4310_v4  ;;  %v27689_v21 = vld [vmem:[#allocation35_spill] sm:$0xff] }
 0x614   : > { %v7081_v14 = vadd.f32 %v6907_v0, %v5438_v15 }
 0x615   : > { %v9989_v46 = vpop.f32.mrf.mxu0  ;;  %v5481_v57 = vadd.f32 %v27683_v1, %v4363_v17  ;;  %v27695_v17 = vld [vmem:[#allocation33_spill] sm:$0xff] }
 0x616   : > { %v8638_v56 = vadd.f32 %v8464_v48, %v7081_v14 }
 0x617   : > { %10395 = vrot.lane.b32.xlu0 %v25160_v19, %s27614_s0  ;;  %v9991_v24 = vpop.f32.mrf.mxu0 }
 0x618   : > { %v10123_v44 = vadd.f32 %v9949_v25, %v8638_v56  ;;  %v27690_v56 = vld [vmem:[#allocation23_spill] sm:$0xff] }
 0x619   : > { %v9995_v63 = vpop.f32.mrf.mxu0 }
 0x61a   : > { %v10161_v47 = vadd.f32 %v25133_v3, %v10123_v44  ;;  %v4373_v44 = vadd.f32 %v27690_v56, %v4320_v23 }
 0x61b   : > { %10324 = vrot.lane.b32.xlu0 %v25153_v29, %s20470_s5  ;;  %v9997_v32 = vpop.f32.mrf.mxu0 }
 0x61c   : > { %v10202_v8 = vrot.slane %v10161_v47, 1  ;;  %v10262_v40 = vrot.slane %v10161_v47, 2  ;;  %v5491_v16 = vadd.f32 %v27694_v34, %v4373_v44 }
 0x61d   : > { %v25209_v28 = vpop.f32.mrf.mxu0 }
 0x61e   : > { %v10237_v58 = vmax.f32 %v10161_v47, %v10202_v8  ;;  %v10203_v3 = vsel %vm2040_vm2, %v10194_v51, %v10202_v8  ;;  %v10263_v42 = vsel %vm2131_vm3, %v10254_v10, %v10262_v40  ;;  %v27688_v10 = vld [vmem:[#allocation27_spill] sm:$0xff]  ;;  %v5544_v30 = vadd.f32 %v27699_v11, %v5491_v16 }
 0x61f   : > { %10401 = vrot.lane.b32.xlu0 %v25153_v29, %s27614_s0  ;;  %v10233_v2 = vmax.f32 %v10157_v20, %v10203_v3  ;;  %v25217_v62 = vpop.f32.mrf.mxu0  ;;  %v27685_v20 = vld [vmem:[#allocation34_spill] sm:$0xff]  ;;  %v5534_v48 = vadd.f32 %v27688_v10, %v5481_v57  ;;  %v27693_v3 = vld [vmem:[#allocation28_spill] sm:$0xff] }
 0x620   : > { %v25204_v9 = vmax.f32 %v10237_v58, %v10262_v40  ;;  %v7003_v49 = vadd.f32 %v27685_v20, %v27684_v13 }
 0x621   : > { %v25219_v50 = vmax.f32 %v10233_v2, %v10263_v42  ;;  %v27696_v42 = vld [vmem:[#allocation36_spill] sm:$0xff] }
 0x622   : > { %v7056_v27 = vadd.f32 %v27689_v21, %v7003_v49  ;;  %v7013_v1 = vadd.f32 %v27696_v42, %v27695_v17  ;;  %v19744_v49 = vld [vmem:[%s27698_s12 + $0x70] ss:$8 sps:$4 sm:$0xff]  }
 0x623   : > { %10326 = vrot.lane.b32.xlu0 %v25189_v22, %s20470_s5  ;;  %v27701_v21 = vld [vmem:[#allocation30_spill] sm:$0xff] }
 0x627   : > { %10403 = vrot.lane.b32.xlu0 %v25189_v22, %s27614_s0 }
 0x62b   : > { %10340 = vrot.lane.b32.xlu0 %v25196_v43, %s20470_s5 }
 0x62f   : > { %10332 = vrot.lane.b32.xlu0 %v25163_v39, %s20470_s5 }
 0x633   : > { %10409 = vrot.lane.b32.xlu0 %v25163_v39, %s27614_s0 }
 0x637   : > { %10342 = vrot.lane.b32.xlu0 %v25204_v9, %s20470_s5 }
 0x639   : > { %v10038_v59 = vpop.f32.mrf.mxu1 }
 0x63a   : > { %v10039_v0 = vadd.f32 %v10038_v59, %v9985_v12  ;;  %v27691_v12 = vld [vmem:[#allocation17_spill] sm:$0xff]  ;;  %v5587_v59 = vadd.f32 %v27693_v3, %v5534_v48 }
 0x63b   : > { %v10040_v38 = vpop.f32.mrf.mxu1  ;;  %10419 = vrot.lane.b32.xlu0 %v25204_v9, %s27614_s0  ;;  %v27692_v47 = vsub.s32 2, %v27691_v12 }
 0x63c   : > { %v10041_v14 = vadd.f32 %v10040_v38, %v9987_v18  ;;  %v8613_v18 = vadd.f32 %v25088_v26, %v8560_v7  ;;  %v7075_v37 = vadd.f32 %v7056_v27, %v5587_v59  ;;  %v5597_v27 = vadd.f32 %v27701_v21, %v5544_v30 }
 0x63d   : > { %v10042_v51 = vpop.f32.mrf.mxu1  ;;  %v25236_v8 = vrot.slane %v25114_v45, %v27692_v47  ;;  %v27702_v21 = vlaneseq }
 0x63e   : > { %v10043_v2 = vadd.f32 %v10042_v51, %v9989_v46  ;;  %v27697_v51 = vsub.s32 3, %v27691_v12  ;;  %v8632_v10 = vadd.f32 %v8613_v18, %v7075_v37 }
 0x63f   : > { %v10091_v55 = vpop.f32.mrf.mxu0  ;;  %v10044_v15 = vpop.f32.mrf.mxu1  ;;  %10334 = vrot.lane.b32.xlu0 %v25219_v50, %s20470_s5  ;;  %vm10485_vm12 = vcmp.lt.s32.totalorder %v27702_v21, 416 }
 0x640   : > { %v10092_v25 = vadd.f32 %v10091_v55, %v10039_v0  ;;  %v10045_v46 = vadd.f32 %v10044_v15, %v9991_v24  ;;  %v25251_v26 = vrot.slane %v25114_v45, %v27697_v51  ;;  %v19746_v0 = vld [vmem:[%s27698_s12 + $0x74] ss:$8 sps:$4 sm:$0xff]   ;;  %v27700_v55 = vld [vmem:[#allocation37_spill] sm:$0xff] }
 0x641   : > { %v10093_v58 = vpop.f32.mrf.mxu0  ;;  %v10048_v40 = vpop.f32.mrf.mxu1  ;;  %v7066_v15 = vadd.f32 %v27700_v55, %v7013_v1  ;;  %11047 = vmatprep.subr.bf16.mxu1 %v19746_v0 }
 0x642   : > { %v10112_v41 = vadd.f32 %v10092_v25, %v25083_v54  ;;  %v10094_v52 = vadd.f32 %v10093_v58, %v10041_v14  ;;  %v10049_v23 = vadd.f32 %v10048_v40, %v9995_v63  ;;  %11048 = vmatpush1.bf16.msra.mxu1 %v19744_v49 }
 0x643   : > { %v10095_v4 = vpop.f32.mrf.mxu0  ;;  %v10050_v38 = vpop.f32.mrf.mxu1  ;;  %10411 = vrot.lane.b32.xlu0 %v25219_v50, %s27614_s0 }
 0x644   : > { %v10096_v57 = vadd.f32 %v10095_v4, %v10043_v2  ;;  %v10150_v13 = vadd.f32 %v25236_v8, %v10112_v41  ;;  %v10113_v54 = vadd.f32 %v10094_v52, %v25086_v5  ;;  %v10051_v25 = vadd.f32 %v10050_v38, %v9997_v32 }
 0x645   : > { %v10097_v20 = vpop.f32.mrf.mxu0  ;;  %v10052_v5 = vpop.f32.mrf.mxu1  ;;  %v7083_v2 = vadd.f32 %v7066_v15, %v5597_v27 }
 0x646   : > { %v10116_v24 = vadd.f32 %v10096_v57, %v25091_v6  ;;  %v10098_v45 = vadd.f32 %v10097_v20, %v10045_v46  ;;  %v10186_v63 = vrot.slane %v10150_v13, 1  ;;  %v25267_v6 = vadd.f32 %v25251_v26, %v10113_v54  ;;  %v19747_v20 = vld [vmem:[%s27698_s12 + $0x60] ss:$8 sps:$4 sm:$0xff]  }
 0x647   : > { %v10101_v48 = vpop.f32.mrf.mxu0  ;;  %10417 = vrot.lane.b32.xlu0 %v25196_v43, %s27614_s0  ;;  %v10053_v7 = vadd.f32 %v10052_v5, %v25209_v28  ;;  %v10054_v3 = vpop.f32.mrf.mxu1  ;;  %v10246_v41 = vrot.slane %v10150_v13, 2  ;;  %v8640_v54 = vadd.f32 %v25102_v31, %v7083_v2  ;;  %v19752_v31 = vld [vmem:[%s27698_s12 + $0x54] ss:$8 sps:$4 sm:$0xff]   ;;  %v19750_v5 = vld [vmem:[%s27698_s12 + $0x50] ss:$8 sps:$4 sm:$0xff]  }
 0x648   : > { %v10154_v14 = vadd.f32 %v25236_v8, %v10116_v24  ;;  %v10102_v56 = vadd.f32 %v10101_v48, %v10049_v23  ;;  %v10117_v44 = vadd.f32 %v10098_v45, %v8632_v10  ;;  %v10055_v16 = vadd.f32 %v10054_v3, %v25217_v62  ;;  %v19749_v62 = vld [vmem:[%s27698_s12 + $0x64] ss:$8 sps:$4 sm:$0xff]   ;;  %v19758_v2 = vld [vmem:[%s27698_s12 + $0x34] ss:$8 sps:$4 sm:$0xff]  }
 0x649   : > { %v10103_v12 = vpop.f32.mrf.mxu0  ;;  %v10189_v42 = vrot.slane %v25267_v6, 1  ;;  %11049 = vmatprep.subr.bf16.mxu1 %v19749_v62 }
 0x64a   : > { %v10187_v47 = vrot.slane %v10154_v14, 1  ;;  %v10247_v58 = vrot.slane %v10154_v14, 2  ;;  %v10120_v40 = vadd.f32 %v10102_v56, %v25094_v53  ;;  %v10104_v59 = vadd.f32 %v10103_v12, %v10051_v25  ;;  %11050 = vmatpush1.bf16.msra.mxu1 %v19747_v20  ;;  %v19776_v20 = vld [vmem:[%s27698_s12 + $0x174] ss:$8 sps:$4 sm:$0xff]  }
 0x64b   : > { %v25272_v32 = vadd.f32 %v25251_v26, %v10117_v44  ;;  %v10105_v52 = vpop.f32.mrf.mxu0  ;;  %11051 = vmatprep.subr.bf16.mxu1 %v19752_v31  ;;  %v27703_v56 = vmov 0.0   ;;  %11100 = vmatprep.subr.bf16.mxu0 %v19776_v20  ;;  %v19780_v31 = vld [vmem:[%s27698_s12 + $0x160] ss:$8 sps:$4 sm:$0xff]  }
 0x64c   : > { %v10158_v18 = vadd.f32 %v25236_v8, %v10120_v40  ;;  %v10121_v4 = vadd.f32 %v10104_v59, %v25097_v35  ;;  %v10106_v38 = vadd.f32 %v10105_v52, %v10053_v7  ;;  %v10188_v28 = vsel %vm2040_vm2, %v10186_v63, %v10187_v47  ;;  %10487 = vst.msk [vmem:[#allocation4] ss:$8 sm:$0xf] %vm10485_vm12, %v27703_v56  ;;  %v19756_v52 = vld [vmem:[%s27698_s12 + $0x30] ss:$8 sps:$4 sm:$0xff]  }
 0x64d   : > { %v10190_v34 = vrot.slane %v25272_v32, 1  ;;  %v10107_v53 = vpop.f32.mrf.mxu0  ;;  %v10226_v37 = vmax.f32 %v10150_v13, %v10188_v28  ;;  %v10248_v17 = vsel %vm2131_vm3, %v10246_v41, %v10247_v58  ;;  %v10250_v0 = vrot.slane %v25272_v32, 2  ;;  %10490 = vst.msk [vmem:[#allocation4 + $0x63] ss:$8 sm:$0xf] %vm10485_vm12, %v27703_v56 }
 0x64e   : > { %v10196_v1 = vrot.slane %v10158_v18, 1  ;;  %v10256_v57 = vrot.slane %v10158_v18, 2  ;;  %v10124_v46 = vadd.f32 %v10106_v38, %v25100_v36  ;;  %v10108_v35 = vadd.f32 %v10107_v53, %v10055_v16  ;;  %11052 = vmatpush1.bf16.msra.mxu1 %v19750_v5  ;;  %v19759_v38 = vld [vmem:[%s27698_s12 + $0x20] ss:$8 sps:$4 sm:$0xff]   ;;  %v19761_v28 = vld [vmem:[%s27698_s12 + $0x24] ss:$8 sps:$4 sm:$0xff]  }
 0x64f   : > { %v25283_v51 = vmax.f32 %v10226_v37, %v10248_v17  ;;  %v10159_v13 = vadd.f32 %v25251_v26, %v10121_v4  ;;  %v10191_v36 = vsel %vm2040_vm2, %v10189_v42, %v10190_v34  ;;  %v19764_v16 = vld [vmem:[%s27698_s12 + $0x14] ss:$8 sps:$4 sm:$0xff]   ;;  %v19765_v42 = vld [vmem:[%s27698_s12] ss:$8 sps:$4 sm:$0xff]   ;;  %v19786_v5 = vld [vmem:[%s27698_s12 + $0x150] ss:$8 sps:$4 sm:$0xff]  }
 0x650   : > { %v25293_v49 = vadd.f32 %v25236_v8, %v10124_v46  ;;  %v10125_v11 = vadd.f32 %v10108_v35, %v8640_v54  ;;  %v10197_v30 = vsel %vm2040_vm2, %v10187_v47, %v10196_v1  ;;  %v10257_v23 = vsel %vm2131_vm3, %v10247_v58, %v10256_v57  ;;  %v19753_v47 = vld [vmem:[%s27698_s12 + $0x40] ss:$8 sps:$4 sm:$0xff]   ;;  %v19755_v58 = vld [vmem:[%s27698_s12 + $0x44] ss:$8 sps:$4 sm:$0xff]   ;;  %v19768_v46 = vld [vmem:[%s27698_s12 + $0xf0] ss:$8 sps:$4 sm:$0xff]  }
 0x651   : > { %10320 = vrot.lane.b32.xlu1 %v25283_v51, %s20470_s5  ;;  %v10249_v8 = vrot.slane %v25267_v6, 2  ;;  %v10230_v24 = vmax.f32 %v10154_v14, %v10197_v30  ;;  %v10227_v15 = vmax.f32 %v25267_v6, %v10191_v36  ;;  %v10198_v27 = vrot.slane %v10159_v13, 1  ;;  %11053 = vmatprep.subr.bf16.mxu1 %v19755_v58  ;;  %v19773_v54 = vld [vmem:[%s27698_s12 + $0xe4] ss:$8 sps:$4 sm:$0xff]   ;;  %v19774_v35 = vld [vmem:[%s27698_s12 + $0x170] ss:$8 sps:$4 sm:$0xff]  }
 0x652   : > { %v25311_v55 = vadd.f32 %v25251_v26, %v10125_v11  ;;  %v10204_v10 = vrot.slane %v25293_v49, 1  ;;  %v10264_v45 = vrot.slane %v25293_v49, 2  ;;  %v10258_v63 = vrot.slane %v10159_v13, 2  ;;  %11054 = vmatpush1.bf16.msra.mxu1 %v19753_v47  ;;  %11101 = vmatpush1.bf16.msra.mxu0 %v19774_v35  ;;  %v19777_v36 = vld [vmem:[%s27698_s12 + $0xd0] ss:$8 sps:$4 sm:$0xff]  }
 0x653   : > { %v25316_v48 = vmax.f32 %v10230_v24, %v10257_v23  ;;  %v10251_v14 = vsel %vm2131_vm3, %v10249_v8, %v10250_v0  ;;  %11055 = vmatprep.subr.bf16.mxu1 %v19758_v2  ;;  %v10199_v4 = vsel %vm2040_vm2, %v10190_v34, %v10198_v27  ;;  %v19762_v34 = vld [vmem:[%s27698_s12 + $0x10] ss:$8 sps:$4 sm:$0xff]   ;;  %v19783_v11 = vld [vmem:[%s27698_s12 + $0xc0] ss:$8 sps:$4 sm:$0xff]   ;;  %v19785_v30 = vld [vmem:[%s27698_s12 + $0xc4] ss:$8 sps:$4 sm:$0xff]  }
 0x654   : > { %v10205_v26 = vsel %vm2040_vm2, %v10196_v1, %v10204_v10  ;;  %v10265_v25 = vsel %vm2131_vm3, %v10256_v57, %v10264_v45  ;;  %v10206_v44 = vrot.slane %v25311_v55, 1  ;;  %v10266_v7 = vrot.slane %v25311_v55, 2  ;;  %v19770_v1 = vld [vmem:[%s27698_s12 + $0xf4] ss:$8 sps:$4 sm:$0xff]   ;;  %v19807_v2 = vld [vmem:[%s27698_s12 + $0x80] ss:$8 sps:$4 sm:$0xff]  }
 0x655   : > { %10397 = vrot.lane.b32.xlu1 %v25283_v51, %s27614_s0  ;;  %v10234_v6 = vmax.f32 %v10158_v18, %v10205_v26  ;;  %v25328_v12 = vmax.f32 %v10227_v15, %v10251_v14  ;;  %v10231_v53 = vmax.f32 %v25272_v32, %v10199_v4  ;;  %v10259_v37 = vsel %vm2131_vm3, %v10250_v0, %v10258_v63  ;;  %v19767_v32 = vld [vmem:[%s27698_s12 + $0x4] ss:$8 sps:$4 sm:$0xff]   ;;  %v19788_v23 = vld [vmem:[%s27698_s12 + $0x154] ss:$8 sps:$4 sm:$0xff]   ;;  %v19789_v15 = vld [vmem:[%s27698_s12 + $0xb0] ss:$8 sps:$4 sm:$0xff]  }
 0x656   : > { %v10207_v3 = vsel %vm2040_vm2, %v10198_v27, %v10206_v44  ;;  %v10267_v59 = vsel %vm2131_vm3, %v10258_v63, %v10266_v7  ;;  %11056 = vmatpush1.bf16.msra.mxu1 %v19756_v52  ;;  %v10238_v57 = vmax.f32 %v25293_v49, %v10204_v10  ;;  %v19779_v49 = vld [vmem:[%s27698_s12 + $0xd4] ss:$8 sps:$4 sm:$0xff]   ;;  %v19782_v0 = vld [vmem:[%s27698_s12 + $0x164] ss:$8 sps:$4 sm:$0xff]   ;;  %v10239_v24 = vmax.f32 %v25311_v55, %v10206_v44  ;;  %v19792_v26 = vld [vmem:[%s27698_s12 + $0x140] ss:$8 sps:$4 sm:$0xff]  }
 0x657   : > { %v25336_v40 = vmax.f32 %v10234_v6, %v10265_v25  ;;  %v10235_v41 = vmax.f32 %v10159_v13, %v10207_v3  ;;  %11057 = vmatprep.subr.bf16.mxu1 %v19761_v28  ;;  %v25377_v17 = vmax.f32 %v10231_v53, %v10259_v37  ;;  %v19771_v13 = vld [vmem:[%s27698_s12 + $0xe0] ss:$8 sps:$4 sm:$0xff]   ;;  %11102 = vmatprep.subr.bf16.mxu0 %v19782_v0  ;;  %v19791_v8 = vld [vmem:[%s27698_s12 + $0xb4] ss:$8 sps:$4 sm:$0xff]   ;;  %v19794_v10 = vld [vmem:[%s27698_s12 + $0x144] ss:$8 sps:$4 sm:$0xff]  }
 0x658   : > { %v25405_v62 = vmax.f32 %v10238_v57, %v10264_v45  ;;  %11103 = vmatpush1.bf16.msra.mxu0 %v19780_v31  ;;  %v19797_v27 = vld [vmem:[%s27698_s12 + $0xa4] ss:$8 sps:$4 sm:$0xff]   ;;  %v25459_v14 = vmax.f32 %v10239_v24, %v10266_v7  ;;  %v19795_v25 = vld [vmem:[%s27698_s12 + $0xa0] ss:$8 sps:$4 sm:$0xff]   ;;  %v19798_v55 = vld [vmem:[%s27698_s12 + $0x130] ss:$8 sps:$4 sm:$0xff]  }
 0x659   : > { %10322 = vrot.lane.b32.xlu1 %v25328_v12, %s20470_s5  ;;  %v25352_v18 = vmax.f32 %v10235_v41, %v10267_v59  ;;  %11104 = vmatprep.subr.bf16.mxu0 %v19788_v23  ;;  %v19800_v6 = vld [vmem:[%s27698_s12 + $0x134] ss:$8 sps:$4 sm:$0xff]   ;;  %v19801_v44 = vld [vmem:[%s27698_s12 + $0x90] ss:$8 sps:$4 sm:$0xff]   ;;  %v19804_v3 = vld [vmem:[%s27698_s12 + $0x120] ss:$8 sps:$4 sm:$0xff]  }
 0x65a   : > { %11058 = vmatpush1.bf16.msra.mxu1 %v19759_v38  ;;  %v19803_v47 = vld [vmem:[%s27698_s12 + $0x94] ss:$8 sps:$4 sm:$0xff]   ;;  %v19806_v59 = vld [vmem:[%s27698_s12 + $0x124] ss:$8 sps:$4 sm:$0xff]   ;;  %v19810_v53 = vld [vmem:[%s27698_s12 + $0x110] ss:$8 sps:$4 sm:$0xff]  }
 0x65b   : > { %11059 = vmatprep.subr.bf16.mxu1 %v19764_v16  ;;  %v19809_v4 = vld [vmem:[%s27698_s12 + $0x84] ss:$8 sps:$4 sm:$0xff]   ;;  %v19812_v38 = vld [vmem:[%s27698_s12 + $0x114] ss:$8 sps:$4 sm:$0xff]  }
 0x65c   : > { %11105 = vmatpush1.bf16.msra.mxu0 %v19786_v5  ;;  %v19824_v57 = vld [vmem:[%s27698_s12 + $0x194] ss:$8 sps:$4 sm:$0xff]   ;;  %v19830_v35 = vld [vmem:[%s27698_s12 + $0x184] ss:$8 sps:$4 sm:$0xff]  }
 0x65d   : > { %10399 = vrot.lane.b32.xlu1 %v25328_v12, %s27614_s0  ;;  %11106 = vmatprep.subr.bf16.mxu0 %v19794_v10 }
 0x65e   : > { %11060 = vmatpush1.bf16.msra.mxu1 %v19762_v34  ;;  %v19818_v34 = vld [vmem:[%s27698_s12 + $0x104] ss:$8 sps:$4 sm:$0xff]  }
 0x65f   : > { %11061 = vmatprep.subr.bf16.mxu1 %v19767_v32 }
 0x660   : > { %11107 = vmatpush1.bf16.msra.mxu0 %v19792_v26 }
 0x661   : > { %10328 = vrot.lane.b32.xlu1 %v25316_v48, %s20470_s5  ;;  %11108 = vmatprep.subr.bf16.mxu0 %v19800_v6 }
 0x662   : > { %11062 = vmatpush1.bf16.msra.mxu1 %v19765_v42 }
 0x663   : > { %11063 = vmatprep.subr.bf16.mxu1 %v19770_v1  ;;  %v19816_v1 = vld [vmem:[%s27698_s12 + $0x100] ss:$8 sps:$4 sm:$0xff]  }
 0x664   : > { %11109 = vmatpush1.bf16.msra.mxu0 %v19798_v55 }
 0x665   : > { %10405 = vrot.lane.b32.xlu1 %v25316_v48, %s27614_s0  ;;  %11110 = vmatprep.subr.bf16.mxu0 %v19806_v59 }
 0x666   : > { %11064 = vmatpush2.bf16.msra.mxu1 %v19768_v46 }
 0x667   : > { %11065 = vmatprep.subr.bf16.mxu1 %v19773_v54  ;;  %v19822_v54 = vld [vmem:[%s27698_s12 + $0x190] ss:$8 sps:$4 sm:$0xff]  }
 0x668   : > { %11111 = vmatpush1.bf16.msra.mxu0 %v19804_v3 }
 0x669   : > { %10330 = vrot.lane.b32.xlu1 %v25377_v17, %s20470_s5  ;;  %11112 = vmatprep.subr.bf16.mxu0 %v19812_v38 }
 0x66a   : > { %11066 = vmatpush2.bf16.msra.mxu1 %v19771_v13 }
 0x66b   : > { %11067 = vmatprep.subr.bf16.mxu1 %v19779_v49  ;;  %v19828_v49 = vld [vmem:[%s27698_s12 + $0x180] ss:$8 sps:$4 sm:$0xff]  }
 0x66c   : > { %11113 = vmatpush1.bf16.msra.mxu0 %v19810_v53 }
 0x66d   : > { %10407 = vrot.lane.b32.xlu1 %v25377_v17, %s27614_s0  ;;  %11114 = vmatprep.subr.bf16.mxu0 %v19818_v34  ;;  %s755_s0 = sand.u32 1, %s20456_s2  }
 0x66e   : > { %11068 = vmatpush2.bf16.msra.mxu1 %v19777_v36  ;;  %v19836_v36 = vld [vmem:[%s27705_s11 + $0x74] ss:$8 sps:$4 sm:$0xff]   ;;  %s16132_s3 = scalar_lea.sflag [#allocation7], %s755_s0 }
 0x66f   : > { %11069 = vmatprep.subr.bf16.mxu1 %v19785_v30 }
 0x670   : > { %11115 = vmatpush1.bf16.msra.mxu0 %v19816_v1 }
 0x671   : > { %10344 = vrot.lane.b32.xlu1 %v25405_v62, %s20470_s5  ;;  %11128 = vmatprep.subr.bf16.mxu0 %v19824_v57 }
 0x672   : > { %11070 = vmatpush2.bf16.msra.mxu1 %v19783_v11 }
 0x673   : > { %11071 = vmatprep.subr.bf16.mxu1 %v19791_v8 }
 0x674   : > { %11129 = vmatpush2.bf16.msra.mxu0 %v19822_v54 }
 0x675   : > { %10421 = vrot.lane.b32.xlu1 %v25405_v62, %s27704_s7  ;;  %11130 = vmatprep.subr.bf16.mxu0 %v19830_v35 }
 0x676   : > { %11072 = vmatpush2.bf16.msra.mxu1 %v19789_v15 }
 0x677   : > { %11073 = vmatprep.subr.bf16.mxu1 %v19797_v27 }
 0x678   : > { %11131 = vmatpush2.bf16.msra.mxu0 %v19828_v49 }
 0x679   : > { %10336 = vrot.lane.b32.xlu1 %v25336_v40, %s20470_s5  ;;  %11419 = vmatprep.subr.bf16.mxu0 %v19836_v36 }
 0x67a   : > { %11074 = vmatpush2.bf16.msra.mxu1 %v19795_v25 }
 0x67b   : > { %11075 = vmatprep.subr.bf16.mxu1 %v19803_v47 }
 0x67d   : > { %10413 = vrot.lane.b32.xlu1 %v25336_v40, %s27704_s7  ;;  %v10317_v45 = vpop.permute.xlu0 %10316 }
 0x67e   : > { %11076 = vmatpush2.bf16.msra.mxu1 %v19801_v44 }
 0x67f   : > { %11077 = vmatprep.subr.bf16.mxu1 %v19809_v4 }
 0x681   : > { %10346 = vrot.lane.b32.xlu1 %v25459_v14, %s20470_s5  ;;  %v10394_v63 = vpop.permute.xlu0 %10393 }
 0x682   : > { %11078 = vmatpush2.bf16.msra.mxu1 %v19807_v2 }
 0x685   : > { %10338 = vrot.lane.b32.xlu1 %v25352_v18, %s20470_s5  ;;  %v25480_v7 = vpop.permute.xlu0 %10318 }
 0x686   : > { %v10349_v58 = vsel %vm10348_vm13, %v10317_v45, %v25480_v7 }
 0x687   : > { %v10377_v41 = vmax.f32 %v25144_v61, %v10349_v58  ;;  %v19815_v61 = vld [vmem:[%s27705_s11 + $0x174] ss:$8 sps:$4 sm:$0xff]  }
 0x688   : > { %11472 = vmatprep.subr.bf16.mxu1 %v19815_v61 }
 0x689   : > { %10415 = vrot.lane.b32.xlu1 %v25352_v18, %s27704_s7  ;;  %v25499_v52 = vpop.permute.xlu0 %10395 }
 0x68a   : > { %v10425_v28 = vsel %vm770_vm1, %v10394_v63, %v25499_v52 }
 0x68b   : > { %v10453_v16 = vmax.f32 %v10377_v41, %v10425_v28 }
 0x68d   : > { %v10469_v37 = vmax.f32 %v10453_v16, 0.0  ;;  %10423 = vrot.lane.b32.xlu1 %v25459_v14, %s27704_s7  ;;  %v10325_v42 = vpop.permute.xlu0 %10324  ;;  %s756_s7 = scalar_lea.vmem [#allocation6], %s755_s0 }
 0x68e   : > { %s16144_s29 = sshll.u32 %s756_s7, 4  ;;  %s16145_s29 = int_to_ptr.vmem [resolvable:$true] %s16144_s29 }
 0x68f   : > { %v10508_v32 = vrot.slane %v10469_v37, 7  ;;  %s20404_s28 = scalar_lea.vmem %s16145_s29, 16 }
 0x690   : > { %p20405_p11 = scmp.ne.s32.totalorder %s16145_s29, %s20404_s28 }
 0x691   : > { %10552 = vst [vmem:[#allocation4] sm:$0xfe] %v10508_v32  ;;  %v10402_v46 = vpop.permute.xlu0 %10401 }
 0x692   : > { %p20406_p12 = pnand %p20405_p11, %p20643_p5 }
 0x694   : > { %p20407_p13 = pneg %p20406_p12 }
 0x695   : > { %v25532_v20 = vpop.permute.xlu0 %10326 }
 0x696   : > { %v10352_v13 = vsel %vm10348_vm13, %v10325_v42, %v25532_v20 }
 0x697   : > { %v10381_v31 = vmax.f32 %v25153_v29, %v10352_v13 }
 0x698   : > { %v10647_v61 = vld [vmem:[#allocation4] sm:$0xfe] }
 0x699   : > { %v25543_v0 = vpop.permute.xlu0 %10403  ;;  %v11525_v1 = vld [vmem:[#allocation4] sm:$0xfc] }
 0x69a   : > { %v10428_v11 = vsel %vm770_vm1, %v10402_v46, %v25543_v0 }
 0x69b   : > { %v10457_v30 = vmax.f32 %v10381_v31, %v10428_v11 }
 0x69d   : > { %v10473_v23 = vmax.f32 %v10457_v30, 0.0  ;;  %v10341_v8 = vpop.permute.xlu0 %10340 }
 0x69f   : > { %v10512_v24 = vrot.slane %v10473_v23, 7 }
 0x6a1   : > { %v25548_v5 = vsel %vm2537_vm7, %v10508_v32, %v10512_v24  ;;  %v10333_v15 = vpop.permute.xlu0 %10332 }
 0x6a2   : > { %v10655_v16 = vpack.c.bf16 %v25548_v5, %v10647_v61  ;;  %v11533_v54 = vpack.c.bf16 %v25548_v5, %v11525_v1 }
 0x6a4   : > { %v10718_v34 = vshll.u32 %v10655_v16, 16  ;;  %v10716_v11 = vshrl.u32 %v10655_v16, 16  ;;  %v11601_v23 = vrot.slane %v11533_v54, 1 }
 0x6a5   : > { %v10410_v10 = vpop.permute.xlu0 %10409 }
 0x6a6   : > { %v10720_v13 = vrot.slane %v10718_v34, 1 }
 0x6a9   : > { %v25550_v45 = vpop.permute.xlu0 %10342 }
 0x6aa   : > { %v10358_v55 = vsel %vm10348_vm13, %v10341_v8, %v25550_v45 }
 0x6ab   : > { %v10389_v47 = vmax.f32 %v25196_v43, %v10358_v55 }
 0x6ad   : > { %v25552_v27 = vpop.permute.xlu0 %10419 }
 0x6b1   : > { %v25554_v29 = vpop.permute.xlu0 %10334 }
 0x6b2   : > { %v10355_v26 = vsel %vm10348_vm13, %v10333_v15, %v25554_v29  ;;  %v10721_v15 = vor.u32 %v10720_v13, %v10716_v11 }
 0x6b3   : > { %v10385_v25 = vmax.f32 %v25163_v39, %v10355_v26 }
 0x6b5   : > { %v25559_v63 = vpop.permute.xlu0 %10411 }
 0x6b6   : > { %v10431_v6 = vsel %vm770_vm1, %v10410_v10, %v25559_v63 }
 0x6b7   : > { %v10461_v44 = vmax.f32 %v10385_v25, %v10431_v6 }
 0x6b9   : > { %v10477_v58 = vmax.f32 %v10461_v44, 0.0  ;;  %v10418_v3 = vpop.permute.xlu0 %10417 }
 0x6ba   : > { %v10434_v59 = vsel %vm770_vm1, %v10418_v3, %v25552_v27 }
 0x6bb   : > { %v10520_v2 = vrot.slane %v10477_v58, 7  ;;  %v10465_v41 = vmax.f32 %v10389_v47, %v10434_v59 }
 0x6bd   : > { %v25569_v39 = vsel %vm2537_vm7, %v10512_v24, %v10520_v2  ;;  %v10481_v4 = vmax.f32 %v10465_v41, 0.0 }
 0x6bf   : > { %v10528_v38 = vrot.slane %v10481_v4, 7 }
 0x6c1   : > { %v10529_v28 = vsel %vm2537_vm7, %v10520_v2, %v10528_v38 }
 0x6c2   : > { %10566 = vst [vmem:[#allocation4 + $0x60] sm:$0x7] %v10529_v28 }
 0x6c3   : > { %v10321_v53 = vpop.permute.xlu1 %10320 }
 0x6c4   : > { %v10350_v43 = vsel %vm10348_vm13, %v25480_v7, %v10321_v53 }
 0x6c5   : > { %v10378_v37 = vmax.f32 %v25160_v19, %v10350_v43 }
 0x6c7   : > { %v10398_v42 = vpop.permute.xlu1 %10397 }
 0x6c8   : > { %v10426_v32 = vsel %vm770_vm1, %v25499_v52, %v10398_v42 }
 0x6c9   : > { %v10454_v57 = vmax.f32 %v10378_v37, %v10426_v32  ;;  %v10651_v46 = vld [vmem:[#allocation4 + $0x60] sm:$0x7] }
 0x6ca   : > { %v25580_v35 = vpack.c.bf16 %v10651_v46, %v25569_v39  ;;  %v11529_v49 = vld [vmem:[#allocation4 + $0x60] sm:$0xf] }
 0x6cb   : > { %v10470_v36 = vmax.f32 %v10454_v57, 0.0  ;;  %v10323_v31 = vpop.permute.xlu1 %10322  ;;  %v11537_v7 = vpack.c.bf16 %v11529_v49, %v25569_v39 }
 0x6cc   : > { %v10351_v19 = vsel %vm10348_vm13, %v10321_v53, %v10323_v31  ;;  %v10723_v30 = vshll.u32 %v25580_v35, 16  ;;  %v10380_v24 = vmax.f32 %v25328_v12, %v10323_v31 }
 0x6cd   : > { %v10509_v52 = vrot.slane %v10470_v36, 7  ;;  %v25585_v8 = vrot.slane %v11537_v7, 1  ;;  %v10379_v26 = vmax.f32 %v25283_v51, %v10351_v19 }
 0x6ce   : > { %v25588_v10 = vrot.slane %v10723_v30, 1 }
 0x6cf   : > { %10553 = vst [vmem:[#allocation4 + $0x8] sm:$0xfe] %v10509_v52  ;;  %v10400_v25 = vpop.permute.xlu1 %10399  ;;  %v25593_v55 = vsel %vm2040_vm2, %v11601_v23, %v25585_v8 }
 0x6d0   : > { %v10427_v6 = vsel %vm770_vm1, %v10398_v42, %v10400_v25  ;;  %v10456_v44 = vmax.f32 %v10380_v24, %v10400_v25  ;;  %v25598_v47 = vsel %vm3050_vm9, %v10721_v15, %v25588_v10 }
 0x6d1   : > { %v10455_v58 = vmax.f32 %v10379_v26, %v10427_v6 }
 0x6d2   : > { %v10472_v12 = vmax.f32 %v10456_v44, 0.0 }
 0x6d3   : > { %v10471_v3 = vmax.f32 %v10455_v58, 0.0  ;;  %v10329_v59 = vpop.permute.xlu1 %10328 }
 0x6d4   : > { %v10511_v2 = vrot.slane %v10472_v12, 7  ;;  %v10353_v51 = vsel %vm10348_vm13, %v25532_v20, %v10329_v59 }
 0x6d5   : > { %v10510_v41 = vrot.slane %v10471_v3, 7  ;;  %v10382_v4 = vmax.f32 %v25189_v22, %v10353_v51 }
 0x6d6   : > { %10556 = vst.msk [vmem:[#allocation4 + $0x18] sm:$0xfe] %vm10555_vm14, %v10511_v2  ;;  %v10648_v58 = vld [vmem:[#allocation4 + $0x8] sm:$0xfe] }
 0x6d7   : > { %10554 = vst [vmem:[#allocation4 + $0x10] sm:$0xfe] %v10510_v41  ;;  %v10406_v38 = vpop.permute.xlu1 %10405 }
 0x6d8   : > { %v10429_v28 = vsel %vm770_vm1, %v25543_v0, %v10406_v38 }
 0x6d9   : > { %v10458_v61 = vmax.f32 %v10382_v4, %v10429_v28 }
 0x6db   : > { %v10474_v16 = vmax.f32 %v10458_v61, 0.0  ;;  %v10331_v53 = vpop.permute.xlu1 %10330 }
 0x6dc   : > { %v10354_v43 = vsel %vm10348_vm13, %v10329_v59, %v10331_v53  ;;  %v10384_v37 = vmax.f32 %v25377_v17, %v10331_v53  ;;  %v11526_v53 = vld [vmem:[#allocation4 + $0x8] sm:$0xfc] }
 0x6dd   : > { %v10514_v34 = vrot.slane %v10474_v16, 7  ;;  %v10383_v20 = vmax.f32 %v25316_v48, %v10354_v43 }
 0x6df   : > { %v25608_v42 = vsel %vm2537_vm7, %v10509_v52, %v10514_v34  ;;  %v10408_v32 = vpop.permute.xlu1 %10407 }
 0x6e0   : > { %v10430_v22 = vsel %vm770_vm1, %v10406_v38, %v10408_v32  ;;  %v10460_v1 = vmax.f32 %v10384_v37, %v10408_v32 }
 0x6e1   : > { %v10459_v57 = vmax.f32 %v10383_v20, %v10430_v22 }
 0x6e2   : > { %v10476_v46 = vmax.f32 %v10460_v1, 0.0 }
 0x6e3   : > { %v10475_v0 = vmax.f32 %v10459_v57, 0.0  ;;  %v10345_v54 = vpop.permute.xlu1 %10344 }
 0x6e4   : > { %v10518_v13 = vrot.slane %v10476_v46, 7  ;;  %v10359_v49 = vsel %vm10348_vm13, %v25550_v45, %v10345_v54 }
 0x6e5   : > { %v10516_v36 = vrot.slane %v10475_v0, 7  ;;  %v10390_v48 = vmax.f32 %v25204_v9, %v10359_v49 }
 0x6e6   : > { %v10519_v17 = vsel %vm2537_vm7, %v10511_v2, %v10518_v13 }
 0x6e7   : > { %v25616_v31 = vsel %vm2537_vm7, %v10510_v41, %v10516_v36  ;;  %10561 = vst.msk [vmem:[#allocation4 + $0x38] sm:$0xff] %vm10560_vm15, %v10519_v17  ;;  %v10422_v7 = vpop.permute.xlu1 %10421 }
 0x6e8   : > { %v10435_v19 = vsel %vm770_vm1, %v25552_v27, %v10422_v7 }
 0x6e9   : > { %v10466_v11 = vmax.f32 %v10390_v48, %v10435_v19 }
 0x6eb   : > { %v10337_v30 = vpop.permute.xlu1 %10336  ;;  %v10482_v15 = vmax.f32 %v10466_v11, 0.0 }
 0x6ec   : > { %v10356_v52 = vsel %vm10348_vm13, %v25554_v29, %v10337_v30  ;;  %v10656_v29 = vpack.c.bf16 %v25608_v42, %v10648_v58  ;;  %v10650_v58 = vld [vmem:[#allocation4 + $0x18] sm:$0xfe] }
 0x6ed   : > { %v10386_v45 = vmax.f32 %v25219_v50, %v10356_v52  ;;  %v10530_v9 = vrot.slane %v10482_v15, 7 }
 0x6ee   : > { %v10730_v51 = vshll.u32 %v10656_v29, 16  ;;  %v10728_v17 = vshrl.u32 %v10656_v29, 16  ;;  %v10578_v15 = vld [vmem:[#allocation4 + $0x38] sm:$0xff]  ;;  %v10649_v29 = vld [vmem:[#allocation4 + $0x10] sm:$0xfe] }
 0x6ef   : > { %v10414_v23 = vpop.permute.xlu1 %10413 }
 0x6f0   : > { %v10432_v24 = vsel %vm770_vm1, %v25559_v63, %v10414_v23 }
 0x6f1   : > { %v10462_v26 = vmax.f32 %v10386_v45, %v10432_v24 }
 0x6f3   : > { %v10478_v25 = vmax.f32 %v10462_v26, 0.0  ;;  %v10347_v6 = vpop.permute.xlu1 %10346 }
 0x6f4   : > { %v10360_v41 = vsel %vm10348_vm13, %v10345_v54, %v10347_v6  ;;  %v10392_v61 = vmax.f32 %v25459_v14, %v10347_v6 }
 0x6f5   : > { %v10522_v44 = vrot.slane %v10478_v25, 7  ;;  %v10391_v43 = vmax.f32 %v25405_v62, %v10360_v41 }
 0x6f7   : > { %v25628_v27 = vsel %vm2537_vm7, %v10514_v34, %v10522_v44  ;;  %v10531_v12 = vsel %vm2537_vm7, %v10522_v44, %v10530_v9  ;;  %v10339_v3 = vpop.permute.xlu1 %10338  ;;  %v19821_v44 = vld [vmem:[%s27705_s11 + $0x164] ss:$8 sps:$4 sm:$0xff]  }
 0x6f8   : > { %10567 = vst [vmem:[#allocation4 + $0x68] sm:$0x7] %v10531_v12  ;;  %v10357_v50 = vsel %vm10348_vm13, %v10337_v30, %v10339_v3  ;;  %v10388_v63 = vmax.f32 %v25352_v18, %v10339_v3  ;;  %v10732_v18 = vrot.slane %v10730_v51, 1  ;;  %v10658_v3 = vpack.c.bf16 %v10578_v15, %v10650_v58  ;;  %v19825_v51 = vld [vmem:[%s27705_s11 + $0x150] ss:$8 sps:$4 sm:$0xff]  }
 0x6f9   : > { %v10387_v59 = vmax.f32 %v25336_v40, %v10357_v50  ;;  %v11534_v40 = vpack.c.bf16 %v25608_v42, %v11526_v53  ;;  %v10657_v50 = vpack.c.bf16 %v25616_v31, %v10649_v29  ;;  %v19845_v29 = vld [vmem:[%s27705_s11 + $0x124] ss:$8 sps:$4 sm:$0xff]  }
 0x6fa   : > { %v10733_v45 = vor.u32 %v10732_v18, %v10728_v17 }
 0x6fb   : > { %v10416_v2 = vpop.permute.xlu1 %10415  ;;  %v10742_v41 = vshll.u32 %v10657_v50, 16  ;;  %v10740_v17 = vshrl.u32 %v10657_v50, 16  ;;  %v19840_v50 = vld [vmem:[%s27705_s11 + $0x60] ss:$8 sps:$4 sm:$0xff]  }
 0x6fc   : > { %v10433_v4 = vsel %vm770_vm1, %v10414_v23, %v10416_v2  ;;  %v10464_v38 = vmax.f32 %v10388_v63, %v10416_v2  ;;  %v19819_v63 = vld [vmem:[%s27705_s11 + $0x160] ss:$8 sps:$4 sm:$0xff]   ;;  %v10754_v2 = vshll.u32 %v10658_v3, 16 }
 0x6fd   : > { %v10463_v28 = vmax.f32 %v10387_v59, %v10433_v4  ;;  %v19827_v59 = vld [vmem:[%s27705_s11 + $0x154] ss:$8 sps:$4 sm:$0xff]   ;;  %v11528_v4 = vld [vmem:[#allocation4 + $0x18] sm:$0xfc] }
 0x6fe   : > { %v10480_v16 = vmax.f32 %v10464_v38, 0.0  ;;  %v10574_v38 = vld [vmem:[#allocation4 + $0x18] sm:$0xff] }
 0x6ff   : > { %v10479_v34 = vmax.f32 %v10463_v28, 0.0  ;;  %v10424_v37 = vpop.permute.xlu1 %10423  ;;  %v10652_v20 = vld [vmem:[#allocation4 + $0x68] sm:$0x7]  ;;  %v19833_v28 = vld [vmem:[%s27705_s11 + $0x144] ss:$8 sps:$4 sm:$0xff]  }
 0x700   : > { %v11530_v32 = vld [vmem:[#allocation4 + $0x68] sm:$0xf]  ;;  %v10526_v22 = vrot.slane %v10480_v16, 7  ;;  %v10436_v1 = vsel %vm770_vm1, %v10422_v7, %v10424_v37  ;;  %v10468_v57 = vmax.f32 %v10392_v61, %v10424_v37  ;;  %v10660_v46 = vpack.c.bf16 %v10652_v20, %v25628_v27  ;;  %v11527_v16 = vld [vmem:[#allocation4 + $0x10] sm:$0xfc] }
 0x701   : > { %v10524_v0 = vrot.slane %v10479_v34, 7  ;;  %v10467_v14 = vmax.f32 %v10391_v43, %v10436_v1  ;;  %v11538_v54 = vpack.c.bf16 %v11530_v32, %v25628_v27  ;;  %v11604_v7 = vrot.slane %v11534_v40, 1 }
 0x702   : > { %v10527_v62 = vsel %vm2537_vm7, %v10518_v13, %v10526_v22  ;;  %v10484_v49 = vmax.f32 %v10468_v57, 0.0  ;;  %v10735_v48 = vshll.u32 %v10660_v46, 16  ;;  %v10766_v24 = vshrl.u32 %v10660_v46, 16  ;;  %v19813_v13 = vld [vmem:[%s27705_s11 + $0x170] ss:$8 sps:$4 sm:$0xff]  }
 0x703   : > { %v25645_v19 = vsel %vm2537_vm7, %v10516_v36, %v10524_v0  ;;  %10565 = vst.msk [vmem:[#allocation4 + $0x58] sm:$0xff] %vm10560_vm15, %v10527_v62  ;;  %v10483_v11 = vmax.f32 %v10467_v14, 0.0  ;;  %v25648_v30 = vrot.slane %v11538_v54, 1  ;;  %v11536_v61 = vpack.c.bf16 %v10578_v15, %v11528_v4  ;;  %v19849_v4 = vld [vmem:[%s27705_s11 + $0x110] ss:$8 sps:$4 sm:$0xff]  }
 0x704   : > { %v10534_v52 = vrot.slane %v10484_v49, 7  ;;  %v10737_v23 = vrot.slane %v10735_v48, 1  ;;  %v11535_v20 = vpack.c.bf16 %v25616_v31, %v11527_v16  ;;  %v10756_v32 = vrot.slane %v10754_v2, 1  ;;  %v19851_v2 = vld [vmem:[%s27705_s11 + $0x114] ss:$8 sps:$4 sm:$0xff]  }
 0x705   : > { %v10532_v26 = vrot.slane %v10483_v11, 7  ;;  %v25655_v36 = vsel %vm2040_vm2, %v11604_v7, %v25648_v30  ;;  %v10744_v46 = vrot.slane %v10742_v41, 1  ;;  %v10752_v14 = vshrl.u32 %v10658_v3, 16  ;;  %v19839_v11 = vld [vmem:[%s27705_s11 + $0x134] ss:$8 sps:$4 sm:$0xff]  }
 0x706   : > { %v10535_v25 = vsel %vm2537_vm7, %v10526_v22, %v10534_v52  ;;  %v10738_v6 = vsel %vm3050_vm9, %v10733_v45, %v10737_v23  ;;  %v10768_v9 = vor.u32 %v10766_v24, %v10737_v23  ;;  %v11610_v62 = vrot.slane %v11536_v61, 1  ;;  %v19857_v16 = vld [vmem:[%s27705_s11 + $0x104] ss:$8 sps:$4 sm:$0xff]  }
 0x707   : > { %v10533_v12 = vsel %vm2537_vm7, %v10524_v0, %v10532_v26  ;;  %10570 = vst.msk [vmem:[#allocation4 + $0x78] sm:$0x7] %vm10569_vm0, %v10535_v25  ;;  %11079 = vmatprep.mubr.bf16.mxu1 %v10738_v6  ;;  %v19831_v0 = vld [vmem:[%s27705_s11 + $0x140] ss:$8 sps:$4 sm:$0xff]   ;;  %v11607_v7 = vrot.slane %v11535_v20, 1  ;;  %v10757_v45 = vor.u32 %v10756_v32, %v10752_v14  ;;  %vm12146_vm1 = vcmp.lt.s32.totalorder %v27702_v21, 192 }
 0x708   : > { %10568 = vst [vmem:[#allocation4 + $0x70] sm:$0x7] %v10533_v12  ;;  %11080 = vmatmul.mubr.bf16.vlgmr.msra.gmra.mxu1 %v25598_v47  ;;  %v10763_v47 = vshrl.u32 %v25580_v35, 16  ;;  %v10590_v35 = vpack.c.bf16 %v10578_v15, %v10574_v38  ;;  %v19834_v26 = vld [vmem:[%s27705_s11 + $0x70] ss:$8 sps:$4 sm:$0xff]  }
 0x709   : > { %11473 = vmatpush1.bf16.msra.mxu1 %v19813_v13  ;;  %11089 = vmatprep.mubr.bf16.mxu1 %v10768_v9  ;;  %v10745_v13 = vor.u32 %v10744_v46, %v10740_v17  ;;  %v19842_v12 = vld [vmem:[%s27705_s11 + $0x64] ss:$8 sps:$4 sm:$0xff]   ;;  %v10572_v38 = vld [vmem:[#allocation4 + $0x8] sm:$0xff]  ;;  %12148 = vst.msk [vmem:[#allocation5] ss:$8 sm:$0x3] %vm12146_vm1, %v27703_v56 }
 0x70a   : > { %11474 = vmatprep.subr.bf16.mxu1 %v19821_v44  ;;  %v10765_v53 = vor.u32 %v10763_v47, %v25588_v10  ;;  %v25680_v43 = vld [vmem:[#allocation4 + $0x58] sm:$0xff]  ;;  %v19837_v44 = vld [vmem:[%s27705_s11 + $0x130] ss:$8 sps:$4 sm:$0xff]   ;;  %v10588_v61 = vpack.c.bf16 %v25608_v42, %v10572_v38  ;;  %v19860_v42 = vld [vmem:[%s27705_s11 + $0x34] ss:$8 sps:$4 sm:$0xff]  }
 0x70b   : > { %v19846_v47 = vld [vmem:[%s27705_s11 + $0x50] ss:$8 sps:$4 sm:$0xff]   ;;  %v19869_v32 = vld [vmem:[%s27705_s11 + $0x184] ss:$8 sps:$4 sm:$0xff]   ;;  %v19912_v38 = vld [vmem:[%s27705_s11 + $0xa0] ss:$8 sps:$4 sm:$0xff]  }
 0x70c   : > { %v19858_v20 = vld [vmem:[%s27705_s11 + $0x30] ss:$8 sps:$4 sm:$0xff]   ;;  %v19881_v17 = vld [vmem:[%s27566_s13 + $0x64] ss:$8 sps:$4 sm:$0xff]   ;;  %v20043_v21 = vld [vmem:[%s27571_s18 + $0x74] ss:$8 sps:$4 sm:$0xff]  }
 0x70d   : > { %11475 = vmatpush1.bf16.msra.mxu1 %v19819_v63  ;;  %v19843_v63 = vld [vmem:[%s27705_s11 + $0x120] ss:$8 sps:$4 sm:$0xff]   ;;  %v19870_v46 = vld [vmem:[%s27705_s11 + $0x10] ss:$8 sps:$4 sm:$0xff]  }
 0x70e   : > { %11476 = vmatprep.subr.bf16.mxu1 %v19827_v59  ;;  %v10654_v34 = vld [vmem:[#allocation4 + $0x78] sm:$0x7]  ;;  %v19848_v59 = vld [vmem:[%s27705_s11 + $0x54] ss:$8 sps:$4 sm:$0xff]   ;;  %v19873_v14 = vld [vmem:[%s27566_s13 + $0x70] ss:$8 sps:$4 sm:$0xff]  }
 0x70f   : > { %v11532_v37 = vld [vmem:[#allocation4 + $0x78] sm:$0xf]  ;;  %v10662_v18 = vpack.c.bf16 %v10654_v34, %v25680_v43  ;;  %v10653_v40 = vld [vmem:[#allocation4 + $0x70] sm:$0x7] }
 0x710   : > { %v11540_v22 = vpack.c.bf16 %v11532_v37, %v25680_v43  ;;  %v11531_v1 = vld [vmem:[#allocation4 + $0x70] sm:$0xf]  ;;  %11090 = vmatmul.mubr.bf16.gmra.mxu1 %v10765_v53  ;;  %v10661_v57 = vpack.c.bf16 %v10653_v40, %v25645_v19  ;;  %v19852_v53 = vld [vmem:[%s27705_s11 + $0x40] ss:$8 sps:$4 sm:$0xff]   ;;  %v19863_v37 = vld [vmem:[%s27705_s11 + $0x194] ss:$8 sps:$4 sm:$0xff]  }
 0x711   : > { %v11539_v10 = vpack.c.bf16 %v11531_v1, %v25645_v19  ;;  %11477 = vmatpush1.bf16.msra.mxu1 %v19825_v51  ;;  %17357 = vmatprep.mubr.msk.bf16.mxu1 %vm10560_vm15, %v10590_v35  ;;  %v10759_v54 = vshll.u32 %v10662_v18, 16  ;;  %v10772_v24 = vshrl.u32 %v10662_v18, 16  ;;  %v19855_v34 = vld [vmem:[%s27705_s11 + $0x100] ss:$8 sps:$4 sm:$0xff]   ;;  %v19861_v35 = vld [vmem:[%s27705_s11 + $0x190] ss:$8 sps:$4 sm:$0xff]  }
 0x712   : > { %v25691_v49 = vrot.slane %v11540_v22, 1  ;;  %11478 = vmatprep.subr.bf16.mxu1 %v19833_v28  ;;  %v10747_v48 = vshll.u32 %v10661_v57, 16  ;;  %v10769_v51 = vshrl.u32 %v10661_v57, 16  ;;  %v19854_v28 = vld [vmem:[%s27705_s11 + $0x44] ss:$8 sps:$4 sm:$0xff]  }
 0x713   : > { %v25696_v52 = vrot.slane %v11539_v10, 1  ;;  %v10761_v23 = vrot.slane %v10759_v54, 1  ;;  %v19866_v18 = vld [vmem:[%s27705_s11 + $0x24] ss:$8 sps:$4 sm:$0xff]   ;;  %v19864_v40 = vld [vmem:[%s27705_s11 + $0x20] ss:$8 sps:$4 sm:$0xff]  }
 0x714   : > { %v25700_v15 = vsel %vm2040_vm2, %v11610_v62, %v25691_v49  ;;  %v10749_v25 = vrot.slane %v10747_v48, 1  ;;  %v19867_v22 = vld [vmem:[%s27705_s11 + $0x180] ss:$8 sps:$4 sm:$0xff]   ;;  %v19872_v1 = vld [vmem:[%s27705_s11 + $0x14] ss:$8 sps:$4 sm:$0xff]  }
 0x715   : > { %v25707_v6 = vsel %vm2040_vm2, %v11607_v7, %v25696_v52  ;;  %11479 = vmatpush1.bf16.msra.mxu1 %v19831_v0  ;;  %v10762_v9 = vsel %vm3050_vm9, %v10757_v45, %v10761_v23  ;;  %v10774_v58 = vor.u32 %v10772_v24, %v10761_v23  ;;  %v19875_v57 = vld [vmem:[%s27566_s13 + $0x74] ss:$8 sps:$4 sm:$0xff]   ;;  %v10586_v10 = vld [vmem:[#allocation4 + $0x78] sm:$0x3]  ;;  %v19878_v62 = vld [vmem:[%s27705_s11 + $0x4] ss:$8 sps:$4 sm:$0xff]  }
 0x716   : > { %17303 = vmatprep.mubr.msk.bf16.mxu0 %vm10560_vm15, %v10762_v9  ;;  %v10750_v3 = vsel %vm3050_vm9, %v10745_v13, %v10749_v25  ;;  %11480 = vmatprep.subr.bf16.mxu1 %v19839_v11  ;;  %v10771_v41 = vor.u32 %v10769_v51, %v10749_v25  ;;  %v10573_v0 = vld [vmem:[#allocation4 + $0x10] sm:$0xff]  ;;  %v10594_v48 = vpack.c.bf16 %v10586_v10, %v25680_v43  ;;  %v19876_v11 = vld [vmem:[%s27705_s11] ss:$8 sps:$4 sm:$0xff]   ;;  %v19890_v13 = vld [vmem:[%s27705_s11 + $0xe4] ss:$8 sps:$4 sm:$0xff]  }
 0x717   : > { %11133 = vmatmul.mubr.bf16.vlgmr.msra.gmra.mxu0 %v10750_v3  ;;  %v10589_v54 = vpack.c.bf16 %v25616_v31, %v10573_v0  ;;  %v19879_v31 = vld [vmem:[%s27566_s13 + $0x60] ss:$8 sps:$4 sm:$0xff]   ;;  %v19884_v7 = vld [vmem:[%s27705_s11 + $0xf4] ss:$8 sps:$4 sm:$0xff]   ;;  %v10585_v45 = vld [vmem:[#allocation4 + $0x70] sm:$0x3] }
 0x718   : > { %11420 = vmatpush1.bf16.msra.mxu0 %v19834_v26  ;;  %17304 = vmatprep.mubr.msk.bf16.mxu0 %vm10560_vm15, %v10774_v58  ;;  %v19887_v43 = vld [vmem:[%s27566_s13 + $0x54] ss:$8 sps:$4 sm:$0xff]   ;;  %v19882_v23 = vld [vmem:[%s27705_s11 + $0xf0] ss:$8 sps:$4 sm:$0xff]   ;;  %v10593_v26 = vpack.c.bf16 %v10585_v45, %v25645_v19  ;;  %v19893_v25 = vld [vmem:[%s27566_s13 + $0x44] ss:$8 sps:$4 sm:$0xff]  }
 0x719   : > { %11481 = vmatpush1.bf16.msra.mxu1 %v19837_v44  ;;  %11421 = vmatprep.subr.bf16.mxu0 %v19842_v12  ;;  %v19885_v24 = vld [vmem:[%s27566_s13 + $0x50] ss:$8 sps:$4 sm:$0xff]   ;;  %v19888_v9 = vld [vmem:[%s27705_s11 + $0xe0] ss:$8 sps:$4 sm:$0xff]   ;;  %v19896_v44 = vld [vmem:[%s27705_s11 + $0xd4] ss:$8 sps:$4 sm:$0xff]  }
 0x71a   : > { %11482 = vmatprep.subr.bf16.mxu1 %v19845_v29  ;;  %v19891_v19 = vld [vmem:[%s27566_s13 + $0x40] ss:$8 sps:$4 sm:$0xff]   ;;  %v19899_v58 = vld [vmem:[%s27566_s13 + $0x34] ss:$8 sps:$4 sm:$0xff]   ;;  %v19894_v12 = vld [vmem:[%s27705_s11 + $0xd0] ss:$8 sps:$4 sm:$0xff]  }
 0x71b   : > { %v19902_v3 = vld [vmem:[%s27705_s11 + $0xc4] ss:$8 sps:$4 sm:$0xff]   ;;  %v19906_v51 = vld [vmem:[%s27705_s11 + $0xb0] ss:$8 sps:$4 sm:$0xff]   ;;  %v19951_v45 = vld [vmem:[%s27566_s13 + $0xa0] ss:$8 sps:$4 sm:$0xff]  }
 0x71c   : > { %11422 = vmatpush1.bf16.msra.mxu0 %v19840_v50  ;;  %v19905_v29 = vld [vmem:[%s27566_s13 + $0x24] ss:$8 sps:$4 sm:$0xff]   ;;  %v19900_v50 = vld [vmem:[%s27705_s11 + $0xc0] ss:$8 sps:$4 sm:$0xff]  }
 0x71d   : > { %11483 = vmatpush1.bf16.msra.mxu1 %v19843_v63  ;;  %11423 = vmatprep.subr.bf16.mxu0 %v19848_v59  ;;  %v19903_v63 = vld [vmem:[%s27566_s13 + $0x20] ss:$8 sps:$4 sm:$0xff]   ;;  %v19908_v59 = vld [vmem:[%s27705_s11 + $0xb4] ss:$8 sps:$4 sm:$0xff]   ;;  %v19938_v10 = vld [vmem:[%s27566_s13 + $0x164] ss:$8 sps:$4 sm:$0xff]  }
 0x71e   : > { %11484 = vmatprep.subr.bf16.mxu1 %v19851_v2  ;;  %v19911_v2 = vld [vmem:[%s27566_s13 + $0x14] ss:$8 sps:$4 sm:$0xff]   ;;  %12151 = vst.msk [vmem:[#allocation5 + $0x31] ss:$8 sm:$0x3] %vm12146_vm1, %v27703_v56 }
 0x71f   : > { %11143 = vmatmul.mubr.bf16.gmra.mxu0 %v10771_v41  ;;  %v19914_v41 = vld [vmem:[%s27705_s11 + $0xa4] ss:$8 sps:$4 sm:$0xff]  }
 0x720   : > { %11424 = vmatpush1.bf16.msra.mxu0 %v19846_v47  ;;  %11451 = vmatprep.mubr.bf16.mxu0 %v10588_v61  ;;  %v19909_v47 = vld [vmem:[%s27566_s13 + $0x10] ss:$8 sps:$4 sm:$0xff]   ;;  %v19920_v61 = vld [vmem:[%s27705_s11 + $0x94] ss:$8 sps:$4 sm:$0xff]  }
 0x721   : > { %11485 = vmatpush1.bf16.msra.mxu1 %v19849_v4  ;;  %11425 = vmatprep.subr.bf16.mxu0 %v19854_v28  ;;  %v19917_v4 = vld [vmem:[%s27566_s13 + $0x4] ss:$8 sps:$4 sm:$0xff]   ;;  %v19915_v28 = vld [vmem:[%s27566_s13] ss:$8 sps:$4 sm:$0xff]  }
 0x722   : > { %11486 = vmatprep.subr.bf16.mxu1 %v19857_v16  ;;  %v19923_v16 = vld [vmem:[%s27566_s13 + $0xf4] ss:$8 sps:$4 sm:$0xff]  }
 0x724   : > { %11426 = vmatpush1.bf16.msra.mxu0 %v19852_v53  ;;  %v19918_v53 = vld [vmem:[%s27705_s11 + $0x90] ss:$8 sps:$4 sm:$0xff]  }
 0x725   : > { %11487 = vmatpush1.bf16.msra.mxu1 %v19855_v34  ;;  %11427 = vmatprep.subr.bf16.mxu0 %v19860_v42  ;;  %v19921_v34 = vld [vmem:[%s27566_s13 + $0xf0] ss:$8 sps:$4 sm:$0xff]   ;;  %v19926_v42 = vld [vmem:[%s27705_s11 + $0x84] ss:$8 sps:$4 sm:$0xff]  }
 0x726   : > { %11500 = vmatprep.subr.bf16.mxu1 %v19863_v37  ;;  %v19929_v37 = vld [vmem:[%s27566_s13 + $0xe4] ss:$8 sps:$4 sm:$0xff]  }
 0x728   : > { %11428 = vmatpush1.bf16.msra.mxu0 %v19858_v20  ;;  %v19924_v20 = vld [vmem:[%s27705_s11 + $0x80] ss:$8 sps:$4 sm:$0xff]   ;;  %s20408_s11 = sshll.u32 %s20474_s10, 4  ;;  %s20409_s11 = int_to_ptr.vmem [resolvable:$false] %s20408_s11 }
 0x729   : > { %11501 = vmatpush2.bf16.msra.mxu1 %v19861_v35  ;;  %11429 = vmatprep.subr.bf16.mxu0 %v19866_v18  ;;  %v19927_v35 = vld [vmem:[%s27566_s13 + $0xe0] ss:$8 sps:$4 sm:$0xff]   ;;  %v19932_v18 = vld [vmem:[%s27566_s13 + $0x174] ss:$8 sps:$4 sm:$0xff]   ;;  %s20410_s4 = scalar_lea.vmem %s20409_s11, 32  ;;  %p20411_p0 = scmp.lt.s32.totalorder %s16145_s29, %s20409_s11 }
 0x72a   : > { %11502 = vmatprep.subr.bf16.mxu1 %v19869_v32  ;;  %v19935_v32 = vld [vmem:[%s27566_s13 + $0xd4] ss:$8 sps:$4 sm:$0xff]   ;;  %p20412_p1 = scmp.lt.s32.totalorder %s20410_s4, %s20404_s28 }
 0x72c   : > { %11430 = vmatpush1.bf16.msra.mxu0 %v19864_v40  ;;  %v10584_v40 = vld [vmem:[#allocation4 + $0x68] sm:$0x3]  ;;  %p20413_p2 = por %p20412_p1, %p20411_p0 }
 0x72d   : > { %11503 = vmatpush2.bf16.msra.mxu1 %v19867_v22  ;;  %11431 = vmatprep.subr.bf16.mxu0 %v19872_v1  ;;  %v10571_v22 = vld [vmem:[#allocation4] sm:$0xff]  ;;  %v19930_v1 = vld [vmem:[%s27566_s13 + $0x170] ss:$8 sps:$4 sm:$0xff]   ;;  %v10592_v0 = vpack.c.bf16 %v10584_v40, %v25628_v27  ;;  %v19944_v27 = vld [vmem:[%s27566_s13 + $0x154] ss:$8 sps:$4 sm:$0xff]  }
 0x72e   : > { %11885 = vmatprep.subr.bf16.mxu1 %v19875_v57  ;;  %v10587_v57 = vpack.c.bf16 %v25548_v5, %v10571_v22  ;;  %v19936_v5 = vld [vmem:[%s27566_s13 + $0x160] ss:$8 sps:$4 sm:$0xff]   ;;  %p20414_p3 = pnand %p20413_p2, %p20407_p13 }
 0x730   : > { %11432 = vmatpush1.bf16.msra.mxu0 %v19870_v46  ;;  %11505 = vmatmul.mubr.bf16.vlgmr.msra.gmra.mxu1 %v10589_v54  ;;  %v19933_v46 = vld [vmem:[%s27566_s13 + $0xd0] ss:$8 sps:$4 sm:$0xff]   ;;  %v19939_v54 = vld [vmem:[%s27566_s13 + $0xc0] ss:$8 sps:$4 sm:$0xff]  }
 0x731   : > { %17358 = vmatprep.mubr.msk.bf16.mxu1 %vm10560_vm15, %v10594_v48  ;;  %11886 = vmatpush1.bf16.msra.mxu1 %v19873_v14  ;;  %v19941_v14 = vld [vmem:[%s27566_s13 + $0xc4] ss:$8 sps:$4 sm:$0xff]   ;;  %v19942_v48 = vld [vmem:[%s27566_s13 + $0x150] ss:$8 sps:$4 sm:$0xff]  }
 0x732   : > { %11433 = vmatprep.subr.bf16.mxu0 %v19878_v62  ;;  %11887 = vmatprep.subr.bf16.mxu1 %v19881_v17  ;;  %v10583_v62 = vld [vmem:[#allocation4 + $0x60] sm:$0x3]  ;;  %v19947_v17 = vld [vmem:[%s27566_s13 + $0xb4] ss:$8 sps:$4 sm:$0xff]  }
 0x734   : > { %11434 = vmatpush1.bf16.msra.mxu0 %v19876_v11  ;;  %v10591_v11 = vpack.c.bf16 %v10583_v62, %v25569_v39  ;;  %v19948_v39 = vld [vmem:[%s27566_s13 + $0x140] ss:$8 sps:$4 sm:$0xff]  }
 0x735   : > { %11888 = vmatpush1.bf16.msra.mxu1 %v19879_v31  ;;  %11435 = vmatprep.subr.bf16.mxu0 %v19884_v7  ;;  %v19945_v31 = vld [vmem:[%s27566_s13 + $0xb0] ss:$8 sps:$4 sm:$0xff]   ;;  %v19950_v7 = vld [vmem:[%s27566_s13 + $0x144] ss:$8 sps:$4 sm:$0xff]  }
 0x736   : > { %11889 = vmatprep.subr.bf16.mxu1 %v19887_v43  ;;  %v19953_v43 = vld [vmem:[%s27566_s13 + $0xa4] ss:$8 sps:$4 sm:$0xff]  }
 0x738   : > { %11436 = vmatpush2.bf16.msra.mxu0 %v19882_v23  ;;  %11515 = vmatmul.mubr.bf16.gmra.mxu1 %v10593_v26  ;;  %v19956_v23 = vld [vmem:[%s27566_s13 + $0x134] ss:$8 sps:$4 sm:$0xff]   ;;  %v19957_v26 = vld [vmem:[%s27566_s13 + $0x90] ss:$8 sps:$4 sm:$0xff]  }
 0x739   : > { %11890 = vmatpush1.bf16.msra.mxu1 %v19885_v24  ;;  %11917 = vmatprep.mubr.bf16.mxu1 %v25655_v36  ;;  %v19897_v36 = vld [vmem:[%s27566_s13 + $0x30] ss:$8 sps:$4 sm:$0xff]   ;;  %v19959_v24 = vld [vmem:[%s27566_s13 + $0x94] ss:$8 sps:$4 sm:$0xff]  }
 0x73a   : > { %11437 = vmatprep.subr.bf16.mxu0 %v19890_v13  ;;  %11891 = vmatprep.subr.bf16.mxu1 %v19893_v25  ;;  %v19962_v13 = vld [vmem:[%s27566_s13 + $0x124] ss:$8 sps:$4 sm:$0xff]  }
 0x73b   : > { %v19965_v25 = vld [vmem:[%s27566_s13 + $0x84] ss:$8 sps:$4 sm:$0xff]  }
 0x73c   : > { %11438 = vmatpush2.bf16.msra.mxu0 %v19888_v9  ;;  %v19960_v9 = vld [vmem:[%s27566_s13 + $0x120] ss:$8 sps:$4 sm:$0xff]  }
 0x73d   : > { %11892 = vmatpush1.bf16.msra.mxu1 %v19891_v19  ;;  %11439 = vmatprep.subr.bf16.mxu0 %v19896_v44  ;;  %v19963_v19 = vld [vmem:[%s27566_s13 + $0x80] ss:$8 sps:$4 sm:$0xff]   ;;  %v19968_v44 = vld [vmem:[%s27566_s13 + $0x114] ss:$8 sps:$4 sm:$0xff]  }
 0x73e   : > { %11893 = vmatprep.subr.bf16.mxu1 %v19899_v58  ;;  %v19966_v58 = vld [vmem:[%s27566_s13 + $0x110] ss:$8 sps:$4 sm:$0xff]  }
 0x740   : > { %11440 = vmatpush2.bf16.msra.mxu0 %v19894_v12  ;;  %v19971_v12 = vld [vmem:[%s27566_s13 + $0x104] ss:$8 sps:$4 sm:$0xff]  }
 0x741   : > { %11894 = vmatpush1.bf16.msra.mxu1 %v19897_v36  ;;  %11441 = vmatprep.subr.bf16.mxu0 %v19902_v3  ;;  %v19969_v36 = vld [vmem:[%s27566_s13 + $0x100] ss:$8 sps:$4 sm:$0xff]   ;;  %v19974_v3 = vld [vmem:[%s27566_s13 + $0x194] ss:$8 sps:$4 sm:$0xff]  }
 0x742   : > { %11895 = vmatprep.subr.bf16.mxu1 %v19905_v29  ;;  %v19972_v29 = vld [vmem:[%s27566_s13 + $0x190] ss:$8 sps:$4 sm:$0xff]  }
 0x744   : > { %11442 = vmatpush2.bf16.msra.mxu0 %v19900_v50  ;;  %v19978_v50 = vld [vmem:[%s27568_s15 + $0x70] ss:$8 sps:$4 sm:$0xff]  }
 0x745   : > { %11896 = vmatpush1.bf16.msra.mxu1 %v19903_v63  ;;  %11443 = vmatprep.subr.bf16.mxu0 %v19908_v59  ;;  %v19983_v63 = vld [vmem:[%s27568_s15 + $0x64] ss:$8 sps:$4 sm:$0xff]   ;;  %v19986_v59 = vld [vmem:[%s27568_s15 + $0x54] ss:$8 sps:$4 sm:$0xff]  }
 0x746   : > { %11897 = vmatprep.subr.bf16.mxu1 %v19911_v2  ;;  %v19984_v2 = vld [vmem:[%s27568_s15 + $0x50] ss:$8 sps:$4 sm:$0xff]  }
 0x748   : > { %11444 = vmatpush2.bf16.msra.mxu0 %v19906_v51  ;;  %v19989_v51 = vld [vmem:[%s27568_s15 + $0x44] ss:$8 sps:$4 sm:$0xff]  }
 0x749   : > { %11898 = vmatpush1.bf16.msra.mxu1 %v19909_v47  ;;  %11445 = vmatprep.subr.bf16.mxu0 %v19914_v41  ;;  %v19987_v47 = vld [vmem:[%s27568_s15 + $0x40] ss:$8 sps:$4 sm:$0xff]   ;;  %v19995_v41 = vld [vmem:[%s27568_s15 + $0x34] ss:$8 sps:$4 sm:$0xff]  }
 0x74a   : > { %11899 = vmatprep.subr.bf16.mxu1 %v19917_v4 }
 0x74c   : > { %11446 = vmatpush2.bf16.msra.mxu0 %v19912_v38  ;;  %v19993_v38 = vld [vmem:[%s27568_s15 + $0x30] ss:$8 sps:$4 sm:$0xff]  }
 0x74d   : > { %11900 = vmatpush1.bf16.msra.mxu1 %v19915_v28  ;;  %11447 = vmatprep.subr.bf16.mxu0 %v19920_v61 }
 0x74e   : > { %11901 = vmatprep.subr.bf16.mxu1 %v19923_v16 }
 0x750   : > { %11448 = vmatpush2.bf16.msra.mxu0 %v19918_v53 }
 0x751   : > { %11902 = vmatpush2.bf16.msra.mxu1 %v19921_v34  ;;  %11449 = vmatprep.subr.bf16.mxu0 %v19926_v42 }
 0x752   : > { %11903 = vmatprep.subr.bf16.mxu1 %v19929_v37 }
 0x754   : > { %11450 = vmatpush2.bf16.msra.mxu0 %v19924_v20 }
 0x755   : > { %11904 = vmatpush2.bf16.msra.mxu1 %v19927_v35  ;;  %11938 = vmatprep.subr.bf16.mxu0 %v19932_v18 }
 0x756   : > { %11905 = vmatprep.subr.bf16.mxu1 %v19935_v32 }
 0x757   : > { %11452 = vmatmul.mubr.bf16.vlgmr.msra.gmra.mxu0 %v10587_v57 }
 0x758   : > { %11461 = vmatprep.mubr.bf16.mxu0 %v10592_v0  ;;  %11939 = vmatpush1.bf16.msra.mxu0 %v19930_v1 }
 0x759   : > { %11906 = vmatpush2.bf16.msra.mxu1 %v19933_v46  ;;  %11940 = vmatprep.subr.bf16.mxu0 %v19938_v10 }
 0x75a   : > { %11907 = vmatprep.subr.bf16.mxu1 %v19941_v14 }
 0x75c   : > { %11941 = vmatpush1.bf16.msra.mxu0 %v19936_v5 }
 0x75d   : > { %11908 = vmatpush2.bf16.msra.mxu1 %v19939_v54  ;;  %11942 = vmatprep.subr.bf16.mxu0 %v19944_v27 }
 0x75e   : > { %11909 = vmatprep.subr.bf16.mxu1 %v19947_v17 }
 0x75f   : > { %11462 = vmatmul.mubr.bf16.gmra.mxu0 %v10591_v11 }
 0x760   : > { %11943 = vmatpush1.bf16.msra.mxu0 %v19942_v48  ;;  %17411 = vmatprep.mubr.msk.bf16.mxu0 %vm10560_vm15, %v25700_v15  ;;  %v19954_v15 = vld [vmem:[%s27566_s13 + $0x130] ss:$8 sps:$4 sm:$0xff]  }
 0x761   : > { %11910 = vmatpush2.bf16.msra.mxu1 %v19945_v31  ;;  %11944 = vmatprep.subr.bf16.mxu0 %v19950_v7 }
 0x762   : > { %11911 = vmatprep.subr.bf16.mxu1 %v19953_v43 }
 0x764   : > { %11945 = vmatpush1.bf16.msra.mxu0 %v19948_v39 }
 0x765   : > { %11912 = vmatpush2.bf16.msra.mxu1 %v19951_v45  ;;  %11946 = vmatprep.subr.bf16.mxu0 %v19956_v23 }
 0x766   : > { %11913 = vmatprep.subr.bf16.mxu1 %v19959_v24 }
 0x768   : > { %11947 = vmatpush1.bf16.msra.mxu0 %v19954_v15 }
 0x769   : > { %11914 = vmatpush2.bf16.msra.mxu1 %v19957_v26  ;;  %11948 = vmatprep.subr.bf16.mxu0 %v19962_v13 }
 0x76a   : > { %11915 = vmatprep.subr.bf16.mxu1 %v19965_v25 }
 0x76c   : > { %11949 = vmatpush1.bf16.msra.mxu0 %v19960_v9 }
 0x76d   : > { %11916 = vmatpush2.bf16.msra.mxu1 %v19963_v19  ;;  %11950 = vmatprep.subr.bf16.mxu0 %v19968_v44  ;;  %v11999_v44 = vld [vmem:[%s27567_s14] sm:$0x3] }
 0x770   : > { %11918 = vmatmul.mubr.bf16.vlgmr.msra.gmra.mxu1 %v25593_v55  ;;  %11951 = vmatpush1.bf16.msra.mxu0 %v19966_v58  ;;  %v19977_v55 = vld [vmem:[%s27566_s13 + $0x184] ss:$8 sps:$4 sm:$0xff]  }
 0x771   : > { %11927 = vmatprep.mubr.bf16.mxu1 %v25648_v30  ;;  %11952 = vmatprep.subr.bf16.mxu0 %v19971_v12  ;;  %v19975_v30 = vld [vmem:[%s27566_s13 + $0x180] ss:$8 sps:$4 sm:$0xff]  }
 0x774   : > { %11953 = vmatpush1.bf16.msra.mxu0 %v19969_v36 }
 0x775   : > { %11966 = vmatprep.subr.bf16.mxu0 %v19974_v3 }
 0x778   : > { %11928 = vmatmul.mubr.bf16.gmra.mxu1 %v25585_v8  ;;  %11967 = vmatpush2.bf16.msra.mxu0 %v19972_v29  ;;  %v19980_v8 = vld [vmem:[%s27568_s15 + $0x74] ss:$8 sps:$4 sm:$0xff]  }
 0x779   : > { %11968 = vmatprep.subr.bf16.mxu0 %v19977_v55  ;;  %12589 = vmatprep.subr.bf16.mxu1 %v19980_v8 }
 0x77a   : > { %12590 = vmatpush1.bf16.msra.mxu1 %v19978_v50 }
 0x77b   : > { %12591 = vmatprep.subr.bf16.mxu1 %v19983_v63 }
 0x77c   : > { %11969 = vmatpush2.bf16.msra.mxu0 %v19975_v30  ;;  %v26054_v30 = vrot.slane %v11999_v44, %v21159_v33 }
 0x77f   : > { %11971 = vmatmul.mubr.bf16.vlgmr.msra.gmra.mxu0 %v25707_v6  ;;  %v19990_v6 = vld [vmem:[%s27569_s16 + $0x70] ss:$8 sps:$4 sm:$0xff]  }
 0x780   : > { %17412 = vmatprep.mubr.msk.bf16.mxu0 %vm10560_vm15, %v25691_v49  ;;  %v19981_v49 = vld [vmem:[%s27568_s15 + $0x60] ss:$8 sps:$4 sm:$0xff]  }
 0x781   : > { %12592 = vmatpush1.bf16.msra.mxu1 %v19981_v49 }
 0x782   : > { %12593 = vmatprep.subr.bf16.mxu1 %v19986_v59 }
 0x785   : > { %12594 = vmatpush1.bf16.msra.mxu1 %v19984_v2 }
 0x786   : > { %12595 = vmatprep.subr.bf16.mxu1 %v19989_v51  ;;  %v26057_v51 = vrot.slane %v11999_v44, %v21175_v60 }
 0x787   : > { %11981 = vmatmul.mubr.bf16.gmra.mxu0 %v25696_v52  ;;  %v19992_v52 = vld [vmem:[%s27569_s16 + $0x74] ss:$8 sps:$4 sm:$0xff]  }
 0x788   : > { %12412 = vmatprep.subr.bf16.mxu0 %v19992_v52 }
 0x789   : > { %12413 = vmatpush1.bf16.msra.mxu0 %v19990_v6  ;;  %12596 = vmatpush1.bf16.msra.mxu1 %v19987_v47 }
 0x78a   : > { %12597 = vmatprep.subr.bf16.mxu1 %v19995_v41  ;;  %v19996_v41 = vld [vmem:[%s27569_s16 + $0x60] ss:$8 sps:$4 sm:$0xff]  }
 0x78d   : > { %12598 = vmatpush1.bf16.msra.mxu1 %v19993_v38 }
 0x7c8   : > { %v11081_v4 = vpop.f32.mrf.mxu1 }
 0x7ca   : > { %v11083_v28 = vpop.f32.mrf.mxu1 }
 0x7cc   : > { %v11085_v61 = vpop.f32.mrf.mxu1 }
 0x7ce   : > { %v11087_v16 = vpop.f32.mrf.mxu1 }
 0x7d0   : > { %v11091_v34 = vpop.f32.mrf.mxu1 }
 0x7d2   : > { %v11093_v37 = vpop.f32.mrf.mxu1 }
 0x7d4   : > { %v11095_v35 = vpop.f32.mrf.mxu1 }
 0x7d6   : > { %v11097_v32 = vpop.f32.mrf.mxu1 }
 0x7d7   : > { %v11134_v53 = vpop.f32.mrf.mxu0 }
 0x7d8   : > { %v11135_v24 = vadd.f32 %v11134_v53, %v11081_v4  ;;  %v19998_v4 = vld [vmem:[%s27569_s16 + $0x64] ss:$8 sps:$4 sm:$0xff]  }
 0x7d9   : > { %v11136_v42 = vpop.f32.mrf.mxu0  ;;  %12414 = vmatprep.subr.bf16.mxu0 %v19998_v4 }
 0x7da   : > { %v11137_v13 = vadd.f32 %v11136_v42, %v11083_v28  ;;  %12415 = vmatpush1.bf16.msra.mxu0 %v19996_v41 }
 0x7db   : > { %v11138_v20 = vpop.f32.mrf.mxu0 }
 0x7dc   : > { %v11139_v9 = vadd.f32 %v11138_v20, %v11085_v61 }
 0x7dd   : > { %v11140_v18 = vpop.f32.mrf.mxu0 }
 0x7de   : > { %v11141_v55 = vadd.f32 %v11140_v18, %v11087_v16 }
 0x7df   : > { %v11144_v40 = vpop.f32.mrf.mxu0 }
 0x7e0   : > { %v11145_v8 = vadd.f32 %v11144_v40, %v11091_v34 }
 0x7e1   : > { %v11146_v1 = vpop.f32.mrf.mxu0 }
 0x7e2   : > { %v11147_v52 = vadd.f32 %v11146_v1, %v11093_v37 }
 0x7e3   : > { %v11148_v46 = vpop.f32.mrf.mxu0 }
 0x7e4   : > { %v11149_v38 = vadd.f32 %v11148_v46, %v11095_v35 }
 0x7e5   : > { %v11150_v0 = vpop.f32.mrf.mxu0 }
 0x7e6   : > { %v11151_v53 = vadd.f32 %v11150_v0, %v11097_v32  ;;  %v19999_v32 = vld [vmem:[%s27568_s15 + $0x20] ss:$8 sps:$4 sm:$0xff]  }
 0x7f0   : > { %v11506_v22 = vpop.f32.mrf.mxu1 }
 0x7f2   : > { %v11508_v57 = vpop.f32.mrf.mxu1 }
 0x7f4   : > { %v11510_v10 = vpop.f32.mrf.mxu1 }
 0x7f6   : > { %v11512_v14 = vpop.f32.mrf.mxu1 }
 0x7f8   : > { %v11516_v54 = vpop.f32.mrf.mxu1 }
 0x7fa   : > { %v11518_v62 = vpop.f32.mrf.mxu1 }
 0x7fc   : > { %v26046_v48 = vpop.f32.mrf.mxu1 }
 0x7fe   : > { %v26048_v31 = vpop.f32.mrf.mxu1 }
 0x817   : > { %v11453_v5 = vpop.f32.mrf.mxu0 }
 0x818   : > { %v11454_v26 = vadd.f32 %v11453_v5, %v11135_v24 }
 0x819   : > { %v11455_v27 = vpop.f32.mrf.mxu0 }
 0x81a   : > { %v11456_v58 = vadd.f32 %v11455_v27, %v11137_v13  ;;  %v11507_v36 = vadd.f32 %v11506_v22, %v11454_v26 }
 0x81b   : > { %v11457_v17 = vpop.f32.mrf.mxu0 }
 0x81c   : > { %v11458_v3 = vadd.f32 %v11457_v17, %v11139_v9  ;;  %v11509_v59 = vadd.f32 %v11508_v57, %v11456_v58 }
 0x81d   : > { %v11459_v11 = vpop.f32.mrf.mxu0 }
 0x81e   : > { %v11460_v2 = vadd.f32 %v11459_v11, %v11141_v55  ;;  %v11511_v28 = vadd.f32 %v11510_v10, %v11458_v3  ;;  %v20001_v10 = vld [vmem:[%s27568_s15 + $0x24] ss:$8 sps:$4 sm:$0xff]  }
 0x81f   : > { %v11463_v7 = vpop.f32.mrf.mxu0  ;;  %12599 = vmatprep.subr.bf16.mxu1 %v20001_v10  ;;  %v20014_v10 = vld [vmem:[%s27569_s16 + $0x30] ss:$8 sps:$4 sm:$0xff]  }
 0x820   : > { %v11464_v61 = vadd.f32 %v11463_v7, %v11145_v8  ;;  %v11513_v22 = vadd.f32 %v11512_v14, %v11460_v2  ;;  %12600 = vmatpush1.bf16.msra.mxu1 %v19999_v32 }
 0x821   : > { %v11465_v39 = vpop.f32.mrf.mxu0 }
 0x822   : > { %v11466_v34 = vadd.f32 %v11465_v39, %v11147_v52  ;;  %v11517_v17 = vadd.f32 %v11516_v54, %v11464_v61  ;;  %v20002_v54 = vld [vmem:[%s27569_s16 + $0x50] ss:$8 sps:$4 sm:$0xff]   ;;  %v20004_v39 = vld [vmem:[%s27569_s16 + $0x54] ss:$8 sps:$4 sm:$0xff]  }
 0x823   : > { %v11467_v23 = vpop.f32.mrf.mxu0  ;;  %12416 = vmatprep.subr.bf16.mxu0 %v20004_v39  ;;  %v20017_v39 = vld [vmem:[%s27568_s15 + $0xb0] ss:$8 sps:$4 sm:$0xff]  }
 0x824   : > { %v11468_v1 = vadd.f32 %v11467_v23, %v11149_v38  ;;  %v11519_v0 = vadd.f32 %v11518_v62, %v11466_v34  ;;  %12417 = vmatpush1.bf16.msra.mxu0 %v20002_v54 }
 0x825   : > { %v11469_v25 = vpop.f32.mrf.mxu0 }
 0x826   : > { %v11470_v57 = vadd.f32 %v11469_v25, %v11151_v53  ;;  %v11521_v26 = vadd.f32 %v26046_v48, %v11468_v1 }
 0x828   : > { %v11523_v13 = vadd.f32 %v26048_v31, %v11470_v57  ;;  %v20016_v57 = vld [vmem:[%s27569_s16 + $0x34] ss:$8 sps:$4 sm:$0xff]  }
 0x830   : > { %v11919_v43 = vpop.f32.mrf.mxu1 }
 0x832   : > { %v11921_v45 = vpop.f32.mrf.mxu1 }
 0x834   : > { %v11923_v15 = vpop.f32.mrf.mxu1 }
 0x836   : > { %v11925_v19 = vpop.f32.mrf.mxu1 }
 0x838   : > { %v11929_v63 = vpop.f32.mrf.mxu1 }
 0x83a   : > { %v11931_v18 = vpop.f32.mrf.mxu1 }
 0x83f   : > { %v11972_v12 = vpop.f32.mrf.mxu0 }
 0x840   : > { %v11973_v29 = vadd.f32 %v11972_v12, %v11919_v43 }
 0x841   : > { %v11974_v50 = vpop.f32.mrf.mxu0 }
 0x842   : > { %v11991_v6 = vadd.f32 %v11973_v29, %v11507_v36  ;;  %v11975_v49 = vadd.f32 %v11974_v50, %v11921_v45  ;;  %v11933_v45 = vpop.f32.mrf.mxu1 }
 0x843   : > { %v11976_v47 = vpop.f32.mrf.mxu0 }
 0x844   : > { %v11977_v16 = vadd.f32 %v11976_v47, %v11923_v15  ;;  %v12011_v42 = vadd.f32 %v26054_v30, %v11991_v6  ;;  %v11992_v37 = vadd.f32 %v11975_v49, %v11509_v59  ;;  %v11935_v50 = vpop.f32.mrf.mxu1 }
 0x845   : > { %v11978_v20 = vpop.f32.mrf.mxu0 }
 0x846   : > { %v11993_v40 = vadd.f32 %v11977_v16, %v11511_v28  ;;  %v11979_v5 = vadd.f32 %v11978_v20, %v11925_v19  ;;  %v12027_v11 = vrot.slane %v12011_v42, 1  ;;  %v12012_v14 = vadd.f32 %v26057_v51, %v11992_v37 }
 0x847   : > { %v11982_v27 = vpop.f32.mrf.mxu0  ;;  %v12053_v25 = vrot.slane %v12011_v42, 2 }
 0x848   : > { %v26067_v35 = vadd.f32 %v26054_v30, %v11993_v40  ;;  %v11983_v46 = vadd.f32 %v11982_v27, %v11929_v63  ;;  %v11994_v7 = vadd.f32 %v11979_v5, %v11513_v22  ;;  %v12030_v3 = vrot.slane %v12012_v14, 1  ;;  %v20008_v40 = vld [vmem:[%s27569_s16 + $0x40] ss:$8 sps:$4 sm:$0xff]   ;;  %v20010_v22 = vld [vmem:[%s27569_s16 + $0x44] ss:$8 sps:$4 sm:$0xff]  }
 0x849   : > { %v11984_v43 = vpop.f32.mrf.mxu0  ;;  %v12056_v52 = vrot.slane %v12012_v14, 2  ;;  %12418 = vmatprep.subr.bf16.mxu0 %v20010_v22 }
 0x84a   : > { %v12028_v23 = vrot.slane %v26067_v35, 1  ;;  %v12054_v24 = vrot.slane %v26067_v35, 2  ;;  %v11995_v15 = vadd.f32 %v11983_v46, %v11517_v17  ;;  %v11985_v62 = vadd.f32 %v11984_v43, %v11931_v18  ;;  %12419 = vmatpush1.bf16.msra.mxu0 %v20008_v40 }
 0x84b   : > { %v26087_v9 = vadd.f32 %v26057_v51, %v11994_v7  ;;  %v11986_v19 = vpop.f32.mrf.mxu0  ;;  %12420 = vmatprep.subr.bf16.mxu0 %v20016_v57 }
 0x84c   : > { %v26090_v44 = vadd.f32 %v26054_v30, %v11995_v15  ;;  %v11996_v58 = vadd.f32 %v11985_v62, %v11519_v0  ;;  %v11987_v12 = vadd.f32 %v11986_v19, %v11933_v45  ;;  %v12029_v36 = vsel %vm2040_vm2, %v12027_v11, %v12028_v23  ;;  %v20019_v45 = vld [vmem:[%s27568_s15 + $0xb4] ss:$8 sps:$4 sm:$0xff]   ;;  %v20025_v15 = vld [vmem:[%s27568_s15 + $0xa4] ss:$8 sps:$4 sm:$0xff]  }
 0x84d   : > { %v12031_v48 = vrot.slane %v26087_v9, 1  ;;  %v12057_v31 = vrot.slane %v26087_v9, 2  ;;  %v11988_v29 = vpop.f32.mrf.mxu0  ;;  %v12047_v55 = vmax.f32 %v12011_v42, %v12029_v36  ;;  %v12055_v49 = vsel %vm2131_vm3, %v12053_v25, %v12054_v24  ;;  %v20005_v42 = vld [vmem:[%s27568_s15 + $0x10] ss:$8 sps:$4 sm:$0xff]  }
 0x84e   : > { %v12033_v8 = vrot.slane %v26090_v44, 1  ;;  %v26097_v63 = vadd.f32 %v26057_v51, %v11996_v58  ;;  %v11997_v6 = vadd.f32 %v11987_v12, %v11521_v26  ;;  %v11989_v59 = vadd.f32 %v11988_v29, %v11935_v50  ;;  %12421 = vmatpush1.bf16.msra.mxu0 %v20014_v10  ;;  %v20028_v26 = vld [vmem:[%s27569_s16 + $0x14] ss:$8 sps:$4 sm:$0xff]   ;;  %v20029_v36 = vld [vmem:[%s27568_s15 + $0x90] ss:$8 sps:$4 sm:$0xff]  }
 0x84f   : > { %v26100_v2 = vmax.f32 %v12047_v55, %v12055_v49  ;;  %v12032_v47 = vsel %vm2040_vm2, %v12030_v3, %v12031_v48  ;;  %v12058_v61 = vsel %vm2131_vm3, %v12056_v52, %v12057_v31  ;;  %v12059_v53 = vrot.slane %v26090_v44, 2  ;;  %v20031_v3 = vld [vmem:[%s27568_s15 + $0x94] ss:$8 sps:$4 sm:$0xff]   ;;  %v20037_v29 = vld [vmem:[%s27568_s15 + $0x84] ss:$8 sps:$4 sm:$0xff]  }
 0x850   : > { %v12035_v41 = vrot.slane %v26097_v63, 1  ;;  %v12017_v4 = vadd.f32 %v26054_v30, %v11997_v6  ;;  %v12048_v38 = vmax.f32 %v12012_v14, %v12032_v47  ;;  %v11998_v28 = vadd.f32 %v11989_v59, %v11523_v13  ;;  %v20007_v30 = vld [vmem:[%s27568_s15 + $0x14] ss:$8 sps:$4 sm:$0xff]   ;;  %v20035_v50 = vld [vmem:[%s27568_s15 + $0x80] ss:$8 sps:$4 sm:$0xff]  }
 0x851   : > { %12085 = vrot.lane.b32.xlu0 %v26100_v2, %s20472_s1  ;;  %v12034_v16 = vsel %vm2040_vm2, %v12028_v23, %v12033_v8  ;;  %v12061_v5 = vrot.slane %v26097_v63, 2  ;;  %12601 = vmatprep.subr.bf16.mxu1 %v20007_v30  ;;  %v12060_v27 = vsel %vm2131_vm3, %v12054_v24, %v12059_v53  ;;  %v20020_v23 = vld [vmem:[%s27569_s16 + $0x20] ss:$8 sps:$4 sm:$0xff]   ;;  %v20022_v24 = vld [vmem:[%s27569_s16 + $0x24] ss:$8 sps:$4 sm:$0xff]  }
 0x852   : > { %v26110_v34 = vmax.f32 %v12048_v38, %v12058_v61  ;;  %v12018_v37 = vadd.f32 %v26057_v51, %v11998_v28  ;;  %v12049_v20 = vmax.f32 %v26067_v35, %v12034_v16  ;;  %v12036_v18 = vsel %vm2040_vm2, %v12031_v48, %v12035_v41  ;;  %v20013_v51 = vld [vmem:[%s27568_s15 + $0x4] ss:$8 sps:$4 sm:$0xff]   ;;  %12602 = vmatpush1.bf16.msra.mxu1 %v20005_v42  ;;  %v20011_v35 = vld [vmem:[%s27568_s15] ss:$8 sps:$4 sm:$0xff]   ;;  %v20040_v55 = vld [vmem:[%s27569_s16 + $0xb4] ss:$8 sps:$4 sm:$0xff]  }
 0x853   : > { %v12037_v1 = vrot.slane %v12017_v4, 1  ;;  %v12050_v17 = vmax.f32 %v26087_v9, %v12036_v18  ;;  %12603 = vmatprep.subr.bf16.mxu1 %v20013_v51  ;;  %v12062_v11 = vsel %vm2131_vm3, %v12057_v31, %v12061_v5  ;;  %v12063_v14 = vrot.slane %v12017_v4, 2  ;;  %12422 = vmatprep.subr.bf16.mxu0 %v20022_v24  ;;  %v20023_v9 = vld [vmem:[%s27568_s15 + $0xa0] ss:$8 sps:$4 sm:$0xff]   ;;  %v20034_v31 = vld [vmem:[%s27569_s16 + $0x4] ss:$8 sps:$4 sm:$0xff]  }
 0x854   : > { %12087 = vrot.lane.b32.xlu1 %v26110_v34, %s20472_s1  ;;  %v12039_v46 = vrot.slane %v12018_v37, 1  ;;  %v26143_v32 = vmax.f32 %v12049_v20, %v12060_v27  ;;  %v12065_v62 = vrot.slane %v12018_v37, 2  ;;  %12423 = vmatpush1.bf16.msra.mxu0 %v20020_v23  ;;  %v20032_v48 = vld [vmem:[%s27569_s16] ss:$8 sps:$4 sm:$0xff]   ;;  %v20052_v49 = vld [vmem:[%s27569_s16 + $0x94] ss:$8 sps:$4 sm:$0xff]  }
 0x855   : > { %12113 = vrot.lane.b32.xlu0 %v26100_v2, %s20470_s5  ;;  %v12038_v0 = vsel %vm2040_vm2, %v12033_v8, %v12037_v1  ;;  %v26154_v7 = vmax.f32 %v12050_v17, %v12062_v11  ;;  %v12064_v13 = vsel %vm2131_vm3, %v12059_v53, %v12063_v14  ;;  %12424 = vmatprep.subr.bf16.mxu0 %v20028_v26  ;;  %v20038_v8 = vld [vmem:[%s27569_s16 + $0xb0] ss:$8 sps:$4 sm:$0xff]   ;;  %v20044_v6 = vld [vmem:[%s27569_s16 + $0xa0] ss:$8 sps:$4 sm:$0xff]   ;;  %v20058_v59 = vld [vmem:[%s27569_s16 + $0x84] ss:$8 sps:$4 sm:$0xff]  }
 0x856   : > { %12604 = vmatpush1.bf16.msra.mxu1 %v20011_v35  ;;  %v12051_v43 = vmax.f32 %v26090_v44, %v12038_v0  ;;  %v12040_v54 = vsel %vm2040_vm2, %v12035_v41, %v12039_v46  ;;  %v20026_v44 = vld [vmem:[%s27569_s16 + $0x10] ss:$8 sps:$4 sm:$0xff]   ;;  %v12066_v58 = vsel %vm2131_vm3, %v12061_v5, %v12065_v62  ;;  %v20056_v47 = vld [vmem:[%s27569_s16 + $0x80] ss:$8 sps:$4 sm:$0xff]   ;;  %v20064_v41 = vld [vmem:[%s27570_s17 + $0x74] ss:$8 sps:$4 sm:$0xff]  }
 0x857   : > { %12613 = vmatprep.subr.bf16.mxu1 %v20019_v45  ;;  %v12052_v25 = vmax.f32 %v26097_v63, %v12040_v54  ;;  %v20046_v63 = vld [vmem:[%s27569_s16 + $0xa4] ss:$8 sps:$4 sm:$0xff]   ;;  %v20050_v52 = vld [vmem:[%s27569_s16 + $0x90] ss:$8 sps:$4 sm:$0xff]  }
 0x858   : > { %12115 = vrot.lane.b32.xlu1 %v26110_v34, %s20470_s5  ;;  %v26185_v19 = vmax.f32 %v12051_v43, %v12064_v13  ;;  %12425 = vmatpush1.bf16.msra.mxu0 %v20026_v44 }
 0x859   : > { %12089 = vrot.lane.b32.xlu0 %v26143_v32, %s20472_s1  ;;  %v26195_v12 = vmax.f32 %v12052_v25, %v12066_v58  ;;  %12426 = vmatprep.subr.bf16.mxu0 %v20034_v31 }
 0x85a   : > { %12614 = vmatpush2.bf16.msra.mxu1 %v20017_v39 }
 0x85b   : > { %12615 = vmatprep.subr.bf16.mxu1 %v20025_v15 }
 0x85c   : > { %12091 = vrot.lane.b32.xlu1 %v26154_v7, %s20472_s1  ;;  %12427 = vmatpush1.bf16.msra.mxu0 %v20032_v48 }
 0x85d   : > { %12117 = vrot.lane.b32.xlu0 %v26143_v32, %s20470_s5  ;;  %12436 = vmatprep.subr.bf16.mxu0 %v20040_v55 }
 0x85e   : > { %12616 = vmatpush2.bf16.msra.mxu1 %v20023_v9 }
 0x85f   : > { %12617 = vmatprep.subr.bf16.mxu1 %v20031_v3 }
 0x860   : > { %12119 = vrot.lane.b32.xlu1 %v26154_v7, %s20470_s5  ;;  %12437 = vmatpush2.bf16.msra.mxu0 %v20038_v8  ;;  %v20041_v8 = vld [vmem:[%s27571_s18 + $0x70] ss:$8 sps:$4 sm:$0xff]  }
 0x861   : > { %12093 = vrot.lane.b32.xlu0 %v26185_v19, %s20472_s1  ;;  %12438 = vmatprep.subr.bf16.mxu0 %v20046_v63 }
 0x862   : > { %12618 = vmatpush2.bf16.msra.mxu1 %v20029_v36 }
 0x863   : > { %12619 = vmatprep.subr.bf16.mxu1 %v20037_v29 }
 0x864   : > { %12095 = vrot.lane.b32.xlu1 %v26195_v12, %s20472_s1  ;;  %12439 = vmatpush2.bf16.msra.mxu0 %v20044_v6 }
 0x865   : > { %12121 = vrot.lane.b32.xlu0 %v26185_v19, %s20470_s5  ;;  %12440 = vmatprep.subr.bf16.mxu0 %v20052_v49 }
 0x866   : > { %12620 = vmatpush2.bf16.msra.mxu1 %v20035_v50 }
 0x867   : > { %13065 = vmatprep.subr.bf16.mxu1 %v20043_v21 }
 0x868   : > { %12123 = vrot.lane.b32.xlu1 %v26195_v12, %s20470_s5  ;;  %12441 = vmatpush2.bf16.msra.mxu0 %v20050_v52  ;;  %v20049_v52 = vld [vmem:[%s27571_s18 + $0x64] ss:$8 sps:$4 sm:$0xff]  }
 0x869   : > { %12442 = vmatprep.subr.bf16.mxu0 %v20058_v59 }
 0x86c   : > { %12443 = vmatpush2.bf16.msra.mxu0 %v20056_v47 }
 0x86d   : > { %12810 = vmatprep.subr.bf16.mxu0 %v20064_v41  ;;  %v20047_v41 = vld [vmem:[%s27571_s18 + $0x60] ss:$8 sps:$4 sm:$0xff]  }
 0x8c3   : > { %v12086_v4 = vpop.permute.xlu0 %12085 }
 0x8c6   : > { %v12088_v38 = vpop.permute.xlu1 %12087 }
 0x8c7   : > { %v12098_v28 = vsel %vm12097_vm4, %v12086_v4, %v12088_v38  ;;  %v12114_v61 = vpop.permute.xlu0 %12113  ;;  %v12108_v16 = vmax.f32 %v26110_v34, %v12088_v38  ;;  %v20055_v38 = vld [vmem:[%s27571_s18 + $0x54] ss:$8 sps:$4 sm:$0xff]  }
 0x8c8   : > { %v12107_v53 = vmax.f32 %v26100_v2, %v12098_v28 }
 0x8ca   : > { %v12116_v42 = vpop.permute.xlu1 %12115 }
 0x8cb   : > { %v12125_v30 = vsel %vm10348_vm13, %v12114_v61, %v12116_v42  ;;  %v12135_v37 = vmax.f32 %v12108_v16, %v12116_v42  ;;  %v12090_v20 = vpop.permute.xlu0 %12089  ;;  %v20053_v61 = vld [vmem:[%s27571_s18 + $0x50] ss:$8 sps:$4 sm:$0xff]  }
 0x8cc   : > { %v12134_v18 = vmax.f32 %v12107_v53, %v12125_v30 }
 0x8cd   : > { %v12141_v40 = vmax.f32 %v12135_v37, 0.0 }
 0x8ce   : > { %v12140_v22 = vmax.f32 %v12134_v18, 0.0  ;;  %v12092_v1 = vpop.permute.xlu1 %12091 }
 0x8cf   : > { %v12160_v51 = vrot.slane %v12141_v40, 7  ;;  %v12099_v57 = vsel %vm12097_vm4, %v12090_v20, %v12092_v1  ;;  %v12118_v5 = vpop.permute.xlu0 %12117  ;;  %v12110_v34 = vmax.f32 %v26154_v7, %v12092_v1 }
 0x8d0   : > { %v12159_v27 = vrot.slane %v12140_v22, 7  ;;  %v12109_v2 = vmax.f32 %v26143_v32, %v12099_v57 }
 0x8d1   : > { %12179 = vst.msk [vmem:[#allocation5 + $0x8] sm:$0xfe] %vm12178_vm5, %v12160_v51 }
 0x8d2   : > { %12177 = vst [vmem:[#allocation5] sm:$0xfe] %v12159_v27  ;;  %v12120_v17 = vpop.permute.xlu1 %12119 }
 0x8d3   : > { %v12126_v35 = vsel %vm10348_vm13, %v12118_v5, %v12120_v17  ;;  %v12137_v46 = vmax.f32 %v12110_v34, %v12120_v17  ;;  %v12094_v0 = vpop.permute.xlu0 %12093 }
 0x8d4   : > { %v12136_v10 = vmax.f32 %v12109_v2, %v12126_v35 }
 0x8d5   : > { %v12143_v11 = vmax.f32 %v12137_v46, 0.0 }
 0x8d6   : > { %v12142_v14 = vmax.f32 %v12136_v10, 0.0  ;;  %v12096_v43 = vpop.permute.xlu1 %12095 }
 0x8d7   : > { %v12163_v54 = vrot.slane %v12143_v11, 7  ;;  %v12100_v39 = vsel %vm12097_vm4, %v12094_v0, %v12096_v43  ;;  %v12112_v7 = vmax.f32 %v26195_v12, %v12096_v43  ;;  %v12122_v15 = vpop.permute.xlu0 %12121 }
 0x8d8   : > { %v12161_v45 = vrot.slane %v12142_v14, 7  ;;  %v12111_v24 = vmax.f32 %v26185_v19, %v12100_v39  ;;  %v12189_v31 = vld [vmem:[#allocation5 + $0x8] sm:$0xff]  ;;  %v20059_v14 = vld [vmem:[%s27571_s18 + $0x40] ss:$8 sps:$4 sm:$0xff]  }
 0x8d9   : > { %v12164_v23 = vsel %vm2537_vm7, %v12160_v51, %v12163_v54  ;;  %v12222_v36 = vld [vmem:[#allocation5] sm:$0xfe]  ;;  %v12223_v19 = vld [vmem:[#allocation5 + $0x8] sm:$0xfe] }
 0x8da   : > { %v26266_v32 = vsel %vm2537_vm7, %v12159_v27, %v12161_v45  ;;  %12182 = vst.msk [vmem:[#allocation5 + $0x18] sm:$0xff] %vm12181_vm6, %v12164_v23  ;;  %v12124_v62 = vpop.permute.xlu1 %12123  ;;  %v12188_v12 = vld [vmem:[#allocation5] sm:$0xff]  ;;  %v12868_v6 = vld [vmem:[#allocation5 + $0x8] sm:$0xf8] }
 0x8db   : > { %v12127_v26 = vsel %vm10348_vm13, %v12122_v15, %v12124_v62  ;;  %v12139_v13 = vmax.f32 %v12112_v7, %v12124_v62  ;;  %v12226_v63 = vpack.c.bf16 %v26266_v32, %v12222_v36  ;;  %v12194_v49 = vpack.c.bf16 %v26266_v32, %v12188_v12  ;;  %v20061_v27 = vld [vmem:[%s27571_s18 + $0x44] ss:$8 sps:$4 sm:$0xff]   ;;  %v20062_v62 = vld [vmem:[%s27570_s17 + $0x70] ss:$8 sps:$4 sm:$0xff]  }
 0x8dc   : > { %v12138_v25 = vmax.f32 %v12111_v24, %v12127_v26  ;;  %v13122_v11 = vld [vmem:[#allocation5] sm:$0xf0] }
 0x8dd   : > { %v12145_v9 = vmax.f32 %v12139_v13, 0.0  ;;  %v12257_v4 = vshll.u32 %v12226_v63, 16 }
 0x8de   : > { %v12144_v44 = vmax.f32 %v12138_v25, 0.0  ;;  %v13126_v25 = vpack.c.bf16 %v26266_v32, %v13122_v11  ;;  %v20095_v11 = vld [vmem:[%s27571_s18 + $0xa0] ss:$8 sps:$4 sm:$0xff]  }
 0x8df   : > { %v12167_v58 = vrot.slane %v12145_v9, 7  ;;  %v12259_v51 = vrot.slane %v12257_v4, 1  ;;  %v20071_v4 = vld [vmem:[%s27571_s18 + $0x20] ss:$8 sps:$4 sm:$0xff]  }
 0x8e0   : > { %v12165_v3 = vrot.slane %v12144_v44, 7 }
 0x8e1   : > { %v12168_v48 = vsel %vm2537_vm7, %v12163_v54, %v12167_v58  ;;  %12187 = vst.msk [vmem:[#allocation5 + $0x38] sm:$0x1] %vm12186_vm8, %v12167_v58  ;;  %v26272_v29 = vld [vmem:[#allocation5 + $0x18] sm:$0xff]  ;;  %v12255_v54 = vshrl.u32 %v12226_v63, 16 }
 0x8e2   : > { %v26275_v55 = vsel %vm2537_vm7, %v12161_v45, %v12165_v3  ;;  %12184 = vst.msk [vmem:[#allocation5 + $0x28] sm:$0xff] %vm12181_vm6, %v12168_v48  ;;  %12185 = vst [vmem:[#allocation5 + $0x30] sm:$0x1] %v12165_v3  ;;  %v12195_v50 = vpack.c.bf16 %v26272_v29, %v12189_v31  ;;  %v12227_v21 = vpack.c.bf16 %v26272_v29, %v12223_v19  ;;  %v20067_v3 = vld [vmem:[%s27571_s18 + $0x34] ss:$8 sps:$4 sm:$0xff]   ;;  %vm16118_vm7 = vcmask 73728  }
 0x8e3   : > { %12183 = vst [vmem:[#allocation5 + $0x20] sm:$0xff] %v26275_v55  ;;  %v12876_v59 = vpack.c.bf16 %v26272_v29, %v12868_v6  ;;  %v12260_v26 = vor.u32 %v12259_v51, %v12255_v54  ;;  %v20070_v48 = vld [vmem:[%s27570_s17 + $0x64] ss:$8 sps:$4 sm:$0xff]   ;;  %v12641_v6 = vld [vmem:[#allocation5 + $0x8] sm:$0xfc] }
 0x8e4   : > { %17463 = vmatprep.mubr.msk.bf16.mxu1 %vm12181_vm6, %v12195_v50  ;;  %v12269_v47 = vshll.u32 %v12227_v21, 16  ;;  %v12267_v34 = vshrl.u32 %v12227_v21, 16  ;;  %v20065_v50 = vld [vmem:[%s27571_s18 + $0x30] ss:$8 sps:$4 sm:$0xff]   ;;  %v20073_v63 = vld [vmem:[%s27571_s18 + $0x24] ss:$8 sps:$4 sm:$0xff]  }
 0x8e5   : > { %12622 = vmatmul.mubr.bf16.vlgmr.msra.gmra.mxu1 %v12194_v49  ;;  %v12921_v28 = vshrl.u32 %v12876_v59, 16  ;;  %v12924_v53 = vshll.u32 %v12876_v59, 16  ;;  %v13158_v49 = vrot.slane %v13126_v25, 2  ;;  %v20076_v59 = vld [vmem:[%s27570_s17 + $0x54] ss:$8 sps:$4 sm:$0xff]  }
 0x8e6   : > { %13066 = vmatpush1.bf16.msra.mxu1 %v20041_v8  ;;  %v12271_v37 = vrot.slane %v12269_v47, 1  ;;  %v20068_v8 = vld [vmem:[%s27570_s17 + $0x60] ss:$8 sps:$4 sm:$0xff]   ;;  %v12645_v47 = vpack.c.bf16 %v26272_v29, %v12641_v6  ;;  %v20103_v54 = vld [vmem:[%s27571_s18 + $0x94] ss:$8 sps:$4 sm:$0xff]  }
 0x8e7   : > { %13067 = vmatprep.subr.bf16.mxu1 %v20049_v52  ;;  %v12923_v17 = vrot.slane %v12921_v28, 1  ;;  %v12926_v46 = vrot.slane %v12924_v53, 2  ;;  %v20083_v51 = vld [vmem:[%s27571_s18] ss:$8 sps:$4 sm:$0xff]   ;;  %v20116_v6 = vld [vmem:[%s27570_s17 + $0x90] ss:$8 sps:$4 sm:$0xff]  }
 0x8e8   : > { %v12874_v16 = vld [vmem:[#allocation5 + $0x38] sm:$0x1]  ;;  %v12272_v43 = vor.u32 %v12271_v37, %v12267_v34  ;;  %v12679_v53 = vrot.slane %v12645_v47, 1  ;;  %v12646_v47 = vpack.c.bf16 %v26275_v55, %v26275_v55 }
 0x8e9   : > { %v12193_v42 = vld [vmem:[#allocation5 + $0x28] sm:$0x3f]  ;;  %v13124_v15 = vld [vmem:[#allocation5 + $0x30] sm:$0x3]  ;;  %v12927_v58 = vor.u32 %v12926_v46, %v12923_v17  ;;  %v20092_v17 = vld [vmem:[%s27570_s17 + $0x20] ss:$8 sps:$4 sm:$0xff]  }
 0x8ea   : > { %v12225_v30 = vld [vmem:[#allocation5 + $0x28] sm:$0x7f]  ;;  %13068 = vmatpush1.bf16.msra.mxu1 %v20047_v41  ;;  %v12197_v18 = vpack.c.bf16 %v12193_v42, %v12193_v42  ;;  %v12192_v40 = vld [vmem:[#allocation5 + $0x20] sm:$0x3f]  ;;  %v13128_v31 = vpack.c.bf16 %v13124_v15, %v26275_v55  ;;  %v12873_v34 = vld [vmem:[#allocation5 + $0x30] sm:$0x1] }
 0x8eb   : > { %v26300_v20 = vld [vmem:[#allocation5 + $0x28] sm:$0xff]  ;;  %v12229_v22 = vpack.c.bf16 %v12225_v30, %v12225_v30  ;;  %v12224_v1 = vld [vmem:[#allocation5 + $0x20] sm:$0x7f]  ;;  %13069 = vmatprep.subr.bf16.mxu1 %v20055_v38  ;;  %v12196_v5 = vpack.c.bf16 %v12192_v40, %v12192_v40 }
 0x8ec   : > { %v12878_v57 = vpack.c.bf16 %v12874_v16, %v26300_v20  ;;  %v12228_v2 = vpack.c.bf16 %v12224_v1, %v12224_v1  ;;  %17464 = vmatprep.mubr.msk.bf16.mxu1 %vm12181_vm6, %v12197_v18  ;;  %v12647_v21 = vpack.c.bf16 %v26300_v20, %v26300_v20  ;;  %v26340_v52 = vrot.slane %v13128_v31, 2  ;;  %v20079_v42 = vld [vmem:[%s27571_s18 + $0x14] ss:$8 sps:$4 sm:$0xff]   ;;  %v20082_v30 = vld [vmem:[%s27570_s17 + $0x44] ss:$8 sps:$4 sm:$0xff]  }
 0x8ed   : > { %v12274_v35 = vshll.u32 %v12229_v22, 16  ;;  %12632 = vmatmul.mubr.bf16.gmra.mxu1 %v12196_v5  ;;  %v12281_v23 = vshrl.u32 %v12229_v22, 16  ;;  %v20077_v18 = vld [vmem:[%s27571_s18 + $0x10] ss:$8 sps:$4 sm:$0xff]   ;;  %v20080_v40 = vld [vmem:[%s27570_s17 + $0x40] ss:$8 sps:$4 sm:$0xff]  }
 0x8ee   : > { %v12929_v10 = vshrl.u32 %v12878_v57, 16  ;;  %v12932_v0 = vshll.u32 %v12878_v57, 16  ;;  %v12262_v39 = vshll.u32 %v12228_v2, 16  ;;  %13070 = vmatpush1.bf16.msra.mxu1 %v20053_v61  ;;  %v26349_v41 = vsel %vm2131_vm3, %v13158_v49, %v26340_v52  ;;  %v20074_v61 = vld [vmem:[%s27570_s17 + $0x50] ss:$8 sps:$4 sm:$0xff]  }
 0x8ef   : > { %v12276_v45 = vrot.slane %v12274_v35, 1  ;;  %13071 = vmatprep.subr.bf16.mxu1 %v20061_v27  ;;  %v12278_v38 = vshrl.u32 %v12228_v2, 16  ;;  %v26354_v28 = vrot.slane %v12647_v21, 1  ;;  %v20085_v22 = vld [vmem:[%s27571_s18 + $0x4] ss:$8 sps:$4 sm:$0xff]  }
 0x8f0   : > { %v12931_v7 = vrot.slane %v12929_v10, 1  ;;  %v12934_v24 = vrot.slane %v12932_v0, 2  ;;  %v12264_v13 = vrot.slane %v12262_v39, 1  ;;  %v20088_v1 = vld [vmem:[%s27570_s17 + $0x34] ss:$8 sps:$4 sm:$0xff]   ;;  %v12877_v0 = vpack.c.bf16 %v12873_v34, %v26275_v55 }
 0x8f1   : > { %v12277_v9 = vsel %vm3050_vm9, %v12272_v43, %v12276_v45  ;;  %v12283_v44 = vor.u32 %v12281_v23, %v12276_v45  ;;  %v12681_v37 = vsel %vm2040_vm2, %v12679_v53, %v26354_v28  ;;  %v20086_v57 = vld [vmem:[%s27570_s17 + $0x30] ss:$8 sps:$4 sm:$0xff]   ;;  %v20091_v5 = vld [vmem:[%s27571_s18 + $0xb4] ss:$8 sps:$4 sm:$0xff]   ;;  %v20094_v27 = vld [vmem:[%s27570_s17 + $0x24] ss:$8 sps:$4 sm:$0xff]  }
 0x8f2   : > { %v26315_v36 = vor.u32 %v12934_v24, %v12931_v7  ;;  %17437 = vmatprep.mubr.msk.bf16.mxu0 %vm12181_vm6, %v12277_v9  ;;  %v12265_v12 = vsel %vm3050_vm9, %v12260_v26, %v12264_v13  ;;  %13072 = vmatpush1.bf16.msra.mxu1 %v20059_v14  ;;  %v12280_v16 = vor.u32 %v12278_v38, %v12264_v13  ;;  %v20089_v2 = vld [vmem:[%s27571_s18 + $0xb0] ss:$8 sps:$4 sm:$0xff]   ;;  %v20097_v35 = vld [vmem:[%s27571_s18 + $0xa4] ss:$8 sps:$4 sm:$0xff]   ;;  %v20100_v10 = vld [vmem:[%s27570_s17 + $0x14] ss:$8 sps:$4 sm:$0xff]  }
 0x8f3   : > { %12445 = vmatmul.mubr.bf16.vlgmr.msra.gmra.mxu0 %v12265_v12  ;;  %13073 = vmatprep.subr.bf16.mxu1 %v20067_v3  ;;  %v12867_v46 = vld [vmem:[#allocation5] sm:$0xf8]  ;;  %v20098_v43 = vld [vmem:[%s27570_s17 + $0x10] ss:$8 sps:$4 sm:$0xff]   ;;  %v12912_v45 = vshrl.u32 %v12877_v0, 16  ;;  %v12915_v23 = vshll.u32 %v12877_v0, 16 }
 0x8f4   : > { %v12936_v19 = vsel %vm7288_vm11, %v12927_v58, %v26315_v36  ;;  %12811 = vmatpush1.bf16.msra.mxu0 %v20062_v62  ;;  %17438 = vmatprep.mubr.msk.bf16.mxu0 %vm12181_vm6, %v12283_v44  ;;  %v12875_v14 = vpack.c.bf16 %v26266_v32, %v12867_v46  ;;  %v20106_v39 = vld [vmem:[%s27570_s17 + $0x4] ss:$8 sps:$4 sm:$0xff]   ;;  %v20101_v7 = vld [vmem:[%s27571_s18 + $0x90] ss:$8 sps:$4 sm:$0xff]   ;;  %v20104_v62 = vld [vmem:[%s27570_s17] ss:$8 sps:$4 sm:$0xff]  }
 0x8f5   : > { %17515 = vmatprep.mubr.msk.bf16.mxu1 %vm12181_vm6, %v12936_v19  ;;  %12812 = vmatprep.subr.bf16.mxu0 %v20070_v48  ;;  %v20109_v26 = vld [vmem:[%s27571_s18 + $0x84] ss:$8 sps:$4 sm:$0xff]   ;;  %v20112_v13 = vld [vmem:[%s27570_s17 + $0xb4] ss:$8 sps:$4 sm:$0xff]   ;;  %v12914_v25 = vrot.slane %v12912_v45, 1  ;;  %v12917_v9 = vrot.slane %v12915_v23, 2 }
 0x8f6   : > { %13074 = vmatpush1.bf16.msra.mxu1 %v20065_v50  ;;  %v12904_v24 = vshrl.u32 %v12875_v14, 16  ;;  %v12907_v15 = vshll.u32 %v12875_v14, 16  ;;  %v20107_v44 = vld [vmem:[%s27571_s18 + $0x80] ss:$8 sps:$4 sm:$0xff]   ;;  %v20110_v12 = vld [vmem:[%s27570_s17 + $0xb0] ss:$8 sps:$4 sm:$0xff]  }
 0x8f7   : > { %13075 = vmatprep.subr.bf16.mxu1 %v20073_v63  ;;  %v12918_v48 = vor.u32 %v12917_v9, %v12914_v25  ;;  %v20115_v31 = vld [vmem:[%s27570_s17 + $0xa4] ss:$8 sps:$4 sm:$0xff]   ;;  %v20113_v50 = vld [vmem:[%s27570_s17 + $0xa0] ss:$8 sps:$4 sm:$0xff]   ;;  %v20118_v63 = vld [vmem:[%s27570_s17 + $0x94] ss:$8 sps:$4 sm:$0xff]  }
 0x8f8   : > { %12813 = vmatpush1.bf16.msra.mxu0 %v20068_v8  ;;  %v12906_v58 = vrot.slane %v12904_v24, 1  ;;  %v12909_v3 = vrot.slane %v12907_v15, 2  ;;  %v27706_v8 = vmov 0   ;;  %v20121_v49 = vld [vmem:[%s27570_s17 + $0x84] ss:$8 sps:$4 sm:$0xff]  }
 0x8f9   : > { %12814 = vmatprep.subr.bf16.mxu0 %v20076_v59  ;;  %v12640_v59 = vld [vmem:[#allocation5] sm:$0xfc]  ;;  %v20124_v38 = vld [vmem:[%s27572_s19 + $0x74] ss:$8 sps:$4 sm:$0xff]   ;;  %v20122_v55 = vld [vmem:[%s27572_s19 + $0x70] ss:$8 sps:$4 sm:$0xff]  }
 0x8fa   : > { %13076 = vmatpush1.bf16.msra.mxu1 %v20071_v4  ;;  %v12910_v19 = vor.u32 %v12909_v3, %v12906_v58  ;;  %v20119_v4 = vld [vmem:[%s27570_s17 + $0x80] ss:$8 sps:$4 sm:$0xff]   ;;  %v20139_v34 = vld [vmem:[%s27572_s19 + $0x24] ss:$8 sps:$4 sm:$0xff]   ;;  %v20148_v0 = vld [vmem:[%s27572_s19 + $0xb4] ss:$8 sps:$4 sm:$0xff]  }
 0x8fb   : > { %12455 = vmatmul.mubr.bf16.gmra.mxu0 %v12280_v16  ;;  %13077 = vmatprep.subr.bf16.mxu1 %v20079_v42  ;;  %v13125_v53 = vld [vmem:[#allocation5 + $0x38] sm:$0x3]  ;;  %v20127_v42 = vld [vmem:[%s27572_s19 + $0x64] ss:$8 sps:$4 sm:$0xff]  }
 0x8fc   : > { %12815 = vmatpush1.bf16.msra.mxu0 %v20074_v61  ;;  %17489 = vmatprep.mubr.msk.bf16.mxu0 %vm12181_vm6, %v12681_v37  ;;  %v12919_v21 = vsel %vm7288_vm11, %v12910_v19, %v12918_v48  ;;  %v12677_v61 = vrot.slane %v12646_v47, 1  ;;  %v20125_v37 = vld [vmem:[%s27572_s19 + $0x60] ss:$8 sps:$4 sm:$0xff]   ;;  %v20145_v46 = vld [vmem:[%s27572_s19 + $0x4] ss:$8 sps:$4 sm:$0xff]  }
 0x8fd   : > { %12816 = vmatprep.subr.bf16.mxu0 %v20082_v30  ;;  %v13129_v30 = vpack.c.bf16 %v13125_v53, %v26300_v20  ;;  %v20128_v20 = vld [vmem:[%s27572_s19 + $0x50] ss:$8 sps:$4 sm:$0xff]   ;;  %v20151_v14 = vld [vmem:[%s27572_s19 + $0xa4] ss:$8 sps:$4 sm:$0xff]   ;;  %v20155_v23 = vld [vmem:[%s27572_s19 + $0x80] ss:$8 sps:$4 sm:$0xff]  }
 0x8fe   : > { %13078 = vmatpush1.bf16.msra.mxu1 %v20077_v18  ;;  %v13123_v18 = vld [vmem:[#allocation5 + $0x8] sm:$0xf0]  ;;  %v20157_v45 = vld [vmem:[%s27572_s19 + $0x84] ss:$8 sps:$4 sm:$0xff]  }
 0x8ff   : > { %13079 = vmatprep.subr.bf16.mxu1 %v20085_v22  ;;  %v13127_v22 = vpack.c.bf16 %v26272_v29, %v13123_v18  ;;  %v20131_v29 = vld [vmem:[%s27572_s19 + $0x40] ss:$8 sps:$4 sm:$0xff]  }
 0x900   : > { %12817 = vmatpush1.bf16.msra.mxu0 %v20080_v40  ;;  %v20130_v40 = vld [vmem:[%s27572_s19 + $0x54] ss:$8 sps:$4 sm:$0xff]   ;;  %v20166_v53 = vld [vmem:[%s27574_s21 + $0x68] sm:$0xff]  }
 0x901   : > { %12818 = vmatprep.subr.bf16.mxu0 %v20088_v1  ;;  %v13162_v1 = vrot.slane %v13129_v30, 2 }
 0x902   : > { %13080 = vmatpush1.bf16.msra.mxu1 %v20083_v51  ;;  %v20133_v51 = vld [vmem:[%s27572_s19 + $0x44] ss:$8 sps:$4 sm:$0xff]  }
 0x903   : > { %13089 = vmatprep.subr.bf16.mxu1 %v20091_v5  ;;  %v20136_v5 = vld [vmem:[%s27572_s19 + $0x34] ss:$8 sps:$4 sm:$0xff]  }
 0x904   : > { %12819 = vmatpush1.bf16.msra.mxu0 %v20086_v57 }
 0x905   : > { %12820 = vmatprep.subr.bf16.mxu0 %v20094_v27  ;;  %v20134_v27 = vld [vmem:[%s27572_s19 + $0x30] ss:$8 sps:$4 sm:$0xff]  }
 0x906   : > { %13090 = vmatpush2.bf16.msra.mxu1 %v20089_v2  ;;  %v20137_v2 = vld [vmem:[%s27572_s19 + $0x20] ss:$8 sps:$4 sm:$0xff]  }
 0x907   : > { %13091 = vmatprep.subr.bf16.mxu1 %v20097_v35  ;;  %v20140_v35 = vld [vmem:[%s27572_s19 + $0x10] ss:$8 sps:$4 sm:$0xff]  }
 0x908   : > { %12821 = vmatpush1.bf16.msra.mxu0 %v20092_v17  ;;  %v20142_v17 = vld [vmem:[%s27572_s19 + $0x14] ss:$8 sps:$4 sm:$0xff]  }
 0x909   : > { %12822 = vmatprep.subr.bf16.mxu0 %v20100_v10  ;;  %v20143_v10 = vld [vmem:[%s27572_s19] ss:$8 sps:$4 sm:$0xff]  }
 0x90a   : > { %13092 = vmatpush2.bf16.msra.mxu1 %v20095_v11  ;;  %v20146_v11 = vld [vmem:[%s27572_s19 + $0xb0] ss:$8 sps:$4 sm:$0xff]  }
 0x90b   : > { %13093 = vmatprep.subr.bf16.mxu1 %v20103_v54  ;;  %v20154_v54 = vld [vmem:[%s27572_s19 + $0x94] ss:$8 sps:$4 sm:$0xff]  }
 0x90c   : > { %12823 = vmatpush1.bf16.msra.mxu0 %v20098_v43  ;;  %v20149_v43 = vld [vmem:[%s27572_s19 + $0xa0] ss:$8 sps:$4 sm:$0xff]  }
 0x90d   : > { %12824 = vmatprep.subr.bf16.mxu0 %v20106_v39  ;;  %v20152_v39 = vld [vmem:[%s27572_s19 + $0x90] ss:$8 sps:$4 sm:$0xff]  }
 0x90e   : > { %13094 = vmatpush2.bf16.msra.mxu1 %v20101_v7 }
 0x90f   : > { %13095 = vmatprep.subr.bf16.mxu1 %v20109_v26 }
 0x910   : > { %12825 = vmatpush1.bf16.msra.mxu0 %v20104_v62 }
 0x911   : > { %12834 = vmatprep.subr.bf16.mxu0 %v20112_v13 }
 0x912   : > { %13096 = vmatpush2.bf16.msra.mxu1 %v20107_v44  ;;  %v20158_v44 = vld [vmem:[%s27574_s21 + $0x88] sm:$0xff]  }
 0x913   : > { %13598 = vmatprep.subr.bf16.mxu1 %v27706_v8 }
 0x914   : > { %12835 = vmatpush2.bf16.msra.mxu0 %v20110_v12 }
 0x915   : > { %12836 = vmatprep.subr.bf16.mxu0 %v20115_v31  ;;  %13098 = vmatmul.mubr.bf16.vlgmr.msra.gmra.mxu1 %v12919_v21 }
 0x916   : > { %17516 = vmatprep.mubr.msk.bf16.mxu1 %vm12181_vm6, %v26315_v36  ;;  %v12644_v36 = vpack.c.bf16 %v26266_v32, %v12640_v59  ;;  %13599 = vmatpush1.bf16.msra.mxu1 %v20158_v44 }
 0x917   : > { %13600 = vmatprep.subr.bf16.mxu1 %v27706_v8 }
 0x918   : > { %12837 = vmatpush2.bf16.msra.mxu0 %v20113_v50  ;;  %v12676_v16 = vrot.slane %v12644_v36, 1  ;;  %v20164_v36 = vld [vmem:[%s27574_s21 + $0x70] sm:$0xff]  }
 0x919   : > { %12838 = vmatprep.subr.bf16.mxu0 %v20118_v63  ;;  %v20162_v63 = vld [vmem:[%s27574_s21 + $0x78] sm:$0xff]  }
 0x91a   : > { %v12678_v32 = vsel %vm2040_vm2, %v12676_v16, %v12677_v61 }
 0x91c   : > { %12839 = vmatpush2.bf16.msra.mxu0 %v20116_v6  ;;  %v20163_v6 = vld [vmem:[%s27574_s21 + $0x1b8] sm:$0xff]  }
 0x91d   : > { %12840 = vmatprep.subr.bf16.mxu0 %v20121_v49  ;;  %13108 = vmatmul.mubr.bf16.gmra.mxu1 %v12918_v48  ;;  %v20161_v48 = vld [vmem:[%s27574_s21 + $0x1c0] sm:$0xff]  }
 0x920   : > { %12841 = vmatpush2.bf16.msra.mxu0 %v20119_v4 }
 0x921   : > { %13292 = vmatprep.subr.bf16.mxu0 %v20124_v38  ;;  %v20165_v38 = vld [vmem:[%s27574_s21 + $0x1b0] sm:$0xff]  }
 0x923   : > { %12843 = vmatmul.mubr.bf16.vlgmr.msra.gmra.mxu0 %v12678_v32  ;;  %v20168_v32 = vld [vmem:[%s27574_s21 + $0x60] sm:$0xff]  }
 0x924   : > { %17490 = vmatprep.mubr.msk.bf16.mxu0 %vm12181_vm6, %v26354_v28  ;;  %13293 = vmatpush1.bf16.msra.mxu0 %v20122_v55  ;;  %v13161_v28 = vrot.slane %v13127_v22, 2 }
 0x925   : > { %13294 = vmatprep.subr.bf16.mxu0 %v20127_v42  ;;  %v20167_v42 = vld [vmem:[%s27574_s21 + $0x1a8] sm:$0xff]  }
 0x926   : > { %v13163_v57 = vsel %vm2131_vm3, %v13161_v28, %v13162_v1 }
 0x928   : > { %13295 = vmatpush1.bf16.msra.mxu0 %v20125_v37 }
 0x929   : > { %13296 = vmatprep.subr.bf16.mxu0 %v20130_v40 }
 0x92b   : > { %12853 = vmatmul.mubr.bf16.gmra.mxu0 %v12677_v61 }
 0x92c   : > { %13297 = vmatpush1.bf16.msra.mxu0 %v20128_v20  ;;  %17541 = vmatprep.mubr.msk.bf16.mxu0 %vm12181_vm6, %v13163_v57 }
 0x92d   : > { %13298 = vmatprep.subr.bf16.mxu0 %v20133_v51 }
 0x930   : > { %13299 = vmatpush1.bf16.msra.mxu0 %v20131_v29 }
 0x931   : > { %13300 = vmatprep.subr.bf16.mxu0 %v20136_v5 }
 0x934   : > { %13301 = vmatpush1.bf16.msra.mxu0 %v20134_v27 }
 0x935   : > { %13302 = vmatprep.subr.bf16.mxu0 %v20139_v34 }
 0x938   : > { %13303 = vmatpush1.bf16.msra.mxu0 %v20137_v2 }
 0x939   : > { %13304 = vmatprep.subr.bf16.mxu0 %v20142_v17 }
 0x93c   : > { %13305 = vmatpush1.bf16.msra.mxu0 %v20140_v35 }
 0x93d   : > { %13306 = vmatprep.subr.bf16.mxu0 %v20145_v46 }
 0x940   : > { %13307 = vmatpush1.bf16.msra.mxu0 %v20143_v10 }
 0x941   : > { %13316 = vmatprep.subr.bf16.mxu0 %v20148_v0 }
 0x944   : > { %13317 = vmatpush2.bf16.msra.mxu0 %v20146_v11  ;;  %v13349_v11 = vld [vmem:[%s27573_s20] sm:$0x3] }
 0x945   : > { %13318 = vmatprep.subr.bf16.mxu0 %v20151_v14 }
 0x948   : > { %13319 = vmatpush2.bf16.msra.mxu0 %v20149_v43 }
 0x949   : > { %13320 = vmatprep.subr.bf16.mxu0 %v20154_v54 }
 0x94c   : > { %13321 = vmatpush2.bf16.msra.mxu0 %v20152_v39 }
 0x94d   : > { %13322 = vmatprep.subr.bf16.mxu0 %v20157_v45  ;;  %v13354_v45 = vrot.slane %v13349_v11, %v21159_v33 }
 0x950   : > { %13323 = vmatpush2.bf16.msra.mxu0 %v20155_v23 }
 0x951   : > { %13894 = vmatprep.subr.bf16.mxu0 %v27706_v8 }
 0x953   : > { %13325 = vmatmul.mubr.bf16.vlgmr.msra.gmra.mxu0 %v26349_v41  ;;  %v20159_v41 = vld [vmem:[%s27574_s21 + $0x1c8] sm:$0xff]  }
 0x954   : > { %17542 = vmatprep.mubr.msk.bf16.mxu0 %vm12181_vm6, %v13162_v1  ;;  %13895 = vmatpush1.bf16.msra.mxu0 %v20159_v41 }
 0x955   : > { %13896 = vmatprep.subr.bf16.mxu0 %v27706_v8 }
 0x958   : > { %13897 = vmatpush1.bf16.msra.mxu0 %v20161_v48 }
 0x959   : > { %13898 = vmatprep.subr.bf16.mxu0 %v27706_v8 }
 0x95b   : > { %13335 = vmatmul.mubr.bf16.gmra.mxu0 %v26340_v52  ;;  %v20160_v52 = vld [vmem:[%s27574_s21 + $0x80] sm:$0xff]  }
 0x95c   : > { %13601 = vmatpush1.bf16.msra.mxu1 %v20160_v52  ;;  %13899 = vmatpush1.bf16.msra.mxu0 %v20163_v6 }
 0x95d   : > { %13602 = vmatprep.subr.bf16.mxu1 %v27706_v8  ;;  %13900 = vmatprep.subr.bf16.mxu0 %v27706_v8 }
 0x960   : > { %13603 = vmatpush1.bf16.msra.mxu1 %v20162_v63  ;;  %13901 = vmatpush1.bf16.msra.mxu0 %v20165_v38 }
 0x961   : > { %13604 = vmatprep.subr.bf16.mxu1 %v27706_v8  ;;  %13902 = vmatprep.subr.bf16.mxu0 %v27706_v8 }
 0x964   : > { %13605 = vmatpush1.bf16.msra.mxu1 %v20164_v36  ;;  %13903 = vmatpush1.bf16.msra.mxu0 %v20167_v42 }
 0x965   : > { %13606 = vmatprep.subr.bf16.mxu1 %v27706_v8  ;;  %13904 = vmatprep.subr.bf16.mxu0 %v27706_v8 }
 0x968   : > { %13607 = vmatpush1.bf16.msra.mxu1 %v20166_v53 }
 0x969   : > { %13608 = vmatprep.subr.bf16.mxu1 %v27706_v8 }
 0x96c   : > { %13609 = vmatpush1.bf16.msra.mxu1 %v20168_v32 }
 0x96d   : > { %13610 = vmatprep.subr.bf16.mxu1 %v27706_v8 }
 0x9a5   : > { %v12623_v7 = vpop.f32.mrf.mxu1 }
 0x9a7   : > { %v12625_v24 = vpop.f32.mrf.mxu1 }
 0x9a9   : > { %v12627_v15 = vpop.f32.mrf.mxu1 }
 0x9ab   : > { %v12629_v62 = vpop.f32.mrf.mxu1 }
 0x9ad   : > { %v12633_v26 = vpop.f32.mrf.mxu1 }
 0x9af   : > { %v12635_v13 = vpop.f32.mrf.mxu1 }
 0x9b1   : > { %v12637_v25 = vpop.f32.mrf.mxu1 }
 0x9b3   : > { %v12446_v9 = vpop.f32.mrf.mxu0  ;;  %v12638_v3 = vpop.f32.mrf.mxu1 }
 0x9b4   : > { %v12624_v58 = vadd.f32 %v12623_v7, %v12446_v9  ;;  %v13358_v7 = vrot.slane %v13349_v11, %v21175_v60 }
 0x9b5   : > { %v12448_v12 = vpop.f32.mrf.mxu0 }
 0x9b6   : > { %v12626_v31 = vadd.f32 %v12625_v24, %v12448_v12 }
 0x9b7   : > { %v12450_v19 = vpop.f32.mrf.mxu0 }
 0x9b8   : > { %v12628_v50 = vadd.f32 %v12627_v15, %v12450_v19 }
 0x9b9   : > { %v12452_v21 = vpop.f32.mrf.mxu0 }
 0x9ba   : > { %v12630_v49 = vadd.f32 %v12629_v62, %v12452_v21 }
 0x9bb   : > { %v12456_v59 = vpop.f32.mrf.mxu0 }
 0x9bc   : > { %v12634_v47 = vadd.f32 %v12633_v26, %v12456_v59  ;;  %v20169_v59 = vld [vmem:[%s27574_s21 + $0x1a0] sm:$0xff]  }
 0x9bd   : > { %v12458_v4 = vpop.f32.mrf.mxu0  ;;  %13905 = vmatpush1.bf16.msra.mxu0 %v20169_v59 }
 0x9be   : > { %v12636_v61 = vadd.f32 %v12635_v13, %v12458_v4  ;;  %13906 = vmatprep.subr.bf16.mxu0 %v27706_v8 }
 0x9bf   : > { %v12460_v16 = vpop.f32.mrf.mxu0 }
 0x9c1   : > { %v12461_v55 = vpop.f32.mrf.mxu0 }
 0x9d5   : > { %v13099_v30 = vpop.f32.mrf.mxu1 }
 0x9d7   : > { %v13101_v37 = vpop.f32.mrf.mxu1 }
 0x9d9   : > { %v13103_v18 = vpop.f32.mrf.mxu1 }
 0x9db   : > { %v13105_v40 = vpop.f32.mrf.mxu1 }
 0x9dd   : > { %v13109_v22 = vpop.f32.mrf.mxu1 }
 0x9df   : > { %v13111_v1 = vpop.f32.mrf.mxu1 }
 0x9e1   : > { %v13113_v20 = vpop.f32.mrf.mxu1 }
 0x9e3   : > { %v12844_v28 = vpop.f32.mrf.mxu0  ;;  %v13114_v57 = vpop.f32.mrf.mxu1 }
 0x9e4   : > { %v12861_v51 = vadd.f32 %v12844_v28, %v12624_v58 }
 0x9e5   : > { %v12846_v29 = vpop.f32.mrf.mxu0 }
 0x9e6   : > { %v13116_v5 = vadd.f32 %v13099_v30, %v12861_v51  ;;  %v12862_v10 = vadd.f32 %v12846_v29, %v12626_v31 }
 0x9e7   : > { %v12848_v27 = vpop.f32.mrf.mxu0 }
 0x9e8   : > { %v12863_v0 = vadd.f32 %v12848_v27, %v12628_v50  ;;  %v13117_v54 = vadd.f32 %v13101_v37, %v12862_v10 }
 0x9e9   : > { %v12850_v34 = vpop.f32.mrf.mxu0 }
 0x9ea   : > { %v12864_v43 = vadd.f32 %v12850_v34, %v12630_v49  ;;  %v13118_v62 = vadd.f32 %v13103_v18, %v12863_v0 }
 0x9eb   : > { %v12854_v2 = vpop.f32.mrf.mxu0 }
 0x9ec   : > { %v12865_v24 = vadd.f32 %v12854_v2, %v12634_v47  ;;  %v13119_v9 = vadd.f32 %v13105_v40, %v12864_v43  ;;  %v20170_v47 = vld [vmem:[%s27574_s21 + $0x58] sm:$0xff]  }
 0x9ed   : > { %v12856_v17 = vpop.f32.mrf.mxu0  ;;  %13611 = vmatpush1.bf16.msra.mxu1 %v20170_v47  ;;  %v20171_v2 = vld [vmem:[%s27574_s21 + $0x198] sm:$0xff]  }
 0x9ee   : > { %v12866_v26 = vadd.f32 %v12856_v17, %v12636_v61  ;;  %v13120_v52 = vadd.f32 %v13109_v22, %v12865_v24  ;;  %13612 = vmatprep.subr.bf16.mxu1 %v27706_v8  ;;  %v20172_v17 = vld [vmem:[%s27574_s21 + $0x50] sm:$0xff]   ;;  %13907 = vmatpush1.bf16.msra.mxu0 %v20171_v2 }
 0x9ef   : > { %v12858_v35 = vpop.f32.mrf.mxu0  ;;  %13908 = vmatprep.subr.bf16.mxu0 %v27706_v8  ;;  %v20185_v2 = vld [vmem:[%s27574_s21 + $0x2f0] sm:$0xff]  }
 0x9f0   : > { %v13121_v31 = vadd.f32 %v13111_v1, %v12866_v26  ;;  %v20176_v26 = vld [vmem:[%s27574_s21 + $0x90] sm:$0xff]  }
 0x9f1   : > { %v12859_v46 = vpop.f32.mrf.mxu0  ;;  %13613 = vmatpush1.bf16.msra.mxu1 %v20172_v17  ;;  %v20186_v17 = vld [vmem:[%s27574_s21 + $0x108] sm:$0xff]  }
 0x9f2   : > { %13626 = vmatprep.subr.bf16.mxu1 %v27706_v8 }
 0xa13   : > { %v13326_v14 = vpop.f32.mrf.mxu0 }
 0xa14   : > { %v13343_v39 = vadd.f32 %v13326_v14, %v13116_v5 }
 0xa15   : > { %v13328_v23 = vpop.f32.mrf.mxu0 }
 0xa16   : > { %v13344_v15 = vadd.f32 %v13328_v23, %v13117_v54  ;;  %v13361_v44 = vadd.f32 %v13354_v45, %v13343_v39  ;;  %v20173_v23 = vld [vmem:[%s27574_s21 + $0x190] sm:$0xff]  }
 0xa17   : > { %v13330_v13 = vpop.f32.mrf.mxu0  ;;  %13909 = vmatpush1.bf16.msra.mxu0 %v20173_v23  ;;  %v20196_v23 = vld [vmem:[%s27574_s21 + $0x130] sm:$0xff]  }
 0xa18   : > { %v13345_v25 = vadd.f32 %v13330_v13, %v13118_v62  ;;  %v13362_v41 = vadd.f32 %v13358_v7, %v13344_v15  ;;  %v13373_v60 = vrot.slane %v13361_v44, 1  ;;  %v13395_v63 = vrot.slane %v13361_v44, 2  ;;  %13922 = vmatprep.subr.bf16.mxu0 %v27706_v8  ;;  %v20175_v62 = vld [vmem:[%s27574_s21 + $0x1d8] sm:$0xff]   ;;  %v20177_v13 = vld [vmem:[%s27574_s21 + $0x1d0] sm:$0xff]  }
 0xa19   : > { %v13332_v58 = vpop.f32.mrf.mxu0 }
 0xa1a   : > { %v13363_v3 = vadd.f32 %v13354_v45, %v13345_v25  ;;  %v13346_v12 = vadd.f32 %v13332_v58, %v13119_v9  ;;  %v13376_v6 = vrot.slane %v13362_v41, 1  ;;  %v13398_v16 = vrot.slane %v13362_v41, 2 }
 0xa1b   : > { %v13336_v48 = vpop.f32.mrf.mxu0  ;;  %13923 = vmatpush2.bf16.msra.mxu0 %v20175_v62 }
 0xa1c   : > { %v13374_v19 = vrot.slane %v13363_v3, 1  ;;  %v13396_v33 = vrot.slane %v13363_v3, 2  ;;  %v13364_v50 = vadd.f32 %v13358_v7, %v13346_v12  ;;  %v13347_v21 = vadd.f32 %v13336_v48, %v13120_v52  ;;  %13924 = vmatprep.subr.bf16.mxu0 %v27706_v8 }
 0xa1d   : > { %v13338_v49 = vpop.f32.mrf.mxu0 }
 0xa1e   : > { %v13377_v4 = vrot.slane %v13364_v50, 1  ;;  %v13399_v36 = vrot.slane %v13364_v50, 2  ;;  %v13365_v38 = vadd.f32 %v13354_v45, %v13347_v21  ;;  %v13348_v61 = vadd.f32 %v13338_v49, %v13121_v31 }
 0xa1f   : > { %v13340_v55 = vpop.f32.mrf.mxu0  ;;  %v13375_v53 = vsel %vm2040_vm2, %v13373_v60, %v13374_v19  ;;  %v13397_v42 = vsel %vm2131_vm3, %v13395_v63, %v13396_v33  ;;  %13925 = vmatpush2.bf16.msra.mxu0 %v20177_v13  ;;  %v20199_v13 = vld [vmem:[%s27574_s21 + $0x448] sm:$0xff]  }
 0xa20   : > { %v13379_v32 = vrot.slane %v13365_v38, 1  ;;  %v13401_v30 = vrot.slane %v13365_v38, 2  ;;  %v13366_v37 = vadd.f32 %v13358_v7, %v13348_v61  ;;  %v13378_v18 = vsel %vm2040_vm2, %v13376_v6, %v13377_v4  ;;  %v20174_v7 = vld [vmem:[%s27574_s21 + $0x98] sm:$0xff]   ;;  %14190 = vmatprep.subr.bf16.mxu0 %v27706_v8 }
 0xa21   : > { %v13341_v40 = vpop.f32.mrf.mxu0  ;;  %v13389_v22 = vmax.f32 %v13361_v44, %v13375_v53  ;;  %v13390_v1 = vmax.f32 %v13362_v41, %v13378_v18  ;;  %v13400_v20 = vsel %vm2131_vm3, %v13398_v16, %v13399_v36  ;;  %13627 = vmatpush2.bf16.msra.mxu1 %v20174_v7  ;;  %v20178_v18 = vld [vmem:[%s27574_s21 + $0x128] sm:$0xff]   ;;  %v20197_v7 = vld [vmem:[%s27574_s21 + $0x310] sm:$0xff]  }
 0xa22   : > { %v13381_v28 = vrot.slane %v13366_v37, 1  ;;  %v13403_v51 = vrot.slane %v13366_v37, 2  ;;  %v13380_v57 = vsel %vm2040_vm2, %v13374_v19, %v13379_v32  ;;  %v13402_v34 = vsel %vm2131_vm3, %v13396_v33, %v13401_v30  ;;  %13628 = vmatprep.subr.bf16.mxu1 %v27706_v8 }
 0xa23   : > { %v26606_v29 = vmax.f32 %v13389_v22, %v13397_v42  ;;  %v13412_v5 = vmax.f32 %v13390_v1, %v13400_v20  ;;  %v13391_v27 = vmax.f32 %v13363_v3, %v13380_v57  ;;  %v13393_v43 = vmax.f32 %v13365_v38, %v13379_v32  ;;  %v20179_v20 = vld [vmem:[%s27574_s21 + $0x308] sm:$0xff]   ;;  %v20180_v57 = vld [vmem:[%s27574_s21 + $0x120] sm:$0xff]  }
 0xa24   : > { %v13382_v35 = vsel %vm2040_vm2, %v13377_v4, %v13381_v28  ;;  %v13404_v46 = vsel %vm2131_vm3, %v13399_v36, %v13403_v51  ;;  %v13394_v10 = vmax.f32 %v13366_v37, %v13381_v28  ;;  %vm20473_vm2 = vmmov 0  }
 0xa25   : > { %v18202_v0 = vpack.i.bf16 %v13412_v5, %v26606_v29  ;;  %v13392_v11 = vmax.f32 %v13364_v50, %v13382_v35  ;;  %v13413_v14 = vmax.f32 %v13391_v27, %v13402_v34  ;;  %v26631_v24 = vmax.f32 %v13393_v43, %v13401_v30  ;;  %13629 = vmatpush2.bf16.msra.mxu1 %v20176_v26  ;;  %v20183_v27 = vld [vmem:[%s27574_s21 + $0x2f8] sm:$0xff]   ;;  %v20184_v34 = vld [vmem:[%s27574_s21 + $0x110] sm:$0xff]   ;;  %v20187_v35 = vld [vmem:[%s27574_s21 + $0x2e8] sm:$0xff]  }
 0xa26   : > { %v26621_v45 = vmax.f32 %v13394_v10, %v13403_v51  ;;  %13746 = vmatprep.subr.bf16.mxu1 %v27706_v8  ;;  %v20189_v10 = vld [vmem:[%s27574_s21 + $0x2e0] sm:$0xff]   ;;  %v20193_v43 = vld [vmem:[%s27574_s21 + $0x2d0] sm:$0xff]   ;;  %vm16044_vm3 = vcmask 64512  }
 0xa27   : > { %18203 = vrot.lane.b32.xlu0 %v18202_v0, %s20472_s1  ;;  %v13414_v54 = vmax.f32 %v13392_v11, %v13404_v46  ;;  %v20188_v46 = vld [vmem:[%s27574_s21 + $0x100] sm:$0xff]   ;;  %v20191_v11 = vld [vmem:[%s27574_s21 + $0x2d8] sm:$0xff]  }
 0xa28   : > { %v18222_v15 = vpack.i.bf16 %v26621_v45, %v26631_v24 }
 0xa29   : > { %v18212_v39 = vpack.i.bf16 %v13414_v54, %v13413_v14 }
 0xa2b   : > { %18208 = vrot.lane.b32.xlu0 %v18202_v0, %s20470_s5  ;;  %18213 = vrot.lane.b32.xlu1 %v18212_v39, %s20472_s1  ;;  %v20190_v0 = vld [vmem:[%s27574_s21 + $0xf8] sm:$0xff]  }
 0xa2f   : > { %18223 = vrot.lane.b32.xlu0 %v18222_v15, %s20472_s1  ;;  %18218 = vrot.lane.b32.xlu1 %v18212_v39, %s20470_s5  ;;  %v20195_v39 = vld [vmem:[%s27574_s21 + $0x318] sm:$0xff]  }
 0xa33   : > { %18228 = vrot.lane.b32.xlu1 %v18222_v15, %s20470_s5  ;;  %v20198_v15 = vld [vmem:[%s27574_s21 + $0x268] sm:$0xff]  }
 0xa99   : > { %v18204_v25 = vpop.permute.xlu0 %18203 }
 0xa9a   : > { %v18206_v9 = vunpack.i.h.bf16 %v18204_v25  ;;  %v18205_v44 = vunpack.i.l.bf16 %v18204_v25 }
 0xa9c   : > { %v13435_v31 = vsel %vm12097_vm4, %v18205_v44, %v18206_v9  ;;  %v13445_v19 = vmax.f32 %v13412_v5, %v18206_v9  ;;  %v20182_v5 = vld [vmem:[%s27574_s21 + $0x118] sm:$0xff]   ;;  %v20200_v44 = vld [vmem:[%s27574_s21 + $0x260] sm:$0xff]  }
 0xa9d   : > { %v18209_v41 = vpop.permute.xlu0 %18208  ;;  %v18214_v58 = vpop.permute.xlu1 %18213  ;;  %v13444_v60 = vmax.f32 %v26606_v29, %v13435_v31  ;;  %v20181_v29 = vld [vmem:[%s27574_s21 + $0x300] sm:$0xff]   ;;  %v20207_v31 = vld [vmem:[%s27574_s21 + $0x428] sm:$0xff]  }
 0xa9e   : > { %v18211_v3 = vunpack.i.h.bf16 %v18209_v41  ;;  %v18210_v12 = vunpack.i.l.bf16 %v18209_v41  ;;  %v18216_v52 = vunpack.i.h.bf16 %v18214_v58  ;;  %v18215_v48 = vunpack.i.l.bf16 %v18214_v58  ;;  %v20201_v41 = vld [vmem:[%s27574_s21 + $0x440] sm:$0xff]   ;;  %v20202_v58 = vld [vmem:[%s27574_s21 + $0x258] sm:$0xff]  }
 0xaa0   : > { %v13462_v33 = vsel %vm10348_vm13, %v18210_v12, %v18211_v3  ;;  %v13436_v50 = vsel %vm12097_vm4, %v18215_v48, %v18216_v52  ;;  %v13472_v63 = vmax.f32 %v13445_v19, %v18211_v3  ;;  %v13447_v6 = vmax.f32 %v13414_v54, %v18216_v52  ;;  %v20194_v54 = vld [vmem:[%s27574_s21 + $0x138] sm:$0xff]   ;;  %v20204_v12 = vld [vmem:[%s27574_s21 + $0x250] sm:$0xff]   ;;  %v20206_v48 = vld [vmem:[%s27574_s21 + $0x248] sm:$0xff]  }
 0xaa1   : > { %v18219_v21 = vpop.permute.xlu1 %18218  ;;  %v13471_v47 = vmax.f32 %v13444_v60, %v13462_v33  ;;  %v13446_v4 = vmax.f32 %v13413_v14, %v13436_v50  ;;  %v20192_v14 = vld [vmem:[%s27574_s21 + $0xf0] sm:$0xff]   ;;  %v20203_v3 = vld [vmem:[%s27574_s21 + $0x438] sm:$0xff]   ;;  %v20208_v19 = vld [vmem:[%s27574_s21 + $0x240] sm:$0xff]   ;;  %v26808_v50 = vpop.permute.xlu0 %18223 }
 0xaa2   : > { %v18221_v49 = vunpack.i.h.bf16 %v18219_v21  ;;  %v18220_v59 = vunpack.i.l.bf16 %v18219_v21  ;;  %v13478_v61 = vmax.f32 %v13472_v63, 0.0  ;;  %v20205_v52 = vld [vmem:[%s27574_s21 + $0x430] sm:$0xff]   ;;  %v20209_v33 = vld [vmem:[%s27574_s21 + $0x420] sm:$0xff]   ;;  %v20210_v21 = vld [vmem:[%s27574_s21 + $0x238] sm:$0xff]   ;;  %v18226_v63 = vunpack.i.h.bf16 %v26808_v50 }
 0xaa3   : > { %v13477_v53 = vmax.f32 %v13471_v47, 0.0 }
 0xaa4   : > { %v13474_v36 = vmax.f32 %v13447_v6, %v18221_v49  ;;  %v13463_v38 = vsel %vm10348_vm13, %v18220_v59, %v18221_v49  ;;  %v20211_v6 = vld [vmem:[%s27574_s21 + $0x418] sm:$0xff]   ;;  %v20212_v59 = vld [vmem:[%s27574_s21 + $0x230] sm:$0xff]   ;;  %v13449_v47 = vmax.f32 %v26621_v45, %v18226_v63 }
 0xaa5   : > { %v13473_v16 = vmax.f32 %v13446_v4, %v13463_v38  ;;  %v26814_v60 = vpop.permute.xlu1 %18228  ;;  %v20213_v4 = vld [vmem:[%s27574_s21 + $0x410] sm:$0xff]   ;;  %v20214_v38 = vld [vmem:[%s27574_s21 + $0x278] sm:$0xff]  }
 0xaa6   : > { %v13480_v55 = vmax.f32 %v13474_v36, 0.0  ;;  %v18231_v49 = vunpack.i.h.bf16 %v26814_v60  ;;  %v20215_v45 = vld [vmem:[%s27574_s21 + $0x458] sm:$0xff]  }
 0xaa7   : > { %v13479_v42 = vmax.f32 %v13473_v16, 0.0  ;;  %v20216_v16 = vld [vmem:[%s27574_s21 + $0x270] sm:$0xff]  }
 0xaa8   : > { %v26657_v32 = vpack.c.bf16 %v13480_v55, %v13478_v61  ;;  %v13476_v36 = vmax.f32 %v13449_v47, %v18231_v49  ;;  %v20217_v55 = vld [vmem:[%s27574_s21 + $0x450] sm:$0xff]   ;;  %v20253_v47 = vld [vmem:[%s27574_s21] sm:$0xff]  }
 0xaa9   : > { %v26659_v30 = vpack.c.bf16 %v13479_v42, %v13477_v53  ;;  %v20218_v42 = vld [vmem:[%s27574_s21 + $0x3a8] sm:$0xff]  }
 0xaaa   : > { %v26662_v37 = vshrl.u32 %v26657_v32, 16  ;;  %v13482_v61 = vmax.f32 %v13476_v36, 0.0  ;;  %v20255_v36 = vld [vmem:[%s27574_s21 + $0x48] sm:$0xff]  }
 0xaab   : > { %v26670_v40 = vshrl.u32 %v26659_v30, 16 }
 0xaac   : > { %17573 = vmatprep.mubr.msk.bf16.mxu1 %vm10560_vm15, %v26662_v37  ;;  %v13681_v22 = vrot.slane %v26662_v37, 1  ;;  %v13829_v1 = vrot.slane %v26662_v37, 2  ;;  %v14125_v51 = vrot.slane %v26662_v37, 4  ;;  %v13977_v26 = vrot.slane %v26662_v37, 3 }
 0xaad   : > { %13631 = vmatmul.mubr.bf16.vlgmr.msra.gmra.mxu1 %v26670_v40  ;;  %v13828_v28 = vrot.slane %v26670_v40, 2  ;;  %v13680_v62 = vrot.slane %v26670_v40, 1  ;;  %v14124_v25 = vrot.slane %v26670_v40, 4  ;;  %v14421_v9 = vrot.slane %v26662_v37, 6 }
 0xaae   : > { %17675 = vmatprep.mubr.msk.bf16.mxu0 %vm10560_vm15, %v13829_v1  ;;  %13747 = vmatpush1.bf16.msra.mxu1 %v20178_v18  ;;  %v26852_v53 = vpack.c.bf16 %v13482_v61, %v13482_v61  ;;  %v13976_v18 = vrot.slane %v26670_v40, 3  ;;  %v20219_v1 = vld [vmem:[%s27574_s21 + $0x588] sm:$0xff]  }
 0xaaf   : > { %17624 = vmatprep.mubr.msk.bf16.mxu1 %vm10560_vm15, %v13681_v22  ;;  %13927 = vmatmul.mubr.bf16.vlgmr.msra.gmra.mxu0 %v13828_v28  ;;  %v14273_v22 = vrot.slane %v26662_v37, 5  ;;  %v20258_v61 = vld [vmem:[%s27574_s21 + $0x628] sm:$0xff]  }
 0xab0   : > { %13748 = vmatprep.subr.bf16.mxu1 %v27706_v8  ;;  %14191 = vmatpush1.bf16.msra.mxu0 %v20179_v20  ;;  %v14420_v20 = vrot.slane %v26670_v40, 6  ;;  %v14720_v28 = vshrl.u32 %v26852_v53, 16 }
 0xab1   : > { %17777 = vmatprep.mubr.msk.bf16.mxu0 %vm10560_vm15, %v14125_v51  ;;  %14192 = vmatprep.subr.bf16.mxu0 %v27706_v8  ;;  %v20220_v51 = vld [vmem:[%s27574_s21 + $0x3a0] sm:$0xff]  }
 0xab2   : > { %13749 = vmatpush1.bf16.msra.mxu1 %v20180_v57  ;;  %v20221_v57 = vld [vmem:[%s27574_s21 + $0x580] sm:$0xff]  }
 0xab3   : > { %13750 = vmatprep.subr.bf16.mxu1 %v27706_v8 }
 0xab4   : > { %14193 = vmatpush1.bf16.msra.mxu0 %v20181_v29  ;;  %v20222_v29 = vld [vmem:[%s27574_s21 + $0x398] sm:$0xff]  }
 0xab5   : > { %14194 = vmatprep.subr.bf16.mxu0 %v27706_v8 }
 0xab6   : > { %13751 = vmatpush1.bf16.msra.mxu1 %v20182_v5  ;;  %v20223_v5 = vld [vmem:[%s27574_s21 + $0x578] sm:$0xff]  }
 0xab7   : > { %13752 = vmatprep.subr.bf16.mxu1 %v27706_v8 }
 0xab8   : > { %14195 = vmatpush1.bf16.msra.mxu0 %v20183_v27  ;;  %v20224_v27 = vld [vmem:[%s27574_s21 + $0x390] sm:$0xff]  }
 0xab9   : > { %14196 = vmatprep.subr.bf16.mxu0 %v27706_v8 }
 0xaba   : > { %13753 = vmatpush1.bf16.msra.mxu1 %v20184_v34  ;;  %v20225_v34 = vld [vmem:[%s27574_s21 + $0x570] sm:$0xff]  }
 0xabb   : > { %13754 = vmatprep.subr.bf16.mxu1 %v27706_v8 }
 0xabc   : > { %14197 = vmatpush1.bf16.msra.mxu0 %v20185_v2  ;;  %v20226_v2 = vld [vmem:[%s27574_s21 + $0x388] sm:$0xff]  }
 0xabd   : > { %14198 = vmatprep.subr.bf16.mxu0 %v27706_v8 }
 0xabe   : > { %13755 = vmatpush1.bf16.msra.mxu1 %v20186_v17  ;;  %v20227_v17 = vld [vmem:[%s27574_s21 + $0x568] sm:$0xff]  }
 0xabf   : > { %13756 = vmatprep.subr.bf16.mxu1 %v27706_v8 }
 0xac0   : > { %14199 = vmatpush1.bf16.msra.mxu0 %v20187_v35  ;;  %v20228_v35 = vld [vmem:[%s27574_s21 + $0x380] sm:$0xff]  }
 0xac1   : > { %14200 = vmatprep.subr.bf16.mxu0 %v27706_v8 }
 0xac2   : > { %13757 = vmatpush1.bf16.msra.mxu1 %v20188_v46  ;;  %v18225_v46 = vunpack.i.l.bf16 %v26808_v50  ;;  %v20246_v50 = vld [vmem:[%s27574_s21 + $0x4c8] sm:$0xff]  }
 0xac3   : > { %13758 = vmatprep.subr.bf16.mxu1 %v27706_v8 }
 0xac4   : > { %14201 = vmatpush1.bf16.msra.mxu0 %v20189_v10  ;;  %v20229_v10 = vld [vmem:[%s27574_s21 + $0x560] sm:$0xff]  }
 0xac5   : > { %14202 = vmatprep.subr.bf16.mxu0 %v27706_v8 }
 0xac6   : > { %13759 = vmatpush1.bf16.msra.mxu1 %v20190_v0  ;;  %v18230_v0 = vunpack.i.l.bf16 %v26814_v60  ;;  %v20248_v60 = vld [vmem:[%s27574_s21 + $0x4c0] sm:$0xff]  }
 0xac7   : > { %13760 = vmatprep.subr.bf16.mxu1 %v27706_v8 }
 0xac8   : > { %14203 = vmatpush1.bf16.msra.mxu0 %v20191_v11  ;;  %v20230_v11 = vld [vmem:[%s27574_s21 + $0x378] sm:$0xff]  }
 0xac9   : > { %14204 = vmatprep.subr.bf16.mxu0 %v27706_v8 }
 0xaca   : > { %13761 = vmatpush1.bf16.msra.mxu1 %v20192_v14  ;;  %v13437_v14 = vsel %vm12097_vm4, %v18225_v46, %v18226_v63  ;;  %v20249_v63 = vld [vmem:[%s27574_s21 + $0x10] sm:$0xff]   ;;  %v20274_v46 = vld [vmem:[%s27574_s21 + $0x638] sm:$0xff]  }
 0xacb   : > { %13774 = vmatprep.subr.bf16.mxu1 %v27706_v8 }
 0xacc   : > { %14205 = vmatpush1.bf16.msra.mxu0 %v20193_v43  ;;  %v20231_v43 = vld [vmem:[%s27574_s21 + $0x558] sm:$0xff]  }
 0xacd   : > { %14218 = vmatprep.subr.bf16.mxu0 %v27706_v8 }
 0xace   : > { %13775 = vmatpush2.bf16.msra.mxu1 %v20194_v54  ;;  %v13464_v54 = vsel %vm10348_vm13, %v18230_v0, %v18231_v49  ;;  %v20251_v49 = vld [vmem:[%s27574_s21 + $0x8] sm:$0xff]  }
 0xacf   : > { %13776 = vmatprep.subr.bf16.mxu1 %v27706_v8 }
 0xad0   : > { %14219 = vmatpush2.bf16.msra.mxu0 %v20195_v39  ;;  %v20232_v39 = vld [vmem:[%s27574_s21 + $0x370] sm:$0xff]  }
 0xad1   : > { %14220 = vmatprep.subr.bf16.mxu0 %v27706_v8 }
 0xad2   : > { %13777 = vmatpush2.bf16.msra.mxu1 %v20196_v23  ;;  %v13448_v23 = vmax.f32 %v26631_v24, %v13437_v14  ;;  %v20235_v24 = vld [vmem:[%s27574_s21 + $0x598] sm:$0xff]  }
 0xad3   : > { %14042 = vmatprep.subr.bf16.mxu1 %v27706_v8 }
 0xad4   : > { %14221 = vmatpush2.bf16.msra.mxu0 %v20197_v7  ;;  %v20233_v7 = vld [vmem:[%s27574_s21 + $0x550] sm:$0xff]  }
 0xad5   : > { %13779 = vmatmul.mubr.bf16.vlgmr.msra.gmra.mxu1 %v13680_v62  ;;  %14486 = vmatprep.subr.bf16.mxu0 %v27706_v8  ;;  %v20234_v62 = vld [vmem:[%s27574_s21 + $0x3b8] sm:$0xff]  }
 0xad6   : > { %14043 = vmatpush1.bf16.msra.mxu1 %v20198_v15  ;;  %17726 = vmatprep.mubr.msk.bf16.mxu1 %vm10560_vm15, %v13977_v26  ;;  %v13475_v15 = vmax.f32 %v13448_v23, %v13464_v54  ;;  %v20277_v54 = vld [vmem:[%s27574_s21 + $0x180] sm:$0xff]  }
 0xad7   : > { %14223 = vmatmul.mubr.bf16.vlgmr.msra.gmra.mxu0 %v14124_v25  ;;  %14044 = vmatprep.subr.bf16.mxu1 %v27706_v8  ;;  %v20237_v25 = vld [vmem:[%s27574_s21 + $0x590] sm:$0xff]  }
 0xad8   : > { %14487 = vmatpush1.bf16.msra.mxu0 %v20199_v13  ;;  %17879 = vmatprep.mubr.msk.bf16.mxu0 %vm10560_vm15, %v14421_v9  ;;  %v13481_v26 = vmax.f32 %v13475_v15, 0.0  ;;  %v20236_v13 = vld [vmem:[%s27574_s21 + $0x3b0] sm:$0xff]  }
 0xad9   : > { %14488 = vmatprep.subr.bf16.mxu0 %v27706_v8 }
 0xada   : > { %14045 = vmatpush1.bf16.msra.mxu1 %v20200_v44  ;;  %v26950_v9 = vpack.c.bf16 %v13481_v26, %v13481_v26  ;;  %v20238_v44 = vld [vmem:[%s27574_s21 + $0x4e8] sm:$0xff]   ;;  %v15079_v26 = vrot.slane %v26657_v32, 1 }
 0xadb   : > { %14046 = vmatprep.subr.bf16.mxu1 %v27706_v8 }
 0xadc   : > { %14489 = vmatpush1.bf16.msra.mxu0 %v20201_v41  ;;  %v14272_v41 = vrot.slane %v26670_v40, 5 }
 0xadd   : > { %14490 = vmatprep.subr.bf16.mxu0 %v27706_v8 }
 0xade   : > { %14047 = vmatpush1.bf16.msra.mxu1 %v20202_v58  ;;  %v14569_v58 = vrot.slane %v26662_v37, 7  ;;  %v20241_v37 = vld [vmem:[%s27574_s21 + $0x30] sm:$0xff]  }
 0xadf   : > { %14048 = vmatprep.subr.bf16.mxu1 %v27706_v8 }
 0xae0   : > { %14491 = vmatpush1.bf16.msra.mxu0 %v20203_v3  ;;  %v20239_v3 = vld [vmem:[%s27574_s21 + $0x38] sm:$0xff]  }
 0xae1   : > { %14492 = vmatprep.subr.bf16.mxu0 %v27706_v8 }
 0xae2   : > { %14049 = vmatpush1.bf16.msra.mxu1 %v20204_v12  ;;  %v14717_v12 = vshrl.u32 %v26950_v9, 16 }
 0xae3   : > { %14050 = vmatprep.subr.bf16.mxu1 %v27706_v8 }
 0xae4   : > { %14493 = vmatpush1.bf16.msra.mxu0 %v20205_v52  ;;  %v20240_v52 = vld [vmem:[%s27574_s21 + $0x4e0] sm:$0xff]  }
 0xae5   : > { %14494 = vmatprep.subr.bf16.mxu0 %v27706_v8 }
 0xae6   : > { %14051 = vmatpush1.bf16.msra.mxu1 %v20206_v48  ;;  %v20242_v48 = vld [vmem:[%s27574_s21 + $0x4d8] sm:$0xff]  }
 0xae7   : > { %14052 = vmatprep.subr.bf16.mxu1 %v27706_v8 }
 0xae8   : > { %14495 = vmatpush1.bf16.msra.mxu0 %v20207_v31  ;;  %v20243_v31 = vld [vmem:[%s27574_s21 + $0x28] sm:$0xff]  }
 0xae9   : > { %14496 = vmatprep.subr.bf16.mxu0 %v27706_v8 }
 0xaea   : > { %14053 = vmatpush1.bf16.msra.mxu1 %v20208_v19  ;;  %v20244_v19 = vld [vmem:[%s27574_s21 + $0x4d0] sm:$0xff]  }
 0xaeb   : > { %14054 = vmatprep.subr.bf16.mxu1 %v27706_v8 }
 0xaec   : > { %14497 = vmatpush1.bf16.msra.mxu0 %v20209_v33  ;;  %v20245_v33 = vld [vmem:[%s27574_s21 + $0x20] sm:$0xff]  }
 0xaed   : > { %14498 = vmatprep.subr.bf16.mxu0 %v27706_v8 }
 0xaee   : > { %14055 = vmatpush1.bf16.msra.mxu1 %v20210_v21  ;;  %v20247_v21 = vld [vmem:[%s27574_s21 + $0x18] sm:$0xff]  }
 0xaef   : > { %14056 = vmatprep.subr.bf16.mxu1 %v27706_v8 }
 0xaf0   : > { %14499 = vmatpush1.bf16.msra.mxu0 %v20211_v6  ;;  %v20250_v6 = vld [vmem:[%s27574_s21 + $0x4b8] sm:$0xff]  }
 0xaf1   : > { %14500 = vmatprep.subr.bf16.mxu0 %v27706_v8 }
 0xaf2   : > { %14057 = vmatpush1.bf16.msra.mxu1 %v20212_v59  ;;  %v20252_v59 = vld [vmem:[%s27574_s21 + $0x4b0] sm:$0xff]  }
 0xaf3   : > { %14070 = vmatprep.subr.bf16.mxu1 %v27706_v8 }
 0xaf4   : > { %14501 = vmatpush1.bf16.msra.mxu0 %v20213_v4  ;;  %v20254_v4 = vld [vmem:[%s27574_s21 + $0x4f8] sm:$0xff]  }
 0xaf5   : > { %14514 = vmatprep.subr.bf16.mxu0 %v27706_v8 }
 0xaf6   : > { %14071 = vmatpush2.bf16.msra.mxu1 %v20214_v38  ;;  %v20256_v38 = vld [vmem:[%s27574_s21 + $0x4f0] sm:$0xff]  }
 0xaf7   : > { %14072 = vmatprep.subr.bf16.mxu1 %v27706_v8 }
 0xaf8   : > { %14515 = vmatpush2.bf16.msra.mxu0 %v20215_v45  ;;  %v20257_v45 = vld [vmem:[%s27574_s21 + $0x40] sm:$0xff]  }
 0xaf9   : > { %14516 = vmatprep.subr.bf16.mxu0 %v27706_v8 }
 0xafa   : > { %14073 = vmatpush2.bf16.msra.mxu1 %v20216_v16  ;;  %v14568_v16 = vrot.slane %v26670_v40, 7  ;;  %v20260_v40 = vld [vmem:[%s27574_s21 + $0x620] sm:$0xff]  }
 0xafb   : > { %14338 = vmatprep.subr.bf16.mxu1 %v27706_v8 }
 0xafc   : > { %14517 = vmatpush2.bf16.msra.mxu0 %v20217_v55  ;;  %v14869_v55 = vrot.slane %v14720_v28, 1 }
 0xafd   : > { %14075 = vmatmul.mubr.bf16.vlgmr.msra.gmra.mxu1 %v13976_v18  ;;  %14786 = vmatprep.subr.bf16.mxu0 %v27706_v8  ;;  %v15185_v18 = vrot.slane %v26657_v32, 2 }
 0xafe   : > { %14339 = vmatpush1.bf16.msra.mxu1 %v20218_v42  ;;  %17828 = vmatprep.mubr.msk.bf16.mxu1 %vm10560_vm15, %v14273_v22  ;;  %v20259_v42 = vld [vmem:[%s27574_s21 + $0x178] sm:$0xff]   ;;  %v20261_v22 = vld [vmem:[%s27574_s21 + $0x170] sm:$0xff]  }
 0xaff   : > { %14519 = vmatmul.mubr.bf16.vlgmr.msra.gmra.mxu0 %v14420_v20  ;;  %14340 = vmatprep.subr.bf16.mxu1 %v27706_v8  ;;  %v20263_v20 = vld [vmem:[%s27574_s21 + $0x168] sm:$0xff]  }
 0xb00   : > { %14787 = vmatpush1.bf16.msra.mxu0 %v20219_v1  ;;  %17981 = vmatprep.mubr.msk.bf16.mxu0 %vm10560_vm15, %v14720_v28  ;;  %v20262_v1 = vld [vmem:[%s27574_s21 + $0x618] sm:$0xff]   ;;  %v20264_v28 = vld [vmem:[%s27574_s21 + $0x610] sm:$0xff]  }
 0xb01   : > { %14788 = vmatprep.subr.bf16.mxu0 %v27706_v8 }
 0xb02   : > { %14341 = vmatpush1.bf16.msra.mxu1 %v20220_v51  ;;  %v20265_v51 = vld [vmem:[%s27574_s21 + $0x160] sm:$0xff]  }
 0xb03   : > { %14342 = vmatprep.subr.bf16.mxu1 %v27706_v8 }
 0xb04   : > { %14789 = vmatpush1.bf16.msra.mxu0 %v20221_v57  ;;  %v20266_v57 = vld [vmem:[%s27574_s21 + $0x608] sm:$0xff]  }
 0xb05   : > { %14790 = vmatprep.subr.bf16.mxu0 %v27706_v8 }
 0xb06   : > { %14343 = vmatpush1.bf16.msra.mxu1 %v20222_v29  ;;  %v20267_v29 = vld [vmem:[%s27574_s21 + $0x158] sm:$0xff]  }
 0xb07   : > { %14344 = vmatprep.subr.bf16.mxu1 %v27706_v8 }
 0xb08   : > { %14791 = vmatpush1.bf16.msra.mxu0 %v20223_v5  ;;  %v20268_v5 = vld [vmem:[%s27574_s21 + $0x600] sm:$0xff]  }
 0xb09   : > { %14792 = vmatprep.subr.bf16.mxu0 %v27706_v8 }
 0xb0a   : > { %14345 = vmatpush1.bf16.msra.mxu1 %v20224_v27  ;;  %v20269_v27 = vld [vmem:[%s27574_s21 + $0x150] sm:$0xff]  }
 0xb0b   : > { %14346 = vmatprep.subr.bf16.mxu1 %v27706_v8 }
 0xb0c   : > { %14793 = vmatpush1.bf16.msra.mxu0 %v20225_v34  ;;  %v20270_v34 = vld [vmem:[%s27574_s21 + $0x5f8] sm:$0xff]  }
 0xb0d   : > { %14794 = vmatprep.subr.bf16.mxu0 %v27706_v8 }
 0xb0e   : > { %14347 = vmatpush1.bf16.msra.mxu1 %v20226_v2  ;;  %v20271_v2 = vld [vmem:[%s27574_s21 + $0x148] sm:$0xff]  }
 0xb0f   : > { %14348 = vmatprep.subr.bf16.mxu1 %v27706_v8 }
 0xb10   : > { %14795 = vmatpush1.bf16.msra.mxu0 %v20227_v17  ;;  %v20272_v17 = vld [vmem:[%s27574_s21 + $0x5f0] sm:$0xff]  }
 0xb11   : > { %14796 = vmatprep.subr.bf16.mxu0 %v27706_v8 }
 0xb12   : > { %14349 = vmatpush1.bf16.msra.mxu1 %v20228_v35  ;;  %v20273_v35 = vld [vmem:[%s27574_s21 + $0x140] sm:$0xff]  }
 0xb13   : > { %14350 = vmatprep.subr.bf16.mxu1 %v27706_v8 }
 0xb14   : > { %14797 = vmatpush1.bf16.msra.mxu0 %v20229_v10  ;;  %v20275_v10 = vld [vmem:[%s27574_s21 + $0x188] sm:$0xff]  }
 0xb15   : > { %14798 = vmatprep.subr.bf16.mxu0 %v27706_v8 }
 0xb16   : > { %14351 = vmatpush1.bf16.msra.mxu1 %v20230_v11  ;;  %v20276_v11 = vld [vmem:[%s27574_s21 + $0x630] sm:$0xff]  }
 0xb17   : > { %14352 = vmatprep.subr.bf16.mxu1 %v27706_v8 }
 0xb18   : > { %14799 = vmatpush1.bf16.msra.mxu0 %v20231_v43 }
 0xb19   : > { %14800 = vmatprep.subr.bf16.mxu0 %v27706_v8 }
 0xb1a   : > { %14353 = vmatpush1.bf16.msra.mxu1 %v20232_v39 }
 0xb1b   : > { %14366 = vmatprep.subr.bf16.mxu1 %v27706_v8 }
 0xb1c   : > { %14801 = vmatpush1.bf16.msra.mxu0 %v20233_v7  ;;  %v20278_v7 = vld [vmem:[%s27574_s21 + $0xd8] sm:$0xff]  }
 0xb1d   : > { %14814 = vmatprep.subr.bf16.mxu0 %v27706_v8 }
 0xb1e   : > { %14367 = vmatpush2.bf16.msra.mxu1 %v20234_v62 }
 0xb1f   : > { %14368 = vmatprep.subr.bf16.mxu1 %v27706_v8 }
 0xb20   : > { %14815 = vmatpush2.bf16.msra.mxu0 %v20235_v24  ;;  %v14868_v24 = vrot.slane %v14717_v12, 1 }
 0xb21   : > { %14816 = vmatprep.subr.bf16.mxu0 %v27706_v8 }
 0xb22   : > { %14369 = vmatpush2.bf16.msra.mxu1 %v20236_v13  ;;  %v20279_v13 = vld [vmem:[%s27574_s21 + $0x2b8] sm:$0xff]  }
 0xb23   : > { %14634 = vmatprep.subr.bf16.mxu1 %v27706_v8 }
 0xb24   : > { %14817 = vmatpush2.bf16.msra.mxu0 %v20237_v25 }
 0xb25   : > { %14371 = vmatmul.mubr.bf16.vlgmr.msra.gmra.mxu1 %v14272_v41  ;;  %15036 = vmatprep.subr.bf16.mxu0 %v27706_v8  ;;  %v15397_v41 = vrot.slane %v26657_v32, 4 }
 0xb26   : > { %14635 = vmatpush1.bf16.msra.mxu1 %v20238_v44  ;;  %17930 = vmatprep.mubr.msk.bf16.mxu1 %vm10560_vm15, %v14569_v58  ;;  %v15184_v44 = vrot.slane %v26659_v30, 2  ;;  %v20280_v58 = vld [vmem:[%s27574_s21 + $0xd0] sm:$0xff]  }
 0xb27   : > { %14819 = vmatmul.mubr.bf16.vlgmr.msra.gmra.mxu0 %v14717_v12  ;;  %14636 = vmatprep.subr.bf16.mxu1 %v27706_v8  ;;  %v20282_v12 = vld [vmem:[%s27574_s21 + $0xc8] sm:$0xff]  }
 0xb28   : > { %15037 = vmatpush1.bf16.msra.mxu0 %v20239_v3  ;;  %18043 = vmatprep.mubr.msk.bf16.mxu0 %vm10560_vm15, %v26657_v32  ;;  %v20281_v3 = vld [vmem:[%s27574_s21 + $0x2b0] sm:$0xff]  }
 0xb29   : > { %15038 = vmatprep.subr.bf16.mxu0 %v27706_v8 }
 0xb2a   : > { %14637 = vmatpush1.bf16.msra.mxu1 %v20240_v52  ;;  %v20283_v52 = vld [vmem:[%s27574_s21 + $0x2a8] sm:$0xff]  }
 0xb2b   : > { %14638 = vmatprep.subr.bf16.mxu1 %v27706_v8 }
 0xb2c   : > { %15039 = vmatpush1.bf16.msra.mxu0 %v20241_v37  ;;  %v20284_v37 = vld [vmem:[%s27574_s21 + $0xc0] sm:$0xff]  }
 0xb2d   : > { %15040 = vmatprep.subr.bf16.mxu0 %v27706_v8 }
 0xb2e   : > { %14639 = vmatpush1.bf16.msra.mxu1 %v20242_v48  ;;  %v20285_v48 = vld [vmem:[%s27574_s21 + $0x2a0] sm:$0xff]  }
 0xb2f   : > { %14640 = vmatprep.subr.bf16.mxu1 %v27706_v8 }
 0xb30   : > { %15041 = vmatpush1.bf16.msra.mxu0 %v20243_v31  ;;  %v20286_v31 = vld [vmem:[%s27574_s21 + $0xb8] sm:$0xff]  }
 0xb31   : > { %15042 = vmatprep.subr.bf16.mxu0 %v27706_v8 }
 0xb32   : > { %14641 = vmatpush1.bf16.msra.mxu1 %v20244_v19  ;;  %v20287_v19 = vld [vmem:[%s27574_s21 + $0x298] sm:$0xff]  }
 0xb33   : > { %14642 = vmatprep.subr.bf16.mxu1 %v27706_v8 }
 0xb34   : > { %15043 = vmatpush1.bf16.msra.mxu0 %v20245_v33  ;;  %v20288_v33 = vld [vmem:[%s27574_s21 + $0xb0] sm:$0xff]  }
 0xb35   : > { %15044 = vmatprep.subr.bf16.mxu0 %v27706_v8 }
 0xb36   : > { %14643 = vmatpush1.bf16.msra.mxu1 %v20246_v50  ;;  %v20289_v50 = vld [vmem:[%s27574_s21 + $0x290] sm:$0xff]  }
 0xb37   : > { %14644 = vmatprep.subr.bf16.mxu1 %v27706_v8 }
 0xb38   : > { %15045 = vmatpush1.bf16.msra.mxu0 %v20247_v21  ;;  %v20290_v21 = vld [vmem:[%s27574_s21 + $0xa8] sm:$0xff]  }
 0xb39   : > { %15046 = vmatprep.subr.bf16.mxu0 %v27706_v8 }
 0xb3a   : > { %14645 = vmatpush1.bf16.msra.mxu1 %v20248_v60  ;;  %v20291_v60 = vld [vmem:[%s27574_s21 + $0x288] sm:$0xff]  }
 0xb3b   : > { %14646 = vmatprep.subr.bf16.mxu1 %v27706_v8 }
 0xb3c   : > { %15047 = vmatpush1.bf16.msra.mxu0 %v20249_v63  ;;  %v20292_v63 = vld [vmem:[%s27574_s21 + $0xa0] sm:$0xff]  }
 0xb3d   : > { %15048 = vmatprep.subr.bf16.mxu0 %v27706_v8 }
 0xb3e   : > { %14647 = vmatpush1.bf16.msra.mxu1 %v20250_v6  ;;  %v20293_v6 = vld [vmem:[%s27574_s21 + $0x280] sm:$0xff]  }
 0xb3f   : > { %14648 = vmatprep.subr.bf16.mxu1 %v27706_v8 }
 0xb40   : > { %15049 = vmatpush1.bf16.msra.mxu0 %v20251_v49  ;;  %v20294_v49 = vld [vmem:[%s27574_s21 + $0xe8] sm:$0xff]  }
 0xb41   : > { %15050 = vmatprep.subr.bf16.mxu0 %v27706_v8 }
 0xb42   : > { %14649 = vmatpush1.bf16.msra.mxu1 %v20252_v59  ;;  %v20295_v59 = vld [vmem:[%s27574_s21 + $0x2c8] sm:$0xff]  }
 0xb43   : > { %14662 = vmatprep.subr.bf16.mxu1 %v27706_v8 }
 0xb44   : > { %15051 = vmatpush1.bf16.msra.mxu0 %v20253_v47 }
 0xb45   : > { %15064 = vmatprep.subr.bf16.mxu0 %v27706_v8 }
 0xb46   : > { %14663 = vmatpush2.bf16.msra.mxu1 %v20254_v4  ;;  %v20296_v4 = vld [vmem:[%s27574_s21 + $0xe0] sm:$0xff]  }
 0xb47   : > { %14664 = vmatprep.subr.bf16.mxu1 %v27706_v8 }
 0xb48   : > { %15065 = vmatpush2.bf16.msra.mxu0 %v20255_v36 }
 0xb49   : > { %15066 = vmatprep.subr.bf16.mxu0 %v27706_v8 }
 0xb4a   : > { %14665 = vmatpush2.bf16.msra.mxu1 %v20256_v38 }
 0xb4b   : > { %14934 = vmatprep.subr.bf16.mxu1 %v27706_v8 }
 0xb4c   : > { %15067 = vmatpush2.bf16.msra.mxu0 %v20257_v45  ;;  %v20297_v45 = vld [vmem:[%s27574_s21 + $0x2c0] sm:$0xff]  }
 0xb4d   : > { %14667 = vmatmul.mubr.bf16.vlgmr.msra.gmra.mxu1 %v14568_v16  ;;  %15250 = vmatprep.subr.bf16.mxu0 %v27706_v8 }
 0xb4e   : > { %14935 = vmatpush1.bf16.msra.mxu1 %v20258_v61  ;;  %18032 = vmatprep.mubr.msk.bf16.mxu1 %vm10560_vm15, %v14869_v55  ;;  %v20298_v55 = vld [vmem:[%s27574_s21 + $0x218] sm:$0xff]  }
 0xb4f   : > { %15069 = vmatmul.mubr.bf16.vlgmr.msra.gmra.mxu0 %v26659_v30  ;;  %14936 = vmatprep.subr.bf16.mxu1 %v27706_v8 }
 0xb50   : > { %15251 = vmatpush1.bf16.msra.mxu0 %v20259_v42  ;;  %18065 = vmatprep.mubr.msk.bf16.mxu0 %vm10560_vm15, %v15185_v18 }
 0xb51   : > { %15252 = vmatprep.subr.bf16.mxu0 %v27706_v8 }
 0xb52   : > { %14937 = vmatpush1.bf16.msra.mxu1 %v20260_v40  ;;  %v15078_v40 = vrot.slane %v26659_v30, 1 }
 0xb53   : > { %14938 = vmatprep.subr.bf16.mxu1 %v27706_v8 }
 0xb54   : > { %15253 = vmatpush1.bf16.msra.mxu0 %v20261_v22  ;;  %v15291_v22 = vrot.slane %v26657_v32, 3 }
 0xb55   : > { %15254 = vmatprep.subr.bf16.mxu0 %v27706_v8 }
 0xb56   : > { %14939 = vmatpush1.bf16.msra.mxu1 %v20262_v1  ;;  %v20299_v1 = vld [vmem:[%s27574_s21 + $0x3f8] sm:$0xff]  }
 0xb57   : > { %14940 = vmatprep.subr.bf16.mxu1 %v27706_v8 }
 0xb58   : > { %15255 = vmatpush1.bf16.msra.mxu0 %v20263_v20 }
 0xb59   : > { %15256 = vmatprep.subr.bf16.mxu0 %v27706_v8 }
 0xb5a   : > { %14941 = vmatpush1.bf16.msra.mxu1 %v20264_v28  ;;  %v15396_v28 = vrot.slane %v26659_v30, 4 }
 0xb5b   : > { %14942 = vmatprep.subr.bf16.mxu1 %v27706_v8 }
 0xb5c   : > { %15257 = vmatpush1.bf16.msra.mxu0 %v20265_v51  ;;  %v15609_v51 = vrot.slane %v26657_v32, 6 }
 0xb5d   : > { %15258 = vmatprep.subr.bf16.mxu0 %v27706_v8 }
 0xb5e   : > { %14943 = vmatpush1.bf16.msra.mxu1 %v20266_v57  ;;  %v20300_v57 = vld [vmem:[%s27574_s21 + $0x210] sm:$0xff]  }
 0xb5f   : > { %14944 = vmatprep.subr.bf16.mxu1 %v27706_v8 }
 0xb60   : > { %15259 = vmatpush1.bf16.msra.mxu0 %v20267_v29  ;;  %v20301_v29 = vld [vmem:[%s27574_s21 + $0x3f0] sm:$0xff]  }
 0xb61   : > { %15260 = vmatprep.subr.bf16.mxu0 %v27706_v8 }
 0xb62   : > { %14945 = vmatpush1.bf16.msra.mxu1 %v20268_v5  ;;  %v20302_v5 = vld [vmem:[%s27574_s21 + $0x208] sm:$0xff]  }
 0xb63   : > { %14946 = vmatprep.subr.bf16.mxu1 %v27706_v8 }
 0xb64   : > { %15261 = vmatpush1.bf16.msra.mxu0 %v20269_v27  ;;  %v20303_v27 = vld [vmem:[%s27574_s21 + $0x3e8] sm:$0xff]  }
 0xb65   : > { %15262 = vmatprep.subr.bf16.mxu0 %v27706_v8 }
 0xb66   : > { %14947 = vmatpush1.bf16.msra.mxu1 %v20270_v34  ;;  %v20304_v34 = vld [vmem:[%s27574_s21 + $0x200] sm:$0xff]  }
 0xb67   : > { %14948 = vmatprep.subr.bf16.mxu1 %v27706_v8 }
 0xb68   : > { %15263 = vmatpush1.bf16.msra.mxu0 %v20271_v2  ;;  %v20305_v2 = vld [vmem:[%s27574_s21 + $0x3e0] sm:$0xff]  }
 0xb69   : > { %15264 = vmatprep.subr.bf16.mxu0 %v27706_v8 }
 0xb6a   : > { %14949 = vmatpush1.bf16.msra.mxu1 %v20272_v17  ;;  %v20306_v17 = vld [vmem:[%s27574_s21 + $0x1f8] sm:$0xff]  }
 0xb6b   : > { %14962 = vmatprep.subr.bf16.mxu1 %v27706_v8 }
 0xb6c   : > { %15265 = vmatpush1.bf16.msra.mxu0 %v20273_v35  ;;  %v20307_v35 = vld [vmem:[%s27574_s21 + $0x3d8] sm:$0xff]  }
 0xb6d   : > { %v27119_v0 = vpop.f32.mrf.mxu1  ;;  %15278 = vmatprep.subr.bf16.mxu0 %v27706_v8 }
 0xb6e   : > { %14963 = vmatpush2.bf16.msra.mxu1 %v20274_v46  ;;  %v20308_v46 = vld [vmem:[%s27574_s21 + $0x1f0] sm:$0xff]  }
 0xb6f   : > { %v13634_v14 = vpop.f32.mrf.mxu1  ;;  %v27125_v43 = vpop.f32.mrf.mxu0  ;;  %14964 = vmatprep.subr.bf16.mxu1 %v27706_v8 }
 0xb70   : > { %15279 = vmatpush2.bf16.msra.mxu0 %v20275_v10  ;;  %v20309_v10 = vld [vmem:[%s27574_s21 + $0x3d0] sm:$0xff]   ;;  %v20311_v14 = vld [vmem:[%s27574_s21 + $0x3c8] sm:$0xff]  }
 0xb71   : > { %v13635_v39 = vpop.f32.mrf.mxu1  ;;  %v13930_v23 = vpop.f32.mrf.mxu0  ;;  %15280 = vmatprep.subr.bf16.mxu0 %v27706_v8 }
 0xb72   : > { %14965 = vmatpush2.bf16.msra.mxu1 %v20276_v11  ;;  %v20310_v11 = vld [vmem:[%s27574_s21 + $0x1e8] sm:$0xff]   ;;  %v20313_v39 = vld [vmem:[%s27574_s21 + $0x3c0] sm:$0xff]  }
 0xb73   : > { %v13636_v15 = vpop.f32.mrf.mxu1  ;;  %v13931_v62 = vpop.f32.mrf.mxu0  ;;  %15144 = vmatprep.subr.bf16.mxu1 %v27706_v8  ;;  %v20314_v23 = vld [vmem:[%s27574_s21 + $0x228] sm:$0xff]  }
 0xb74   : > { %15281 = vmatpush2.bf16.msra.mxu0 %v20277_v54  ;;  %v20312_v54 = vld [vmem:[%s27574_s21 + $0x1e0] sm:$0xff]  }
 0xb75   : > { %14967 = vmatmul.mubr.bf16.vlgmr.msra.gmra.mxu1 %v14868_v24  ;;  %v13932_v25 = vpop.f32.mrf.mxu0  ;;  %15462 = vmatprep.subr.bf16.mxu0 %v27706_v8  ;;  %v20316_v62 = vld [vmem:[%s27574_s21 + $0x220] sm:$0xff]  }
 0xb76   : > { %15145 = vmatpush1.bf16.msra.mxu1 %v20278_v7  ;;  %18054 = vmatprep.mubr.msk.bf16.mxu1 %vm10560_vm15, %v15079_v26  ;;  %v20315_v7 = vld [vmem:[%s27574_s21 + $0x408] sm:$0xff]  }
 0xb77   : > { %15283 = vmatmul.mubr.bf16.vlgmr.msra.gmra.mxu0 %v15184_v44  ;;  %15146 = vmatprep.subr.bf16.mxu1 %v27706_v8 }
 0xb78   : > { %15463 = vmatpush1.bf16.msra.mxu0 %v20279_v13  ;;  %18087 = vmatprep.mubr.msk.bf16.mxu0 %vm10560_vm15, %v15397_v41  ;;  %v20317_v13 = vld [vmem:[%s27574_s21 + $0x400] sm:$0xff]   ;;  %v20318_v41 = vld [vmem:[%s27574_s21 + $0x358] sm:$0xff]  }
 0xb79   : > { %15464 = vmatprep.subr.bf16.mxu0 %v27706_v8 }
 0xb7a   : > { %15147 = vmatpush1.bf16.msra.mxu1 %v20280_v58 }
 0xb7b   : > { %15148 = vmatprep.subr.bf16.mxu1 %v27706_v8 }
 0xb7c   : > { %15465 = vmatpush1.bf16.msra.mxu0 %v20281_v3 }
 0xb7d   : > { %15466 = vmatprep.subr.bf16.mxu0 %v27706_v8 }
 0xb7e   : > { %15149 = vmatpush1.bf16.msra.mxu1 %v20282_v12  ;;  %v15290_v12 = vrot.slane %v26659_v30, 3 }
 0xb7f   : > { %15150 = vmatprep.subr.bf16.mxu1 %v27706_v8 }
 0xb80   : > { %15467 = vmatpush1.bf16.msra.mxu0 %v20283_v52  ;;  %v15503_v52 = vrot.slane %v26657_v32, 5 }
 0xb81   : > { %15468 = vmatprep.subr.bf16.mxu0 %v27706_v8 }
 0xb82   : > { %15151 = vmatpush1.bf16.msra.mxu1 %v20284_v37  ;;  %v20319_v37 = vld [vmem:[%s27574_s21 + $0x538] sm:$0xff]  }
 0xb83   : > { %15152 = vmatprep.subr.bf16.mxu1 %v27706_v8 }
 0xb84   : > { %15469 = vmatpush1.bf16.msra.mxu0 %v20285_v48 }
 0xb85   : > { %15470 = vmatprep.subr.bf16.mxu0 %v27706_v8 }
 0xb86   : > { %15153 = vmatpush1.bf16.msra.mxu1 %v20286_v31  ;;  %v15608_v31 = vrot.slane %v26659_v30, 6 }
 0xb87   : > { %15154 = vmatprep.subr.bf16.mxu1 %v27706_v8 }
 0xb88   : > { %15471 = vmatpush1.bf16.msra.mxu0 %v20287_v19  ;;  %v20320_v19 = vld [vmem:[%s27574_s21 + $0x350] sm:$0xff]  }
 0xb89   : > { %15472 = vmatprep.subr.bf16.mxu0 %v27706_v8 }
 0xb8a   : > { %15155 = vmatpush1.bf16.msra.mxu1 %v20288_v33  ;;  %v20321_v33 = vld [vmem:[%s27574_s21 + $0x530] sm:$0xff]  }
 0xb8b   : > { %15156 = vmatprep.subr.bf16.mxu1 %v27706_v8 }
 0xb8c   : > { %15473 = vmatpush1.bf16.msra.mxu0 %v20289_v50  ;;  %v20322_v50 = vld [vmem:[%s27574_s21 + $0x348] sm:$0xff]  }
 0xb8d   : > { %15474 = vmatprep.subr.bf16.mxu0 %v27706_v8 }
 0xb8e   : > { %15157 = vmatpush1.bf16.msra.mxu1 %v20290_v21  ;;  %v20323_v21 = vld [vmem:[%s27574_s21 + $0x528] sm:$0xff]  }
 0xb8f   : > { %15158 = vmatprep.subr.bf16.mxu1 %v27706_v8 }
 0xb90   : > { %15475 = vmatpush1.bf16.msra.mxu0 %v20291_v60  ;;  %v20324_v60 = vld [vmem:[%s27574_s21 + $0x340] sm:$0xff]  }
 0xb91   : > { %15476 = vmatprep.subr.bf16.mxu0 %v27706_v8 }
 0xb92   : > { %15159 = vmatpush1.bf16.msra.mxu1 %v20292_v63  ;;  %v20325_v63 = vld [vmem:[%s27574_s21 + $0x520] sm:$0xff]  }
 0xb93   : > { %15172 = vmatprep.subr.bf16.mxu1 %v27706_v8 }
 0xb94   : > { %15477 = vmatpush1.bf16.msra.mxu0 %v20293_v6  ;;  %v20326_v6 = vld [vmem:[%s27574_s21 + $0x338] sm:$0xff]  }
 0xb95   : > { %v27210_v47 = vpop.f32.mrf.mxu1  ;;  %15490 = vmatprep.subr.bf16.mxu0 %v27706_v8 }
 0xb96   : > { %15173 = vmatpush2.bf16.msra.mxu1 %v20294_v49  ;;  %v20327_v49 = vld [vmem:[%s27574_s21 + $0x518] sm:$0xff]  }
 0xb97   : > { %v13782_v36 = vpop.f32.mrf.mxu1  ;;  %v27216_v38 = vpop.f32.mrf.mxu0  ;;  %15174 = vmatprep.subr.bf16.mxu1 %v27706_v8 }
 0xb98   : > { %15491 = vmatpush2.bf16.msra.mxu0 %v20295_v59  ;;  %v20328_v59 = vld [vmem:[%s27574_s21 + $0x330] sm:$0xff]   ;;  %v20330_v36 = vld [vmem:[%s27574_s21 + $0x328] sm:$0xff]  }
 0xb99   : > { %v13783_v61 = vpop.f32.mrf.mxu1  ;;  %v14226_v16 = vpop.f32.mrf.mxu0  ;;  %15492 = vmatprep.subr.bf16.mxu0 %v27706_v8 }
 0xb9a   : > { %15175 = vmatpush2.bf16.msra.mxu1 %v20296_v4  ;;  %v20329_v4 = vld [vmem:[%s27574_s21 + $0x510] sm:$0xff]   ;;  %v20332_v61 = vld [vmem:[%s27574_s21 + $0x320] sm:$0xff]  }
 0xb9b   : > { %v13784_v42 = vpop.f32.mrf.mxu1  ;;  %v14227_v18 = vpop.f32.mrf.mxu0  ;;  %15356 = vmatprep.subr.bf16.mxu1 %v27706_v8  ;;  %v20333_v16 = vld [vmem:[%s27574_s21 + $0x500] sm:$0xff]  }
 0xb9c   : > { %15493 = vmatpush2.bf16.msra.mxu0 %v20297_v45  ;;  %v20331_v45 = vld [vmem:[%s27574_s21 + $0x508] sm:$0xff]  }
 0xb9d   : > { %v14228_v20 = vpop.f32.mrf.mxu0  ;;  %15177 = vmatmul.mubr.bf16.vlgmr.msra.gmra.mxu1 %v15078_v40  ;;  %15674 = vmatprep.subr.bf16.mxu0 %v27706_v8  ;;  %v20335_v42 = vld [vmem:[%s27574_s21 + $0x548] sm:$0xff]   ;;  %v20336_v40 = vld [vmem:[%s27574_s21 + $0x360] sm:$0xff]  }
 0xb9e   : > { %15357 = vmatpush1.bf16.msra.mxu1 %v20298_v55  ;;  %18076 = vmatprep.mubr.msk.bf16.mxu1 %vm10560_vm15, %v15291_v22  ;;  %v20334_v55 = vld [vmem:[%s27574_s21 + $0x368] sm:$0xff]   ;;  %v20337_v20 = vld [vmem:[%s27574_s21 + $0x540] sm:$0xff]  }
 0xb9f   : > { %15495 = vmatmul.mubr.bf16.vlgmr.msra.gmra.mxu0 %v15396_v28  ;;  %15358 = vmatprep.subr.bf16.mxu1 %v27706_v8 }
 0xba0   : > { %15675 = vmatpush1.bf16.msra.mxu0 %v20299_v1  ;;  %18109 = vmatprep.mubr.msk.bf16.mxu0 %vm10560_vm15, %v15609_v51 }
 0xba1   : > { %15676 = vmatprep.subr.bf16.mxu0 %v27706_v8 }
 0xba2   : > { %15359 = vmatpush1.bf16.msra.mxu1 %v20300_v57  ;;  %v20338_v57 = vld [vmem:[%s27574_s21 + $0x498] sm:$0xff]  }
 0xba3   : > { %15360 = vmatprep.subr.bf16.mxu1 %v27706_v8 }
 0xba4   : > { %15677 = vmatpush1.bf16.msra.mxu0 %v20301_v29 }
 0xba5   : > { %15678 = vmatprep.subr.bf16.mxu0 %v27706_v8 }
 0xba6   : > { %15361 = vmatpush1.bf16.msra.mxu1 %v20302_v5 }
 0xba7   : > { %15362 = vmatprep.subr.bf16.mxu1 %v27706_v8 }
 0xba8   : > { %15679 = vmatpush1.bf16.msra.mxu0 %v20303_v27  ;;  %v15502_v27 = vrot.slane %v26659_v30, 5 }
 0xba9   : > { %15680 = vmatprep.subr.bf16.mxu0 %v27706_v8 }
 0xbaa   : > { %15363 = vmatpush1.bf16.msra.mxu1 %v20304_v34  ;;  %v15715_v34 = vrot.slane %v26657_v32, 7  ;;  %v20341_v32 = vld [vmem:[%s27574_s21 + $0x480] sm:$0xff]  }
 0xbab   : > { %15364 = vmatprep.subr.bf16.mxu1 %v27706_v8 }
 0xbac   : > { %15681 = vmatpush1.bf16.msra.mxu0 %v20305_v2 }
 0xbad   : > { %15682 = vmatprep.subr.bf16.mxu0 %v27706_v8 }
 0xbae   : > { %15365 = vmatpush1.bf16.msra.mxu1 %v20306_v17  ;;  %v20339_v17 = vld [vmem:[%s27574_s21 + $0x490] sm:$0xff]  }
 0xbaf   : > { %15366 = vmatprep.subr.bf16.mxu1 %v27706_v8 }
 0xbb0   : > { %15683 = vmatpush1.bf16.msra.mxu0 %v20307_v35  ;;  %v20340_v35 = vld [vmem:[%s27574_s21 + $0x488] sm:$0xff]  }
 0xbb1   : > { %15684 = vmatprep.subr.bf16.mxu0 %v27706_v8 }
 0xbb2   : > { %15367 = vmatpush1.bf16.msra.mxu1 %v20308_v46  ;;  %v20342_v46 = vld [vmem:[%s27574_s21 + $0x478] sm:$0xff]  }
 0xbb3   : > { %15368 = vmatprep.subr.bf16.mxu1 %v27706_v8 }
 0xbb4   : > { %15685 = vmatpush1.bf16.msra.mxu0 %v20309_v10  ;;  %v20343_v10 = vld [vmem:[%s27574_s21 + $0x470] sm:$0xff]  }
 0xbb5   : > { %15686 = vmatprep.subr.bf16.mxu0 %v27706_v8 }
 0xbb6   : > { %15369 = vmatpush1.bf16.msra.mxu1 %v20310_v11  ;;  %v20344_v11 = vld [vmem:[%s27574_s21 + $0x468] sm:$0xff]  }
 0xbb7   : > { %15370 = vmatprep.subr.bf16.mxu1 %v27706_v8 }
 0xbb8   : > { %15687 = vmatpush1.bf16.msra.mxu0 %v20311_v14  ;;  %v20345_v14 = vld [vmem:[%s27574_s21 + $0x460] sm:$0xff]  }
 0xbb9   : > { %15688 = vmatprep.subr.bf16.mxu0 %v27706_v8 }
 0xbba   : > { %15371 = vmatpush1.bf16.msra.mxu1 %v20312_v54  ;;  %v20346_v54 = vld [vmem:[%s27574_s21 + $0x4a8] sm:$0xff]  }
 0xbbb   : > { %15384 = vmatprep.subr.bf16.mxu1 %v27706_v8 }
 0xbbc   : > { %15689 = vmatpush1.bf16.msra.mxu0 %v20313_v39 }
 0xbbd   : > { %v27300_v15 = vpop.f32.mrf.mxu1  ;;  %15702 = vmatprep.subr.bf16.mxu0 %v27706_v8 }
 0xbbe   : > { %15385 = vmatpush2.bf16.msra.mxu1 %v20314_v23  ;;  %v20347_v23 = vld [vmem:[%s27574_s21 + $0x4a0] sm:$0xff]  }
 0xbbf   : > { %v14078_v24 = vpop.f32.mrf.mxu1  ;;  %v27306_v26 = vpop.f32.mrf.mxu0  ;;  %15386 = vmatprep.subr.bf16.mxu1 %v27706_v8 }
 0xbc0   : > { %15703 = vmatpush2.bf16.msra.mxu0 %v20315_v7 }
 0xbc1   : > { %v14079_v25 = vpop.f32.mrf.mxu1  ;;  %v14522_v44 = vpop.f32.mrf.mxu0  ;;  %15704 = vmatprep.subr.bf16.mxu0 %v27706_v8 }
 0xbc2   : > { %15387 = vmatpush2.bf16.msra.mxu1 %v20316_v62  ;;  %v20348_v25 = vld [vmem:[%s27574_s21 + $0x5d8] sm:$0xff]  }
 0xbc3   : > { %v14080_v58 = vpop.f32.mrf.mxu1  ;;  %v14523_v3 = vpop.f32.mrf.mxu0  ;;  %15568 = vmatprep.subr.bf16.mxu1 %v27706_v8 }
 0xbc4   : > { %15705 = vmatpush2.bf16.msra.mxu0 %v20317_v13  ;;  %v15714_v58 = vrot.slane %v26659_v30, 7  ;;  %v15925_v3 = vrot.slane %v26852_v53, 1  ;;  %v20350_v30 = vld [vmem:[%s27574_s21 + $0x5c8] sm:$0xff]  }
 0xbc5   : > { %v14524_v48 = vpop.f32.mrf.mxu0  ;;  %15389 = vmatmul.mubr.bf16.vlgmr.msra.gmra.mxu1 %v15290_v12  ;;  %15882 = vmatprep.subr.bf16.mxu0 %v27706_v8 }
 0xbc6   : > { %15569 = vmatpush1.bf16.msra.mxu1 %v20318_v41  ;;  %18098 = vmatprep.mubr.msk.bf16.mxu1 %vm10560_vm15, %v15503_v52  ;;  %v20349_v52 = vld [vmem:[%s27574_s21 + $0x5d0] sm:$0xff]  }
 0xbc7   : > { %15707 = vmatmul.mubr.bf16.vlgmr.msra.gmra.mxu0 %v15608_v31  ;;  %15570 = vmatprep.subr.bf16.mxu1 %v27706_v8  ;;  %v20353_v48 = vld [vmem:[%s27574_s21 + $0x5b0] sm:$0xff]   ;;  %v20354_v31 = vld [vmem:[%s27574_s21 + $0x5a8] sm:$0xff]  }
 0xbc8   : > { %15883 = vmatpush1.bf16.msra.mxu0 %v20319_v37  ;;  %18131 = vmatprep.mubr.msk.bf16.mxu0 %vm10560_vm15, %v26852_v53  ;;  %v20351_v53 = vld [vmem:[%s27574_s21 + $0x5c0] sm:$0xff]   ;;  %v20352_v37 = vld [vmem:[%s27574_s21 + $0x5b8] sm:$0xff]  }
 0xbc9   : > { %15884 = vmatprep.subr.bf16.mxu0 %v27706_v8 }
 0xbca   : > { %15571 = vmatpush1.bf16.msra.mxu1 %v20320_v19  ;;  %v20355_v19 = vld [vmem:[%s27574_s21 + $0x5a0] sm:$0xff]  }
 0xbcb   : > { %15572 = vmatprep.subr.bf16.mxu1 %v27706_v8 }
 0xbcc   : > { %15885 = vmatpush1.bf16.msra.mxu0 %v20321_v33  ;;  %v20356_v33 = vld [vmem:[%s27574_s21 + $0x5e8] sm:$0xff]  }
 0xbcd   : > { %15886 = vmatprep.subr.bf16.mxu0 %v27706_v8 }
 0xbce   : > { %15573 = vmatpush1.bf16.msra.mxu1 %v20322_v50 }
 0xbcf   : > { %15574 = vmatprep.subr.bf16.mxu1 %v27706_v8 }
 0xbd0   : > { %15887 = vmatpush1.bf16.msra.mxu0 %v20323_v21  ;;  %v20357_v21 = vld [vmem:[%s27574_s21 + $0x5e0] sm:$0xff]  }
 0xbd1   : > { %15888 = vmatprep.subr.bf16.mxu0 %v27706_v8 }
 0xbd2   : > { %15575 = vmatpush1.bf16.msra.mxu1 %v20324_v60 }
 0xbd3   : > { %15576 = vmatprep.subr.bf16.mxu1 %v27706_v8 }
 0xbd4   : > { %15889 = vmatpush1.bf16.msra.mxu0 %v20325_v63 }
 0xbd5   : > { %15890 = vmatprep.subr.bf16.mxu0 %v27706_v8 }
 0xbd6   : > { %15577 = vmatpush1.bf16.msra.mxu1 %v20326_v6 }
 0xbd7   : > { %15578 = vmatprep.subr.bf16.mxu1 %v27706_v8 }
 0xbd8   : > { %15891 = vmatpush1.bf16.msra.mxu0 %v20327_v49 }
 0xbd9   : > { %15892 = vmatprep.subr.bf16.mxu0 %v27706_v8 }
 0xbda   : > { %15579 = vmatpush1.bf16.msra.mxu1 %v20328_v59 }
 0xbdb   : > { %15580 = vmatprep.subr.bf16.mxu1 %v27706_v8 }
 0xbdc   : > { %15893 = vmatpush1.bf16.msra.mxu0 %v20329_v4 }
 0xbdd   : > { %15894 = vmatprep.subr.bf16.mxu0 %v27706_v8 }
 0xbde   : > { %15581 = vmatpush1.bf16.msra.mxu1 %v20330_v36  ;;  %v15924_v36 = vrot.slane %v26950_v9, 1 }
 0xbdf   : > { %15582 = vmatprep.subr.bf16.mxu1 %v27706_v8 }
 0xbe0   : > { %15895 = vmatpush1.bf16.msra.mxu0 %v20331_v45 }
 0xbe1   : > { %15896 = vmatprep.subr.bf16.mxu0 %v27706_v8 }
 0xbe2   : > { %15583 = vmatpush1.bf16.msra.mxu1 %v20332_v61 }
 0xbe3   : > { %15596 = vmatprep.subr.bf16.mxu1 %v27706_v8 }
 0xbe4   : > { %15897 = vmatpush1.bf16.msra.mxu0 %v20333_v16 }
 0xbe5   : > { %v27390_v18 = vpop.f32.mrf.mxu1  ;;  %15910 = vmatprep.subr.bf16.mxu0 %v27706_v8 }
 0xbe6   : > { %15597 = vmatpush2.bf16.msra.mxu1 %v20334_v55 }
 0xbe7   : > { %v14374_v22 = vpop.f32.mrf.mxu1  ;;  %v27396_v1 = vpop.f32.mrf.mxu0  ;;  %15598 = vmatprep.subr.bf16.mxu1 %v27706_v8 }
 0xbe8   : > { %15911 = vmatpush2.bf16.msra.mxu0 %v20335_v42 }
 0xbe9   : > { %v14375_v28 = vpop.f32.mrf.mxu1  ;;  %v14822_v51 = vpop.f32.mrf.mxu0  ;;  %15912 = vmatprep.subr.bf16.mxu0 %v27706_v8 }
 0xbea   : > { %15599 = vmatpush2.bf16.msra.mxu1 %v20336_v40 }
 0xbeb   : > { %v14376_v29 = vpop.f32.mrf.mxu1  ;;  %v14823_v5 = vpop.f32.mrf.mxu0  ;;  %15780 = vmatprep.subr.bf16.mxu1 %v27706_v8 }
 0xbec   : > { %15913 = vmatpush2.bf16.msra.mxu0 %v20337_v20 }
 0xbed   : > { %v14824_v2 = vpop.f32.mrf.mxu0  ;;  %15601 = vmatmul.mubr.bf16.vlgmr.msra.gmra.mxu1 %v15502_v27  ;;  %v16042_v27 = vld [vmem:[%s27576_s23] sm:$0xff] }
 0xbee   : > { %15781 = vmatpush1.bf16.msra.mxu1 %v20338_v57  ;;  %18120 = vmatprep.mubr.msk.bf16.mxu1 %vm10560_vm15, %v15715_v34 }
 0xbef   : > { %15915 = vmatmul.mubr.bf16.vlgmr.msra.gmra.mxu0 %v26950_v9  ;;  %15782 = vmatprep.subr.bf16.mxu1 %v27706_v8 }
 0xbf2   : > { %15783 = vmatpush1.bf16.msra.mxu1 %v20339_v17 }
 0xbf3   : > { %15784 = vmatprep.subr.bf16.mxu1 %v27706_v8 }
 0xbf6   : > { %15785 = vmatpush1.bf16.msra.mxu1 %v20340_v35 }
 0xbf7   : > { %15786 = vmatprep.subr.bf16.mxu1 %v27706_v8 }
 0xbfa   : > { %15787 = vmatpush1.bf16.msra.mxu1 %v20341_v32 }
 0xbfb   : > { %15788 = vmatprep.subr.bf16.mxu1 %v27706_v8 }
 0xbfe   : > { %15789 = vmatpush1.bf16.msra.mxu1 %v20342_v46 }
 0xbff   : > { %15790 = vmatprep.subr.bf16.mxu1 %v27706_v8 }
 0xc02   : > { %15791 = vmatpush1.bf16.msra.mxu1 %v20343_v10 }
 0xc03   : > { %15792 = vmatprep.subr.bf16.mxu1 %v27706_v8 }
 0xc06   : > { %15793 = vmatpush1.bf16.msra.mxu1 %v20344_v11 }
 0xc07   : > { %15794 = vmatprep.subr.bf16.mxu1 %v27706_v8 }
 0xc0a   : > { %15795 = vmatpush1.bf16.msra.mxu1 %v20345_v14 }
 0xc0b   : > { %15808 = vmatprep.subr.bf16.mxu1 %v27706_v8 }
 0xc0d   : > { %v27443_v39 = vpop.f32.mrf.mxu1 }
 0xc0e   : > { %15809 = vmatpush2.bf16.msra.mxu1 %v20346_v54 }
 0xc0f   : > { %v14670_v7 = vpop.f32.mrf.mxu1  ;;  %v15070_v62 = vpop.f32.mrf.mxu0  ;;  %15810 = vmatprep.subr.bf16.mxu1 %v27706_v8 }
 0xc10   : > { %v15071_v16 = vadd.f32 %v15070_v62, %v27119_v0 }
 0xc11   : > { %v14671_v24 = vpop.f32.mrf.mxu1  ;;  %v15072_v13 = vpop.f32.mrf.mxu0 }
 0xc12   : > { %15811 = vmatpush2.bf16.msra.mxu1 %v20347_v23 }
 0xc13   : > { %v14672_v44 = vpop.f32.mrf.mxu1  ;;  %v15073_v41 = vpop.f32.mrf.mxu0  ;;  %15990 = vmatprep.subr.bf16.mxu1 %v27706_v8 }
 0xc15   : > { %v15074_v12 = vpop.f32.mrf.mxu0  ;;  %15813 = vmatmul.mubr.bf16.vlgmr.msra.gmra.mxu1 %v15714_v58 }
 0xc16   : > { %15991 = vmatpush1.bf16.msra.mxu1 %v20348_v25  ;;  %18142 = vmatprep.mubr.msk.bf16.mxu1 %vm10560_vm15, %v15925_v3 }
 0xc17   : > { %15992 = vmatprep.subr.bf16.mxu1 %v27706_v8 }
 0xc1a   : > { %15993 = vmatpush1.bf16.msra.mxu1 %v20349_v52 }
 0xc1b   : > { %15994 = vmatprep.subr.bf16.mxu1 %v27706_v8 }
 0xc1e   : > { %15995 = vmatpush1.bf16.msra.mxu1 %v20350_v30 }
 0xc1f   : > { %15996 = vmatprep.subr.bf16.mxu1 %v27706_v8 }
 0xc22   : > { %15997 = vmatpush1.bf16.msra.mxu1 %v20351_v53 }
 0xc23   : > { %15998 = vmatprep.subr.bf16.mxu1 %v27706_v8 }
 0xc26   : > { %15999 = vmatpush1.bf16.msra.mxu1 %v20352_v37 }
 0xc27   : > { %16000 = vmatprep.subr.bf16.mxu1 %v27706_v8 }
 0xc2a   : > { %16001 = vmatpush1.bf16.msra.mxu1 %v20353_v48 }
 0xc2b   : > { %16002 = vmatprep.subr.bf16.mxu1 %v27706_v8 }
 0xc2e   : > { %16003 = vmatpush1.bf16.msra.mxu1 %v20354_v31 }
 0xc2f   : > { %16004 = vmatprep.subr.bf16.mxu1 %v27706_v8 }
 0xc32   : > { %16005 = vmatpush1.bf16.msra.mxu1 %v20355_v19  ;;  %v16039_v19 = vld [vmem:[%s27575_s22] sm:$0x1] }
 0xc33   : > { %16018 = vmatprep.subr.bf16.mxu1 %v27706_v8 }
 0xc35   : > { %v27488_v50 = vpop.f32.mrf.mxu1 }
 0xc36   : > { %16019 = vmatpush2.bf16.msra.mxu1 %v20356_v33 }
 0xc37   : > { %v14970_v60 = vpop.f32.mrf.mxu1  ;;  %v15284_v63 = vpop.f32.mrf.mxu0  ;;  %16020 = vmatprep.subr.bf16.mxu1 %v27706_v8 }
 0xc38   : > { %v15285_v9 = vadd.f32 %v15284_v63, %v27125_v43  ;;  %v16043_v63 = vld [vmem:[%s27577_s24] sm:$0x1] }
 0xc39   : > { %v14971_v6 = vpop.f32.mrf.mxu1  ;;  %v15286_v49 = vpop.f32.mrf.mxu0 }
 0xc3a   : > { %16021 = vmatpush2.bf16.msra.mxu1 %v20357_v21 }
 0xc3b   : > { %v14972_v59 = vpop.f32.mrf.mxu1  ;;  %v15287_v4 = vpop.f32.mrf.mxu0  ;;  %18150 = vmatprep.subr.mxu1 %v27703_v56 }
 0xc3d   : > { %v15288_v45 = vpop.f32.mrf.mxu0  ;;  %16023 = vmatmul.mubr.bf16.vlgmr.msra.gmra.mxu1 %v15924_v36 }
 0xc3e   : > { %18151 = vmatpush3.msra.mxu1 %v16042_v27  ;;  %18152 = vmatprep.mubr.msk.f32.mxu1 %vm20473_vm2, %v27703_v56 }
 0xc5d   : > { %v15178_v61 = vpop.f32.mrf.mxu1 }
 0xc5e   : > { %v15179_v55 = vadd.f32 %v15178_v61, %v27210_v47 }
 0xc5f   : > { %v15180_v42 = vpop.f32.mrf.mxu1  ;;  %v15496_v40 = vpop.f32.mrf.mxu0 }
 0xc60   : > { %v16030_v22 = vadd.f32 %v15179_v55, %v15071_v16 }
 0xc61   : > { %v15181_v8 = vpop.f32.mrf.mxu1  ;;  %v15498_v20 = vpop.f32.mrf.mxu0 }
 0xc63   : > { %v15182_v28 = vpop.f32.mrf.mxu1  ;;  %v15499_v51 = vpop.f32.mrf.mxu0 }
 0xc65   : > { %v15500_v57 = vpop.f32.mrf.mxu0 }
 0xc85   : > { %v15390_v29 = vpop.f32.mrf.mxu1 }
 0xc86   : > { %v15391_v5 = vadd.f32 %v15390_v29, %v27300_v15  ;;  %v15497_v15 = vadd.f32 %v15496_v40, %v27216_v38 }
 0xc87   : > { %v15392_v0 = vpop.f32.mrf.mxu1  ;;  %v15708_v34 = vpop.f32.mrf.mxu0 }
 0xc88   : > { %v16031_v47 = vadd.f32 %v15391_v5, %v15285_v9  ;;  %v15709_v44 = vadd.f32 %v15708_v34, %v27306_v26 }
 0xc89   : > { %v15393_v2 = vpop.f32.mrf.mxu1  ;;  %v15710_v17 = vpop.f32.mrf.mxu0 }
 0xc8a   : > { %v16035_v35 = vadd.f32 %v16031_v47, %v16030_v22 }
 0xc8b   : > { %v15394_v32 = vpop.f32.mrf.mxu1  ;;  %v15711_v46 = vpop.f32.mrf.mxu0 }
 0xc8d   : > { %v15712_v10 = vpop.f32.mrf.mxu0 }
 0xcad   : > { %v15602_v43 = vpop.f32.mrf.mxu1 }
 0xcae   : > { %v15603_v11 = vadd.f32 %v15602_v43, %v27390_v18 }
 0xcaf   : > { %v15604_v14 = vpop.f32.mrf.mxu1  ;;  %v15916_v54 = vpop.f32.mrf.mxu0 }
 0xcb0   : > { %v16032_v23 = vadd.f32 %v15603_v11, %v15497_v15  ;;  %v15917_v53 = vadd.f32 %v15916_v54, %v27396_v1 }
 0xcb1   : > { %v15605_v7 = vpop.f32.mrf.mxu1  ;;  %v15918_v62 = vpop.f32.mrf.mxu0 }
 0xcb3   : > { %v15606_v24 = vpop.f32.mrf.mxu1  ;;  %v15919_v13 = vpop.f32.mrf.mxu0 }
 0xcb5   : > { %v15920_v56 = vpop.f32.mrf.mxu0 }
 0xcd5   : > { %v15814_v25 = vpop.f32.mrf.mxu1 }
 0xcd6   : > { %v15815_v41 = vadd.f32 %v15814_v25, %v27443_v39 }
 0xcd7   : > { %v15816_v58 = vpop.f32.mrf.mxu1 }
 0xcd8   : > { %v16033_v3 = vadd.f32 %v15815_v41, %v15709_v44 }
 0xcd9   : > { %v15817_v12 = vpop.f32.mrf.mxu1 }
 0xcda   : > { %v16036_v52 = vadd.f32 %v16033_v3, %v16032_v23 }
 0xcdb   : > { %v15818_v38 = vpop.f32.mrf.mxu1 }
 0xcdc   : > { %v16037_v30 = vadd.f32 %v16036_v52, %v16035_v35 }
 0xcfd   : > { %v16024_v18 = vpop.f32.mrf.mxu1 }
 0xcfe   : > { %v16025_v37 = vadd.f32 %v16024_v18, %v27488_v50 }
 0xcff   : > { %v16026_v48 = vpop.f32.mrf.mxu1 }
 0xd00   : > { %v16034_v31 = vadd.f32 %v16025_v37, %v15917_v53 }
 0xd01   : > { %v16027_v26 = vpop.f32.mrf.mxu1 }
 0xd02   : > { %v16038_v33 = vadd.f32 %v16037_v30, %v16034_v31 }
 0xd03   : > { %v16028_v39 = vpop.f32.mrf.mxu1 }
 0xd04   : > { %v16040_v21 = vadd.f32 %v16039_v19, %v16038_v33 }
 0xd06   : > { %v16041_v60 = vmax.f32 %v16040_v21, 0.0 }
 0xd08   : > { %18153 = vmatmul.mubr.msk.f32.vlgmr.msra.gmra.mxu1 %vm16044_vm3, %v16041_v60 }
 0xdc8   : > { %v16114_v1 = vpop.f32.mrf.mxu1 }
 0xdc9   : > { %v16115_v50 = vadd.f32 %v16114_v1, %v16043_v63 }
 0xdca   : > { %v18154_v6 = vpop.f32.mrf.mxu1 }
 0xdcb   : > { %v16119_v49 = vsel %vm16118_vm7, %v16115_v50, -inf }
 0xdcc   : > { %16120 = vmax.xlane.f32.xlu0 %v16119_v49 }
 0xe55   : > { %v16121_v59 = vpop.xlane.xlu0 %16120 }
 0xe56   : > { %v16122_v4 = vsub.f32 %v16115_v50, %v16121_v59 }
 0xe58   : > { %v16123_v36 = vmul.f32 1.442695, %v16122_v4 }
 0xe5a   : > { %20358 = vpow2.f32 %v16123_v36 }
 0xe67   : > { %v20359_v45 = vpop.eup %20358 }
 0xe68   : > { %v16125_v61 = vsel %vm16118_vm7, %v20359_v45, 0.0 }
 0xe69   : > { %16126 = vadd.xlane.f32.xlu1 %v16125_v61 }
 0xef2   : > { %v16127_v16 = vpop.xlane.xlu1 %16126 }
 0xef3   : > { %20360 = vrcp.f32 %v16127_v16 }
 0xf00   : > { %v20361_v55 = vpop.eup %20360 }
 0xf01   : > { %v16129_v42 = vmul.f32 %v20361_v55, %v20359_v45 }
 0xf03   : > { %16130 = vst.msk [vmem:[%s756_s7] sm:$0x1] %vm16118_vm7, %v16129_v42 }
 0xf04   : > { %20417 = shalt.err (!%p20414_p3)
}
 0xf05   : > { %s20418_s5 = scalar_lea.hbm %s16142_s8, 16  ;;  %s20422_s7 = scalar_lea.hbm %s27709_s9, 32 }
 0xf06   : > { %p20419_p4 = scmp.ne.s32.totalorder %s16142_s8, %s20418_s5  ;;  %p20423_p9 = scmp.lt.s32.totalorder %s16142_s8, %s27709_s9 }
 0xf07   : > { %p20424_p10 = scmp.lt.s32.totalorder %s20422_s7, %s20418_s5 }
 0xf08   : > { %p20420_p7 = pnand %p20419_p4, %p20643_p5 }
 0xf09   : > { %p20425_p11 = por %p20424_p10, %p20423_p9 }
 0xf0a   : > { %p20421_p8 = pneg %p20420_p7 }
 0xf0c   : > { %p20426_p12 = pnand %p20425_p11, %p20421_p8 }
 0xf0e   : > { %20429 = shalt.err (!%p20426_p12)
}
 0xf0f   : > { %18155 = dma.vmem_to_hbm [thread:$0]  (%p20643_p5), %s16145_s29, 16, %s16142_s8, %s16132_s3  }
 0xf10 PF: > { %s27710_s10 = sld [smem:[#allocation11_spill]] }
 0xf11   : > { %s27711_s11 = sld [smem:[#allocation9_spill]] }
 0xf16   : > { %p18161_p13 = scmp.ge.s32.totalorder %s27710_s10, 2 }
 0xf17   : > { %s16156_s4 = sand.u32 1, %s27711_s11  }
 0xf18   : > { %p18158_p0 = pnand %p18161_p13, %p20647_p6  ;;  %s16157_s0 = scalar_lea.sflag [#allocation7], %s16156_s4 }
 0xf1a   : > { %p18159_p1 = pneg %p18158_p0 }
 0xf1c   : > { %20447 = dma.done.wait (%p18159_p1), %s16157_s0, 16  }
 0xf1d   : > { %20449 = vsyncadd (%p18159_p1), %s16157_s0, 4294967280  ;;  %s27713_s30 = sld [smem:[#allocation13_spill]]  ;;  %s27716_s29 = smov %s20456_s2 }
 0xf1e   : > { %s27714_s12 = sld [smem:[#allocation10_spill]] }
 0xf1f   : > { %s27715_s6 = sld [smem:[#allocation14_spill]] }
 0xf23   : > { %p35_p2 = scmp.ge.s32.totalorder %s27713_s30, 4  }
 0xf24   : > { %s27717_s2 = smov %s27714_s12 }
 0xf25   :  { %37 = sbr.rel (!%p35_p2) target bundleno = 18 (0x12), region = 177 }
 0xf2a   :  { %16161 = vsyncpa [#allocation7], 1 }
 0xf2b   :  { %16163 = vsyncpa [#allocation7 + $0x1], 1 }

</bundles_post_ra>
